<compile_context>
chip_gen: v6e
topology: v6e:2x2x1
jax: 0.10.0
libtpu: 0.0.40
codegen_flags: <defaults>
</compile_context>

<pallas_src>
import functools

import jax
import jax.numpy as jnp
from jax.experimental import pallas as pl
from jax.experimental.pallas import tpu as pltpu

EPS = 1e-5
_VMEM_LIMIT = 48 * 1024 * 1024   # explicit; < v7x's 64 MiB physical VMEM


def _sign(v):
    # torch.sign semantics (-1 / 0 / +1) via two compares (cheap VPU ops).
    return (v > 0).astype(jnp.float32) - (v < 0).astype(jnp.float32)


# ---------------------------------------------------------------------------
# Fused (block-diagonal grouped) conv-as-matmul + folded BN + activation
# ---------------------------------------------------------------------------
def _matmul_bn_act_kernel(p_ref, w_ref, s_ref, b_ref, o_ref, *,
                          act_in, act_out, mm_dtype):
    p = p_ref[...]                                     # (tm, K)
    if act_in == "sign":
        p = _sign(p)                                   # exact ternary
    acc = jnp.dot(p.astype(mm_dtype), w_ref[...],
                  preferred_element_type=jnp.float32)  # MXU, f32 accumulate
    y = acc * s_ref[...] + b_ref[...]                  # folded BatchNorm (+bias)
    if act_out == "sign":
        y = _sign(y)
    elif act_out == "relu":
        y = jnp.maximum(y, 0.0)
    o_ref[...] = y.astype(o_ref.dtype)                 # lane-dense (tm, Cout)


def _pick_tm(m):
    """Largest tile <= 512 dividing m, preferring >= 2 grid steps (2 TCs on v7x)."""
    for need_two in (True, False):
        for tm in (512, 256, 128, 64, 32, 16, 8):
            if m % tm == 0 and (m // tm >= 2 or not need_two):
                return tm
    return m


def matmul_bn_act(patches, wmat, scale, bias, *, act_in, act_out):
    """y = act_out( act_in(patches) @ wmat * scale + bias ), output [M, Cout]."""
    M, K = patches.shape
    Cout = wmat.shape[1]
    tm = _pick_tm(M)
    kern = functools.partial(_matmul_bn_act_kernel, act_in=act_in,
                             act_out=act_out, mm_dtype=wmat.dtype)
    cost = pl.CostEstimate(
        flops=2 * M * K * Cout,
        transcendentals=0,
        bytes_accessed=(patches.size * patches.dtype.itemsize
                        + wmat.size * wmat.dtype.itemsize
                        + M * Cout * 4 + 2 * Cout * 4))
    return pl.pallas_call(
        kern,
        out_shape=jax.ShapeDtypeStruct((M, Cout), jnp.float32),
        grid=(M // tm,),
        in_specs=[
            pl.BlockSpec((tm, K), lambda m: (m, 0)),      # patch tile (pipelined)
            pl.BlockSpec((K, Cout), lambda m: (0, 0)),    # weights: VMEM-resident
            pl.BlockSpec((1, Cout), lambda m: (0, 0)),    # BN scale: resident
            pl.BlockSpec((1, Cout), lambda m: (0, 0)),    # BN bias:  resident
        ],
        out_specs=pl.BlockSpec((tm, Cout), lambda m: (m, 0)),
        compiler_params=pltpu.CompilerParams(
            dimension_semantics=("parallel",),
            vmem_limit_bytes=_VMEM_LIMIT),
        cost_estimate=cost,
    )(patches, wmat, scale, bias)


def conv_bn_act(x, prep, item):
    """Grouped stride-1 Conv2d + folded BN + optional sign/ReLU, NHWC."""
    N, H, W, Cin = x.shape
    k, pad, act_in, act_out = item["k"], item["pad"], item["act_in"], item["act_out"]
    if k == 1:
        patches = x.reshape(N * H * W, Cin)     # 1x1 conv: no im2col at all
        kern_act_in = act_in                    # sign fused into the kernel
    else:
        kern_act_in = None
        xs = x
        if act_in == "sign":
            # sign is exact in bf16 -> binarize before im2col so the k*k-times
            # larger patch array moves half the HBM bytes.
            xs = _sign(x).astype(prep["w"].dtype)
        xp = jnp.pad(xs, ((0, 0), (pad, pad), (pad, pad), (0, 0)))
        # TODO(synk): form the k*k patches inside the kernel from a
        # VMEM-resident row tile to remove this k*k HBM blow-up entirely.
        pats = [xp[:, i:i + H, j:j + W, :] for i in range(k) for j in range(k)]
        patches = jnp.stack(pats, axis=3).reshape(N * H * W, k * k * Cin)
    out = matmul_bn_act(patches, prep["w"], prep["scale"], prep["bias"],
                        act_in=kern_act_in, act_out=act_out)
    return out.reshape(N, H, W, -1)


# ---------------------------------------------------------------------------
# Pooling kernels (tiled, read the activation exactly once)
# ---------------------------------------------------------------------------
def _maxpool2_kernel(x_ref, o_ref):
    c = o_ref.shape[-1]
    x = x_ref[...]                                    # (tr, 2, Wo, 2*C)
    r = jnp.maximum(x[:, 0], x[:, 1])                 # row-pair max    (tr, Wo, 2*C)
    o_ref[...] = jnp.maximum(r[:, :, :c], r[:, :, c:])  # col-pair max  (tr, Wo, C)


def maxpool2(x):
    """MaxPool2d(kernel_size=2, stride=2) in NHWC."""
    N, H, W, C = x.shape
    Ho, Wo = H // 2, W // 2
    R = N * Ho
    xr = x.reshape(R, 2, Wo, 2 * C)                   # free metadata-only reshape
    tr = R // 2 if (R % 2 == 0 and R >= 2) else R     # >= 2 grid steps
    out = pl.pallas_call(
        _maxpool2_kernel,
        out_shape=jax.ShapeDtypeStruct((R, Wo, C), x.dtype),
        grid=(R // tr,),
        in_specs=[pl.BlockSpec((tr, 2, Wo, 2 * C), lambda i: (i, 0, 0, 0))],
        out_specs=pl.BlockSpec((tr, Wo, C), lambda i: (i, 0, 0)),
        compiler_params=pltpu.CompilerParams(
            dimension_semantics=("parallel",),
            vmem_limit_bytes=_VMEM_LIMIT),
    )(xr)
    return out.reshape(N, Ho, Wo, C)


def _avgpool_kernel(x_ref, o_ref):
    o_ref[0] = jnp.mean(x_ref[0], axis=0, keepdims=True)   # (1, C)


def global_avgpool(x):
    """AvgPool2d(kernel_size=8, stride=1) on an 8x8 map -> [N, C]."""
    N, H, W, C = x.shape
    xr = x.reshape(N, H * W, C)
    out = pl.pallas_call(
        _avgpool_kernel,
        out_shape=jax.ShapeDtypeStruct((N, 1, C), x.dtype),
        grid=(N,),
        in_specs=[pl.BlockSpec((1, H * W, C), lambda n: (n, 0, 0))],
        out_specs=pl.BlockSpec((1, 1, C), lambda n: (n, 0, 0)),
        compiler_params=pltpu.CompilerParams(
            dimension_semantics=("parallel",),
            vmem_limit_bytes=_VMEM_LIMIT),
    )(xr)
    return out.reshape(N, C)


# ---------------------------------------------------------------------------
# Glue: channel shuffle, plan, params, forward
# ---------------------------------------------------------------------------
def channel_shuffle_nhwc(x, groups):
    N, H, W, C = x.shape
    cpg = C // groups
    x = x.reshape(N, H, W, groups, cpg)
    x = jnp.transpose(x, (0, 1, 2, 4, 3))
    return x.reshape(N, H, W, C)


def make_plan(cfg):
    return [
        dict(cin=3, cout=cfg[0], k=5, pad=2, groups=1, shuffle=0, act_in=None, act_out=None),
        dict(cin=cfg[0], cout=cfg[1], k=1, pad=0, groups=2, shuffle=0, act_in="sign", act_out=None),
        dict(cin=cfg[1], cout=cfg[2], k=1, pad=0, groups=2, shuffle=2, act_in="sign", act_out=None),
        "maxpool",
        dict(cin=cfg[2], cout=cfg[3], k=3, pad=1, groups=16, shuffle=2, act_in="sign", act_out=None),
        dict(cin=cfg[3], cout=cfg[4], k=1, pad=0, groups=4, shuffle=16, act_in="sign", act_out=None),
        dict(cin=cfg[4], cout=cfg[5], k=1, pad=0, groups=4, shuffle=4, act_in="sign", act_out=None),
        "maxpool",
        dict(cin=cfg[5], cout=cfg[6], k=3, pad=1, groups=32, shuffle=4, act_in="sign", act_out=None),
        dict(cin=cfg[6], cout=cfg[7], k=1, pad=0, groups=8, shuffle=32, act_in="sign", act_out="sign"),
        dict(cin=cfg[7], cout=10, k=1, pad=0, groups=1, shuffle=0, act_in=None, act_out="relu"),
        "avgpool",
    ]


def init_params(key, plan):
    """Deterministic synthetic params; inference BN folded with the conv bias."""
    params = []
    for item in plan:
        if not isinstance(item, dict):
            params.append(None)
            continue
        cin, cout, k, g = item["cin"], item["cout"], item["k"], item["groups"]
        key, *ks = jax.random.split(key, 7)
        w = 0.1 * jax.random.normal(ks[0], (cout, cin // g, k, k), jnp.float32)
        cb = 0.05 * jax.random.normal(ks[1], (cout,), jnp.float32)
        gamma = 1.0 + 0.1 * jax.random.normal(ks[2], (cout,), jnp.float32)
        beta = 0.1 * jax.random.normal(ks[3], (cout,), jnp.float32)
        mean = 0.1 * jax.random.normal(ks[4], (cout,), jnp.float32)
        var = jax.random.uniform(ks[5], (cout,), jnp.float32, 0.5, 1.5)
        s = gamma / jnp.sqrt(var + EPS)
        b = (cb - mean) * s + beta
        params.append(dict(w=w, scale=s, bias=b))
    return params


def prepare_params(plan, params):
    """Fold the group axis into a block-diagonal [K, Cout] matmul weight
    (lane-dense output, MXU N dimension fully used); pick matmul dtype."""
    prepped = []
    for item, p in zip(plan, params):
        if not isinstance(item, dict):
            prepped.append(None)
            continue
        cin, cout, k, g = item["cin"], item["cout"], item["k"], item["groups"]
        w = p["w"]                                         # [Cout, cin//g, k, k]
        if g > 1:
            cg_out, cg_in = cout // g, cin // g
            wg = w.reshape(g, cg_out, cg_in, k, k)
            eye = jnp.eye(g, dtype=w.dtype)
            w = jnp.einsum("goikl,gh->gohikl", wg, eye).reshape(cout, cin, k, k)
        # flatten to [K, Cout] with K ordered (i, j, ci) to match the patches
        wmat = jnp.transpose(w, (2, 3, 1, 0)).reshape(k * k * cin, cout)
        # Binarized-input layers run the MXU in bf16 (sign values exact);
        # accumulation and the scale/bias epilogue stay f32 in the kernel.
        mm_dtype = jnp.bfloat16 if item["act_in"] == "sign" else jnp.float32
        prepped.append(dict(
            w=wmat.astype(mm_dtype),
            scale=p["scale"].reshape(1, cout).astype(jnp.float32),
            bias=p["bias"].reshape(1, cout).astype(jnp.float32)))
    return prepped


def net_forward(x_nchw, plan, prepped):
    # Accept NCHW like the PyTorch module; kernels run in NHWC.
    x = jnp.transpose(x_nchw, (0, 2, 3, 1)).astype(jnp.float32)
    for item, prep in zip(plan, prepped):
        if item == "maxpool":
            x = maxpool2(x)
        elif item == "avgpool":
            x = global_avgpool(x)                           # [N, C]
        else:
            if item["shuffle"]:
                # sign is elementwise -> commutes with the channel permutation,
                # so shuffle here and keep sign fused with the conv.
                x = channel_shuffle_nhwc(x, item["shuffle"])
            x = conv_bn_act(x, prep, item)
    return x.reshape(x.shape[0], -1)                        # x.view(N, -1)


if __name__ == "__main__":
    # Scaled-down cfg (same group/shuffle structure as the default
    # [256,256,256,512,512,512,1024,1024]); CIFAR-style 3x32x32 input.
    cfg = [64, 64, 64, 128, 128, 128, 256, 256]
    plan = make_plan(cfg)

    key = jax.random.PRNGKey(0)
    kp, kx = jax.random.split(key)
    params = init_params(kp, plan)
    prepped = prepare_params(plan, params)
    x = jax.random.normal(kx, (2, 3, 32, 32), jnp.float32)   # NCHW, like PyTorch

    fwd = jax.jit(lambda inp: net_forward(inp, plan, prepped))
    out = jax.block_until_ready(fwd(x))
    assert out.shape == (2, 10), out.shape
    assert bool(jnp.all(jnp.isfinite(out)))
    print("KERNEL_OK")
</pallas_src>

<mosaic_0001>
module attributes {stable_mosaic.version = 11 : i64} {
  func.func @_matmul_bn_act_kernel(%arg0: i32, %arg1: memref<512x75xf32, #tpu.memory_space<vmem>>, %arg2: memref<75x64xf32, #tpu.memory_space<vmem>>, %arg3: memref<1x64xf32, #tpu.memory_space<vmem>>, %arg4: memref<1x64xf32, #tpu.memory_space<vmem>>, %arg5: memref<512x64xf32, #tpu.memory_space<vmem>>) attributes {dimension_semantics = [#tpu.dimension_semantics<parallel>], iteration_bounds = array<i64: 4>, scalar_prefetch = 0 : i64, scratch_operands = 0 : i64, tpu.core_type = #tpu.core_type<tc>, window_params = [{transform_indices = @transform_0, window_bounds = array<i64: 512, 75>}, {pipeline_mode = #tpu.pipeline_mode<synchronous>, transform_indices = @transform_1, window_bounds = array<i64: 75, 64>}, {pipeline_mode = #tpu.pipeline_mode<synchronous>, transform_indices = @transform_2, window_bounds = array<i64: 1, 64>}, {pipeline_mode = #tpu.pipeline_mode<synchronous>, transform_indices = @transform_3, window_bounds = array<i64: 1, 64>}, {transform_indices = @transform_4, window_bounds = array<i64: 512, 64>}]} {
    %c0 = arith.constant 0 : index
    %c0_0 = arith.constant 0 : index
    %0 = vector.load %arg1[%c0, %c0_0] : memref<512x75xf32, #tpu.memory_space<vmem>>, vector<512x75xf32>
    %c0_1 = arith.constant 0 : index
    %c0_2 = arith.constant 0 : index
    %1 = vector.load %arg2[%c0_1, %c0_2] : memref<75x64xf32, #tpu.memory_space<vmem>>, vector<75x64xf32>
    %cst = arith.constant dense<0.000000e+00> : vector<512x64xf32>
    %2 = tpu.matmul %0, %1, %cst {dimension_numbers = #tpu.dot_dimension_numbers<[1], [0], [0], [1], [0, 0, 1, 1], [], []>} : vector<512x75xf32>, vector<75x64xf32>, vector<512x64xf32> -> vector<512x64xf32>
    %c0_3 = arith.constant 0 : index
    %c0_4 = arith.constant 0 : index
    %3 = vector.load %arg3[%c0_3, %c0_4] : memref<1x64xf32, #tpu.memory_space<vmem>>, vector<1x64xf32>
    %4 = vector.broadcast %3 : vector<1x64xf32> to vector<512x64xf32>
    %5 = arith.mulf %2, %4 : vector<512x64xf32>
    %c0_5 = arith.constant 0 : index
    %c0_6 = arith.constant 0 : index
    %6 = vector.load %arg4[%c0_5, %c0_6] : memref<1x64xf32, #tpu.memory_space<vmem>>, vector<1x64xf32>
    %7 = vector.broadcast %6 : vector<1x64xf32> to vector<512x64xf32>
    %8 = arith.addf %5, %7 : vector<512x64xf32>
    %c0_7 = arith.constant 0 : index
    %c0_8 = arith.constant 0 : index
    %9 = vector.load %arg5[%c0_7, %c0_8] : memref<512x64xf32, #tpu.memory_space<vmem>>, vector<512x64xf32>
    tpu.vector_store %arg5[%c0_7, %c0_8], %8 {strides = array<i32>} : memref<512x64xf32, #tpu.memory_space<vmem>>, vector<512x64xf32>,
    return
  }
  func.func @transform_0(%arg0: i32) -> (i32, i32) {
    %c0_i32 = arith.constant 0 : i32
    %c0_i32_0 = arith.constant 0 : i32
    return %arg0, %c0_i32 : i32, i32
  }
  func.func @transform_1(%arg0: i32) -> (i32, i32) {
    %c0_i32 = arith.constant 0 : i32
    %c0_i32_0 = arith.constant 0 : i32
    %c0_i32_1 = arith.constant 0 : i32
    return %c0_i32, %c0_i32_0 : i32, i32
  }
  func.func @transform_2(%arg0: i32) -> (i32, i32) {
    %c0_i32 = arith.constant 0 : i32
    %c0_i32_0 = arith.constant 0 : i32
    %c0_i32_1 = arith.constant 0 : i32
    return %c0_i32, %c0_i32_0 : i32, i32
  }
  func.func @transform_3(%arg0: i32) -> (i32, i32) {
    %c0_i32 = arith.constant 0 : i32
    %c0_i32_0 = arith.constant 0 : i32
    %c0_i32_1 = arith.constant 0 : i32
    return %c0_i32, %c0_i32_0 : i32, i32
  }
  func.func @transform_4(%arg0: i32) -> (i32, i32) {
    %c0_i32 = arith.constant 0 : i32
    %c0_i32_0 = arith.constant 0 : i32
    return %arg0, %c0_i32 : i32, i32
  }
}

module attributes {stable_mosaic.version = 11 : i64} {
  func.func @_matmul_bn_act_kernel(%arg0: i32, %arg1: memref<512x64xf32, #tpu.memory_space<vmem>>, %arg2: memref<64x64xbf16, #tpu.memory_space<vmem>>, %arg3: memref<1x64xf32, #tpu.memory_space<vmem>>, %arg4: memref<1x64xf32, #tpu.memory_space<vmem>>, %arg5: memref<512x64xf32, #tpu.memory_space<vmem>>) attributes {dimension_semantics = [#tpu.dimension_semantics<parallel>], iteration_bounds = array<i64: 4>, scalar_prefetch = 0 : i64, scratch_operands = 0 : i64, tpu.core_type = #tpu.core_type<tc>, window_params = [{transform_indices = @transform_0, window_bounds = array<i64: 512, 64>}, {pipeline_mode = #tpu.pipeline_mode<synchronous>, transform_indices = @transform_1, window_bounds = array<i64: 64, 64>}, {pipeline_mode = #tpu.pipeline_mode<synchronous>, transform_indices = @transform_2, window_bounds = array<i64: 1, 64>}, {pipeline_mode = #tpu.pipeline_mode<synchronous>, transform_indices = @transform_3, window_bounds = array<i64: 1, 64>}, {transform_indices = @transform_4, window_bounds = array<i64: 512, 64>}]} {
    %c0 = arith.constant 0 : index
    %c0_0 = arith.constant 0 : index
    %0 = vector.load %arg1[%c0, %c0_0] : memref<512x64xf32, #tpu.memory_space<vmem>>, vector<512x64xf32>
    %cst = arith.constant 0.000000e+00 : f32
    %1 = vector.broadcast %cst : f32 to vector<512x64xf32>
    %2 = arith.cmpf ogt, %0, %1 : vector<512x64xf32>
    %3 = arith.extui %2 : vector<512x64xi1> to vector<512x64xi32>
    %4 = arith.sitofp %3 : vector<512x64xi32> to vector<512x64xf32>
    %cst_1 = arith.constant 0.000000e+00 : f32
    %5 = vector.broadcast %cst_1 : f32 to vector<512x64xf32>
    %6 = arith.cmpf olt, %0, %5 : vector<512x64xf32>
    %7 = arith.extui %6 : vector<512x64xi1> to vector<512x64xi32>
    %8 = arith.sitofp %7 : vector<512x64xi32> to vector<512x64xf32>
    %9 = arith.subf %4, %8 : vector<512x64xf32>
    %10 = arith.truncf %9 : vector<512x64xf32> to vector<512x64xbf16>
    %c0_2 = arith.constant 0 : index
    %c0_3 = arith.constant 0 : index
    %11 = vector.load %arg2[%c0_2, %c0_3] : memref<64x64xbf16, #tpu.memory_space<vmem>>, vector<64x64xbf16>
    %cst_4 = arith.constant dense<0.000000e+00> : vector<512x64xf32>
    %12 = tpu.matmul %10, %11, %cst_4 {dimension_numbers = #tpu.dot_dimension_numbers<[1], [0], [0], [1], [0, 0, 1, 1], [], []>} : vector<512x64xbf16>, vector<64x64xbf16>, vector<512x64xf32> -> vector<512x64xf32>
    %c0_5 = arith.constant 0 : index
    %c0_6 = arith.constant 0 : index
    %13 = vector.load %arg3[%c0_5, %c0_6] : memref<1x64xf32, #tpu.memory_space<vmem>>, vector<1x64xf32>
    %14 = vector.broadcast %13 : vector<1x64xf32> to vector<512x64xf32>
    %15 = arith.mulf %12, %14 : vector<512x64xf32>
    %c0_7 = arith.constant 0 : index
    %c0_8 = arith.constant 0 : index
    %16 = vector.load %arg4[%c0_7, %c0_8] : memref<1x64xf32, #tpu.memory_space<vmem>>, vector<1x64xf32>
    %17 = vector.broadcast %16 : vector<1x64xf32> to vector<512x64xf32>
    %18 = arith.addf %15, %17 : vector<512x64xf32>
    %c0_9 = arith.constant 0 : index
    %c0_10 = arith.constant 0 : index
    %19 = vector.load %arg5[%c0_9, %c0_10] : memref<512x64xf32, #tpu.memory_space<vmem>>, vector<512x64xf32>
    tpu.vector_store %arg5[%c0_9, %c0_10], %18 {strides = array<i32>} : memref<512x64xf32, #tpu.memory_space<vmem>>, vector<512x64xf32>,
    return
  }
  func.func @transform_0(%arg0: i32) -> (i32, i32) {
    %c0_i32 = arith.constant 0 : i32
    %c0_i32_0 = arith.constant 0 : i32
    return %arg0, %c0_i32 : i32, i32
  }
  func.func @transform_1(%arg0: i32) -> (i32, i32) {
    %c0_i32 = arith.constant 0 : i32
    %c0_i32_0 = arith.constant 0 : i32
    %c0_i32_1 = arith.constant 0 : i32
    return %c0_i32, %c0_i32_0 : i32, i32
  }
  func.func @transform_2(%arg0: i32) -> (i32, i32) {
    %c0_i32 = arith.constant 0 : i32
    %c0_i32_0 = arith.constant 0 : i32
    %c0_i32_1 = arith.constant 0 : i32
    return %c0_i32, %c0_i32_0 : i32, i32
  }
  func.func @transform_3(%arg0: i32) -> (i32, i32) {
    %c0_i32 = arith.constant 0 : i32
    %c0_i32_0 = arith.constant 0 : i32
    %c0_i32_1 = arith.constant 0 : i32
    return %c0_i32, %c0_i32_0 : i32, i32
  }
  func.func @transform_4(%arg0: i32) -> (i32, i32) {
    %c0_i32 = arith.constant 0 : i32
    %c0_i32_0 = arith.constant 0 : i32
    return %arg0, %c0_i32 : i32, i32
  }
}

module attributes {stable_mosaic.version = 11 : i64} {
  func.func @_maxpool2_kernel(%arg0: i32, %arg1: memref<16x2x16x128xf32, #tpu.memory_space<vmem>>, %arg2: memref<16x16x64xf32, #tpu.memory_space<vmem>>) attributes {dimension_semantics = [#tpu.dimension_semantics<parallel>], iteration_bounds = array<i64: 2>, scalar_prefetch = 0 : i64, scratch_operands = 0 : i64, tpu.core_type = #tpu.core_type<tc>, window_params = [{transform_indices = @transform_0, window_bounds = array<i64: 16, 2, 16, 128>}, {transform_indices = @transform_1, window_bounds = array<i64: 16, 16, 64>}]} {
    %c0 = arith.constant 0 : index
    %c0_0 = arith.constant 0 : index
    %c0_1 = arith.constant 0 : index
    %c0_2 = arith.constant 0 : index
    %0 = vector.load %arg1[%c0, %c0_0, %c0_1, %c0_2] : memref<16x2x16x128xf32, #tpu.memory_space<vmem>>, vector<16x2x16x128xf32>
    %1 = vector.extract_strided_slice %0 {offsets = [0, 0, 0, 0], sizes = [16, 1, 16, 128], strides = [1, 1, 1, 1]} : vector<16x2x16x128xf32> to vector<16x1x16x128xf32>
    %2 = vector.shape_cast %1 : vector<16x1x16x128xf32> to vector<16x16x128xf32>
    %3 = vector.extract_strided_slice %0 {offsets = [0, 1, 0, 0], sizes = [16, 1, 16, 128], strides = [1, 1, 1, 1]} : vector<16x2x16x128xf32> to vector<16x1x16x128xf32>
    %4 = vector.shape_cast %3 : vector<16x1x16x128xf32> to vector<16x16x128xf32>
    %5 = arith.maximumf %2, %4 : vector<16x16x128xf32>
    %6 = vector.extract_strided_slice %5 {offsets = [0, 0, 0], sizes = [16, 16, 64], strides = [1, 1, 1]} : vector<16x16x128xf32> to vector<16x16x64xf32>
    %7 = vector.extract_strided_slice %5 {offsets = [0, 0, 64], sizes = [16, 16, 64], strides = [1, 1, 1]} : vector<16x16x128xf32> to vector<16x16x64xf32>
    %8 = arith.maximumf %6, %7 : vector<16x16x64xf32>
    %c0_3 = arith.constant 0 : index
    %c0_4 = arith.constant 0 : index
    %c0_5 = arith.constant 0 : index
    %9 = vector.load %arg2[%c0_3, %c0_4, %c0_5] : memref<16x16x64xf32, #tpu.memory_space<vmem>>, vector<16x16x64xf32>
    tpu.vector_store %arg2[%c0_3, %c0_4, %c0_5], %8 {strides = array<i32>} : memref<16x16x64xf32, #tpu.memory_space<vmem>>, vector<16x16x64xf32>,
    return
  }
  func.func @transform_0(%arg0: i32) -> (i32, i32, i32, i32) {
    %c0_i32 = arith.constant 0 : i32
    %c0_i32_0 = arith.constant 0 : i32
    %c0_i32_1 = arith.constant 0 : i32
    %c0_i32_2 = arith.constant 0 : i32
    return %arg0, %c0_i32, %c0_i32_0, %c0_i32_1 : i32, i32, i32, i32
  }
  func.func @transform_1(%arg0: i32) -> (i32, i32, i32) {
    %c0_i32 = arith.constant 0 : i32
    %c0_i32_0 = arith.constant 0 : i32
    %c0_i32_1 = arith.constant 0 : i32
    return %arg0, %c0_i32, %c0_i32_0 : i32, i32, i32
  }
}

module attributes {stable_mosaic.version = 11 : i64} {
  func.func @_matmul_bn_act_kernel(%arg0: i32, %arg1: memref<256x576xbf16, #tpu.memory_space<vmem>>, %arg2: memref<576x128xbf16, #tpu.memory_space<vmem>>, %arg3: memref<1x128xf32, #tpu.memory_space<vmem>>, %arg4: memref<1x128xf32, #tpu.memory_space<vmem>>, %arg5: memref<256x128xf32, #tpu.memory_space<vmem>>) attributes {dimension_semantics = [#tpu.dimension_semantics<parallel>], iteration_bounds = array<i64: 2>, scalar_prefetch = 0 : i64, scratch_operands = 0 : i64, tpu.core_type = #tpu.core_type<tc>, window_params = [{transform_indices = @transform_0, window_bounds = array<i64: 256, 576>}, {pipeline_mode = #tpu.pipeline_mode<synchronous>, transform_indices = @transform_1, window_bounds = array<i64: 576, 128>}, {pipeline_mode = #tpu.pipeline_mode<synchronous>, transform_indices = @transform_2, window_bounds = array<i64: 1, 128>}, {pipeline_mode = #tpu.pipeline_mode<synchronous>, transform_indices = @transform_3, window_bounds = array<i64: 1, 128>}, {transform_indices = @transform_4, window_bounds = array<i64: 256, 128>}]} {
    %c0 = arith.constant 0 : index
    %c0_0 = arith.constant 0 : index
    %0 = vector.load %arg1[%c0, %c0_0] : memref<256x576xbf16, #tpu.memory_space<vmem>>, vector<256x576xbf16>
    %c0_1 = arith.constant 0 : index
    %c0_2 = arith.constant 0 : index
    %1 = vector.load %arg2[%c0_1, %c0_2] : memref<576x128xbf16, #tpu.memory_space<vmem>>, vector<576x128xbf16>
    %cst = arith.constant dense<0.000000e+00> : vector<256x128xf32>
    %2 = tpu.matmul %0, %1, %cst {dimension_numbers = #tpu.dot_dimension_numbers<[1], [0], [0], [1], [0, 0, 1, 1], [], []>} : vector<256x576xbf16>, vector<576x128xbf16>, vector<256x128xf32> -> vector<256x128xf32>
    %c0_3 = arith.constant 0 : index
    %c0_4 = arith.constant 0 : index
    %3 = vector.load %arg3[%c0_3, %c0_4] : memref<1x128xf32, #tpu.memory_space<vmem>>, vector<1x128xf32>
    %4 = vector.broadcast %3 : vector<1x128xf32> to vector<256x128xf32>
    %5 = arith.mulf %2, %4 : vector<256x128xf32>
    %c0_5 = arith.constant 0 : index
    %c0_6 = arith.constant 0 : index
    %6 = vector.load %arg4[%c0_5, %c0_6] : memref<1x128xf32, #tpu.memory_space<vmem>>, vector<1x128xf32>
    %7 = vector.broadcast %6 : vector<1x128xf32> to vector<256x128xf32>
    %8 = arith.addf %5, %7 : vector<256x128xf32>
    %c0_7 = arith.constant 0 : index
    %c0_8 = arith.constant 0 : index
    %9 = vector.load %arg5[%c0_7, %c0_8] : memref<256x128xf32, #tpu.memory_space<vmem>>, vector<256x128xf32>
    tpu.vector_store %arg5[%c0_7, %c0_8], %8 {strides = array<i32>} : memref<256x128xf32, #tpu.memory_space<vmem>>, vector<256x128xf32>,
    return
  }
  func.func @transform_0(%arg0: i32) -> (i32, i32) {
    %c0_i32 = arith.constant 0 : i32
    %c0_i32_0 = arith.constant 0 : i32
    return %arg0, %c0_i32 : i32, i32
  }
  func.func @transform_1(%arg0: i32) -> (i32, i32) {
    %c0_i32 = arith.constant 0 : i32
    %c0_i32_0 = arith.constant 0 : i32
    %c0_i32_1 = arith.constant 0 : i32
    return %c0_i32, %c0_i32_0 : i32, i32
  }
  func.func @transform_2(%arg0: i32) -> (i32, i32) {
    %c0_i32 = arith.constant 0 : i32
    %c0_i32_0 = arith.constant 0 : i32
    %c0_i32_1 = arith.constant 0 : i32
    return %c0_i32, %c0_i32_0 : i32, i32
  }
  func.func @transform_3(%arg0: i32) -> (i32, i32) {
    %c0_i32 = arith.constant 0 : i32
    %c0_i32_0 = arith.constant 0 : i32
    %c0_i32_1 = arith.constant 0 : i32
    return %c0_i32, %c0_i32_0 : i32, i32
  }
  func.func @transform_4(%arg0: i32) -> (i32, i32) {
    %c0_i32 = arith.constant 0 : i32
    %c0_i32_0 = arith.constant 0 : i32
    return %arg0, %c0_i32 : i32, i32
  }
}

module attributes {stable_mosaic.version = 11 : i64} {
  func.func @_matmul_bn_act_kernel(%arg0: i32, %arg1: memref<256x128xf32, #tpu.memory_space<vmem>>, %arg2: memref<128x128xbf16, #tpu.memory_space<vmem>>, %arg3: memref<1x128xf32, #tpu.memory_space<vmem>>, %arg4: memref<1x128xf32, #tpu.memory_space<vmem>>, %arg5: memref<256x128xf32, #tpu.memory_space<vmem>>) attributes {dimension_semantics = [#tpu.dimension_semantics<parallel>], iteration_bounds = array<i64: 2>, scalar_prefetch = 0 : i64, scratch_operands = 0 : i64, tpu.core_type = #tpu.core_type<tc>, window_params = [{transform_indices = @transform_0, window_bounds = array<i64: 256, 128>}, {pipeline_mode = #tpu.pipeline_mode<synchronous>, transform_indices = @transform_1, window_bounds = array<i64: 128, 128>}, {pipeline_mode = #tpu.pipeline_mode<synchronous>, transform_indices = @transform_2, window_bounds = array<i64: 1, 128>}, {pipeline_mode = #tpu.pipeline_mode<synchronous>, transform_indices = @transform_3, window_bounds = array<i64: 1, 128>}, {transform_indices = @transform_4, window_bounds = array<i64: 256, 128>}]} {
    %c0 = arith.constant 0 : index
    %c0_0 = arith.constant 0 : index
    %0 = vector.load %arg1[%c0, %c0_0] : memref<256x128xf32, #tpu.memory_space<vmem>>, vector<256x128xf32>
    %cst = arith.constant 0.000000e+00 : f32
    %1 = vector.broadcast %cst : f32 to vector<256x128xf32>
    %2 = arith.cmpf ogt, %0, %1 : vector<256x128xf32>
    %3 = arith.extui %2 : vector<256x128xi1> to vector<256x128xi32>
    %4 = arith.sitofp %3 : vector<256x128xi32> to vector<256x128xf32>
    %cst_1 = arith.constant 0.000000e+00 : f32
    %5 = vector.broadcast %cst_1 : f32 to vector<256x128xf32>
    %6 = arith.cmpf olt, %0, %5 : vector<256x128xf32>
    %7 = arith.extui %6 : vector<256x128xi1> to vector<256x128xi32>
    %8 = arith.sitofp %7 : vector<256x128xi32> to vector<256x128xf32>
    %9 = arith.subf %4, %8 : vector<256x128xf32>
    %10 = arith.truncf %9 : vector<256x128xf32> to vector<256x128xbf16>
    %c0_2 = arith.constant 0 : index
    %c0_3 = arith.constant 0 : index
    %11 = vector.load %arg2[%c0_2, %c0_3] : memref<128x128xbf16, #tpu.memory_space<vmem>>, vector<128x128xbf16>
    %cst_4 = arith.constant dense<0.000000e+00> : vector<256x128xf32>
    %12 = tpu.matmul %10, %11, %cst_4 {dimension_numbers = #tpu.dot_dimension_numbers<[1], [0], [0], [1], [0, 0, 1, 1], [], []>} : vector<256x128xbf16>, vector<128x128xbf16>, vector<256x128xf32> -> vector<256x128xf32>
    %c0_5 = arith.constant 0 : index
    %c0_6 = arith.constant 0 : index
    %13 = vector.load %arg3[%c0_5, %c0_6] : memref<1x128xf32, #tpu.memory_space<vmem>>, vector<1x128xf32>
    %14 = vector.broadcast %13 : vector<1x128xf32> to vector<256x128xf32>
    %15 = arith.mulf %12, %14 : vector<256x128xf32>
    %c0_7 = arith.constant 0 : index
    %c0_8 = arith.constant 0 : index
    %16 = vector.load %arg4[%c0_7, %c0_8] : memref<1x128xf32, #tpu.memory_space<vmem>>, vector<1x128xf32>
    %17 = vector.broadcast %16 : vector<1x128xf32> to vector<256x128xf32>
    %18 = arith.addf %15, %17 : vector<256x128xf32>
    %c0_9 = arith.constant 0 : index
    %c0_10 = arith.constant 0 : index
    %19 = vector.load %arg5[%c0_9, %c0_10] : memref<256x128xf32, #tpu.memory_space<vmem>>, vector<256x128xf32>
    tpu.vector_store %arg5[%c0_9, %c0_10], %18 {strides = array<i32>} : memref<256x128xf32, #tpu.memory_space<vmem>>, vector<256x128xf32>,
    return
  }
  func.func @transform_0(%arg0: i32) -> (i32, i32) {
    %c0_i32 = arith.constant 0 : i32
    %c0_i32_0 = arith.constant 0 : i32
    return %arg0, %c0_i32 : i32, i32
  }
  func.func @transform_1(%arg0: i32) -> (i32, i32) {
    %c0_i32 = arith.constant 0 : i32
    %c0_i32_0 = arith.constant 0 : i32
    %c0_i32_1 = arith.constant 0 : i32
    return %c0_i32, %c0_i32_0 : i32, i32
  }
  func.func @transform_2(%arg0: i32) -> (i32, i32) {
    %c0_i32 = arith.constant 0 : i32
    %c0_i32_0 = arith.constant 0 : i32
    %c0_i32_1 = arith.constant 0 : i32
    return %c0_i32, %c0_i32_0 : i32, i32
  }
  func.func @transform_3(%arg0: i32) -> (i32, i32) {
    %c0_i32 = arith.constant 0 : i32
    %c0_i32_0 = arith.constant 0 : i32
    %c0_i32_1 = arith.constant 0 : i32
    return %c0_i32, %c0_i32_0 : i32, i32
  }
  func.func @transform_4(%arg0: i32) -> (i32, i32) {
    %c0_i32 = arith.constant 0 : i32
    %c0_i32_0 = arith.constant 0 : i32
    return %arg0, %c0_i32 : i32, i32
  }
}

module attributes {stable_mosaic.version = 11 : i64} {
  func.func @_maxpool2_kernel(%arg0: i32, %arg1: memref<8x2x8x256xf32, #tpu.memory_space<vmem>>, %arg2: memref<8x8x128xf32, #tpu.memory_space<vmem>>) attributes {dimension_semantics = [#tpu.dimension_semantics<parallel>], iteration_bounds = array<i64: 2>, scalar_prefetch = 0 : i64, scratch_operands = 0 : i64, tpu.core_type = #tpu.core_type<tc>, window_params = [{transform_indices = @transform_0, window_bounds = array<i64: 8, 2, 8, 256>}, {transform_indices = @transform_1, window_bounds = array<i64: 8, 8, 128>}]} {
    %c0 = arith.constant 0 : index
    %c0_0 = arith.constant 0 : index
    %c0_1 = arith.constant 0 : index
    %c0_2 = arith.constant 0 : index
    %0 = vector.load %arg1[%c0, %c0_0, %c0_1, %c0_2] : memref<8x2x8x256xf32, #tpu.memory_space<vmem>>, vector<8x2x8x256xf32>
    %1 = vector.extract_strided_slice %0 {offsets = [0, 0, 0, 0], sizes = [8, 1, 8, 256], strides = [1, 1, 1, 1]} : vector<8x2x8x256xf32> to vector<8x1x8x256xf32>
    %2 = vector.shape_cast %1 : vector<8x1x8x256xf32> to vector<8x8x256xf32>
    %3 = vector.extract_strided_slice %0 {offsets = [0, 1, 0, 0], sizes = [8, 1, 8, 256], strides = [1, 1, 1, 1]} : vector<8x2x8x256xf32> to vector<8x1x8x256xf32>
    %4 = vector.shape_cast %3 : vector<8x1x8x256xf32> to vector<8x8x256xf32>
    %5 = arith.maximumf %2, %4 : vector<8x8x256xf32>
    %6 = vector.extract_strided_slice %5 {offsets = [0, 0, 0], sizes = [8, 8, 128], strides = [1, 1, 1]} : vector<8x8x256xf32> to vector<8x8x128xf32>
    %7 = vector.extract_strided_slice %5 {offsets = [0, 0, 128], sizes = [8, 8, 128], strides = [1, 1, 1]} : vector<8x8x256xf32> to vector<8x8x128xf32>
    %8 = arith.maximumf %6, %7 : vector<8x8x128xf32>
    %c0_3 = arith.constant 0 : index
    %c0_4 = arith.constant 0 : index
    %c0_5 = arith.constant 0 : index
    %9 = vector.load %arg2[%c0_3, %c0_4, %c0_5] : memref<8x8x128xf32, #tpu.memory_space<vmem>>, vector<8x8x128xf32>
    tpu.vector_store %arg2[%c0_3, %c0_4, %c0_5], %8 {strides = array<i32>} : memref<8x8x128xf32, #tpu.memory_space<vmem>>, vector<8x8x128xf32>,
    return
  }
  func.func @transform_0(%arg0: i32) -> (i32, i32, i32, i32) {
    %c0_i32 = arith.constant 0 : i32
    %c0_i32_0 = arith.constant 0 : i32
    %c0_i32_1 = arith.constant 0 : i32
    %c0_i32_2 = arith.constant 0 : i32
    return %arg0, %c0_i32, %c0_i32_0, %c0_i32_1 : i32, i32, i32, i32
  }
  func.func @transform_1(%arg0: i32) -> (i32, i32, i32) {
    %c0_i32 = arith.constant 0 : i32
    %c0_i32_0 = arith.constant 0 : i32
    %c0_i32_1 = arith.constant 0 : i32
    return %arg0, %c0_i32, %c0_i32_0 : i32, i32, i32
  }
}

module attributes {stable_mosaic.version = 11 : i64} {
  func.func @_matmul_bn_act_kernel(%arg0: i32, %arg1: memref<64x1152xbf16, #tpu.memory_space<vmem>>, %arg2: memref<1152x256xbf16, #tpu.memory_space<vmem>>, %arg3: memref<1x256xf32, #tpu.memory_space<vmem>>, %arg4: memref<1x256xf32, #tpu.memory_space<vmem>>, %arg5: memref<64x256xf32, #tpu.memory_space<vmem>>) attributes {dimension_semantics = [#tpu.dimension_semantics<parallel>], iteration_bounds = array<i64: 2>, scalar_prefetch = 0 : i64, scratch_operands = 0 : i64, tpu.core_type = #tpu.core_type<tc>, window_params = [{transform_indices = @transform_0, window_bounds = array<i64: 64, 1152>}, {pipeline_mode = #tpu.pipeline_mode<synchronous>, transform_indices = @transform_1, window_bounds = array<i64: 1152, 256>}, {pipeline_mode = #tpu.pipeline_mode<synchronous>, transform_indices = @transform_2, window_bounds = array<i64: 1, 256>}, {pipeline_mode = #tpu.pipeline_mode<synchronous>, transform_indices = @transform_3, window_bounds = array<i64: 1, 256>}, {transform_indices = @transform_4, window_bounds = array<i64: 64, 256>}]} {
    %c0 = arith.constant 0 : index
    %c0_0 = arith.constant 0 : index
    %0 = vector.load %arg1[%c0, %c0_0] : memref<64x1152xbf16, #tpu.memory_space<vmem>>, vector<64x1152xbf16>
    %c0_1 = arith.constant 0 : index
    %c0_2 = arith.constant 0 : index
    %1 = vector.load %arg2[%c0_1, %c0_2] : memref<1152x256xbf16, #tpu.memory_space<vmem>>, vector<1152x256xbf16>
    %cst = arith.constant dense<0.000000e+00> : vector<64x256xf32>
    %2 = tpu.matmul %0, %1, %cst {dimension_numbers = #tpu.dot_dimension_numbers<[1], [0], [0], [1], [0, 0, 1, 1], [], []>} : vector<64x1152xbf16>, vector<1152x256xbf16>, vector<64x256xf32> -> vector<64x256xf32>
    %c0_3 = arith.constant 0 : index
    %c0_4 = arith.constant 0 : index
    %3 = vector.load %arg3[%c0_3, %c0_4] : memref<1x256xf32, #tpu.memory_space<vmem>>, vector<1x256xf32>
    %4 = vector.broadcast %3 : vector<1x256xf32> to vector<64x256xf32>
    %5 = arith.mulf %2, %4 : vector<64x256xf32>
    %c0_5 = arith.constant 0 : index
    %c0_6 = arith.constant 0 : index
    %6 = vector.load %arg4[%c0_5, %c0_6] : memref<1x256xf32, #tpu.memory_space<vmem>>, vector<1x256xf32>
    %7 = vector.broadcast %6 : vector<1x256xf32> to vector<64x256xf32>
    %8 = arith.addf %5, %7 : vector<64x256xf32>
    %c0_7 = arith.constant 0 : index
    %c0_8 = arith.constant 0 : index
    %9 = vector.load %arg5[%c0_7, %c0_8] : memref<64x256xf32, #tpu.memory_space<vmem>>, vector<64x256xf32>
    tpu.vector_store %arg5[%c0_7, %c0_8], %8 {strides = array<i32>} : memref<64x256xf32, #tpu.memory_space<vmem>>, vector<64x256xf32>,
    return
  }
  func.func @transform_0(%arg0: i32) -> (i32, i32) {
    %c0_i32 = arith.constant 0 : i32
    %c0_i32_0 = arith.constant 0 : i32
    return %arg0, %c0_i32 : i32, i32
  }
  func.func @transform_1(%arg0: i32) -> (i32, i32) {
    %c0_i32 = arith.constant 0 : i32
    %c0_i32_0 = arith.constant 0 : i32
    %c0_i32_1 = arith.constant 0 : i32
    return %c0_i32, %c0_i32_0 : i32, i32
  }
  func.func @transform_2(%arg0: i32) -> (i32, i32) {
    %c0_i32 = arith.constant 0 : i32
    %c0_i32_0 = arith.constant 0 : i32
    %c0_i32_1 = arith.constant 0 : i32
    return %c0_i32, %c0_i32_0 : i32, i32
  }
  func.func @transform_3(%arg0: i32) -> (i32, i32) {
    %c0_i32 = arith.constant 0 : i32
    %c0_i32_0 = arith.constant 0 : i32
    %c0_i32_1 = arith.constant 0 : i32
    return %c0_i32, %c0_i32_0 : i32, i32
  }
  func.func @transform_4(%arg0: i32) -> (i32, i32) {
    %c0_i32 = arith.constant 0 : i32
    %c0_i32_0 = arith.constant 0 : i32
    return %arg0, %c0_i32 : i32, i32
  }
}

module attributes {stable_mosaic.version = 11 : i64} {
  func.func @_matmul_bn_act_kernel(%arg0: i32, %arg1: memref<64x256xf32, #tpu.memory_space<vmem>>, %arg2: memref<256x256xbf16, #tpu.memory_space<vmem>>, %arg3: memref<1x256xf32, #tpu.memory_space<vmem>>, %arg4: memref<1x256xf32, #tpu.memory_space<vmem>>, %arg5: memref<64x256xf32, #tpu.memory_space<vmem>>) attributes {dimension_semantics = [#tpu.dimension_semantics<parallel>], iteration_bounds = array<i64: 2>, scalar_prefetch = 0 : i64, scratch_operands = 0 : i64, tpu.core_type = #tpu.core_type<tc>, window_params = [{transform_indices = @transform_0, window_bounds = array<i64: 64, 256>}, {pipeline_mode = #tpu.pipeline_mode<synchronous>, transform_indices = @transform_1, window_bounds = array<i64: 256, 256>}, {pipeline_mode = #tpu.pipeline_mode<synchronous>, transform_indices = @transform_2, window_bounds = array<i64: 1, 256>}, {pipeline_mode = #tpu.pipeline_mode<synchronous>, transform_indices = @transform_3, window_bounds = array<i64: 1, 256>}, {transform_indices = @transform_4, window_bounds = array<i64: 64, 256>}]} {
    %c0 = arith.constant 0 : index
    %c0_0 = arith.constant 0 : index
    %0 = vector.load %arg1[%c0, %c0_0] : memref<64x256xf32, #tpu.memory_space<vmem>>, vector<64x256xf32>
    %cst = arith.constant 0.000000e+00 : f32
    %1 = vector.broadcast %cst : f32 to vector<64x256xf32>
    %2 = arith.cmpf ogt, %0, %1 : vector<64x256xf32>
    %3 = arith.extui %2 : vector<64x256xi1> to vector<64x256xi32>
    %4 = arith.sitofp %3 : vector<64x256xi32> to vector<64x256xf32>
    %cst_1 = arith.constant 0.000000e+00 : f32
    %5 = vector.broadcast %cst_1 : f32 to vector<64x256xf32>
    %6 = arith.cmpf olt, %0, %5 : vector<64x256xf32>
    %7 = arith.extui %6 : vector<64x256xi1> to vector<64x256xi32>
    %8 = arith.sitofp %7 : vector<64x256xi32> to vector<64x256xf32>
    %9 = arith.subf %4, %8 : vector<64x256xf32>
    %10 = arith.truncf %9 : vector<64x256xf32> to vector<64x256xbf16>
    %c0_2 = arith.constant 0 : index
    %c0_3 = arith.constant 0 : index
    %11 = vector.load %arg2[%c0_2, %c0_3] : memref<256x256xbf16, #tpu.memory_space<vmem>>, vector<256x256xbf16>
    %cst_4 = arith.constant dense<0.000000e+00> : vector<64x256xf32>
    %12 = tpu.matmul %10, %11, %cst_4 {dimension_numbers = #tpu.dot_dimension_numbers<[1], [0], [0], [1], [0, 0, 1, 1], [], []>} : vector<64x256xbf16>, vector<256x256xbf16>, vector<64x256xf32> -> vector<64x256xf32>
    %c0_5 = arith.constant 0 : index
    %c0_6 = arith.constant 0 : index
    %13 = vector.load %arg3[%c0_5, %c0_6] : memref<1x256xf32, #tpu.memory_space<vmem>>, vector<1x256xf32>
    %14 = vector.broadcast %13 : vector<1x256xf32> to vector<64x256xf32>
    %15 = arith.mulf %12, %14 : vector<64x256xf32>
    %c0_7 = arith.constant 0 : index
    %c0_8 = arith.constant 0 : index
    %16 = vector.load %arg4[%c0_7, %c0_8] : memref<1x256xf32, #tpu.memory_space<vmem>>, vector<1x256xf32>
    %17 = vector.broadcast %16 : vector<1x256xf32> to vector<64x256xf32>
    %18 = arith.addf %15, %17 : vector<64x256xf32>
    %cst_9 = arith.constant 0.000000e+00 : f32
    %19 = vector.broadcast %cst_9 : f32 to vector<64x256xf32>
    %20 = arith.cmpf ogt, %18, %19 : vector<64x256xf32>
    %21 = arith.extui %20 : vector<64x256xi1> to vector<64x256xi32>
    %22 = arith.sitofp %21 : vector<64x256xi32> to vector<64x256xf32>
    %cst_10 = arith.constant 0.000000e+00 : f32
    %23 = vector.broadcast %cst_10 : f32 to vector<64x256xf32>
    %24 = arith.cmpf olt, %18, %23 : vector<64x256xf32>
    %25 = arith.extui %24 : vector<64x256xi1> to vector<64x256xi32>
    %26 = arith.sitofp %25 : vector<64x256xi32> to vector<64x256xf32>
    %27 = arith.subf %22, %26 : vector<64x256xf32>
    %c0_11 = arith.constant 0 : index
    %c0_12 = arith.constant 0 : index
    %28 = vector.load %arg5[%c0_11, %c0_12] : memref<64x256xf32, #tpu.memory_space<vmem>>, vector<64x256xf32>
    tpu.vector_store %arg5[%c0_11, %c0_12], %27 {strides = array<i32>} : memref<64x256xf32, #tpu.memory_space<vmem>>, vector<64x256xf32>,
    return
  }
  func.func @transform_0(%arg0: i32) -> (i32, i32) {
    %c0_i32 = arith.constant 0 : i32
    %c0_i32_0 = arith.constant 0 : i32
    return %arg0, %c0_i32 : i32, i32
  }
  func.func @transform_1(%arg0: i32) -> (i32, i32) {
    %c0_i32 = arith.constant 0 : i32
    %c0_i32_0 = arith.constant 0 : i32
    %c0_i32_1 = arith.constant 0 : i32
    return %c0_i32, %c0_i32_0 : i32, i32
  }
  func.func @transform_2(%arg0: i32) -> (i32, i32) {
    %c0_i32 = arith.constant 0 : i32
    %c0_i32_0 = arith.constant 0 : i32
    %c0_i32_1 = arith.constant 0 : i32
    return %c0_i32, %c0_i32_0 : i32, i32
  }
  func.func @transform_3(%arg0: i32) -> (i32, i32) {
    %c0_i32 = arith.constant 0 : i32
    %c0_i32_0 = arith.constant 0 : i32
    %c0_i32_1 = arith.constant 0 : i32
    return %c0_i32, %c0_i32_0 : i32, i32
  }
  func.func @transform_4(%arg0: i32) -> (i32, i32) {
    %c0_i32 = arith.constant 0 : i32
    %c0_i32_0 = arith.constant 0 : i32
    return %arg0, %c0_i32 : i32, i32
  }
}

module attributes {stable_mosaic.version = 11 : i64} {
  func.func @_matmul_bn_act_kernel(%arg0: i32, %arg1: memref<64x256xf32, #tpu.memory_space<vmem>>, %arg2: memref<256x10xf32, #tpu.memory_space<vmem>>, %arg3: memref<1x10xf32, #tpu.memory_space<vmem>>, %arg4: memref<1x10xf32, #tpu.memory_space<vmem>>, %arg5: memref<64x10xf32, #tpu.memory_space<vmem>>) attributes {dimension_semantics = [#tpu.dimension_semantics<parallel>], iteration_bounds = array<i64: 2>, scalar_prefetch = 0 : i64, scratch_operands = 0 : i64, tpu.core_type = #tpu.core_type<tc>, window_params = [{transform_indices = @transform_0, window_bounds = array<i64: 64, 256>}, {pipeline_mode = #tpu.pipeline_mode<synchronous>, transform_indices = @transform_1, window_bounds = array<i64: 256, 10>}, {pipeline_mode = #tpu.pipeline_mode<synchronous>, transform_indices = @transform_2, window_bounds = array<i64: 1, 10>}, {pipeline_mode = #tpu.pipeline_mode<synchronous>, transform_indices = @transform_3, window_bounds = array<i64: 1, 10>}, {transform_indices = @transform_4, window_bounds = array<i64: 64, 10>}]} {
    %c0 = arith.constant 0 : index
    %c0_0 = arith.constant 0 : index
    %0 = vector.load %arg1[%c0, %c0_0] : memref<64x256xf32, #tpu.memory_space<vmem>>, vector<64x256xf32>
    %c0_1 = arith.constant 0 : index
    %c0_2 = arith.constant 0 : index
    %1 = vector.load %arg2[%c0_1, %c0_2] : memref<256x10xf32, #tpu.memory_space<vmem>>, vector<256x10xf32>
    %cst = arith.constant dense<0.000000e+00> : vector<64x10xf32>
    %2 = tpu.matmul %0, %1, %cst {dimension_numbers = #tpu.dot_dimension_numbers<[1], [0], [0], [1], [0, 0, 1, 1], [], []>} : vector<64x256xf32>, vector<256x10xf32>, vector<64x10xf32> -> vector<64x10xf32>
    %c0_3 = arith.constant 0 : index
    %c0_4 = arith.constant 0 : index
    %3 = vector.load %arg3[%c0_3, %c0_4] : memref<1x10xf32, #tpu.memory_space<vmem>>, vector<1x10xf32>
    %4 = vector.broadcast %3 : vector<1x10xf32> to vector<64x10xf32>
    %5 = arith.mulf %2, %4 : vector<64x10xf32>
    %c0_5 = arith.constant 0 : index
    %c0_6 = arith.constant 0 : index
    %6 = vector.load %arg4[%c0_5, %c0_6] : memref<1x10xf32, #tpu.memory_space<vmem>>, vector<1x10xf32>
    %7 = vector.broadcast %6 : vector<1x10xf32> to vector<64x10xf32>
    %8 = arith.addf %5, %7 : vector<64x10xf32>
    %cst_7 = arith.constant 0.000000e+00 : f32
    %9 = vector.broadcast %cst_7 : f32 to vector<64x10xf32>
    %10 = arith.maximumf %8, %9 : vector<64x10xf32>
    %c0_8 = arith.constant 0 : index
    %c0_9 = arith.constant 0 : index
    %11 = vector.load %arg5[%c0_8, %c0_9] : memref<64x10xf32, #tpu.memory_space<vmem>>, vector<64x10xf32>
    tpu.vector_store %arg5[%c0_8, %c0_9], %10 {strides = array<i32>} : memref<64x10xf32, #tpu.memory_space<vmem>>, vector<64x10xf32>,
    return
  }
  func.func @transform_0(%arg0: i32) -> (i32, i32) {
    %c0_i32 = arith.constant 0 : i32
    %c0_i32_0 = arith.constant 0 : i32
    return %arg0, %c0_i32 : i32, i32
  }
  func.func @transform_1(%arg0: i32) -> (i32, i32) {
    %c0_i32 = arith.constant 0 : i32
    %c0_i32_0 = arith.constant 0 : i32
    %c0_i32_1 = arith.constant 0 : i32
    return %c0_i32, %c0_i32_0 : i32, i32
  }
  func.func @transform_2(%arg0: i32) -> (i32, i32) {
    %c0_i32 = arith.constant 0 : i32
    %c0_i32_0 = arith.constant 0 : i32
    %c0_i32_1 = arith.constant 0 : i32
    return %c0_i32, %c0_i32_0 : i32, i32
  }
  func.func @transform_3(%arg0: i32) -> (i32, i32) {
    %c0_i32 = arith.constant 0 : i32
    %c0_i32_0 = arith.constant 0 : i32
    %c0_i32_1 = arith.constant 0 : i32
    return %c0_i32, %c0_i32_0 : i32, i32
  }
  func.func @transform_4(%arg0: i32) -> (i32, i32) {
    %c0_i32 = arith.constant 0 : i32
    %c0_i32_0 = arith.constant 0 : i32
    return %arg0, %c0_i32 : i32, i32
  }
}

module attributes {stable_mosaic.version = 11 : i64} {
  func.func @_avgpool_kernel(%arg0: i32, %arg1: memref<1x64x10xf32, #tpu.memory_space<vmem>>, %arg2: memref<1x1x10xf32, #tpu.memory_space<vmem>>) attributes {dimension_semantics = [#tpu.dimension_semantics<parallel>], iteration_bounds = array<i64: 2>, scalar_prefetch = 0 : i64, scratch_operands = 0 : i64, tpu.core_type = #tpu.core_type<tc>, window_params = [{transform_indices = @transform_0, window_bounds = array<i64: 1, 64, 10>}, {transform_indices = @transform_1, window_bounds = array<i64: 1, 1, 10>}]} {
    %c0 = arith.constant 0 : index
    %c0_0 = arith.constant 0 : index
    %c0_1 = arith.constant 0 : index
    %0 = vector.load %arg1[%c0, %c0_0, %c0_1] : memref<1x64x10xf32, #tpu.memory_space<vmem>>, vector<1x64x10xf32>
    %1 = vector.shape_cast %0 : vector<1x64x10xf32> to vector<64x10xf32>
    %cst = arith.constant dense<0.000000e+00> : vector<10xf32>
    %2 = vector.multi_reduction <add>, %1, %cst [0] : vector<64x10xf32> to vector<10xf32>
    %3 = vector.shape_cast %2 : vector<10xf32> to vector<1x10xf32>
    %cst_2 = arith.constant 6.400000e+01 : f32
    %4 = vector.broadcast %cst_2 : f32 to vector<1x10xf32>
    %5 = arith.divf %3, %4 : vector<1x10xf32>
    %c0_3 = arith.constant 0 : index
    %c0_4 = arith.constant 0 : index
    %c0_5 = arith.constant 0 : index
    %6 = vector.load %arg2[%c0_3, %c0_4, %c0_5] : memref<1x1x10xf32, #tpu.memory_space<vmem>>, vector<1x1x10xf32>
    %7 = vector.shape_cast %6 : vector<1x1x10xf32> to vector<1x10xf32>
    %8 = vector.shape_cast %5 : vector<1x10xf32> to vector<1x1x10xf32>
    tpu.vector_store %arg2[%c0_3, %c0_4, %c0_5], %8 {strides = array<i32>} : memref<1x1x10xf32, #tpu.memory_space<vmem>>, vector<1x1x10xf32>,
    return
  }
  func.func @transform_0(%arg0: i32) -> (i32, i32, i32) {
    %c0_i32 = arith.constant 0 : i32
    %c0_i32_0 = arith.constant 0 : i32
    %c0_i32_1 = arith.constant 0 : i32
    return %arg0, %c0_i32, %c0_i32_0 : i32, i32, i32
  }
  func.func @transform_1(%arg0: i32) -> (i32, i32, i32) {
    %c0_i32 = arith.constant 0 : i32
    %c0_i32_0 = arith.constant 0 : i32
    %c0_i32_1 = arith.constant 0 : i32
    return %arg0, %c0_i32, %c0_i32_0 : i32, i32, i32
  }
}

</mosaic_0001>

<bundles_post_ra>
// kernel: _lambda_.12
= control target key start
LH: loop header
LB: loop body
LE: loop exit
PB: predicated region body
PF: predicated region fallthrough
CT: control target
= control target key end

     0   :  { %s1449_s15 = smov 0   ;;  %s1901_s0 = inlined_call_operand.vmem [shape: f32[2048,75], index: 0, kind: input, shape index: {}]   ;;  %s1902_s1 = inlined_call_operand.vmem [shape: f32[75,64], index: 1, kind: input, shape index: {}]   ;;  %s1903_s2 = inlined_call_operand.vmem [shape: f32[1,64], index: 2, kind: input, shape index: {}]   ;;  %s1904_s3 = inlined_call_operand.vmem [shape: f32[1,64], index: 3, kind: input, shape index: {}]   ;;  %s1905_s4 = inlined_call_operand.vmem [shape: f32[2048,64], index: 4, kind: output, shape index: {}]  }
   0x1 LB: > { %s1120_s16 = sadd.s32 4294967295, %s1422_s15   ;;  %p1124_p0 = scmp.ge.s32.totalorder %s1422_s15, 1  ;;  %s1422_s15 = sphi %s1449_s15, %s14_s15  }
   0x2   : > { %p163_p1 = scmp.lt.s32.totalorder %s1422_s15, 5 }
   0x4   : > { %p164_p2 = pnand %p1124_p0, %p163_p1 }
   0x5   : > { %s1125_s21 = sshll.u32 (!%p164_p2), %s1120_s16, 6 }
   0x6   : > { %167 = sbr.rel (%p164_p2) target bundleno = 293 (0x125), region = 36  ;;  %p190_p3 = scmp.lt.s32.totalorder (!%p164_p2), %s1125_s21, 255 }
   0xb   : > { %v274_v0 = vld [vmem:[%s1902_s1 + $0x48] sm:$0x7]  ;;  %vm468_vm0 = vcmask 1042432   ;;  %v273_v1 = vld [vmem:[%s1902_s1 + $0x40] sm:$0xff]  ;;  %v272_v2 = vld [vmem:[%s1902_s1 + $0x38] sm:$0xff]  ;;  %s1907_s21 = smov (!%p190_p3, %s1125_s21), 255 }
   0xc   : > { %1272 = vmatprep.subr.msk.mxu0 %vm468_vm0, %v274_v0  ;;  %1388 = vmatprep.subr.msk.mxu1 %vm468_vm0, %v274_v0  ;;  %v271_v3 = vld [vmem:[%s1902_s1 + $0x30] sm:$0xff]  ;;  %v270_v4 = vld [vmem:[%s1902_s1 + $0x28] sm:$0xff]  ;;  %v269_v5 = vld [vmem:[%s1902_s1 + $0x20] sm:$0xff]  ;;  %s1126_s8 = sshll.u32 %s1907_s21, 3  ;;  %vm275_vm1 = vcmask 613376   ;;  %vm999_vm2 = vcmask 523264  }
   0xd   : > { %1273 = vmatpush3.msk.msra.mxu0 %vm468_vm0, %v274_v0  ;;  %1398 = vmatpush3.msk.msra.mxu1 %vm468_vm0, %v274_v0  ;;  %v268_v6 = vld [vmem:[%s1902_s1 + $0x18] sm:$0xff]  ;;  %v267_v7 = vld [vmem:[%s1902_s1 + $0x10] sm:$0xff]  ;;  %v266_v8 = vld [vmem:[%s1902_s1 + $0x8] sm:$0xff]  ;;  %s1492_s13 = scalar_lea.vmem %s1901_s0, %s1126_s8  ;;  %s1642_s24 = scalar_lea.vmem %s1905_s4, %s1126_s8 }
   0xe   : > { %1274 = vmatprep.subr.mxu0 %v273_v1  ;;  %1389 = vmatprep.subr.mxu1 %v273_v1  ;;  %v265_v9 = vld [vmem:[%s1902_s1] sm:$0xff]  ;;  %v202_v12 = vld [vmem:[%s1492_s13 + $0x8] sm:$0xff]  ;;  %v203_v14 = vld [vmem:[%s1492_s13 + $0x10] sm:$0xff] }
   0xf   : > { %1275 = vmatpush3.msra.mxu0 %v273_v1  ;;  %1399 = vmatpush3.msra.mxu1 %v273_v1  ;;  %v201_v10 = vld [vmem:[%s1492_s13] sm:$0xff]  ;;  %v234_v13 = vld [vmem:[%s1492_s13 + $0x108] sm:$0xff]  ;;  %v235_v15 = vld [vmem:[%s1492_s13 + $0x110] sm:$0xff] }
  0x10   : > { %1276 = vmatprep.subr.mxu0 %v272_v2  ;;  %1390 = vmatprep.subr.mxu1 %v272_v2  ;;  %v233_v11 = vld [vmem:[%s1492_s13 + $0x100] sm:$0xff]  ;;  %v204_v16 = vld [vmem:[%s1492_s13 + $0x18] sm:$0xff]  ;;  %v206_v20 = vld [vmem:[%s1492_s13 + $0x28] sm:$0xff] }
  0x11   : > { %1277 = vmatpush3.msra.mxu0 %v272_v2  ;;  %1400 = vmatpush3.msra.mxu1 %v272_v2  ;;  %v236_v17 = vld [vmem:[%s1492_s13 + $0x118] sm:$0xff]  ;;  %v205_v18 = vld [vmem:[%s1492_s13 + $0x20] sm:$0xff]  ;;  %v238_v21 = vld [vmem:[%s1492_s13 + $0x128] sm:$0xff] }
  0x12   : > { %1278 = vmatprep.subr.mxu0 %v271_v3  ;;  %1391 = vmatprep.subr.mxu1 %v271_v3  ;;  %v237_v19 = vld [vmem:[%s1492_s13 + $0x120] sm:$0xff]  ;;  %v207_v22 = vld [vmem:[%s1492_s13 + $0x30] sm:$0xff]  ;;  %v208_v24 = vld [vmem:[%s1492_s13 + $0x38] sm:$0xff] }
  0x13   : > { %1279 = vmatpush3.msra.mxu0 %v271_v3  ;;  %1401 = vmatpush3.msra.mxu1 %v271_v3  ;;  %v239_v23 = vld [vmem:[%s1492_s13 + $0x130] sm:$0xff]  ;;  %v240_v25 = vld [vmem:[%s1492_s13 + $0x138] sm:$0xff]  ;;  %v209_v26 = vld [vmem:[%s1492_s13 + $0x40] sm:$0xff] }
  0x14   : > { %1280 = vmatprep.subr.mxu0 %v270_v4  ;;  %1392 = vmatprep.subr.mxu1 %v270_v4  ;;  %v241_v27 = vld [vmem:[%s1492_s13 + $0x140] sm:$0xff]  ;;  %v210_v28 = vld [vmem:[%s1492_s13 + $0x48] sm:$0xff]  ;;  %v211_v30 = vld [vmem:[%s1492_s13 + $0x50] sm:$0xff] }
  0x15   : > { %1281 = vmatpush3.msra.mxu0 %v270_v4  ;;  %1402 = vmatpush3.msra.mxu1 %v270_v4  ;;  %v242_v29 = vld [vmem:[%s1492_s13 + $0x148] sm:$0xff]  ;;  %v243_v31 = vld [vmem:[%s1492_s13 + $0x150] sm:$0xff]  ;;  %v212_v32 = vld [vmem:[%s1492_s13 + $0x58] sm:$0xff] }
  0x16   : > { %1282 = vmatprep.subr.mxu0 %v269_v5  ;;  %1393 = vmatprep.subr.mxu1 %v269_v5  ;;  %v244_v33 = vld [vmem:[%s1492_s13 + $0x158] sm:$0xff]  ;;  %v213_v34 = vld [vmem:[%s1492_s13 + $0x60] sm:$0xff]  ;;  %v214_v36 = vld [vmem:[%s1492_s13 + $0x68] sm:$0xff] }
  0x17   : > { %1283 = vmatpush3.msra.mxu0 %v269_v5  ;;  %1403 = vmatpush3.msra.mxu1 %v269_v5  ;;  %v245_v35 = vld [vmem:[%s1492_s13 + $0x160] sm:$0xff]  ;;  %v246_v37 = vld [vmem:[%s1492_s13 + $0x168] sm:$0xff]  ;;  %v215_v38 = vld [vmem:[%s1492_s13 + $0x70] sm:$0xff] }
  0x18   : > { %1284 = vmatprep.subr.mxu0 %v268_v6  ;;  %1394 = vmatprep.subr.mxu1 %v268_v6  ;;  %v247_v39 = vld [vmem:[%s1492_s13 + $0x170] sm:$0xff]  ;;  %v216_v40 = vld [vmem:[%s1492_s13 + $0x78] sm:$0xff]  ;;  %v217_v42 = vld [vmem:[%s1492_s13 + $0x80] sm:$0xff] }
  0x19   : > { %1285 = vmatpush3.msra.mxu0 %v268_v6  ;;  %1404 = vmatpush3.msra.mxu1 %v268_v6  ;;  %v248_v41 = vld [vmem:[%s1492_s13 + $0x178] sm:$0xff]  ;;  %v249_v43 = vld [vmem:[%s1492_s13 + $0x180] sm:$0xff]  ;;  %v218_v44 = vld [vmem:[%s1492_s13 + $0x88] sm:$0xff] }
  0x1a   : > { %1286 = vmatprep.subr.mxu0 %v267_v7  ;;  %1395 = vmatprep.subr.mxu1 %v267_v7  ;;  %v250_v45 = vld [vmem:[%s1492_s13 + $0x188] sm:$0xff]  ;;  %v219_v46 = vld [vmem:[%s1492_s13 + $0x90] sm:$0xff]  ;;  %v220_v48 = vld [vmem:[%s1492_s13 + $0x98] sm:$0xff] }
  0x1b   : > { %1287 = vmatpush3.msra.mxu0 %v267_v7  ;;  %1405 = vmatpush3.msra.mxu1 %v267_v7  ;;  %v251_v47 = vld [vmem:[%s1492_s13 + $0x190] sm:$0xff]  ;;  %v252_v49 = vld [vmem:[%s1492_s13 + $0x198] sm:$0xff]  ;;  %v221_v50 = vld [vmem:[%s1492_s13 + $0xa0] sm:$0xff] }
  0x1c   : > { %1288 = vmatprep.subr.mxu0 %v266_v8  ;;  %1396 = vmatprep.subr.mxu1 %v266_v8  ;;  %v253_v51 = vld [vmem:[%s1492_s13 + $0x1a0] sm:$0xff]  ;;  %v222_v52 = vld [vmem:[%s1492_s13 + $0xa8] sm:$0xff]  ;;  %v223_v54 = vld [vmem:[%s1492_s13 + $0xb0] sm:$0xff] }
  0x1d   : > { %1289 = vmatpush3.msra.mxu0 %v266_v8  ;;  %1406 = vmatpush3.msra.mxu1 %v266_v8  ;;  %v254_v53 = vld [vmem:[%s1492_s13 + $0x1a8] sm:$0xff]  ;;  %v255_v55 = vld [vmem:[%s1492_s13 + $0x1b0] sm:$0xff]  ;;  %v224_v56 = vld [vmem:[%s1492_s13 + $0xb8] sm:$0xff] }
  0x1e   : > { %1290 = vmatprep.subr.mxu0 %v265_v9  ;;  %1397 = vmatprep.subr.mxu1 %v265_v9  ;;  %v256_v57 = vld [vmem:[%s1492_s13 + $0x1b8] sm:$0xff]  ;;  %v225_v58 = vld [vmem:[%s1492_s13 + $0xc0] sm:$0xff]  ;;  %v226_v60 = vld [vmem:[%s1492_s13 + $0xc8] sm:$0xff] }
  0x1f   : > { %1291 = vmatpush3.msra.mxu0 %v265_v9  ;;  %1407 = vmatpush3.msra.mxu1 %v265_v9  ;;  %v257_v59 = vld [vmem:[%s1492_s13 + $0x1c0] sm:$0xff]  ;;  %v258_v61 = vld [vmem:[%s1492_s13 + $0x1c8] sm:$0xff]  ;;  %v227_v62 = vld [vmem:[%s1492_s13 + $0xd0] sm:$0xff] }
  0x20   : > { %1292 = vmatprep.mubr.msk.f32.mxu0 %vm275_vm1, %v201_v10  ;;  %1340 = vmatprep.mubr.msk.f32.mxu1 %vm275_vm1, %v233_v11  ;;  %v259_v63 = vld [vmem:[%s1492_s13 + $0x1d0] sm:$0xff]  ;;  %v228_v0 = vld [vmem:[%s1492_s13 + $0xd8] sm:$0xff]  ;;  %v229_v2 = vld [vmem:[%s1492_s13 + $0xe0] sm:$0xff] }
  0x21   : > { %1293 = vmatmul.mubr.msk.f32.vlgmr.msra.gmra.mxu0 %vm275_vm1, %v202_v12  ;;  %1341 = vmatmul.mubr.msk.f32.vlgmr.msra.gmra.mxu1 %vm275_vm1, %v234_v13  ;;  %v260_v1 = vld [vmem:[%s1492_s13 + $0x1d8] sm:$0xff]  ;;  %v261_v3 = vld [vmem:[%s1492_s13 + $0x1e0] sm:$0xff]  ;;  %v230_v4 = vld [vmem:[%s1492_s13 + $0xe8] sm:$0xff] }
  0x22   : > { %1295 = vmatprep.mubr.msk.f32.mxu0 %vm275_vm1, %v203_v14  ;;  %1343 = vmatprep.mubr.msk.f32.mxu1 %vm275_vm1, %v235_v15  ;;  %v262_v5 = vld [vmem:[%s1492_s13 + $0x1e8] sm:$0xff]  ;;  %v231_v6 = vld [vmem:[%s1492_s13 + $0xf0] sm:$0xff]  ;;  %v232_v8 = vld [vmem:[%s1492_s13 + $0xf8] sm:$0xff] }
  0x23   : > { %v263_v7 = vld [vmem:[%s1492_s13 + $0x1f0] sm:$0xff]  ;;  %v264_v9 = vld [vmem:[%s1492_s13 + $0x1f8] sm:$0xff]  ;;  %v1628_v10 = vld [vmem:[%s1903_s2] ss:$0 sm:$0xff] }
  0x24   : > { %v1633_v12 = vld [vmem:[%s1904_s3] ss:$0 sm:$0xff] }
  0x25   : > { %1296 = vmatmul.mubr.msk.f32.gmra.mxu0 %vm275_vm1, %v204_v16  ;;  %1344 = vmatmul.mubr.msk.f32.gmra.mxu1 %vm275_vm1, %v236_v17 }
  0x26   : > { %1298 = vmatprep.mubr.msk.f32.mxu0 %vm275_vm1, %v205_v18  ;;  %1346 = vmatprep.mubr.msk.f32.mxu1 %vm275_vm1, %v237_v19 }
  0x29   : > { %1299 = vmatmul.mubr.msk.f32.gmra.mxu0 %vm275_vm1, %v206_v20  ;;  %1347 = vmatmul.mubr.msk.f32.gmra.mxu1 %vm275_vm1, %v238_v21 }
  0x2a   : > { %1301 = vmatprep.mubr.msk.f32.mxu0 %vm275_vm1, %v207_v22  ;;  %1349 = vmatprep.mubr.msk.f32.mxu1 %vm275_vm1, %v239_v23 }
  0x2d   : > { %1302 = vmatmul.mubr.msk.f32.gmra.mxu0 %vm275_vm1, %v208_v24  ;;  %1350 = vmatmul.mubr.msk.f32.gmra.mxu1 %vm275_vm1, %v240_v25 }
  0x2e   : > { %1304 = vmatprep.mubr.msk.f32.mxu0 %vm275_vm1, %v209_v26  ;;  %1352 = vmatprep.mubr.msk.f32.mxu1 %vm275_vm1, %v241_v27 }
  0x31   : > { %1305 = vmatmul.mubr.msk.f32.gmra.mxu0 %vm275_vm1, %v210_v28  ;;  %1353 = vmatmul.mubr.msk.f32.gmra.mxu1 %vm275_vm1, %v242_v29 }
  0x32   : > { %1307 = vmatprep.mubr.msk.f32.mxu0 %vm275_vm1, %v211_v30  ;;  %1355 = vmatprep.mubr.msk.f32.mxu1 %vm275_vm1, %v243_v31 }
  0x35   : > { %1308 = vmatmul.mubr.msk.f32.gmra.mxu0 %vm275_vm1, %v212_v32  ;;  %1356 = vmatmul.mubr.msk.f32.gmra.mxu1 %vm275_vm1, %v244_v33 }
  0x36   : > { %1310 = vmatprep.mubr.msk.f32.mxu0 %vm275_vm1, %v213_v34  ;;  %1358 = vmatprep.mubr.msk.f32.mxu1 %vm275_vm1, %v245_v35 }
  0x39   : > { %1311 = vmatmul.mubr.msk.f32.gmra.mxu0 %vm275_vm1, %v214_v36  ;;  %1359 = vmatmul.mubr.msk.f32.gmra.mxu1 %vm275_vm1, %v246_v37 }
  0x3a   : > { %1313 = vmatprep.mubr.msk.f32.mxu0 %vm275_vm1, %v215_v38  ;;  %1361 = vmatprep.mubr.msk.f32.mxu1 %vm275_vm1, %v247_v39 }
  0x3d   : > { %1314 = vmatmul.mubr.msk.f32.gmra.mxu0 %vm275_vm1, %v216_v40  ;;  %1362 = vmatmul.mubr.msk.f32.gmra.mxu1 %vm275_vm1, %v248_v41 }
  0x3e   : > { %1316 = vmatprep.mubr.msk.f32.mxu0 %vm275_vm1, %v217_v42  ;;  %1364 = vmatprep.mubr.msk.f32.mxu1 %vm275_vm1, %v249_v43 }
  0x41   : > { %1317 = vmatmul.mubr.msk.f32.gmra.mxu0 %vm275_vm1, %v218_v44  ;;  %1365 = vmatmul.mubr.msk.f32.gmra.mxu1 %vm275_vm1, %v250_v45 }
  0x42   : > { %1319 = vmatprep.mubr.msk.f32.mxu0 %vm275_vm1, %v219_v46  ;;  %1367 = vmatprep.mubr.msk.f32.mxu1 %vm275_vm1, %v251_v47 }
  0x45   : > { %1320 = vmatmul.mubr.msk.f32.gmra.mxu0 %vm275_vm1, %v220_v48  ;;  %1368 = vmatmul.mubr.msk.f32.gmra.mxu1 %vm275_vm1, %v252_v49 }
  0x46   : > { %1322 = vmatprep.mubr.msk.f32.mxu0 %vm275_vm1, %v221_v50  ;;  %1370 = vmatprep.mubr.msk.f32.mxu1 %vm275_vm1, %v253_v51 }
  0x49   : > { %1323 = vmatmul.mubr.msk.f32.gmra.mxu0 %vm275_vm1, %v222_v52  ;;  %1371 = vmatmul.mubr.msk.f32.gmra.mxu1 %vm275_vm1, %v254_v53 }
  0x4a   : > { %1325 = vmatprep.mubr.msk.f32.mxu0 %vm275_vm1, %v223_v54  ;;  %1373 = vmatprep.mubr.msk.f32.mxu1 %vm275_vm1, %v255_v55 }
  0x4d   : > { %1326 = vmatmul.mubr.msk.f32.gmra.mxu0 %vm275_vm1, %v224_v56  ;;  %1374 = vmatmul.mubr.msk.f32.gmra.mxu1 %vm275_vm1, %v256_v57 }
  0x4e   : > { %1328 = vmatprep.mubr.msk.f32.mxu0 %vm275_vm1, %v225_v58  ;;  %1376 = vmatprep.mubr.msk.f32.mxu1 %vm275_vm1, %v257_v59 }
  0x51   : > { %1329 = vmatmul.mubr.msk.f32.gmra.mxu0 %vm275_vm1, %v226_v60  ;;  %1377 = vmatmul.mubr.msk.f32.gmra.mxu1 %vm275_vm1, %v258_v61 }
  0x52   : > { %1331 = vmatprep.mubr.msk.f32.mxu0 %vm275_vm1, %v227_v62  ;;  %1379 = vmatprep.mubr.msk.f32.mxu1 %vm275_vm1, %v259_v63 }
  0x55   : > { %1332 = vmatmul.mubr.msk.f32.gmra.mxu0 %vm275_vm1, %v228_v0  ;;  %1380 = vmatmul.mubr.msk.f32.gmra.mxu1 %vm275_vm1, %v260_v1 }
  0x56   : > { %1334 = vmatprep.mubr.msk.f32.mxu0 %vm275_vm1, %v229_v2  ;;  %1382 = vmatprep.mubr.msk.f32.mxu1 %vm275_vm1, %v261_v3 }
  0x59   : > { %1335 = vmatmul.mubr.msk.f32.gmra.mxu0 %vm275_vm1, %v230_v4  ;;  %1383 = vmatmul.mubr.msk.f32.gmra.mxu1 %vm275_vm1, %v262_v5 }
  0x5a   : > { %1337 = vmatprep.mubr.msk.f32.mxu0 %vm275_vm1, %v231_v6  ;;  %1385 = vmatprep.mubr.msk.f32.mxu1 %vm275_vm1, %v263_v7 }
  0x5d   : > { %1338 = vmatmul.mubr.msk.f32.gmra.mxu0 %vm275_vm1, %v232_v8  ;;  %1386 = vmatmul.mubr.msk.f32.gmra.mxu1 %vm275_vm1, %v264_v9 }
  0xe1   : > { %v1294_v11 = vpop.f32.mrf.mxu0  ;;  %v1342_v13 = vpop.f32.mrf.mxu1 }
  0xe2   : > { %v865_v14 = vmul.f32 %v1294_v11, %v1628_v10  ;;  %v897_v15 = vmul.f32 %v1342_v13, %v1628_v10 }
  0xe3   : > { %v538_v16 = vpop.f32.mrf.mxu0  ;;  %v698_v17 = vpop.f32.mrf.mxu1 }
  0xe4   : > { %v936_v18 = vadd.f32 %v1633_v12, %v865_v14  ;;  %v968_v19 = vadd.f32 %v1633_v12, %v897_v15  ;;  %v864_v20 = vmul.f32 %v1628_v10, %v538_v16  ;;  %v896_v21 = vmul.f32 %v1628_v10, %v698_v17 }
  0xe5   : > { %v1297_v22 = vpop.f32.mrf.mxu0  ;;  %v1345_v23 = vpop.f32.mrf.mxu1 }
  0xe6   : > { %1001 = vst.msk [vmem:[%s1642_s24 + $0x8] sm:$0xff] %vm999_vm2, %v936_v18  ;;  %1033 = vst.msk [vmem:[%s1642_s24 + $0x108] sm:$0xff] %vm999_vm2, %v968_v19  ;;  %v935_v24 = vadd.f32 %v1633_v12, %v864_v20  ;;  %v967_v25 = vadd.f32 %v1633_v12, %v896_v21  ;;  %v867_v26 = vmul.f32 %v1297_v22, %v1628_v10 }
  0xe7   : > { %v899_v27 = vmul.f32 %v1345_v23, %v1628_v10  ;;  %v548_v28 = vpop.f32.mrf.mxu0  ;;  %v708_v29 = vpop.f32.mrf.mxu1 }
  0xe8   : > { %1000 = vst.msk [vmem:[%s1642_s24] sm:$0xff] %vm999_vm2, %v935_v24  ;;  %1032 = vst.msk [vmem:[%s1642_s24 + $0x100] sm:$0xff] %vm999_vm2, %v967_v25  ;;  %v938_v30 = vadd.f32 %v1633_v12, %v867_v26  ;;  %v866_v32 = vmul.f32 %v1628_v10, %v548_v28  ;;  %v898_v33 = vmul.f32 %v1628_v10, %v708_v29 }
  0xe9   : > { %v970_v31 = vadd.f32 %v1633_v12, %v899_v27  ;;  %v1300_v34 = vpop.f32.mrf.mxu0  ;;  %v1348_v35 = vpop.f32.mrf.mxu1 }
  0xea   : > { %1003 = vst.msk [vmem:[%s1642_s24 + $0x18] sm:$0xff] %vm999_vm2, %v938_v30  ;;  %v937_v36 = vadd.f32 %v1633_v12, %v866_v32  ;;  %v969_v37 = vadd.f32 %v1633_v12, %v898_v33  ;;  %v869_v38 = vmul.f32 %v1300_v34, %v1628_v10  ;;  %v901_v39 = vmul.f32 %v1348_v35, %v1628_v10 }
  0xeb   : > { %1035 = vst.msk [vmem:[%s1642_s24 + $0x118] sm:$0xff] %vm999_vm2, %v970_v31  ;;  %v558_v40 = vpop.f32.mrf.mxu0  ;;  %v718_v41 = vpop.f32.mrf.mxu1 }
  0xec   : > { %1002 = vst.msk [vmem:[%s1642_s24 + $0x10] sm:$0xff] %vm999_vm2, %v937_v36  ;;  %1034 = vst.msk [vmem:[%s1642_s24 + $0x110] sm:$0xff] %vm999_vm2, %v969_v37  ;;  %v940_v42 = vadd.f32 %v1633_v12, %v869_v38  ;;  %v972_v43 = vadd.f32 %v1633_v12, %v901_v39  ;;  %v868_v44 = vmul.f32 %v1628_v10, %v558_v40 }
  0xed   : > { %v900_v45 = vmul.f32 %v1628_v10, %v718_v41  ;;  %v1303_v46 = vpop.f32.mrf.mxu0  ;;  %v1351_v47 = vpop.f32.mrf.mxu1 }
  0xee   : > { %1005 = vst.msk [vmem:[%s1642_s24 + $0x28] sm:$0xff] %vm999_vm2, %v940_v42  ;;  %1037 = vst.msk [vmem:[%s1642_s24 + $0x128] sm:$0xff] %vm999_vm2, %v972_v43  ;;  %v939_v48 = vadd.f32 %v1633_v12, %v868_v44  ;;  %v871_v50 = vmul.f32 %v1303_v46, %v1628_v10  ;;  %v903_v51 = vmul.f32 %v1351_v47, %v1628_v10 }
  0xef   : > { %v971_v49 = vadd.f32 %v1633_v12, %v900_v45  ;;  %v568_v52 = vpop.f32.mrf.mxu0  ;;  %v728_v53 = vpop.f32.mrf.mxu1 }
  0xf0   : > { %1004 = vst.msk [vmem:[%s1642_s24 + $0x20] sm:$0xff] %vm999_vm2, %v939_v48  ;;  %v942_v54 = vadd.f32 %v1633_v12, %v871_v50  ;;  %v974_v55 = vadd.f32 %v1633_v12, %v903_v51  ;;  %v870_v56 = vmul.f32 %v1628_v10, %v568_v52  ;;  %v902_v57 = vmul.f32 %v1628_v10, %v728_v53 }
  0xf1   : > { %1036 = vst.msk [vmem:[%s1642_s24 + $0x120] sm:$0xff] %vm999_vm2, %v971_v49  ;;  %v1306_v58 = vpop.f32.mrf.mxu0  ;;  %v1354_v59 = vpop.f32.mrf.mxu1 }
  0xf2   : > { %1007 = vst.msk [vmem:[%s1642_s24 + $0x38] sm:$0xff] %vm999_vm2, %v942_v54  ;;  %1039 = vst.msk [vmem:[%s1642_s24 + $0x138] sm:$0xff] %vm999_vm2, %v974_v55  ;;  %v941_v60 = vadd.f32 %v1633_v12, %v870_v56  ;;  %v973_v61 = vadd.f32 %v1633_v12, %v902_v57  ;;  %v873_v62 = vmul.f32 %v1306_v58, %v1628_v10 }
  0xf3   : > { %v905_v63 = vmul.f32 %v1354_v59, %v1628_v10  ;;  %v578_v0 = vpop.f32.mrf.mxu0  ;;  %v738_v1 = vpop.f32.mrf.mxu1 }
  0xf4   : > { %1006 = vst.msk [vmem:[%s1642_s24 + $0x30] sm:$0xff] %vm999_vm2, %v941_v60  ;;  %1038 = vst.msk [vmem:[%s1642_s24 + $0x130] sm:$0xff] %vm999_vm2, %v973_v61  ;;  %v944_v2 = vadd.f32 %v1633_v12, %v873_v62  ;;  %v872_v4 = vmul.f32 %v1628_v10, %v578_v0  ;;  %v904_v5 = vmul.f32 %v1628_v10, %v738_v1 }
  0xf5   : > { %v976_v3 = vadd.f32 %v1633_v12, %v905_v63  ;;  %v1309_v6 = vpop.f32.mrf.mxu0  ;;  %v1357_v7 = vpop.f32.mrf.mxu1 }
  0xf6   : > { %1009 = vst.msk [vmem:[%s1642_s24 + $0x48] sm:$0xff] %vm999_vm2, %v944_v2  ;;  %v943_v8 = vadd.f32 %v1633_v12, %v872_v4  ;;  %v975_v9 = vadd.f32 %v1633_v12, %v904_v5  ;;  %v875_v11 = vmul.f32 %v1309_v6, %v1628_v10  ;;  %v907_v13 = vmul.f32 %v1357_v7, %v1628_v10 }
  0xf7   : > { %1041 = vst.msk [vmem:[%s1642_s24 + $0x148] sm:$0xff] %vm999_vm2, %v976_v3  ;;  %v588_v14 = vpop.f32.mrf.mxu0  ;;  %v748_v15 = vpop.f32.mrf.mxu1 }
  0xf8   : > { %1008 = vst.msk [vmem:[%s1642_s24 + $0x40] sm:$0xff] %vm999_vm2, %v943_v8  ;;  %1040 = vst.msk [vmem:[%s1642_s24 + $0x140] sm:$0xff] %vm999_vm2, %v975_v9  ;;  %v946_v16 = vadd.f32 %v1633_v12, %v875_v11  ;;  %v978_v17 = vadd.f32 %v1633_v12, %v907_v13  ;;  %v874_v18 = vmul.f32 %v1628_v10, %v588_v14 }
  0xf9   : > { %v906_v19 = vmul.f32 %v1628_v10, %v748_v15  ;;  %v1312_v20 = vpop.f32.mrf.mxu0  ;;  %v1360_v21 = vpop.f32.mrf.mxu1 }
  0xfa   : > { %1011 = vst.msk [vmem:[%s1642_s24 + $0x58] sm:$0xff] %vm999_vm2, %v946_v16  ;;  %1043 = vst.msk [vmem:[%s1642_s24 + $0x158] sm:$0xff] %vm999_vm2, %v978_v17  ;;  %v945_v22 = vadd.f32 %v1633_v12, %v874_v18  ;;  %v877_v24 = vmul.f32 %v1312_v20, %v1628_v10  ;;  %v909_v25 = vmul.f32 %v1360_v21, %v1628_v10 }
  0xfb   : > { %v977_v23 = vadd.f32 %v1633_v12, %v906_v19  ;;  %v598_v26 = vpop.f32.mrf.mxu0  ;;  %v758_v27 = vpop.f32.mrf.mxu1 }
  0xfc   : > { %1010 = vst.msk [vmem:[%s1642_s24 + $0x50] sm:$0xff] %vm999_vm2, %v945_v22  ;;  %v948_v28 = vadd.f32 %v1633_v12, %v877_v24  ;;  %v980_v29 = vadd.f32 %v1633_v12, %v909_v25  ;;  %v876_v30 = vmul.f32 %v1628_v10, %v598_v26  ;;  %v908_v31 = vmul.f32 %v1628_v10, %v758_v27 }
  0xfd   : > { %1042 = vst.msk [vmem:[%s1642_s24 + $0x150] sm:$0xff] %vm999_vm2, %v977_v23  ;;  %v1315_v32 = vpop.f32.mrf.mxu0  ;;  %v1363_v33 = vpop.f32.mrf.mxu1 }
  0xfe   : > { %1013 = vst.msk [vmem:[%s1642_s24 + $0x68] sm:$0xff] %vm999_vm2, %v948_v28  ;;  %1045 = vst.msk [vmem:[%s1642_s24 + $0x168] sm:$0xff] %vm999_vm2, %v980_v29  ;;  %v947_v34 = vadd.f32 %v1633_v12, %v876_v30  ;;  %v979_v35 = vadd.f32 %v1633_v12, %v908_v31  ;;  %v879_v36 = vmul.f32 %v1315_v32, %v1628_v10 }
  0xff   : > { %v911_v37 = vmul.f32 %v1363_v33, %v1628_v10  ;;  %v608_v38 = vpop.f32.mrf.mxu0  ;;  %v768_v39 = vpop.f32.mrf.mxu1 }
 0x100   : > { %1012 = vst.msk [vmem:[%s1642_s24 + $0x60] sm:$0xff] %vm999_vm2, %v947_v34  ;;  %1044 = vst.msk [vmem:[%s1642_s24 + $0x160] sm:$0xff] %vm999_vm2, %v979_v35  ;;  %v950_v40 = vadd.f32 %v1633_v12, %v879_v36  ;;  %v878_v42 = vmul.f32 %v1628_v10, %v608_v38  ;;  %v910_v43 = vmul.f32 %v1628_v10, %v768_v39 }
 0x101   : > { %v982_v41 = vadd.f32 %v1633_v12, %v911_v37  ;;  %v1318_v44 = vpop.f32.mrf.mxu0  ;;  %v1366_v45 = vpop.f32.mrf.mxu1 }
 0x102   : > { %1015 = vst.msk [vmem:[%s1642_s24 + $0x78] sm:$0xff] %vm999_vm2, %v950_v40  ;;  %v949_v46 = vadd.f32 %v1633_v12, %v878_v42  ;;  %v981_v47 = vadd.f32 %v1633_v12, %v910_v43  ;;  %v881_v48 = vmul.f32 %v1318_v44, %v1628_v10  ;;  %v913_v49 = vmul.f32 %v1366_v45, %v1628_v10 }
 0x103   : > { %1047 = vst.msk [vmem:[%s1642_s24 + $0x178] sm:$0xff] %vm999_vm2, %v982_v41  ;;  %v618_v50 = vpop.f32.mrf.mxu0  ;;  %v778_v51 = vpop.f32.mrf.mxu1 }
 0x104   : > { %1014 = vst.msk [vmem:[%s1642_s24 + $0x70] sm:$0xff] %vm999_vm2, %v949_v46  ;;  %1046 = vst.msk [vmem:[%s1642_s24 + $0x170] sm:$0xff] %vm999_vm2, %v981_v47  ;;  %v952_v52 = vadd.f32 %v1633_v12, %v881_v48  ;;  %v984_v53 = vadd.f32 %v1633_v12, %v913_v49  ;;  %v880_v54 = vmul.f32 %v1628_v10, %v618_v50 }
 0x105   : > { %v912_v55 = vmul.f32 %v1628_v10, %v778_v51  ;;  %v1321_v56 = vpop.f32.mrf.mxu0  ;;  %v1369_v57 = vpop.f32.mrf.mxu1 }
 0x106   : > { %1017 = vst.msk [vmem:[%s1642_s24 + $0x88] sm:$0xff] %vm999_vm2, %v952_v52  ;;  %1049 = vst.msk [vmem:[%s1642_s24 + $0x188] sm:$0xff] %vm999_vm2, %v984_v53  ;;  %v951_v58 = vadd.f32 %v1633_v12, %v880_v54  ;;  %v883_v60 = vmul.f32 %v1321_v56, %v1628_v10  ;;  %v915_v61 = vmul.f32 %v1369_v57, %v1628_v10 }
 0x107   : > { %v983_v59 = vadd.f32 %v1633_v12, %v912_v55  ;;  %v628_v62 = vpop.f32.mrf.mxu0  ;;  %v788_v63 = vpop.f32.mrf.mxu1 }
 0x108   : > { %1016 = vst.msk [vmem:[%s1642_s24 + $0x80] sm:$0xff] %vm999_vm2, %v951_v58  ;;  %v954_v0 = vadd.f32 %v1633_v12, %v883_v60  ;;  %v986_v1 = vadd.f32 %v1633_v12, %v915_v61  ;;  %v882_v2 = vmul.f32 %v1628_v10, %v628_v62  ;;  %v914_v3 = vmul.f32 %v1628_v10, %v788_v63 }
 0x109   : > { %1048 = vst.msk [vmem:[%s1642_s24 + $0x180] sm:$0xff] %vm999_vm2, %v983_v59  ;;  %v1324_v4 = vpop.f32.mrf.mxu0  ;;  %v1372_v5 = vpop.f32.mrf.mxu1 }
 0x10a   : > { %1019 = vst.msk [vmem:[%s1642_s24 + $0x98] sm:$0xff] %vm999_vm2, %v954_v0  ;;  %1051 = vst.msk [vmem:[%s1642_s24 + $0x198] sm:$0xff] %vm999_vm2, %v986_v1  ;;  %v953_v6 = vadd.f32 %v1633_v12, %v882_v2  ;;  %v985_v7 = vadd.f32 %v1633_v12, %v914_v3  ;;  %v885_v8 = vmul.f32 %v1324_v4, %v1628_v10 }
 0x10b   : > { %v917_v9 = vmul.f32 %v1372_v5, %v1628_v10  ;;  %v638_v11 = vpop.f32.mrf.mxu0  ;;  %v798_v13 = vpop.f32.mrf.mxu1 }
 0x10c   : > { %1018 = vst.msk [vmem:[%s1642_s24 + $0x90] sm:$0xff] %vm999_vm2, %v953_v6  ;;  %1050 = vst.msk [vmem:[%s1642_s24 + $0x190] sm:$0xff] %vm999_vm2, %v985_v7  ;;  %v956_v14 = vadd.f32 %v1633_v12, %v885_v8  ;;  %v884_v16 = vmul.f32 %v1628_v10, %v638_v11  ;;  %v916_v17 = vmul.f32 %v1628_v10, %v798_v13 }
 0x10d   : > { %v988_v15 = vadd.f32 %v1633_v12, %v917_v9  ;;  %v1327_v18 = vpop.f32.mrf.mxu0  ;;  %v1375_v19 = vpop.f32.mrf.mxu1 }
 0x10e   : > { %1021 = vst.msk [vmem:[%s1642_s24 + $0xa8] sm:$0xff] %vm999_vm2, %v956_v14  ;;  %v955_v20 = vadd.f32 %v1633_v12, %v884_v16  ;;  %v987_v21 = vadd.f32 %v1633_v12, %v916_v17  ;;  %v887_v22 = vmul.f32 %v1327_v18, %v1628_v10  ;;  %v919_v23 = vmul.f32 %v1375_v19, %v1628_v10 }
 0x10f   : > { %1053 = vst.msk [vmem:[%s1642_s24 + $0x1a8] sm:$0xff] %vm999_vm2, %v988_v15  ;;  %v648_v24 = vpop.f32.mrf.mxu0  ;;  %v808_v25 = vpop.f32.mrf.mxu1 }
 0x110   : > { %1020 = vst.msk [vmem:[%s1642_s24 + $0xa0] sm:$0xff] %vm999_vm2, %v955_v20  ;;  %1052 = vst.msk [vmem:[%s1642_s24 + $0x1a0] sm:$0xff] %vm999_vm2, %v987_v21  ;;  %v958_v26 = vadd.f32 %v1633_v12, %v887_v22  ;;  %v990_v27 = vadd.f32 %v1633_v12, %v919_v23  ;;  %v886_v28 = vmul.f32 %v1628_v10, %v648_v24 }
 0x111   : > { %v918_v29 = vmul.f32 %v1628_v10, %v808_v25  ;;  %v1330_v30 = vpop.f32.mrf.mxu0  ;;  %v1378_v31 = vpop.f32.mrf.mxu1 }
 0x112   : > { %1023 = vst.msk [vmem:[%s1642_s24 + $0xb8] sm:$0xff] %vm999_vm2, %v958_v26  ;;  %1055 = vst.msk [vmem:[%s1642_s24 + $0x1b8] sm:$0xff] %vm999_vm2, %v990_v27  ;;  %v957_v32 = vadd.f32 %v1633_v12, %v886_v28  ;;  %v889_v34 = vmul.f32 %v1330_v30, %v1628_v10  ;;  %v921_v35 = vmul.f32 %v1378_v31, %v1628_v10 }
 0x113   : > { %v989_v33 = vadd.f32 %v1633_v12, %v918_v29  ;;  %v658_v36 = vpop.f32.mrf.mxu0  ;;  %v818_v37 = vpop.f32.mrf.mxu1 }
 0x114   : > { %1022 = vst.msk [vmem:[%s1642_s24 + $0xb0] sm:$0xff] %vm999_vm2, %v957_v32  ;;  %v960_v38 = vadd.f32 %v1633_v12, %v889_v34  ;;  %v992_v39 = vadd.f32 %v1633_v12, %v921_v35  ;;  %v888_v40 = vmul.f32 %v1628_v10, %v658_v36  ;;  %v920_v41 = vmul.f32 %v1628_v10, %v818_v37 }
 0x115   : > { %1054 = vst.msk [vmem:[%s1642_s24 + $0x1b0] sm:$0xff] %vm999_vm2, %v989_v33  ;;  %v1333_v42 = vpop.f32.mrf.mxu0  ;;  %v1381_v43 = vpop.f32.mrf.mxu1 }
 0x116   : > { %1025 = vst.msk [vmem:[%s1642_s24 + $0xc8] sm:$0xff] %vm999_vm2, %v960_v38  ;;  %1057 = vst.msk [vmem:[%s1642_s24 + $0x1c8] sm:$0xff] %vm999_vm2, %v992_v39  ;;  %v959_v44 = vadd.f32 %v1633_v12, %v888_v40  ;;  %v991_v45 = vadd.f32 %v1633_v12, %v920_v41  ;;  %v891_v46 = vmul.f32 %v1333_v42, %v1628_v10 }
 0x117   : > { %v923_v47 = vmul.f32 %v1381_v43, %v1628_v10  ;;  %v668_v48 = vpop.f32.mrf.mxu0  ;;  %v828_v49 = vpop.f32.mrf.mxu1 }
 0x118   : > { %1024 = vst.msk [vmem:[%s1642_s24 + $0xc0] sm:$0xff] %vm999_vm2, %v959_v44  ;;  %1056 = vst.msk [vmem:[%s1642_s24 + $0x1c0] sm:$0xff] %vm999_vm2, %v991_v45  ;;  %v962_v50 = vadd.f32 %v1633_v12, %v891_v46  ;;  %v890_v52 = vmul.f32 %v1628_v10, %v668_v48  ;;  %v922_v53 = vmul.f32 %v1628_v10, %v828_v49 }
 0x119   : > { %v994_v51 = vadd.f32 %v1633_v12, %v923_v47  ;;  %v1336_v54 = vpop.f32.mrf.mxu0  ;;  %v1384_v55 = vpop.f32.mrf.mxu1 }
 0x11a   : > { %1027 = vst.msk [vmem:[%s1642_s24 + $0xd8] sm:$0xff] %vm999_vm2, %v962_v50  ;;  %v961_v56 = vadd.f32 %v1633_v12, %v890_v52  ;;  %v993_v57 = vadd.f32 %v1633_v12, %v922_v53  ;;  %v893_v58 = vmul.f32 %v1336_v54, %v1628_v10  ;;  %v925_v59 = vmul.f32 %v1384_v55, %v1628_v10 }
 0x11b   : > { %1059 = vst.msk [vmem:[%s1642_s24 + $0x1d8] sm:$0xff] %vm999_vm2, %v994_v51  ;;  %v678_v60 = vpop.f32.mrf.mxu0  ;;  %v838_v61 = vpop.f32.mrf.mxu1 }
 0x11c   : > { %1026 = vst.msk [vmem:[%s1642_s24 + $0xd0] sm:$0xff] %vm999_vm2, %v961_v56  ;;  %1058 = vst.msk [vmem:[%s1642_s24 + $0x1d0] sm:$0xff] %vm999_vm2, %v993_v57  ;;  %v964_v62 = vadd.f32 %v1633_v12, %v893_v58  ;;  %v996_v63 = vadd.f32 %v1633_v12, %v925_v59  ;;  %v892_v0 = vmul.f32 %v1628_v10, %v678_v60 }
 0x11d   : > { %v924_v1 = vmul.f32 %v1628_v10, %v838_v61  ;;  %v1339_v2 = vpop.f32.mrf.mxu0  ;;  %v1387_v3 = vpop.f32.mrf.mxu1 }
 0x11e   : > { %1029 = vst.msk [vmem:[%s1642_s24 + $0xe8] sm:$0xff] %vm999_vm2, %v964_v62  ;;  %1061 = vst.msk [vmem:[%s1642_s24 + $0x1e8] sm:$0xff] %vm999_vm2, %v996_v63  ;;  %v963_v4 = vadd.f32 %v1633_v12, %v892_v0  ;;  %v895_v6 = vmul.f32 %v1339_v2, %v1628_v10  ;;  %v927_v7 = vmul.f32 %v1387_v3, %v1628_v10 }
 0x11f   : > { %v995_v5 = vadd.f32 %v1633_v12, %v924_v1  ;;  %v688_v8 = vpop.f32.mrf.mxu0  ;;  %v848_v9 = vpop.f32.mrf.mxu1 }
 0x120   : > { %1028 = vst.msk [vmem:[%s1642_s24 + $0xe0] sm:$0xff] %vm999_vm2, %v963_v4  ;;  %v966_v11 = vadd.f32 %v1633_v12, %v895_v6  ;;  %v998_v13 = vadd.f32 %v1633_v12, %v927_v7  ;;  %v894_v14 = vmul.f32 %v1628_v10, %v688_v8  ;;  %v926_v15 = vmul.f32 %v1628_v10, %v848_v9 }
 0x121   : > { %1060 = vst.msk [vmem:[%s1642_s24 + $0x1e0] sm:$0xff] %vm999_vm2, %v995_v5 }
 0x122   : > { %1031 = vst.msk [vmem:[%s1642_s24 + $0xf8] sm:$0xff] %vm999_vm2, %v966_v11  ;;  %1063 = vst.msk [vmem:[%s1642_s24 + $0x1f8] sm:$0xff] %vm999_vm2, %v998_v13  ;;  %v965_v16 = vadd.f32 %v1633_v12, %v894_v14  ;;  %v997_v17 = vadd.f32 %v1633_v12, %v926_v15 }
 0x124   : > { %1030 = vst.msk [vmem:[%s1642_s24 + $0xf0] sm:$0xff] %vm999_vm2, %v965_v16  ;;  %1062 = vst.msk [vmem:[%s1642_s24 + $0x1f0] sm:$0xff] %vm999_vm2, %v997_v17 }
 0x125 PF: > { %s14_s15 = sadd.s32 1, %s1422_s15  }
 0x126   : > { %p11_p4 = scmp.ge.s32.totalorder %s14_s15, 6  }
 0x128   :  { %13 = sbr.rel (!%p11_p4) target bundleno = 1 (0x1), region = 66 }

// kernel: _lambda_.13
= control target key start
LH: loop header
LB: loop body
LE: loop exit
PB: predicated region body
PF: predicated region fallthrough
CT: control target
= control target key end

     0   :  { %s1766_s15 = smov 0   ;;  %s2296_s0 = inlined_call_operand.vmem [shape: f32[2048,64], index: 0, kind: input, shape index: {}]   ;;  %s2297_s1 = inlined_call_operand.vmem [shape: bf16[64,64], index: 1, kind: input, shape index: {}]   ;;  %s2298_s2 = inlined_call_operand.vmem [shape: f32[1,64], index: 2, kind: input, shape index: {}]   ;;  %s2299_s3 = inlined_call_operand.vmem [shape: f32[1,64], index: 3, kind: input, shape index: {}]   ;;  %s2300_s4 = inlined_call_operand.vmem [shape: f32[2048,64], index: 4, kind: output, shape index: {}]  }
   0x1 LB: > { %s1426_s16 = sadd.s32 4294967295, %s1738_s15   ;;  %p1430_p0 = scmp.ge.s32.totalorder %s1738_s15, 1  ;;  %s1738_s15 = sphi %s1766_s15, %s14_s15  }
   0x2   : > { %p163_p1 = scmp.lt.s32.totalorder %s1738_s15, 5 }
   0x4   : > { %p164_p2 = pnand %p1430_p0, %p163_p1 }
   0x5   : > { %s1431_s19 = sshll.u32 (!%p164_p2), %s1426_s16, 6 }
   0x6   : > { %167 = sbr.rel (%p164_p2) target bundleno = 311 (0x137), region = 36  ;;  %p190_p3 = scmp.lt.s32.totalorder (!%p164_p2), %s1431_s19, 255 }
   0xb   : > { %v1728_v0 = vld [vmem:[%s2297_s1 + $0x18] sm:$0xff]   ;;  %v1729_v1 = vld [vmem:[%s2297_s1 + $0x10] sm:$0xff]   ;;  %s2302_s19 = smov (!%p190_p3, %s1431_s19), 255  ;;  %v1730_v2 = vld [vmem:[%s2297_s1 + $0x8] sm:$0xff]   ;;  %vm778_vm0 = vcmask 523264   ;;  %v1740_v8 = vmov 0.0  }
   0xc   : > { %1639 = vmatprep.subr.bf16.mxu0 %v1728_v0  ;;  %1711 = vmatprep.subr.bf16.mxu1 %v1728_v0  ;;  %s1432_s24 = sshll.u32 %s2302_s19, 3  ;;  %v1731_v6 = vld [vmem:[%s2297_s1] sm:$0xff]  }
   0xd   : > { %1640 = vmatpush3.bf16.msra.mxu0 %v1728_v0  ;;  %1715 = vmatpush3.bf16.msra.mxu1 %v1728_v0  ;;  %s1791_s27 = scalar_lea.vmem %s2296_s0, %s1432_s24  ;;  %s2036_s10 = scalar_lea.vmem %s2300_s4, %s1432_s24 }
   0xe   : > { %1641 = vmatprep.subr.bf16.mxu0 %v1729_v1  ;;  %1712 = vmatprep.subr.bf16.mxu1 %v1729_v1  ;;  %v202_v3 = vld [vmem:[%s1791_s27] sm:$0xff]  ;;  %v203_v4 = vld [vmem:[%s1791_s27 + $0x8] sm:$0xff]  ;;  %v204_v13 = vld [vmem:[%s1791_s27 + $0x10] sm:$0xff] }
   0xf   : > { %v234_v5 = vld [vmem:[%s1791_s27 + $0x100] sm:$0xff]  ;;  %vm266_vm1 = vcmp.gt.f32.partialorder %v202_v3, 0.0  ;;  %vm267_vm2 = vcmp.gt.f32.partialorder %v203_v4, 0.0  ;;  %vm458_vm3 = vcmp.lt.f32.partialorder %v202_v3, 0.0  ;;  %vm459_vm4 = vcmp.lt.f32.partialorder %v203_v4, 0.0  ;;  %v235_v7 = vld [vmem:[%s1791_s27 + $0x108] sm:$0xff] }
  0x10   : > { %v1435_v9 = vsel %vm266_vm1, 1.0, %v1740_v8  ;;  %v1436_v10 = vsel %vm267_vm2, 1.0, %v1740_v8  ;;  %v1499_v11 = vsel %vm458_vm3, 1.0, %v1740_v8  ;;  %v1500_v12 = vsel %vm459_vm4, 1.0, %v1740_v8  ;;  %v205_v16 = vld [vmem:[%s1791_s27 + $0x18] sm:$0xff]  ;;  %v236_v19 = vld [vmem:[%s1791_s27 + $0x110] sm:$0xff] }
  0x11   : > { %1642 = vmatpush3.bf16.msra.mxu0 %v1729_v1  ;;  %1716 = vmatpush3.bf16.msra.mxu1 %v1729_v1  ;;  %v650_v14 = vsub.f32 %v1435_v9, %v1499_v11  ;;  %v651_v15 = vsub.f32 %v1436_v10, %v1500_v12  ;;  %vm298_vm5 = vcmp.gt.f32.partialorder %v234_v5, 0.0  ;;  %vm299_vm6 = vcmp.gt.f32.partialorder %v235_v7, 0.0  ;;  %v237_v23 = vld [vmem:[%s1791_s27 + $0x118] sm:$0xff]  ;;  %v206_v28 = vld [vmem:[%s1791_s27 + $0x20] sm:$0xff]  ;;  %v207_v29 = vld [vmem:[%s1791_s27 + $0x28] sm:$0xff] }
  0x12   : > { %1643 = vmatprep.subr.bf16.mxu0 %v1730_v2  ;;  %1713 = vmatprep.subr.bf16.mxu1 %v1730_v2  ;;  %v1467_v17 = vsel %vm298_vm5, 1.0, %v1740_v8  ;;  %v1468_v18 = vsel %vm299_vm6, 1.0, %v1740_v8  ;;  %vm490_vm7 = vcmp.lt.f32.partialorder %v234_v5, 0.0  ;;  %vm491_vm8 = vcmp.lt.f32.partialorder %v235_v7, 0.0  ;;  %v238_v37 = vld [vmem:[%s1791_s27 + $0x120] sm:$0xff]  ;;  %v239_v38 = vld [vmem:[%s1791_s27 + $0x128] sm:$0xff] }
  0x13   : > { %v714_v20 = vpack.c.bf16 %v651_v15, %v650_v14  ;;  %v1531_v21 = vsel %vm490_vm7, 1.0, %v1740_v8  ;;  %v1532_v22 = vsel %vm491_vm8, 1.0, %v1740_v8  ;;  %vm268_vm9 = vcmp.gt.f32.partialorder %v204_v13, 0.0  ;;  %v208_v47 = vld [vmem:[%s1791_s27 + $0x30] sm:$0xff]  ;;  %v209_v48 = vld [vmem:[%s1791_s27 + $0x38] sm:$0xff]  ;;  %v210_v0 = vld [vmem:[%s1791_s27 + $0x40] sm:$0xff] }
  0x14   : > { %v682_v24 = vsub.f32 %v1467_v17, %v1531_v21  ;;  %v683_v25 = vsub.f32 %v1468_v18, %v1532_v22  ;;  %vm269_vm10 = vcmp.gt.f32.partialorder %v205_v16, 0.0  ;;  %v1437_v26 = vsel %vm268_vm9, 1.0, %v1740_v8  ;;  %v240_v55 = vld [vmem:[%s1791_s27 + $0x130] sm:$0xff]  ;;  %v241_v58 = vld [vmem:[%s1791_s27 + $0x138] sm:$0xff]  ;;  %v211_v1 = vld [vmem:[%s1791_s27 + $0x48] sm:$0xff] }
  0x15   : > { %1644 = vmatpush3.bf16.msra.mxu0 %v1730_v2  ;;  %1717 = vmatpush3.bf16.msra.mxu1 %v1730_v2  ;;  %v1438_v27 = vsel %vm269_vm10, 1.0, %v1740_v8  ;;  %vm460_vm11 = vcmp.lt.f32.partialorder %v204_v13, 0.0  ;;  %vm461_vm12 = vcmp.lt.f32.partialorder %v205_v16, 0.0  ;;  %vm300_vm13 = vcmp.gt.f32.partialorder %v236_v19, 0.0  ;;  %v242_v10 = vld [vmem:[%s1791_s27 + $0x140] sm:$0xff]  ;;  %v243_v11 = vld [vmem:[%s1791_s27 + $0x148] sm:$0xff] }
  0x16   : > { %1645 = vmatprep.subr.bf16.mxu0 %v1731_v6  ;;  %1714 = vmatprep.subr.bf16.mxu1 %v1731_v6  ;;  %v730_v30 = vpack.c.bf16 %v683_v25, %v682_v24  ;;  %v1501_v31 = vsel %vm460_vm11, 1.0, %v1740_v8  ;;  %v1502_v32 = vsel %vm461_vm12, 1.0, %v1740_v8  ;;  %vm301_vm14 = vcmp.gt.f32.partialorder %v237_v23, 0.0  ;;  %v213_v21 = vld [vmem:[%s1791_s27 + $0x58] sm:$0xff] }
  0x17   : > { %1647 = vmatprep.mubr.msk.bf16.mxu0 %vm778_vm0, %v714_v20  ;;  %v652_v33 = vsub.f32 %v1437_v26, %v1501_v31  ;;  %v653_v34 = vsub.f32 %v1438_v27, %v1502_v32  ;;  %v1469_v35 = vsel %vm300_vm13, 1.0, %v1740_v8  ;;  %v1470_v36 = vsel %vm301_vm14, 1.0, %v1740_v8  ;;  %v212_v20 = vld [vmem:[%s1791_s27 + $0x50] sm:$0xff]  ;;  %v245_v31 = vld [vmem:[%s1791_s27 + $0x158] sm:$0xff] }
  0x18   : > { %1679 = vmatprep.mubr.msk.bf16.mxu1 %vm778_vm0, %v730_v30  ;;  %vm492_vm15 = vcmp.lt.f32.partialorder %v236_v19, 0.0  ;;  %vm493_vm1 = vcmp.lt.f32.partialorder %v237_v23, 0.0  ;;  %vm270_vm2 = vcmp.gt.f32.partialorder %v206_v28, 0.0  ;;  %vm271_vm3 = vcmp.gt.f32.partialorder %v207_v29, 0.0 }
  0x19   : > { %1646 = vmatpush3.bf16.msra.mxu0 %v1731_v6  ;;  %1718 = vmatpush3.bf16.msra.mxu1 %v1731_v6  ;;  %v715_v39 = vpack.c.bf16 %v653_v34, %v652_v33  ;;  %v1533_v40 = vsel %vm492_vm15, 1.0, %v1740_v8  ;;  %v1534_v41 = vsel %vm493_vm1, 1.0, %v1740_v8  ;;  %v1439_v42 = vsel %vm270_vm2, 1.0, %v1740_v8 }
  0x1a   : > { %v684_v43 = vsub.f32 %v1469_v35, %v1533_v40  ;;  %v685_v44 = vsub.f32 %v1470_v36, %v1534_v41  ;;  %v1440_v45 = vsel %vm271_vm3, 1.0, %v1740_v8  ;;  %vm462_vm4 = vcmp.lt.f32.partialorder %v206_v28, 0.0  ;;  %v244_v28 = vld [vmem:[%s1791_s27 + $0x150] sm:$0xff] }
  0x1b   : > { %vm463_vm5 = vcmp.lt.f32.partialorder %v207_v29, 0.0  ;;  %v1503_v46 = vsel %vm462_vm4, 1.0, %v1740_v8  ;;  %vm302_vm6 = vcmp.gt.f32.partialorder %v238_v37, 0.0  ;;  %vm303_vm7 = vcmp.gt.f32.partialorder %v239_v38, 0.0 }
  0x1c   : > { %1648 = vmatmul.mubr.msk.bf16.vlgmr.msra.gmra.mxu0 %vm778_vm0, %v715_v39  ;;  %v731_v49 = vpack.c.bf16 %v685_v44, %v684_v43  ;;  %v1504_v50 = vsel %vm463_vm5, 1.0, %v1740_v8  ;;  %v654_v51 = vsub.f32 %v1439_v42, %v1503_v46  ;;  %v1471_v52 = vsel %vm302_vm6, 1.0, %v1740_v8  ;;  %v246_v46 = vld [vmem:[%s1791_s27 + $0x160] sm:$0xff] }
  0x1d   : > { %v655_v53 = vsub.f32 %v1440_v45, %v1504_v50  ;;  %v1472_v54 = vsel %vm303_vm7, 1.0, %v1740_v8  ;;  %vm494_vm8 = vcmp.lt.f32.partialorder %v238_v37, 0.0  ;;  %vm495_vm9 = vcmp.lt.f32.partialorder %v239_v38, 0.0  ;;  %v214_v37 = vld [vmem:[%s1791_s27 + $0x60] sm:$0xff]  ;;  %v215_v38 = vld [vmem:[%s1791_s27 + $0x68] sm:$0xff] }
  0x1e   : > { %1680 = vmatmul.mubr.msk.bf16.vlgmr.msra.gmra.mxu1 %vm778_vm0, %v731_v49  ;;  %v1535_v56 = vsel %vm494_vm8, 1.0, %v1740_v8  ;;  %v1536_v57 = vsel %vm495_vm9, 1.0, %v1740_v8  ;;  %vm272_vm10 = vcmp.gt.f32.partialorder %v208_v47, 0.0  ;;  %vm273_vm11 = vcmp.gt.f32.partialorder %v209_v48, 0.0 }
  0x1f   : > { %v716_v59 = vpack.c.bf16 %v655_v53, %v654_v51  ;;  %v686_v60 = vsub.f32 %v1471_v52, %v1535_v56  ;;  %v687_v61 = vsub.f32 %v1472_v54, %v1536_v57  ;;  %v1441_v62 = vsel %vm272_vm10, 1.0, %v1740_v8  ;;  %v216_v56 = vld [vmem:[%s1791_s27 + $0x70] sm:$0xff]  ;;  %v217_v57 = vld [vmem:[%s1791_s27 + $0x78] sm:$0xff] }
  0x20   : > { %v1442_v63 = vsel %vm273_vm11, 1.0, %v1740_v8  ;;  %vm464_vm12 = vcmp.lt.f32.partialorder %v208_v47, 0.0  ;;  %vm465_vm13 = vcmp.lt.f32.partialorder %v209_v48, 0.0  ;;  %vm304_vm14 = vcmp.gt.f32.partialorder %v240_v55, 0.0  ;;  %v247_v47 = vld [vmem:[%s1791_s27 + $0x168] sm:$0xff] }
  0x21   : > { %1651 = vmatprep.mubr.msk.bf16.mxu0 %vm778_vm0, %v716_v59  ;;  %v732_v2 = vpack.c.bf16 %v687_v61, %v686_v60  ;;  %v1505_v3 = vsel %vm464_vm12, 1.0, %v1740_v8  ;;  %v1506_v4 = vsel %vm465_vm13, 1.0, %v1740_v8  ;;  %vm305_vm15 = vcmp.gt.f32.partialorder %v241_v58, 0.0 }
  0x22   : > { %v656_v5 = vsub.f32 %v1441_v62, %v1505_v3  ;;  %v657_v6 = vsub.f32 %v1442_v63, %v1506_v4  ;;  %v1473_v7 = vsel %vm304_vm14, 1.0, %v1740_v8  ;;  %v1474_v9 = vsel %vm305_vm15, 1.0, %v1740_v8  ;;  %v249_v3 = vld [vmem:[%s1791_s27 + $0x178] sm:$0xff] }
  0x23   : > { %1683 = vmatprep.mubr.msk.bf16.mxu1 %vm778_vm0, %v732_v2  ;;  %vm496_vm1 = vcmp.lt.f32.partialorder %v240_v55, 0.0  ;;  %vm497_vm2 = vcmp.lt.f32.partialorder %v241_v58, 0.0  ;;  %vm274_vm3 = vcmp.gt.f32.partialorder %v210_v0, 0.0  ;;  %vm275_vm4 = vcmp.gt.f32.partialorder %v211_v1, 0.0 }
  0x24   : > { %v717_v12 = vpack.c.bf16 %v657_v6, %v656_v5  ;;  %v1537_v13 = vsel %vm496_vm1, 1.0, %v1740_v8  ;;  %v1538_v14 = vsel %vm497_vm2, 1.0, %v1740_v8  ;;  %v1443_v15 = vsel %vm274_vm3, 1.0, %v1740_v8 }
  0x25   : > { %v688_v16 = vsub.f32 %v1473_v7, %v1537_v13  ;;  %v689_v17 = vsub.f32 %v1474_v9, %v1538_v14  ;;  %v1444_v18 = vsel %vm275_vm4, 1.0, %v1740_v8  ;;  %vm466_vm5 = vcmp.lt.f32.partialorder %v210_v0, 0.0  ;;  %v248_v0 = vld [vmem:[%s1791_s27 + $0x170] sm:$0xff] }
  0x26   : > { %1652 = vmatmul.mubr.msk.bf16.gmra.mxu0 %vm778_vm0, %v717_v12  ;;  %vm467_vm6 = vcmp.lt.f32.partialorder %v211_v1, 0.0  ;;  %v1507_v19 = vsel %vm466_vm5, 1.0, %v1740_v8  ;;  %vm306_vm7 = vcmp.gt.f32.partialorder %v242_v10, 0.0  ;;  %vm307_vm8 = vcmp.gt.f32.partialorder %v243_v11, 0.0 }
  0x27   : > { %v733_v22 = vpack.c.bf16 %v689_v17, %v688_v16  ;;  %v1508_v23 = vsel %vm467_vm6, 1.0, %v1740_v8  ;;  %v658_v24 = vsub.f32 %v1443_v15, %v1507_v19  ;;  %v1475_v25 = vsel %vm306_vm7, 1.0, %v1740_v8  ;;  %v250_v19 = vld [vmem:[%s1791_s27 + $0x180] sm:$0xff] }
  0x28   : > { %v659_v26 = vsub.f32 %v1444_v18, %v1508_v23  ;;  %v1476_v27 = vsel %vm307_vm8, 1.0, %v1740_v8  ;;  %vm498_vm9 = vcmp.lt.f32.partialorder %v242_v10, 0.0  ;;  %vm499_vm10 = vcmp.lt.f32.partialorder %v243_v11, 0.0  ;;  %v218_v10 = vld [vmem:[%s1791_s27 + $0x80] sm:$0xff]  ;;  %v219_v11 = vld [vmem:[%s1791_s27 + $0x88] sm:$0xff] }
  0x29   : > { %1684 = vmatmul.mubr.msk.bf16.gmra.mxu1 %vm778_vm0, %v733_v22  ;;  %v1539_v29 = vsel %vm498_vm9, 1.0, %v1740_v8  ;;  %v1540_v30 = vsel %vm499_vm10, 1.0, %v1740_v8  ;;  %vm276_vm11 = vcmp.gt.f32.partialorder %v212_v20, 0.0  ;;  %vm277_vm12 = vcmp.gt.f32.partialorder %v213_v21, 0.0 }
  0x2a   : > { %v718_v32 = vpack.c.bf16 %v659_v26, %v658_v24  ;;  %v690_v33 = vsub.f32 %v1475_v25, %v1539_v29  ;;  %v691_v34 = vsub.f32 %v1476_v27, %v1540_v30  ;;  %v1445_v35 = vsel %vm276_vm11, 1.0, %v1740_v8  ;;  %v220_v29 = vld [vmem:[%s1791_s27 + $0x90] sm:$0xff]  ;;  %v221_v30 = vld [vmem:[%s1791_s27 + $0x98] sm:$0xff] }
  0x2b   : > { %v1446_v36 = vsel %vm277_vm12, 1.0, %v1740_v8  ;;  %vm468_vm13 = vcmp.lt.f32.partialorder %v212_v20, 0.0  ;;  %vm469_vm14 = vcmp.lt.f32.partialorder %v213_v21, 0.0  ;;  %vm308_vm15 = vcmp.gt.f32.partialorder %v244_v28, 0.0  ;;  %v251_v20 = vld [vmem:[%s1791_s27 + $0x188] sm:$0xff] }
  0x2c   : > { %1655 = vmatprep.mubr.msk.bf16.mxu0 %vm778_vm0, %v718_v32  ;;  %v734_v39 = vpack.c.bf16 %v691_v34, %v690_v33  ;;  %v1509_v40 = vsel %vm468_vm13, 1.0, %v1740_v8  ;;  %v1510_v41 = vsel %vm469_vm14, 1.0, %v1740_v8  ;;  %vm309_vm1 = vcmp.gt.f32.partialorder %v245_v31, 0.0 }
  0x2d   : > { %v660_v42 = vsub.f32 %v1445_v35, %v1509_v40  ;;  %v661_v43 = vsub.f32 %v1446_v36, %v1510_v41  ;;  %v1477_v44 = vsel %vm308_vm15, 1.0, %v1740_v8  ;;  %v1478_v45 = vsel %vm309_vm1, 1.0, %v1740_v8  ;;  %v253_v40 = vld [vmem:[%s1791_s27 + $0x198] sm:$0xff] }
  0x2e   : > { %1687 = vmatprep.mubr.msk.bf16.mxu1 %vm778_vm0, %v734_v39  ;;  %vm500_vm2 = vcmp.lt.f32.partialorder %v244_v28, 0.0  ;;  %vm501_vm3 = vcmp.lt.f32.partialorder %v245_v31, 0.0  ;;  %vm278_vm4 = vcmp.gt.f32.partialorder %v214_v37, 0.0  ;;  %vm279_vm5 = vcmp.gt.f32.partialorder %v215_v38, 0.0 }
  0x2f   : > { %v719_v48 = vpack.c.bf16 %v661_v43, %v660_v42  ;;  %v1541_v49 = vsel %vm500_vm2, 1.0, %v1740_v8  ;;  %v1542_v50 = vsel %vm501_vm3, 1.0, %v1740_v8  ;;  %v1447_v51 = vsel %vm278_vm4, 1.0, %v1740_v8 }
  0x30   : > { %v692_v52 = vsub.f32 %v1477_v44, %v1541_v49  ;;  %v693_v53 = vsub.f32 %v1478_v45, %v1542_v50  ;;  %v1448_v54 = vsel %vm279_vm5, 1.0, %v1740_v8  ;;  %vm470_vm6 = vcmp.lt.f32.partialorder %v214_v37, 0.0  ;;  %v252_v37 = vld [vmem:[%s1791_s27 + $0x190] sm:$0xff] }
  0x31   : > { %1656 = vmatmul.mubr.msk.bf16.gmra.mxu0 %vm778_vm0, %v719_v48  ;;  %vm471_vm7 = vcmp.lt.f32.partialorder %v215_v38, 0.0  ;;  %v1511_v55 = vsel %vm470_vm6, 1.0, %v1740_v8  ;;  %vm310_vm8 = vcmp.gt.f32.partialorder %v246_v46, 0.0  ;;  %vm311_vm9 = vcmp.gt.f32.partialorder %v247_v47, 0.0 }
  0x32   : > { %v735_v58 = vpack.c.bf16 %v693_v53, %v692_v52  ;;  %v1512_v59 = vsel %vm471_vm7, 1.0, %v1740_v8  ;;  %v662_v60 = vsub.f32 %v1447_v51, %v1511_v55  ;;  %v1479_v61 = vsel %vm310_vm8, 1.0, %v1740_v8  ;;  %v254_v55 = vld [vmem:[%s1791_s27 + $0x1a0] sm:$0xff] }
  0x33   : > { %v663_v62 = vsub.f32 %v1448_v54, %v1512_v59  ;;  %v1480_v63 = vsel %vm311_vm9, 1.0, %v1740_v8  ;;  %vm502_vm10 = vcmp.lt.f32.partialorder %v246_v46, 0.0  ;;  %vm503_vm11 = vcmp.lt.f32.partialorder %v247_v47, 0.0  ;;  %v222_v46 = vld [vmem:[%s1791_s27 + $0xa0] sm:$0xff]  ;;  %v223_v47 = vld [vmem:[%s1791_s27 + $0xa8] sm:$0xff] }
  0x34   : > { %1688 = vmatmul.mubr.msk.bf16.gmra.mxu1 %vm778_vm0, %v735_v58  ;;  %v1543_v1 = vsel %vm502_vm10, 1.0, %v1740_v8  ;;  %v1544_v2 = vsel %vm503_vm11, 1.0, %v1740_v8  ;;  %vm280_vm12 = vcmp.gt.f32.partialorder %v216_v56, 0.0  ;;  %vm281_vm13 = vcmp.gt.f32.partialorder %v217_v57, 0.0 }
  0x35   : > { %v720_v4 = vpack.c.bf16 %v663_v62, %v662_v60  ;;  %v694_v5 = vsub.f32 %v1479_v61, %v1543_v1  ;;  %v695_v6 = vsub.f32 %v1480_v63, %v1544_v2  ;;  %v1449_v7 = vsel %vm280_vm12, 1.0, %v1740_v8  ;;  %v224_v1 = vld [vmem:[%s1791_s27 + $0xb0] sm:$0xff]  ;;  %v225_v2 = vld [vmem:[%s1791_s27 + $0xb8] sm:$0xff] }
  0x36   : > { %v1450_v9 = vsel %vm281_vm13, 1.0, %v1740_v8  ;;  %vm472_vm14 = vcmp.lt.f32.partialorder %v216_v56, 0.0  ;;  %vm473_vm15 = vcmp.lt.f32.partialorder %v217_v57, 0.0  ;;  %vm312_vm1 = vcmp.gt.f32.partialorder %v248_v0, 0.0  ;;  %v255_v56 = vld [vmem:[%s1791_s27 + $0x1a8] sm:$0xff] }
  0x37   : > { %1659 = vmatprep.mubr.msk.bf16.mxu0 %vm778_vm0, %v720_v4  ;;  %v736_v12 = vpack.c.bf16 %v695_v6, %v694_v5  ;;  %v1513_v13 = vsel %vm472_vm14, 1.0, %v1740_v8  ;;  %v1514_v14 = vsel %vm473_vm15, 1.0, %v1740_v8  ;;  %vm313_vm2 = vcmp.gt.f32.partialorder %v249_v3, 0.0 }
  0x38   : > { %v664_v15 = vsub.f32 %v1449_v7, %v1513_v13  ;;  %v665_v16 = vsub.f32 %v1450_v9, %v1514_v14  ;;  %v1481_v17 = vsel %vm312_vm1, 1.0, %v1740_v8  ;;  %v1482_v18 = vsel %vm313_vm2, 1.0, %v1740_v8  ;;  %v257_v13 = vld [vmem:[%s1791_s27 + $0x1b8] sm:$0xff] }
  0x39   : > { %1691 = vmatprep.mubr.msk.bf16.mxu1 %vm778_vm0, %v736_v12  ;;  %vm504_vm3 = vcmp.lt.f32.partialorder %v248_v0, 0.0  ;;  %vm505_vm4 = vcmp.lt.f32.partialorder %v249_v3, 0.0  ;;  %vm282_vm5 = vcmp.gt.f32.partialorder %v218_v10, 0.0  ;;  %vm283_vm6 = vcmp.gt.f32.partialorder %v219_v11, 0.0 }
  0x3a   : > { %v721_v21 = vpack.c.bf16 %v665_v16, %v664_v15  ;;  %v1545_v22 = vsel %vm504_vm3, 1.0, %v1740_v8  ;;  %v1546_v23 = vsel %vm505_vm4, 1.0, %v1740_v8  ;;  %v1451_v24 = vsel %vm282_vm5, 1.0, %v1740_v8 }
  0x3b   : > { %v696_v25 = vsub.f32 %v1481_v17, %v1545_v22  ;;  %v697_v26 = vsub.f32 %v1482_v18, %v1546_v23  ;;  %v1452_v27 = vsel %vm283_vm6, 1.0, %v1740_v8  ;;  %vm474_vm7 = vcmp.lt.f32.partialorder %v218_v10, 0.0  ;;  %v256_v10 = vld [vmem:[%s1791_s27 + $0x1b0] sm:$0xff] }
  0x3c   : > { %1660 = vmatmul.mubr.msk.bf16.gmra.mxu0 %vm778_vm0, %v721_v21  ;;  %vm475_vm8 = vcmp.lt.f32.partialorder %v219_v11, 0.0  ;;  %v1515_v28 = vsel %vm474_vm7, 1.0, %v1740_v8  ;;  %vm314_vm9 = vcmp.gt.f32.partialorder %v250_v19, 0.0  ;;  %vm315_vm10 = vcmp.gt.f32.partialorder %v251_v20, 0.0 }
  0x3d   : > { %v737_v31 = vpack.c.bf16 %v697_v26, %v696_v25  ;;  %v1516_v32 = vsel %vm475_vm8, 1.0, %v1740_v8  ;;  %v666_v33 = vsub.f32 %v1451_v24, %v1515_v28  ;;  %v1483_v34 = vsel %vm314_vm9, 1.0, %v1740_v8  ;;  %v258_v28 = vld [vmem:[%s1791_s27 + $0x1c0] sm:$0xff] }
  0x3e   : > { %v667_v35 = vsub.f32 %v1452_v27, %v1516_v32  ;;  %v1484_v36 = vsel %vm315_vm10, 1.0, %v1740_v8  ;;  %vm506_vm11 = vcmp.lt.f32.partialorder %v250_v19, 0.0  ;;  %vm507_vm12 = vcmp.lt.f32.partialorder %v251_v20, 0.0  ;;  %v226_v19 = vld [vmem:[%s1791_s27 + $0xc0] sm:$0xff]  ;;  %v227_v20 = vld [vmem:[%s1791_s27 + $0xc8] sm:$0xff] }
  0x3f   : > { %1692 = vmatmul.mubr.msk.bf16.gmra.mxu1 %vm778_vm0, %v737_v31  ;;  %v1547_v38 = vsel %vm506_vm11, 1.0, %v1740_v8  ;;  %v1548_v39 = vsel %vm507_vm12, 1.0, %v1740_v8  ;;  %vm284_vm13 = vcmp.gt.f32.partialorder %v220_v29, 0.0  ;;  %vm285_vm14 = vcmp.gt.f32.partialorder %v221_v30, 0.0 }
  0x40   : > { %v722_v41 = vpack.c.bf16 %v667_v35, %v666_v33  ;;  %v698_v42 = vsub.f32 %v1483_v34, %v1547_v38  ;;  %v699_v43 = vsub.f32 %v1484_v36, %v1548_v39  ;;  %v1453_v44 = vsel %vm284_vm13, 1.0, %v1740_v8  ;;  %v228_v38 = vld [vmem:[%s1791_s27 + $0xd0] sm:$0xff]  ;;  %v229_v39 = vld [vmem:[%s1791_s27 + $0xd8] sm:$0xff] }
  0x41   : > { %v1454_v45 = vsel %vm285_vm14, 1.0, %v1740_v8  ;;  %vm476_vm15 = vcmp.lt.f32.partialorder %v220_v29, 0.0  ;;  %vm477_vm1 = vcmp.lt.f32.partialorder %v221_v30, 0.0  ;;  %vm316_vm2 = vcmp.gt.f32.partialorder %v252_v37, 0.0  ;;  %v259_v29 = vld [vmem:[%s1791_s27 + $0x1c8] sm:$0xff] }
  0x42   : > { %1663 = vmatprep.mubr.msk.bf16.mxu0 %vm778_vm0, %v722_v41  ;;  %v738_v48 = vpack.c.bf16 %v699_v43, %v698_v42  ;;  %v1517_v49 = vsel %vm476_vm15, 1.0, %v1740_v8  ;;  %v1518_v50 = vsel %vm477_vm1, 1.0, %v1740_v8  ;;  %vm317_vm3 = vcmp.gt.f32.partialorder %v253_v40, 0.0 }
  0x43   : > { %v668_v51 = vsub.f32 %v1453_v44, %v1517_v49  ;;  %v669_v52 = vsub.f32 %v1454_v45, %v1518_v50  ;;  %v1485_v53 = vsel %vm316_vm2, 1.0, %v1740_v8  ;;  %v1486_v54 = vsel %vm317_vm3, 1.0, %v1740_v8  ;;  %v261_v49 = vld [vmem:[%s1791_s27 + $0x1d8] sm:$0xff] }
  0x44   : > { %1695 = vmatprep.mubr.msk.bf16.mxu1 %vm778_vm0, %v738_v48  ;;  %vm508_vm4 = vcmp.lt.f32.partialorder %v252_v37, 0.0  ;;  %vm509_vm5 = vcmp.lt.f32.partialorder %v253_v40, 0.0  ;;  %vm286_vm6 = vcmp.gt.f32.partialorder %v222_v46, 0.0  ;;  %vm287_vm7 = vcmp.gt.f32.partialorder %v223_v47, 0.0 }
  0x45   : > { %v723_v57 = vpack.c.bf16 %v669_v52, %v668_v51  ;;  %v1549_v58 = vsel %vm508_vm4, 1.0, %v1740_v8  ;;  %v1550_v59 = vsel %vm509_vm5, 1.0, %v1740_v8  ;;  %v1455_v60 = vsel %vm286_vm6, 1.0, %v1740_v8 }
  0x46   : > { %v700_v61 = vsub.f32 %v1485_v53, %v1549_v58  ;;  %v701_v62 = vsub.f32 %v1486_v54, %v1550_v59  ;;  %v1456_v63 = vsel %vm287_vm7, 1.0, %v1740_v8  ;;  %vm478_vm8 = vcmp.lt.f32.partialorder %v222_v46, 0.0  ;;  %v260_v46 = vld [vmem:[%s1791_s27 + $0x1d0] sm:$0xff] }
  0x47   : > { %1664 = vmatmul.mubr.msk.bf16.gmra.mxu0 %vm778_vm0, %v723_v57  ;;  %vm479_vm9 = vcmp.lt.f32.partialorder %v223_v47, 0.0  ;;  %v1519_v0 = vsel %vm478_vm8, 1.0, %v1740_v8  ;;  %vm318_vm10 = vcmp.gt.f32.partialorder %v254_v55, 0.0  ;;  %vm319_vm11 = vcmp.gt.f32.partialorder %v255_v56, 0.0 }
  0x48   : > { %v739_v3 = vpack.c.bf16 %v701_v62, %v700_v61  ;;  %v1520_v4 = vsel %vm479_vm9, 1.0, %v1740_v8  ;;  %v670_v5 = vsub.f32 %v1455_v60, %v1519_v0  ;;  %v1487_v6 = vsel %vm318_vm10, 1.0, %v1740_v8  ;;  %v262_v0 = vld [vmem:[%s1791_s27 + $0x1e0] sm:$0xff] }
  0x49   : > { %v671_v7 = vsub.f32 %v1456_v63, %v1520_v4  ;;  %v1488_v9 = vsel %vm319_vm11, 1.0, %v1740_v8  ;;  %vm510_vm12 = vcmp.lt.f32.partialorder %v254_v55, 0.0  ;;  %vm511_vm13 = vcmp.lt.f32.partialorder %v255_v56, 0.0  ;;  %v230_v55 = vld [vmem:[%s1791_s27 + $0xe0] sm:$0xff]  ;;  %v231_v56 = vld [vmem:[%s1791_s27 + $0xe8] sm:$0xff] }
  0x4a   : > { %1696 = vmatmul.mubr.msk.bf16.gmra.mxu1 %vm778_vm0, %v739_v3  ;;  %v1551_v11 = vsel %vm510_vm12, 1.0, %v1740_v8  ;;  %v1552_v12 = vsel %vm511_vm13, 1.0, %v1740_v8  ;;  %vm288_vm14 = vcmp.gt.f32.partialorder %v224_v1, 0.0  ;;  %vm289_vm15 = vcmp.gt.f32.partialorder %v225_v2, 0.0 }
  0x4b   : > { %v724_v14 = vpack.c.bf16 %v671_v7, %v670_v5  ;;  %v702_v15 = vsub.f32 %v1487_v6, %v1551_v11  ;;  %v703_v16 = vsub.f32 %v1488_v9, %v1552_v12  ;;  %v1457_v17 = vsel %vm288_vm14, 1.0, %v1740_v8  ;;  %v232_v11 = vld [vmem:[%s1791_s27 + $0xf0] sm:$0xff]  ;;  %v233_v12 = vld [vmem:[%s1791_s27 + $0xf8] sm:$0xff] }
  0x4c   : > { %v1458_v18 = vsel %vm289_vm15, 1.0, %v1740_v8  ;;  %vm480_vm1 = vcmp.lt.f32.partialorder %v224_v1, 0.0  ;;  %vm481_vm2 = vcmp.lt.f32.partialorder %v225_v2, 0.0  ;;  %vm320_vm3 = vcmp.gt.f32.partialorder %v256_v10, 0.0  ;;  %v263_v1 = vld [vmem:[%s1791_s27 + $0x1e8] sm:$0xff] }
  0x4d   : > { %1667 = vmatprep.mubr.msk.bf16.mxu0 %vm778_vm0, %v724_v14  ;;  %v740_v21 = vpack.c.bf16 %v703_v16, %v702_v15  ;;  %v1521_v22 = vsel %vm480_vm1, 1.0, %v1740_v8  ;;  %v1522_v23 = vsel %vm481_vm2, 1.0, %v1740_v8  ;;  %vm321_vm4 = vcmp.gt.f32.partialorder %v257_v13, 0.0 }
  0x4e   : > { %v672_v24 = vsub.f32 %v1457_v17, %v1521_v22  ;;  %v673_v25 = vsub.f32 %v1458_v18, %v1522_v23  ;;  %v1489_v26 = vsel %vm320_vm3, 1.0, %v1740_v8  ;;  %v1490_v27 = vsel %vm321_vm4, 1.0, %v1740_v8  ;;  %v265_v22 = vld [vmem:[%s1791_s27 + $0x1f8] sm:$0xff] }
  0x4f   : > { %1699 = vmatprep.mubr.msk.bf16.mxu1 %vm778_vm0, %v740_v21  ;;  %vm512_vm5 = vcmp.lt.f32.partialorder %v256_v10, 0.0  ;;  %vm513_vm6 = vcmp.lt.f32.partialorder %v257_v13, 0.0  ;;  %vm290_vm7 = vcmp.gt.f32.partialorder %v226_v19, 0.0  ;;  %vm291_vm8 = vcmp.gt.f32.partialorder %v227_v20, 0.0 }
  0x50   : > { %v725_v30 = vpack.c.bf16 %v673_v25, %v672_v24  ;;  %v1553_v31 = vsel %vm512_vm5, 1.0, %v1740_v8  ;;  %v1554_v32 = vsel %vm513_vm6, 1.0, %v1740_v8  ;;  %v1459_v33 = vsel %vm290_vm7, 1.0, %v1740_v8 }
  0x51   : > { %v704_v34 = vsub.f32 %v1489_v26, %v1553_v31  ;;  %v705_v35 = vsub.f32 %v1490_v27, %v1554_v32  ;;  %v1460_v36 = vsel %vm291_vm8, 1.0, %v1740_v8  ;;  %vm482_vm9 = vcmp.lt.f32.partialorder %v226_v19, 0.0  ;;  %v264_v19 = vld [vmem:[%s1791_s27 + $0x1f0] sm:$0xff] }
  0x52   : > { %1668 = vmatmul.mubr.msk.bf16.gmra.mxu0 %vm778_vm0, %v725_v30  ;;  %vm483_vm10 = vcmp.lt.f32.partialorder %v227_v20, 0.0  ;;  %v1523_v37 = vsel %vm482_vm9, 1.0, %v1740_v8  ;;  %vm322_vm11 = vcmp.gt.f32.partialorder %v258_v28, 0.0  ;;  %vm323_vm12 = vcmp.gt.f32.partialorder %v259_v29, 0.0 }
  0x53   : > { %v741_v40 = vpack.c.bf16 %v705_v35, %v704_v34  ;;  %v1524_v41 = vsel %vm483_vm10, 1.0, %v1740_v8  ;;  %v674_v42 = vsub.f32 %v1459_v33, %v1523_v37  ;;  %v1491_v43 = vsel %vm322_vm11, 1.0, %v1740_v8 }
  0x54   : > { %v675_v44 = vsub.f32 %v1460_v36, %v1524_v41  ;;  %v1492_v45 = vsel %vm323_vm12, 1.0, %v1740_v8  ;;  %vm514_vm13 = vcmp.lt.f32.partialorder %v258_v28, 0.0  ;;  %vm515_vm14 = vcmp.lt.f32.partialorder %v259_v29, 0.0  ;;  %v2023_v41 = vld [vmem:[%s2298_s2] ss:$0 sm:$0xff] }
  0x55   : > { %1700 = vmatmul.mubr.msk.bf16.gmra.mxu1 %vm778_vm0, %v741_v40  ;;  %v1555_v47 = vsel %vm514_vm13, 1.0, %v1740_v8  ;;  %v1556_v48 = vsel %vm515_vm14, 1.0, %v1740_v8  ;;  %vm292_vm15 = vcmp.gt.f32.partialorder %v228_v38, 0.0  ;;  %vm293_vm1 = vcmp.gt.f32.partialorder %v229_v39, 0.0 }
  0x56   : > { %v726_v50 = vpack.c.bf16 %v675_v44, %v674_v42  ;;  %v706_v51 = vsub.f32 %v1491_v43, %v1555_v47  ;;  %v707_v52 = vsub.f32 %v1492_v45, %v1556_v48  ;;  %v1461_v53 = vsel %vm292_vm15, 1.0, %v1740_v8  ;;  %v2028_v43 = vld [vmem:[%s2299_s3] ss:$0 sm:$0xff] }
  0x57   : > { %v1462_v54 = vsel %vm293_vm1, 1.0, %v1740_v8  ;;  %vm484_vm2 = vcmp.lt.f32.partialorder %v228_v38, 0.0  ;;  %vm485_vm3 = vcmp.lt.f32.partialorder %v229_v39, 0.0  ;;  %vm324_vm4 = vcmp.gt.f32.partialorder %v260_v46, 0.0 }
  0x58   : > { %1671 = vmatprep.mubr.msk.bf16.mxu0 %vm778_vm0, %v726_v50  ;;  %v742_v57 = vpack.c.bf16 %v707_v52, %v706_v51  ;;  %v1525_v58 = vsel %vm484_vm2, 1.0, %v1740_v8  ;;  %v1526_v59 = vsel %vm485_vm3, 1.0, %v1740_v8  ;;  %vm325_vm5 = vcmp.gt.f32.partialorder %v261_v49, 0.0 }
  0x59   : > { %v676_v60 = vsub.f32 %v1461_v53, %v1525_v58  ;;  %v677_v61 = vsub.f32 %v1462_v54, %v1526_v59  ;;  %v1493_v62 = vsel %vm324_vm4, 1.0, %v1740_v8  ;;  %v1494_v63 = vsel %vm325_vm5, 1.0, %v1740_v8 }
  0x5a   : > { %1703 = vmatprep.mubr.msk.bf16.mxu1 %vm778_vm0, %v742_v57  ;;  %vm516_vm6 = vcmp.lt.f32.partialorder %v260_v46, 0.0  ;;  %vm517_vm7 = vcmp.lt.f32.partialorder %v261_v49, 0.0  ;;  %vm294_vm8 = vcmp.gt.f32.partialorder %v230_v55, 0.0  ;;  %vm295_vm9 = vcmp.gt.f32.partialorder %v231_v56, 0.0 }
  0x5b   : > { %v727_v2 = vpack.c.bf16 %v677_v61, %v676_v60  ;;  %v1557_v3 = vsel %vm516_vm6, 1.0, %v1740_v8  ;;  %v1558_v4 = vsel %vm517_vm7, 1.0, %v1740_v8  ;;  %v1463_v5 = vsel %vm294_vm8, 1.0, %v1740_v8 }
  0x5c   : > { %v708_v6 = vsub.f32 %v1493_v62, %v1557_v3  ;;  %v709_v7 = vsub.f32 %v1494_v63, %v1558_v4  ;;  %v1464_v9 = vsel %vm295_vm9, 1.0, %v1740_v8  ;;  %vm486_vm10 = vcmp.lt.f32.partialorder %v230_v55, 0.0 }
  0x5d   : > { %1672 = vmatmul.mubr.msk.bf16.gmra.mxu0 %vm778_vm0, %v727_v2  ;;  %vm487_vm11 = vcmp.lt.f32.partialorder %v231_v56, 0.0  ;;  %v1527_v10 = vsel %vm486_vm10, 1.0, %v1740_v8  ;;  %vm326_vm12 = vcmp.gt.f32.partialorder %v262_v0, 0.0  ;;  %vm327_vm13 = vcmp.gt.f32.partialorder %v263_v1, 0.0 }
  0x5e   : > { %v743_v13 = vpack.c.bf16 %v709_v7, %v708_v6  ;;  %v1528_v14 = vsel %vm487_vm11, 1.0, %v1740_v8  ;;  %v678_v15 = vsub.f32 %v1463_v5, %v1527_v10  ;;  %v1495_v16 = vsel %vm326_vm12, 1.0, %v1740_v8 }
  0x5f   : > { %v679_v17 = vsub.f32 %v1464_v9, %v1528_v14  ;;  %v1496_v18 = vsel %vm327_vm13, 1.0, %v1740_v8  ;;  %vm518_vm14 = vcmp.lt.f32.partialorder %v262_v0, 0.0  ;;  %vm519_vm15 = vcmp.lt.f32.partialorder %v263_v1, 0.0 }
  0x60   : > { %1704 = vmatmul.mubr.msk.bf16.gmra.mxu1 %vm778_vm0, %v743_v13  ;;  %v1559_v20 = vsel %vm518_vm14, 1.0, %v1740_v8  ;;  %v1560_v21 = vsel %vm519_vm15, 1.0, %v1740_v8  ;;  %vm296_vm1 = vcmp.gt.f32.partialorder %v232_v11, 0.0  ;;  %vm297_vm2 = vcmp.gt.f32.partialorder %v233_v12, 0.0 }
  0x61   : > { %v728_v23 = vpack.c.bf16 %v679_v17, %v678_v15  ;;  %v710_v24 = vsub.f32 %v1495_v16, %v1559_v20  ;;  %v711_v25 = vsub.f32 %v1496_v18, %v1560_v21  ;;  %v1465_v26 = vsel %vm296_vm1, 1.0, %v1740_v8 }
  0x62   : > { %v1466_v27 = vsel %vm297_vm2, 1.0, %v1740_v8  ;;  %vm488_vm3 = vcmp.lt.f32.partialorder %v232_v11, 0.0  ;;  %vm489_vm4 = vcmp.lt.f32.partialorder %v233_v12, 0.0  ;;  %vm328_vm5 = vcmp.gt.f32.partialorder %v264_v19, 0.0 }
  0x63   : > { %1675 = vmatprep.mubr.msk.bf16.mxu0 %vm778_vm0, %v728_v23  ;;  %v744_v28 = vpack.c.bf16 %v711_v25, %v710_v24  ;;  %v1529_v29 = vsel %vm488_vm3, 1.0, %v1740_v8  ;;  %v1530_v30 = vsel %vm489_vm4, 1.0, %v1740_v8  ;;  %vm329_vm6 = vcmp.gt.f32.partialorder %v265_v22, 0.0 }
  0x64   : > { %v680_v31 = vsub.f32 %v1465_v26, %v1529_v29  ;;  %v681_v32 = vsub.f32 %v1466_v27, %v1530_v30  ;;  %v1497_v33 = vsel %vm328_vm5, 1.0, %v1740_v8  ;;  %v1498_v34 = vsel %vm329_vm6, 1.0, %v1740_v8 }
  0x65   : > { %1707 = vmatprep.mubr.msk.bf16.mxu1 %vm778_vm0, %v744_v28  ;;  %vm520_vm7 = vcmp.lt.f32.partialorder %v264_v19, 0.0  ;;  %vm521_vm8 = vcmp.lt.f32.partialorder %v265_v22, 0.0 }
  0x66   : > { %v729_v35 = vpack.c.bf16 %v681_v32, %v680_v31  ;;  %v1561_v36 = vsel %vm520_vm7, 1.0, %v1740_v8  ;;  %v1562_v37 = vsel %vm521_vm8, 1.0, %v1740_v8 }
  0x67   : > { %v712_v38 = vsub.f32 %v1497_v33, %v1561_v36  ;;  %v713_v39 = vsub.f32 %v1498_v34, %v1562_v37 }
  0x68   : > { %1676 = vmatmul.mubr.msk.bf16.gmra.mxu0 %vm778_vm0, %v729_v35 }
  0x69   : > { %v745_v40 = vpack.c.bf16 %v713_v39, %v712_v38 }
  0x6b   : > { %1708 = vmatmul.mubr.msk.bf16.gmra.mxu1 %vm778_vm0, %v745_v40 }
  0xdc   : > { %v1649_v42 = vpop.f32.mrf.mxu0 }
  0xdd   : > { %v1173_v8 = vmul.f32 %v1649_v42, %v2023_v41 }
  0xde   : > { %v909_v44 = vpop.f32.mrf.mxu0  ;;  %v1681_v46 = vpop.f32.mrf.mxu1 }
  0xdf   : > { %v1244_v45 = vadd.f32 %v2028_v43, %v1173_v8  ;;  %v1171_v47 = vmul.f32 %v2023_v41, %v909_v44  ;;  %v1205_v48 = vmul.f32 %v1681_v46, %v2023_v41 }
  0xe0   : > { %v1650_v49 = vpop.f32.mrf.mxu0  ;;  %v1037_v51 = vpop.f32.mrf.mxu1 }
  0xe1   : > { %1308 = vst.msk [vmem:[%s2036_s10 + $0x10] sm:$0xff] %vm778_vm0, %v1244_v45  ;;  %v1242_v50 = vadd.f32 %v2028_v43, %v1171_v47  ;;  %v1174_v52 = vmul.f32 %v1650_v49, %v2023_v41  ;;  %v1276_v53 = vadd.f32 %v2028_v43, %v1205_v48  ;;  %v1203_v54 = vmul.f32 %v2023_v41, %v1037_v51 }
  0xe2   : > { %v912_v55 = vpop.f32.mrf.mxu0  ;;  %v1682_v57 = vpop.f32.mrf.mxu1 }
  0xe3   : > { %1306 = vst.msk [vmem:[%s2036_s10] sm:$0xff] %vm778_vm0, %v1242_v50  ;;  %v1245_v56 = vadd.f32 %v2028_v43, %v1174_v52  ;;  %v1172_v58 = vmul.f32 %v2023_v41, %v912_v55  ;;  %1340 = vst.msk [vmem:[%s2036_s10 + $0x110] sm:$0xff] %vm778_vm0, %v1276_v53  ;;  %v1274_v59 = vadd.f32 %v2028_v43, %v1203_v54 }
  0xe4   : > { %v1206_v60 = vmul.f32 %v1682_v57, %v2023_v41  ;;  %v1040_v62 = vpop.f32.mrf.mxu1 }
  0xe5   : > { %1309 = vst.msk [vmem:[%s2036_s10 + $0x18] sm:$0xff] %vm778_vm0, %v1245_v56  ;;  %v1243_v61 = vadd.f32 %v2028_v43, %v1172_v58  ;;  %1338 = vst.msk [vmem:[%s2036_s10 + $0x100] sm:$0xff] %vm778_vm0, %v1274_v59  ;;  %v1204_v0 = vmul.f32 %v2023_v41, %v1040_v62 }
  0xe6   : > { %v1277_v63 = vadd.f32 %v2028_v43, %v1206_v60  ;;  %v1653_v1 = vpop.f32.mrf.mxu0 }
  0xe7   : > { %1307 = vst.msk [vmem:[%s2036_s10 + $0x8] sm:$0xff] %vm778_vm0, %v1243_v61  ;;  %v1275_v2 = vadd.f32 %v2028_v43, %v1204_v0  ;;  %v1177_v3 = vmul.f32 %v1653_v1, %v2023_v41 }
  0xe8   : > { %1341 = vst.msk [vmem:[%s2036_s10 + $0x118] sm:$0xff] %vm778_vm0, %v1277_v63  ;;  %v925_v4 = vpop.f32.mrf.mxu0 }
  0xe9   : > { %1339 = vst.msk [vmem:[%s2036_s10 + $0x108] sm:$0xff] %vm778_vm0, %v1275_v2  ;;  %v1248_v5 = vadd.f32 %v2028_v43, %v1177_v3  ;;  %v1685_v6 = vpop.f32.mrf.mxu1  ;;  %v1175_v7 = vmul.f32 %v2023_v41, %v925_v4 }
  0xea   : > { %v1209_v9 = vmul.f32 %v1685_v6, %v2023_v41  ;;  %v1654_v10 = vpop.f32.mrf.mxu0 }
  0xeb   : > { %1312 = vst.msk [vmem:[%s2036_s10 + $0x30] sm:$0xff] %vm778_vm0, %v1248_v5  ;;  %v1246_v11 = vadd.f32 %v2028_v43, %v1175_v7  ;;  %v1053_v12 = vpop.f32.mrf.mxu1  ;;  %v1178_v13 = vmul.f32 %v1654_v10, %v2023_v41 }
  0xec   : > { %v1280_v14 = vadd.f32 %v2028_v43, %v1209_v9  ;;  %v1207_v15 = vmul.f32 %v2023_v41, %v1053_v12  ;;  %v928_v16 = vpop.f32.mrf.mxu0 }
  0xed   : > { %1310 = vst.msk [vmem:[%s2036_s10 + $0x20] sm:$0xff] %vm778_vm0, %v1246_v11  ;;  %v1249_v17 = vadd.f32 %v2028_v43, %v1178_v13  ;;  %v1686_v18 = vpop.f32.mrf.mxu1  ;;  %v1176_v19 = vmul.f32 %v2023_v41, %v928_v16 }
  0xee   : > { %1344 = vst.msk [vmem:[%s2036_s10 + $0x130] sm:$0xff] %vm778_vm0, %v1280_v14  ;;  %v1278_v20 = vadd.f32 %v2028_v43, %v1207_v15  ;;  %v1210_v21 = vmul.f32 %v1686_v18, %v2023_v41 }
  0xef   : > { %1313 = vst.msk [vmem:[%s2036_s10 + $0x38] sm:$0xff] %vm778_vm0, %v1249_v17  ;;  %v1247_v22 = vadd.f32 %v2028_v43, %v1176_v19  ;;  %v1056_v23 = vpop.f32.mrf.mxu1 }
  0xf0   : > { %1342 = vst.msk [vmem:[%s2036_s10 + $0x120] sm:$0xff] %vm778_vm0, %v1278_v20  ;;  %v1281_v24 = vadd.f32 %v2028_v43, %v1210_v21  ;;  %v1208_v25 = vmul.f32 %v2023_v41, %v1056_v23 }
  0xf1   : > { %1311 = vst.msk [vmem:[%s2036_s10 + $0x28] sm:$0xff] %vm778_vm0, %v1247_v22  ;;  %v1657_v26 = vpop.f32.mrf.mxu0 }
  0xf2   : > { %1345 = vst.msk [vmem:[%s2036_s10 + $0x138] sm:$0xff] %vm778_vm0, %v1281_v24  ;;  %v1279_v27 = vadd.f32 %v2028_v43, %v1208_v25  ;;  %v1181_v28 = vmul.f32 %v1657_v26, %v2023_v41 }
  0xf3   : > { %v941_v29 = vpop.f32.mrf.mxu0 }
  0xf4   : > { %1343 = vst.msk [vmem:[%s2036_s10 + $0x128] sm:$0xff] %vm778_vm0, %v1279_v27  ;;  %v1252_v30 = vadd.f32 %v2028_v43, %v1181_v28  ;;  %v1689_v31 = vpop.f32.mrf.mxu1  ;;  %v1179_v32 = vmul.f32 %v2023_v41, %v941_v29 }
  0xf5   : > { %v1213_v33 = vmul.f32 %v1689_v31, %v2023_v41  ;;  %v1658_v34 = vpop.f32.mrf.mxu0 }
  0xf6   : > { %1316 = vst.msk [vmem:[%s2036_s10 + $0x50] sm:$0xff] %vm778_vm0, %v1252_v30  ;;  %v1250_v35 = vadd.f32 %v2028_v43, %v1179_v32  ;;  %v1069_v36 = vpop.f32.mrf.mxu1  ;;  %v1182_v37 = vmul.f32 %v1658_v34, %v2023_v41 }
  0xf7   : > { %v1284_v38 = vadd.f32 %v2028_v43, %v1213_v33  ;;  %v1211_v39 = vmul.f32 %v2023_v41, %v1069_v36  ;;  %v944_v40 = vpop.f32.mrf.mxu0 }
  0xf8   : > { %1314 = vst.msk [vmem:[%s2036_s10 + $0x40] sm:$0xff] %vm778_vm0, %v1250_v35  ;;  %v1253_v42 = vadd.f32 %v2028_v43, %v1182_v37  ;;  %v1690_v8 = vpop.f32.mrf.mxu1  ;;  %v1180_v44 = vmul.f32 %v2023_v41, %v944_v40 }
  0xf9   : > { %1348 = vst.msk [vmem:[%s2036_s10 + $0x150] sm:$0xff] %vm778_vm0, %v1284_v38  ;;  %v1282_v45 = vadd.f32 %v2028_v43, %v1211_v39  ;;  %v1214_v46 = vmul.f32 %v1690_v8, %v2023_v41 }
  0xfa   : > { %1317 = vst.msk [vmem:[%s2036_s10 + $0x58] sm:$0xff] %vm778_vm0, %v1253_v42  ;;  %v1251_v47 = vadd.f32 %v2028_v43, %v1180_v44  ;;  %v1072_v48 = vpop.f32.mrf.mxu1 }
  0xfb   : > { %1346 = vst.msk [vmem:[%s2036_s10 + $0x140] sm:$0xff] %vm778_vm0, %v1282_v45  ;;  %v1285_v49 = vadd.f32 %v2028_v43, %v1214_v46  ;;  %v1212_v50 = vmul.f32 %v2023_v41, %v1072_v48 }
  0xfc   : > { %1315 = vst.msk [vmem:[%s2036_s10 + $0x48] sm:$0xff] %vm778_vm0, %v1251_v47  ;;  %v1661_v51 = vpop.f32.mrf.mxu0 }
  0xfd   : > { %1349 = vst.msk [vmem:[%s2036_s10 + $0x158] sm:$0xff] %vm778_vm0, %v1285_v49  ;;  %v1283_v52 = vadd.f32 %v2028_v43, %v1212_v50  ;;  %v1185_v53 = vmul.f32 %v1661_v51, %v2023_v41 }
  0xfe   : > { %v957_v54 = vpop.f32.mrf.mxu0 }
  0xff   : > { %1347 = vst.msk [vmem:[%s2036_s10 + $0x148] sm:$0xff] %vm778_vm0, %v1283_v52  ;;  %v1256_v55 = vadd.f32 %v2028_v43, %v1185_v53  ;;  %v1693_v56 = vpop.f32.mrf.mxu1  ;;  %v1183_v57 = vmul.f32 %v2023_v41, %v957_v54 }
 0x100   : > { %v1217_v58 = vmul.f32 %v1693_v56, %v2023_v41  ;;  %v1662_v59 = vpop.f32.mrf.mxu0 }
 0x101   : > { %1320 = vst.msk [vmem:[%s2036_s10 + $0x70] sm:$0xff] %vm778_vm0, %v1256_v55  ;;  %v1254_v60 = vadd.f32 %v2028_v43, %v1183_v57  ;;  %v1085_v61 = vpop.f32.mrf.mxu1  ;;  %v1186_v62 = vmul.f32 %v1662_v59, %v2023_v41 }
 0x102   : > { %v1288_v63 = vadd.f32 %v2028_v43, %v1217_v58  ;;  %v1215_v0 = vmul.f32 %v2023_v41, %v1085_v61  ;;  %v960_v1 = vpop.f32.mrf.mxu0 }
 0x103   : > { %1318 = vst.msk [vmem:[%s2036_s10 + $0x60] sm:$0xff] %vm778_vm0, %v1254_v60  ;;  %v1257_v2 = vadd.f32 %v2028_v43, %v1186_v62  ;;  %v1694_v3 = vpop.f32.mrf.mxu1  ;;  %v1184_v4 = vmul.f32 %v2023_v41, %v960_v1 }
 0x104   : > { %1352 = vst.msk [vmem:[%s2036_s10 + $0x170] sm:$0xff] %vm778_vm0, %v1288_v63  ;;  %v1286_v5 = vadd.f32 %v2028_v43, %v1215_v0  ;;  %v1218_v6 = vmul.f32 %v1694_v3, %v2023_v41 }
 0x105   : > { %1321 = vst.msk [vmem:[%s2036_s10 + $0x78] sm:$0xff] %vm778_vm0, %v1257_v2  ;;  %v1255_v7 = vadd.f32 %v2028_v43, %v1184_v4  ;;  %v1088_v9 = vpop.f32.mrf.mxu1 }
 0x106   : > { %1350 = vst.msk [vmem:[%s2036_s10 + $0x160] sm:$0xff] %vm778_vm0, %v1286_v5  ;;  %v1289_v10 = vadd.f32 %v2028_v43, %v1218_v6  ;;  %v1216_v11 = vmul.f32 %v2023_v41, %v1088_v9 }
 0x107   : > { %1319 = vst.msk [vmem:[%s2036_s10 + $0x68] sm:$0xff] %vm778_vm0, %v1255_v7  ;;  %v1665_v12 = vpop.f32.mrf.mxu0 }
 0x108   : > { %1353 = vst.msk [vmem:[%s2036_s10 + $0x178] sm:$0xff] %vm778_vm0, %v1289_v10  ;;  %v1287_v13 = vadd.f32 %v2028_v43, %v1216_v11  ;;  %v1189_v14 = vmul.f32 %v1665_v12, %v2023_v41 }
 0x109   : > { %v973_v15 = vpop.f32.mrf.mxu0 }
 0x10a   : > { %1351 = vst.msk [vmem:[%s2036_s10 + $0x168] sm:$0xff] %vm778_vm0, %v1287_v13  ;;  %v1260_v16 = vadd.f32 %v2028_v43, %v1189_v14  ;;  %v1697_v17 = vpop.f32.mrf.mxu1  ;;  %v1187_v18 = vmul.f32 %v2023_v41, %v973_v15 }
 0x10b   : > { %v1221_v19 = vmul.f32 %v1697_v17, %v2023_v41  ;;  %v1666_v20 = vpop.f32.mrf.mxu0 }
 0x10c   : > { %1324 = vst.msk [vmem:[%s2036_s10 + $0x90] sm:$0xff] %vm778_vm0, %v1260_v16  ;;  %v1258_v21 = vadd.f32 %v2028_v43, %v1187_v18  ;;  %v1101_v22 = vpop.f32.mrf.mxu1  ;;  %v1190_v23 = vmul.f32 %v1666_v20, %v2023_v41 }
 0x10d   : > { %v1292_v24 = vadd.f32 %v2028_v43, %v1221_v19  ;;  %v1219_v25 = vmul.f32 %v2023_v41, %v1101_v22  ;;  %v976_v26 = vpop.f32.mrf.mxu0 }
 0x10e   : > { %1322 = vst.msk [vmem:[%s2036_s10 + $0x80] sm:$0xff] %vm778_vm0, %v1258_v21  ;;  %v1261_v27 = vadd.f32 %v2028_v43, %v1190_v23  ;;  %v1698_v28 = vpop.f32.mrf.mxu1  ;;  %v1188_v29 = vmul.f32 %v2023_v41, %v976_v26 }
 0x10f   : > { %1356 = vst.msk [vmem:[%s2036_s10 + $0x190] sm:$0xff] %vm778_vm0, %v1292_v24  ;;  %v1290_v30 = vadd.f32 %v2028_v43, %v1219_v25  ;;  %v1222_v31 = vmul.f32 %v1698_v28, %v2023_v41 }
 0x110   : > { %1325 = vst.msk [vmem:[%s2036_s10 + $0x98] sm:$0xff] %vm778_vm0, %v1261_v27  ;;  %v1259_v32 = vadd.f32 %v2028_v43, %v1188_v29  ;;  %v1104_v33 = vpop.f32.mrf.mxu1 }
 0x111   : > { %1354 = vst.msk [vmem:[%s2036_s10 + $0x180] sm:$0xff] %vm778_vm0, %v1290_v30  ;;  %v1293_v34 = vadd.f32 %v2028_v43, %v1222_v31  ;;  %v1220_v35 = vmul.f32 %v2023_v41, %v1104_v33 }
 0x112   : > { %1323 = vst.msk [vmem:[%s2036_s10 + $0x88] sm:$0xff] %vm778_vm0, %v1259_v32  ;;  %v1669_v36 = vpop.f32.mrf.mxu0 }
 0x113   : > { %1357 = vst.msk [vmem:[%s2036_s10 + $0x198] sm:$0xff] %vm778_vm0, %v1293_v34  ;;  %v1291_v37 = vadd.f32 %v2028_v43, %v1220_v35  ;;  %v1193_v38 = vmul.f32 %v1669_v36, %v2023_v41 }
 0x114   : > { %v989_v39 = vpop.f32.mrf.mxu0 }
 0x115   : > { %1355 = vst.msk [vmem:[%s2036_s10 + $0x188] sm:$0xff] %vm778_vm0, %v1291_v37  ;;  %v1264_v40 = vadd.f32 %v2028_v43, %v1193_v38  ;;  %v1701_v42 = vpop.f32.mrf.mxu1  ;;  %v1191_v8 = vmul.f32 %v2023_v41, %v989_v39 }
 0x116   : > { %v1225_v44 = vmul.f32 %v1701_v42, %v2023_v41  ;;  %v1670_v45 = vpop.f32.mrf.mxu0 }
 0x117   : > { %1328 = vst.msk [vmem:[%s2036_s10 + $0xb0] sm:$0xff] %vm778_vm0, %v1264_v40  ;;  %v1262_v46 = vadd.f32 %v2028_v43, %v1191_v8  ;;  %v1117_v47 = vpop.f32.mrf.mxu1  ;;  %v1194_v48 = vmul.f32 %v1670_v45, %v2023_v41 }
 0x118   : > { %v1296_v49 = vadd.f32 %v2028_v43, %v1225_v44  ;;  %v1223_v50 = vmul.f32 %v2023_v41, %v1117_v47  ;;  %v992_v51 = vpop.f32.mrf.mxu0 }
 0x119   : > { %1326 = vst.msk [vmem:[%s2036_s10 + $0xa0] sm:$0xff] %vm778_vm0, %v1262_v46  ;;  %v1265_v52 = vadd.f32 %v2028_v43, %v1194_v48  ;;  %v1702_v53 = vpop.f32.mrf.mxu1  ;;  %v1192_v54 = vmul.f32 %v2023_v41, %v992_v51 }
 0x11a   : > { %1360 = vst.msk [vmem:[%s2036_s10 + $0x1b0] sm:$0xff] %vm778_vm0, %v1296_v49  ;;  %v1294_v55 = vadd.f32 %v2028_v43, %v1223_v50  ;;  %v1226_v56 = vmul.f32 %v1702_v53, %v2023_v41 }
 0x11b   : > { %1329 = vst.msk [vmem:[%s2036_s10 + $0xb8] sm:$0xff] %vm778_vm0, %v1265_v52  ;;  %v1263_v57 = vadd.f32 %v2028_v43, %v1192_v54  ;;  %v1120_v58 = vpop.f32.mrf.mxu1 }
 0x11c   : > { %1358 = vst.msk [vmem:[%s2036_s10 + $0x1a0] sm:$0xff] %vm778_vm0, %v1294_v55  ;;  %v1297_v59 = vadd.f32 %v2028_v43, %v1226_v56  ;;  %v1224_v60 = vmul.f32 %v2023_v41, %v1120_v58 }
 0x11d   : > { %1327 = vst.msk [vmem:[%s2036_s10 + $0xa8] sm:$0xff] %vm778_vm0, %v1263_v57  ;;  %v1673_v61 = vpop.f32.mrf.mxu0 }
 0x11e   : > { %1361 = vst.msk [vmem:[%s2036_s10 + $0x1b8] sm:$0xff] %vm778_vm0, %v1297_v59  ;;  %v1295_v62 = vadd.f32 %v2028_v43, %v1224_v60  ;;  %v1197_v63 = vmul.f32 %v1673_v61, %v2023_v41 }
 0x11f   : > { %v1005_v0 = vpop.f32.mrf.mxu0 }
 0x120   : > { %1359 = vst.msk [vmem:[%s2036_s10 + $0x1a8] sm:$0xff] %vm778_vm0, %v1295_v62  ;;  %v1268_v1 = vadd.f32 %v2028_v43, %v1197_v63  ;;  %v1705_v2 = vpop.f32.mrf.mxu1  ;;  %v1195_v3 = vmul.f32 %v2023_v41, %v1005_v0 }
 0x121   : > { %v1229_v4 = vmul.f32 %v1705_v2, %v2023_v41  ;;  %v1674_v5 = vpop.f32.mrf.mxu0 }
 0x122   : > { %1332 = vst.msk [vmem:[%s2036_s10 + $0xd0] sm:$0xff] %vm778_vm0, %v1268_v1  ;;  %v1266_v6 = vadd.f32 %v2028_v43, %v1195_v3  ;;  %v1133_v7 = vpop.f32.mrf.mxu1  ;;  %v1198_v9 = vmul.f32 %v1674_v5, %v2023_v41 }
 0x123   : > { %v1300_v10 = vadd.f32 %v2028_v43, %v1229_v4  ;;  %v1227_v11 = vmul.f32 %v2023_v41, %v1133_v7  ;;  %v1008_v12 = vpop.f32.mrf.mxu0 }
 0x124   : > { %1330 = vst.msk [vmem:[%s2036_s10 + $0xc0] sm:$0xff] %vm778_vm0, %v1266_v6  ;;  %v1269_v13 = vadd.f32 %v2028_v43, %v1198_v9  ;;  %v1706_v14 = vpop.f32.mrf.mxu1  ;;  %v1196_v15 = vmul.f32 %v2023_v41, %v1008_v12 }
 0x125   : > { %1364 = vst.msk [vmem:[%s2036_s10 + $0x1d0] sm:$0xff] %vm778_vm0, %v1300_v10  ;;  %v1298_v16 = vadd.f32 %v2028_v43, %v1227_v11  ;;  %v1230_v17 = vmul.f32 %v1706_v14, %v2023_v41 }
 0x126   : > { %1333 = vst.msk [vmem:[%s2036_s10 + $0xd8] sm:$0xff] %vm778_vm0, %v1269_v13  ;;  %v1267_v18 = vadd.f32 %v2028_v43, %v1196_v15  ;;  %v1136_v19 = vpop.f32.mrf.mxu1 }
 0x127   : > { %1362 = vst.msk [vmem:[%s2036_s10 + $0x1c0] sm:$0xff] %vm778_vm0, %v1298_v16  ;;  %v1301_v20 = vadd.f32 %v2028_v43, %v1230_v17  ;;  %v1228_v21 = vmul.f32 %v2023_v41, %v1136_v19 }
 0x128   : > { %1331 = vst.msk [vmem:[%s2036_s10 + $0xc8] sm:$0xff] %vm778_vm0, %v1267_v18  ;;  %v1677_v22 = vpop.f32.mrf.mxu0 }
 0x129   : > { %1365 = vst.msk [vmem:[%s2036_s10 + $0x1d8] sm:$0xff] %vm778_vm0, %v1301_v20  ;;  %v1299_v23 = vadd.f32 %v2028_v43, %v1228_v21  ;;  %v1201_v24 = vmul.f32 %v1677_v22, %v2023_v41 }
 0x12a   : > { %v1021_v25 = vpop.f32.mrf.mxu0 }
 0x12b   : > { %1363 = vst.msk [vmem:[%s2036_s10 + $0x1c8] sm:$0xff] %vm778_vm0, %v1299_v23  ;;  %v1272_v26 = vadd.f32 %v2028_v43, %v1201_v24  ;;  %v1709_v27 = vpop.f32.mrf.mxu1  ;;  %v1199_v28 = vmul.f32 %v2023_v41, %v1021_v25 }
 0x12c   : > { %v1233_v29 = vmul.f32 %v1709_v27, %v2023_v41  ;;  %v1678_v30 = vpop.f32.mrf.mxu0 }
 0x12d   : > { %1336 = vst.msk [vmem:[%s2036_s10 + $0xf0] sm:$0xff] %vm778_vm0, %v1272_v26  ;;  %v1270_v31 = vadd.f32 %v2028_v43, %v1199_v28  ;;  %v1149_v32 = vpop.f32.mrf.mxu1  ;;  %v1202_v33 = vmul.f32 %v1678_v30, %v2023_v41 }
 0x12e   : > { %v1304_v34 = vadd.f32 %v2028_v43, %v1233_v29  ;;  %v1231_v35 = vmul.f32 %v2023_v41, %v1149_v32  ;;  %v1024_v36 = vpop.f32.mrf.mxu0 }
 0x12f   : > { %1334 = vst.msk [vmem:[%s2036_s10 + $0xe0] sm:$0xff] %vm778_vm0, %v1270_v31  ;;  %v1273_v37 = vadd.f32 %v2028_v43, %v1202_v33  ;;  %v1710_v38 = vpop.f32.mrf.mxu1  ;;  %v1200_v39 = vmul.f32 %v2023_v41, %v1024_v36 }
 0x130   : > { %1368 = vst.msk [vmem:[%s2036_s10 + $0x1f0] sm:$0xff] %vm778_vm0, %v1304_v34  ;;  %v1302_v40 = vadd.f32 %v2028_v43, %v1231_v35  ;;  %v1234_v42 = vmul.f32 %v1710_v38, %v2023_v41 }
 0x131   : > { %1337 = vst.msk [vmem:[%s2036_s10 + $0xf8] sm:$0xff] %vm778_vm0, %v1273_v37  ;;  %v1271_v8 = vadd.f32 %v2028_v43, %v1200_v39  ;;  %v1152_v44 = vpop.f32.mrf.mxu1 }
 0x132   : > { %1366 = vst.msk [vmem:[%s2036_s10 + $0x1e0] sm:$0xff] %vm778_vm0, %v1302_v40  ;;  %v1305_v45 = vadd.f32 %v2028_v43, %v1234_v42  ;;  %v1232_v46 = vmul.f32 %v2023_v41, %v1152_v44 }
 0x133   : > { %1335 = vst.msk [vmem:[%s2036_s10 + $0xe8] sm:$0xff] %vm778_vm0, %v1271_v8 }
 0x134   : > { %1369 = vst.msk [vmem:[%s2036_s10 + $0x1f8] sm:$0xff] %vm778_vm0, %v1305_v45  ;;  %v1303_v47 = vadd.f32 %v2028_v43, %v1232_v46 }
 0x136   : > { %1367 = vst.msk [vmem:[%s2036_s10 + $0x1e8] sm:$0xff] %vm778_vm0, %v1303_v47 }
 0x137 PF: > { %s14_s15 = sadd.s32 1, %s1738_s15  }
 0x138   : > { %p11_p4 = scmp.ge.s32.totalorder %s14_s15, 6  }
 0x13a   :  { %13 = sbr.rel (!%p11_p4) target bundleno = 1 (0x1), region = 66 }

// kernel: _lambda_.15
= control target key start
LH: loop header
LB: loop body
LE: loop exit
PB: predicated region body
PF: predicated region fallthrough
CT: control target
= control target key end

     0   :  { %s515_s6 = smov 0   ;;  %s828_s0 = inlined_call_operand.vmem [shape: f32[32,2,16,128], index: 0, kind: input, shape index: {}]   ;;  %s829_s1 = inlined_call_operand.vmem [shape: f32[32,16,64], index: 1, kind: output, shape index: {}]  }
   0x1 LB: > { %s472_s7 = sadd.s32 4294967295, %s502_s6   ;;  %p476_p0 = scmp.ge.s32.totalorder %s502_s6, 1  ;;  %s502_s6 = sphi %s515_s6, %s11_s6  }
   0x2   : > { %p89_p1 = scmp.lt.s32.totalorder %s502_s6, 3 }
   0x4   : > { %p90_p2 = pnand %p476_p0, %p89_p1 }
   0x5   : > { %s477_s8 = sshll.u32 (!%p90_p2), %s472_s7, 4  ;;  %s504_s13 = smov (!%p90_p2), 64  }
   0x6   : > { %93 = sbr.rel (%p90_p2) target bundleno = 196 (0xc4), region = 24  ;;  %p112_p3 = scmp.lt.s32.totalorder (!%p90_p2), %s477_s8, 31 }
   0xb   : > { %s831_s8 = smov (!%p112_p3, %s477_s8), 31  ;;  %vm381_vm0 = vcmask 523264  }
   0xc   : > { %s485_s9 = sshll.u32 %s831_s8, 5  ;;  %s486_s14 = sshll.u32 %s831_s8, 4 }
   0xd   : > { %s529_s12 = scalar_lea.vmem %s828_s0, %s485_s9  ;;  %s727_s17 = scalar_lea.vmem %s829_s1, %s486_s14 }
   0xe   : > { %v129_v0 = vld [vmem:[%s529_s12 + $0x20] sm:$0xff]  ;;  %v131_v1 = vld [vmem:[%s529_s12 + $0x30] sm:$0xff]  ;;  %v130_v5 = vld [vmem:[%s529_s12 + $0x28] sm:$0xff] }
   0xf   : > { %v125_v2 = vld [vmem:[%s529_s12] sm:$0xff]  ;;  %v534_v3 = vmax.f32 %v129_v0, %v131_v1  ;;  %v127_v4 = vld [vmem:[%s529_s12 + $0x10] sm:$0xff]  ;;  %v132_v6 = vld [vmem:[%s529_s12 + $0x38] sm:$0xff] }
  0x10   : > { %v539_v7 = vmax.f32 %v125_v2, %v127_v4  ;;  %v126_v8 = vld [vmem:[%s529_s12 + $0x8] sm:$0xff]  ;;  %v128_v9 = vld [vmem:[%s529_s12 + $0x18] sm:$0xff]  ;;  %v545_v10 = vmax.f32 %v130_v5, %v132_v6  ;;  %v133_v14 = vld [vmem:[%s529_s12 + $0x40] sm:$0xff] }
  0x11   : > { %257 = vrot.lane.b32.xlu1 %v534_v3, %s504_s13  ;;  %v549_v11 = vmax.f32 %v126_v8, %v128_v9  ;;  %v134_v12 = vld [vmem:[%s529_s12 + $0x48] sm:$0xff]  ;;  %v136_v13 = vld [vmem:[%s529_s12 + $0x58] sm:$0xff]  ;;  %v135_v15 = vld [vmem:[%s529_s12 + $0x50] sm:$0xff] }
  0x12   : > { %253 = vrot.lane.b32.xlu0 %v539_v7, %s504_s13  ;;  %v557_v16 = vmax.f32 %v134_v12, %v136_v13  ;;  %v561_v17 = vmax.f32 %v133_v14, %v135_v15  ;;  %v138_v18 = vld [vmem:[%s529_s12 + $0x68] sm:$0xff]  ;;  %v140_v19 = vld [vmem:[%s529_s12 + $0x78] sm:$0xff]  ;;  %v137_v20 = vld [vmem:[%s529_s12 + $0x60] sm:$0xff] }
  0x13   : > { %v139_v21 = vld [vmem:[%s529_s12 + $0x70] sm:$0xff]  ;;  %v569_v22 = vmax.f32 %v138_v18, %v140_v19  ;;  %v142_v24 = vld [vmem:[%s529_s12 + $0x88] sm:$0xff]  ;;  %v144_v25 = vld [vmem:[%s529_s12 + $0x98] sm:$0xff] }
  0x14   : > { %v573_v23 = vmax.f32 %v137_v20, %v139_v21  ;;  %v141_v26 = vld [vmem:[%s529_s12 + $0x80] sm:$0xff]  ;;  %v143_v27 = vld [vmem:[%s529_s12 + $0x90] sm:$0xff]  ;;  %v581_v28 = vmax.f32 %v142_v24, %v144_v25  ;;  %v146_v30 = vld [vmem:[%s529_s12 + $0xa8] sm:$0xff] }
  0x15   : > { %259 = vrot.lane.b32.xlu1 %v545_v10, %s504_s13  ;;  %v585_v29 = vmax.f32 %v141_v26, %v143_v27  ;;  %v148_v31 = vld [vmem:[%s529_s12 + $0xb8] sm:$0xff]  ;;  %v145_v32 = vld [vmem:[%s529_s12 + $0xa0] sm:$0xff]  ;;  %v147_v33 = vld [vmem:[%s529_s12 + $0xb0] sm:$0xff] }
  0x16   : > { %255 = vrot.lane.b32.xlu0 %v549_v11, %s504_s13  ;;  %v593_v34 = vmax.f32 %v146_v30, %v148_v31  ;;  %v597_v35 = vmax.f32 %v145_v32, %v147_v33  ;;  %v150_v36 = vld [vmem:[%s529_s12 + $0xc8] sm:$0xff]  ;;  %v152_v37 = vld [vmem:[%s529_s12 + $0xd8] sm:$0xff]  ;;  %v149_v38 = vld [vmem:[%s529_s12 + $0xc0] sm:$0xff] }
  0x17   : > { %v151_v39 = vld [vmem:[%s529_s12 + $0xd0] sm:$0xff]  ;;  %v605_v40 = vmax.f32 %v150_v36, %v152_v37  ;;  %v154_v42 = vld [vmem:[%s529_s12 + $0xe8] sm:$0xff]  ;;  %v156_v43 = vld [vmem:[%s529_s12 + $0xf8] sm:$0xff] }
  0x18   : > { %v609_v41 = vmax.f32 %v149_v38, %v151_v39  ;;  %v153_v44 = vld [vmem:[%s529_s12 + $0xe0] sm:$0xff]  ;;  %v155_v45 = vld [vmem:[%s529_s12 + $0xf0] sm:$0xff]  ;;  %v617_v46 = vmax.f32 %v154_v42, %v156_v43  ;;  %v158_v48 = vld [vmem:[%s529_s12 + $0x108] sm:$0xff] }
  0x19   : > { %263 = vrot.lane.b32.xlu1 %v557_v16, %s504_s13  ;;  %v621_v47 = vmax.f32 %v153_v44, %v155_v45  ;;  %v160_v49 = vld [vmem:[%s529_s12 + $0x118] sm:$0xff]  ;;  %v157_v50 = vld [vmem:[%s529_s12 + $0x100] sm:$0xff]  ;;  %v159_v51 = vld [vmem:[%s529_s12 + $0x110] sm:$0xff] }
  0x1a   : > { %261 = vrot.lane.b32.xlu0 %v561_v17, %s504_s13  ;;  %v629_v52 = vmax.f32 %v158_v48, %v160_v49  ;;  %v633_v53 = vmax.f32 %v157_v50, %v159_v51  ;;  %v162_v54 = vld [vmem:[%s529_s12 + $0x128] sm:$0xff]  ;;  %v164_v55 = vld [vmem:[%s529_s12 + $0x138] sm:$0xff]  ;;  %v161_v56 = vld [vmem:[%s529_s12 + $0x120] sm:$0xff] }
  0x1b   : > { %v163_v57 = vld [vmem:[%s529_s12 + $0x130] sm:$0xff]  ;;  %v641_v58 = vmax.f32 %v162_v54, %v164_v55  ;;  %v166_v60 = vld [vmem:[%s529_s12 + $0x148] sm:$0xff]  ;;  %v168_v61 = vld [vmem:[%s529_s12 + $0x158] sm:$0xff] }
  0x1c   : > { %v645_v59 = vmax.f32 %v161_v56, %v163_v57  ;;  %v165_v62 = vld [vmem:[%s529_s12 + $0x140] sm:$0xff]  ;;  %v167_v63 = vld [vmem:[%s529_s12 + $0x150] sm:$0xff]  ;;  %v653_v0 = vmax.f32 %v166_v60, %v168_v61  ;;  %v170_v2 = vld [vmem:[%s529_s12 + $0x168] sm:$0xff] }
  0x1d   : > { %267 = vrot.lane.b32.xlu1 %v569_v22, %s504_s13  ;;  %v657_v1 = vmax.f32 %v165_v62, %v167_v63  ;;  %v172_v4 = vld [vmem:[%s529_s12 + $0x178] sm:$0xff]  ;;  %v169_v5 = vld [vmem:[%s529_s12 + $0x160] sm:$0xff]  ;;  %v171_v6 = vld [vmem:[%s529_s12 + $0x170] sm:$0xff] }
  0x1e   : > { %265 = vrot.lane.b32.xlu0 %v573_v23, %s504_s13  ;;  %v665_v8 = vmax.f32 %v170_v2, %v172_v4  ;;  %v669_v9 = vmax.f32 %v169_v5, %v171_v6  ;;  %v174_v12 = vld [vmem:[%s529_s12 + $0x188] sm:$0xff]  ;;  %v176_v13 = vld [vmem:[%s529_s12 + $0x198] sm:$0xff]  ;;  %v173_v14 = vld [vmem:[%s529_s12 + $0x180] sm:$0xff] }
  0x1f   : > { %v175_v15 = vld [vmem:[%s529_s12 + $0x190] sm:$0xff]  ;;  %v677_v18 = vmax.f32 %v174_v12, %v176_v13  ;;  %v178_v20 = vld [vmem:[%s529_s12 + $0x1a8] sm:$0xff]  ;;  %v180_v21 = vld [vmem:[%s529_s12 + $0x1b8] sm:$0xff] }
  0x20   : > { %v681_v19 = vmax.f32 %v173_v14, %v175_v15  ;;  %v177_v24 = vld [vmem:[%s529_s12 + $0x1a0] sm:$0xff]  ;;  %v179_v25 = vld [vmem:[%s529_s12 + $0x1b0] sm:$0xff]  ;;  %v689_v26 = vmax.f32 %v178_v20, %v180_v21  ;;  %v182_v30 = vld [vmem:[%s529_s12 + $0x1c8] sm:$0xff] }
  0x21   : > { %271 = vrot.lane.b32.xlu1 %v581_v28, %s504_s13  ;;  %v693_v27 = vmax.f32 %v177_v24, %v179_v25  ;;  %v184_v31 = vld [vmem:[%s529_s12 + $0x1d8] sm:$0xff]  ;;  %v181_v32 = vld [vmem:[%s529_s12 + $0x1c0] sm:$0xff]  ;;  %v183_v33 = vld [vmem:[%s529_s12 + $0x1d0] sm:$0xff] }
  0x22   : > { %269 = vrot.lane.b32.xlu0 %v585_v29, %s504_s13  ;;  %v701_v36 = vmax.f32 %v182_v30, %v184_v31  ;;  %v705_v37 = vmax.f32 %v181_v32, %v183_v33  ;;  %v186_v38 = vld [vmem:[%s529_s12 + $0x1e8] sm:$0xff]  ;;  %v188_v39 = vld [vmem:[%s529_s12 + $0x1f8] sm:$0xff]  ;;  %v185_v42 = vld [vmem:[%s529_s12 + $0x1e0] sm:$0xff] }
  0x23   : > { %v187_v43 = vld [vmem:[%s529_s12 + $0x1f0] sm:$0xff]  ;;  %v713_v44 = vmax.f32 %v186_v38, %v188_v39 }
  0x24   : > { %v717_v45 = vmax.f32 %v185_v42, %v187_v43 }
  0x25   : > { %275 = vrot.lane.b32.xlu1 %v593_v34, %s504_s13 }
  0x26   : > { %273 = vrot.lane.b32.xlu0 %v597_v35, %s504_s13 }
  0x29   : > { %279 = vrot.lane.b32.xlu1 %v605_v40, %s504_s13 }
  0x2a   : > { %277 = vrot.lane.b32.xlu0 %v609_v41, %s504_s13 }
  0x2d   : > { %283 = vrot.lane.b32.xlu1 %v617_v46, %s504_s13 }
  0x2e   : > { %281 = vrot.lane.b32.xlu0 %v621_v47, %s504_s13 }
  0x31   : > { %287 = vrot.lane.b32.xlu1 %v629_v52, %s504_s13 }
  0x32   : > { %285 = vrot.lane.b32.xlu0 %v633_v53, %s504_s13 }
  0x35   : > { %291 = vrot.lane.b32.xlu1 %v641_v58, %s504_s13 }
  0x36   : > { %289 = vrot.lane.b32.xlu0 %v645_v59, %s504_s13 }
  0x39   : > { %295 = vrot.lane.b32.xlu1 %v653_v0, %s504_s13 }
  0x3a   : > { %293 = vrot.lane.b32.xlu0 %v657_v1, %s504_s13 }
  0x3d   : > { %299 = vrot.lane.b32.xlu1 %v665_v8, %s504_s13 }
  0x3e   : > { %297 = vrot.lane.b32.xlu0 %v669_v9, %s504_s13 }
  0x41   : > { %303 = vrot.lane.b32.xlu1 %v677_v18, %s504_s13 }
  0x42   : > { %301 = vrot.lane.b32.xlu0 %v681_v19, %s504_s13 }
  0x45   : > { %307 = vrot.lane.b32.xlu1 %v689_v26, %s504_s13 }
  0x46   : > { %305 = vrot.lane.b32.xlu0 %v693_v27, %s504_s13 }
  0x49   : > { %311 = vrot.lane.b32.xlu1 %v701_v36, %s504_s13 }
  0x4a   : > { %309 = vrot.lane.b32.xlu0 %v705_v37, %s504_s13 }
  0x4d   : > { %315 = vrot.lane.b32.xlu1 %v713_v44, %s504_s13 }
  0x4e   : > { %313 = vrot.lane.b32.xlu0 %v717_v45, %s504_s13 }
  0x83   : > { %v258_v48 = vpop.permute.xlu1 %257 }
  0x84   : > { %v351_v49 = vmax.f32 %v534_v3, %v258_v48  ;;  %v254_v50 = vpop.permute.xlu0 %253 }
  0x85   : > { %v349_v51 = vmax.f32 %v539_v7, %v254_v50 }
  0x86   : > { %384 = vst.msk [vmem:[%s727_s17 + $0x10] sm:$0xff] %vm381_vm0, %v351_v49 }
  0x87   : > { %382 = vst.msk [vmem:[%s727_s17] sm:$0xff] %vm381_vm0, %v349_v51  ;;  %v260_v54 = vpop.permute.xlu1 %259 }
  0x88   : > { %v352_v55 = vmax.f32 %v545_v10, %v260_v54  ;;  %v256_v56 = vpop.permute.xlu0 %255 }
  0x89   : > { %v350_v57 = vmax.f32 %v549_v11, %v256_v56 }
  0x8a   : > { %385 = vst.msk [vmem:[%s727_s17 + $0x18] sm:$0xff] %vm381_vm0, %v352_v55 }
  0x8b   : > { %383 = vst.msk [vmem:[%s727_s17 + $0x8] sm:$0xff] %vm381_vm0, %v350_v57  ;;  %v264_v3 = vpop.permute.xlu1 %263 }
  0x8c   : > { %v354_v7 = vmax.f32 %v557_v16, %v264_v3  ;;  %v262_v60 = vpop.permute.xlu0 %261 }
  0x8d   : > { %v353_v61 = vmax.f32 %v561_v17, %v262_v60 }
  0x8e   : > { %387 = vst.msk [vmem:[%s727_s17 + $0x28] sm:$0xff] %vm381_vm0, %v354_v7 }
  0x8f   : > { %386 = vst.msk [vmem:[%s727_s17 + $0x20] sm:$0xff] %vm381_vm0, %v353_v61  ;;  %v268_v10 = vpop.permute.xlu1 %267 }
  0x90   : > { %v356_v11 = vmax.f32 %v569_v22, %v268_v10  ;;  %v266_v62 = vpop.permute.xlu0 %265 }
  0x91   : > { %v355_v63 = vmax.f32 %v573_v23, %v266_v62 }
  0x92   : > { %389 = vst.msk [vmem:[%s727_s17 + $0x38] sm:$0xff] %vm381_vm0, %v356_v11 }
  0x93   : > { %388 = vst.msk [vmem:[%s727_s17 + $0x30] sm:$0xff] %vm381_vm0, %v355_v63  ;;  %v272_v16 = vpop.permute.xlu1 %271 }
  0x94   : > { %v358_v17 = vmax.f32 %v581_v28, %v272_v16  ;;  %v270_v2 = vpop.permute.xlu0 %269 }
  0x95   : > { %v357_v4 = vmax.f32 %v585_v29, %v270_v2 }
  0x96   : > { %391 = vst.msk [vmem:[%s727_s17 + $0x48] sm:$0xff] %vm381_vm0, %v358_v17 }
  0x97   : > { %390 = vst.msk [vmem:[%s727_s17 + $0x40] sm:$0xff] %vm381_vm0, %v357_v4  ;;  %v276_v22 = vpop.permute.xlu1 %275 }
  0x98   : > { %v360_v23 = vmax.f32 %v593_v34, %v276_v22  ;;  %v274_v5 = vpop.permute.xlu0 %273 }
  0x99   : > { %v359_v6 = vmax.f32 %v597_v35, %v274_v5 }
  0x9a   : > { %393 = vst.msk [vmem:[%s727_s17 + $0x58] sm:$0xff] %vm381_vm0, %v360_v23 }
  0x9b   : > { %392 = vst.msk [vmem:[%s727_s17 + $0x50] sm:$0xff] %vm381_vm0, %v359_v6  ;;  %v280_v28 = vpop.permute.xlu1 %279 }
  0x9c   : > { %v362_v29 = vmax.f32 %v605_v40, %v280_v28  ;;  %v278_v12 = vpop.permute.xlu0 %277 }
  0x9d   : > { %v361_v13 = vmax.f32 %v609_v41, %v278_v12 }
  0x9e   : > { %395 = vst.msk [vmem:[%s727_s17 + $0x68] sm:$0xff] %vm381_vm0, %v362_v29 }
  0x9f   : > { %394 = vst.msk [vmem:[%s727_s17 + $0x60] sm:$0xff] %vm381_vm0, %v361_v13  ;;  %v284_v34 = vpop.permute.xlu1 %283 }
  0xa0   : > { %v364_v35 = vmax.f32 %v617_v46, %v284_v34  ;;  %v282_v14 = vpop.permute.xlu0 %281 }
  0xa1   : > { %v363_v15 = vmax.f32 %v621_v47, %v282_v14 }
  0xa2   : > { %397 = vst.msk [vmem:[%s727_s17 + $0x78] sm:$0xff] %vm381_vm0, %v364_v35 }
  0xa3   : > { %396 = vst.msk [vmem:[%s727_s17 + $0x70] sm:$0xff] %vm381_vm0, %v363_v15  ;;  %v288_v40 = vpop.permute.xlu1 %287 }
  0xa4   : > { %v366_v41 = vmax.f32 %v629_v52, %v288_v40  ;;  %v286_v20 = vpop.permute.xlu0 %285 }
  0xa5   : > { %v365_v21 = vmax.f32 %v633_v53, %v286_v20 }
  0xa6   : > { %399 = vst.msk [vmem:[%s727_s17 + $0x88] sm:$0xff] %vm381_vm0, %v366_v41 }
  0xa7   : > { %398 = vst.msk [vmem:[%s727_s17 + $0x80] sm:$0xff] %vm381_vm0, %v365_v21  ;;  %v292_v46 = vpop.permute.xlu1 %291 }
  0xa8   : > { %v368_v47 = vmax.f32 %v641_v58, %v292_v46  ;;  %v290_v24 = vpop.permute.xlu0 %289 }
  0xa9   : > { %v367_v25 = vmax.f32 %v645_v59, %v290_v24 }
  0xaa   : > { %401 = vst.msk [vmem:[%s727_s17 + $0x98] sm:$0xff] %vm381_vm0, %v368_v47 }
  0xab   : > { %400 = vst.msk [vmem:[%s727_s17 + $0x90] sm:$0xff] %vm381_vm0, %v367_v25  ;;  %v296_v52 = vpop.permute.xlu1 %295 }
  0xac   : > { %v370_v53 = vmax.f32 %v653_v0, %v296_v52  ;;  %v294_v30 = vpop.permute.xlu0 %293 }
  0xad   : > { %v369_v31 = vmax.f32 %v657_v1, %v294_v30 }
  0xae   : > { %403 = vst.msk [vmem:[%s727_s17 + $0xa8] sm:$0xff] %vm381_vm0, %v370_v53 }
  0xaf   : > { %402 = vst.msk [vmem:[%s727_s17 + $0xa0] sm:$0xff] %vm381_vm0, %v369_v31  ;;  %v300_v58 = vpop.permute.xlu1 %299 }
  0xb0   : > { %v372_v59 = vmax.f32 %v665_v8, %v300_v58  ;;  %v298_v32 = vpop.permute.xlu0 %297 }
  0xb1   : > { %v371_v33 = vmax.f32 %v669_v9, %v298_v32 }
  0xb2   : > { %405 = vst.msk [vmem:[%s727_s17 + $0xb8] sm:$0xff] %vm381_vm0, %v372_v59 }
  0xb3   : > { %404 = vst.msk [vmem:[%s727_s17 + $0xb0] sm:$0xff] %vm381_vm0, %v371_v33  ;;  %v304_v0 = vpop.permute.xlu1 %303 }
  0xb4   : > { %v374_v1 = vmax.f32 %v677_v18, %v304_v0  ;;  %v302_v38 = vpop.permute.xlu0 %301 }
  0xb5   : > { %v373_v39 = vmax.f32 %v681_v19, %v302_v38 }
  0xb6   : > { %407 = vst.msk [vmem:[%s727_s17 + $0xc8] sm:$0xff] %vm381_vm0, %v374_v1 }
  0xb7   : > { %406 = vst.msk [vmem:[%s727_s17 + $0xc0] sm:$0xff] %vm381_vm0, %v373_v39  ;;  %v308_v8 = vpop.permute.xlu1 %307 }
  0xb8   : > { %v376_v9 = vmax.f32 %v689_v26, %v308_v8  ;;  %v306_v42 = vpop.permute.xlu0 %305 }
  0xb9   : > { %v375_v43 = vmax.f32 %v693_v27, %v306_v42 }
  0xba   : > { %409 = vst.msk [vmem:[%s727_s17 + $0xd8] sm:$0xff] %vm381_vm0, %v376_v9 }
  0xbb   : > { %408 = vst.msk [vmem:[%s727_s17 + $0xd0] sm:$0xff] %vm381_vm0, %v375_v43  ;;  %v312_v18 = vpop.permute.xlu1 %311 }
  0xbc   : > { %v378_v48 = vmax.f32 %v701_v36, %v312_v18  ;;  %v310_v19 = vpop.permute.xlu0 %309 }
  0xbd   : > { %v377_v49 = vmax.f32 %v705_v37, %v310_v19 }
  0xbe   : > { %411 = vst.msk [vmem:[%s727_s17 + $0xe8] sm:$0xff] %vm381_vm0, %v378_v48 }
  0xbf   : > { %410 = vst.msk [vmem:[%s727_s17 + $0xe0] sm:$0xff] %vm381_vm0, %v377_v49  ;;  %v316_v50 = vpop.permute.xlu1 %315 }
  0xc0   : > { %v380_v26 = vmax.f32 %v713_v44, %v316_v50  ;;  %v314_v51 = vpop.permute.xlu0 %313 }
  0xc1   : > { %v379_v27 = vmax.f32 %v717_v45, %v314_v51 }
  0xc2   : > { %413 = vst.msk [vmem:[%s727_s17 + $0xf8] sm:$0xff] %vm381_vm0, %v380_v26 }
  0xc3   : > { %412 = vst.msk [vmem:[%s727_s17 + $0xf0] sm:$0xff] %vm381_vm0, %v379_v27 }
  0xc4 PF: > { %s11_s6 = sadd.s32 1, %s502_s6  }
  0xc5   : > { %p8_p4 = scmp.ge.s32.totalorder %s11_s6, 4  }
  0xc7   :  { %10 = sbr.rel (!%p8_p4) target bundleno = 1 (0x1), region = 54 }

// kernel: _lambda_.16
= control target key start
LH: loop header
LB: loop body
LE: loop exit
PB: predicated region body
PF: predicated region fallthrough
CT: control target
= control target key end

     0   :  { %s2322_s15 = smov 0   ;;  %s2891_s0 = inlined_call_operand.vmem [shape: bf16[512,576], index: 0, kind: input, shape index: {}]   ;;  %s2892_s1 = inlined_call_operand.vmem [shape: bf16[576,128], index: 1, kind: input, shape index: {}]   ;;  %s2893_s2 = inlined_call_operand.vmem [shape: f32[1,128], index: 2, kind: input, shape index: {}]   ;;  %s2894_s3 = inlined_call_operand.vmem [shape: f32[1,128], index: 3, kind: input, shape index: {}]   ;;  %s2895_s4 = inlined_call_operand.vmem [shape: f32[512,128], index: 4, kind: output, shape index: {}]  }
   0x1 LB: > { %s1687_s16 = sadd.s32 4294967295, %s2295_s15   ;;  %p1691_p0 = scmp.ge.s32.totalorder %s2295_s15, 1  ;;  %s2295_s15 = sphi %s2322_s15, %s14_s15  }
   0x2   : > { %p164_p1 = scmp.lt.s32.totalorder %s2295_s15, 3 }
   0x4   : > { %p165_p2 = pnand %p1691_p0, %p164_p1 }
   0x6   : > { %168 = sbr.rel (%p165_p2) target bundleno = 406 (0x196), region = 36 }
   0xb   : > { %v2141_v0 = vld [vmem:[%s2892_s1 + $0x78] sm:$0xff]   ;;  %s1692_s19 = sshll.u32 %s1687_s16, 5  ;;  %v2143_v2 = vld [vmem:[%s2892_s1 + $0x70] sm:$0xff]   ;;  %v2145_v4 = vld [vmem:[%s2892_s1 + $0x68] sm:$0xff]   ;;  %vm989_vm0 = vcmask 523264  }
   0xc   : > { %v2142_v1 = vld [vmem:[%s2892_s1 + $0x38] sm:$0xff]   ;;  %1832 = vmatprep.subr.bf16.mxu0 %v2141_v0  ;;  %2116 = vmatprep.subr.bf16.mxu1 %v2141_v0  ;;  %p192_p3 = scmp.lt.s32.totalorder %s1692_s19, 63  ;;  %v2144_v3 = vld [vmem:[%s2892_s1 + $0x30] sm:$0xff]   ;;  %v2146_v5 = vld [vmem:[%s2892_s1 + $0x28] sm:$0xff]  }
   0xd   : > { %1833 = vmatpush3.bf16.msra.mxu0 %v2142_v1  ;;  %2124 = vmatpush3.bf16.msra.mxu1 %v2142_v1  ;;  %v2147_v6 = vld [vmem:[%s2892_s1 + $0x60] sm:$0xff]   ;;  %v2149_v8 = vld [vmem:[%s2892_s1 + $0x58] sm:$0xff]   ;;  %v2151_v10 = vld [vmem:[%s2892_s1 + $0x50] sm:$0xff]  }
   0xe   : > { %1834 = vmatprep.subr.bf16.mxu0 %v2143_v2  ;;  %2117 = vmatprep.subr.bf16.mxu1 %v2143_v2  ;;  %s2933_s19 = smov (!%p192_p3, %s1692_s19), 63  ;;  %v2148_v7 = vld [vmem:[%s2892_s1 + $0x20] sm:$0xff]   ;;  %v2150_v9 = vld [vmem:[%s2892_s1 + $0x18] sm:$0xff]   ;;  %v2152_v13 = vld [vmem:[%s2892_s1 + $0x10] sm:$0xff]  }
   0xf   : > { %s2132_s6 = smul.u32 20, %s2933_s19  ;;  %v2153_v14 = vld [vmem:[%s2892_s1 + $0x48] sm:$0xff]   ;;  %v2155_v16 = vld [vmem:[%s2892_s1 + $0x40] sm:$0xff]   ;;  %v2163_v18 = vld [vmem:[%s2892_s1 + $0xf8] sm:$0xff]   ;;  %s1695_s25 = sshll.u32 %s2933_s19, 3 }
  0x10   : > { %v2154_v15 = vld [vmem:[%s2892_s1 + $0x8] sm:$0xff]   ;;  %v2156_v17 = vld [vmem:[%s2892_s1] sm:$0xff]   ;;  %v2166_v19 = vld [vmem:[%s2892_s1 + $0x118] sm:$0xff]   ;;  %s2700_s19 = scalar_lea.vmem %s2895_s4, %s1695_s25 }
  0x11   : > { %1835 = vmatpush3.bf16.msra.mxu0 %v2144_v3  ;;  %2125 = vmatpush3.bf16.msra.mxu1 %v2144_v3  ;;  %s2363_s13 = scalar_lea.vmem %s2891_s0, %s2132_s6  ;;  %v2164_v22 = vld [vmem:[%s2892_s1 + $0xb8] sm:$0xff]   ;;  %v2165_v23 = vld [vmem:[%s2892_s1 + $0xf0] sm:$0xff]   ;;  %v2174_v28 = vld [vmem:[%s2892_s1 + $0xe8] sm:$0xff]  }
  0x12   : > { %1836 = vmatprep.subr.bf16.mxu0 %v2145_v4  ;;  %2118 = vmatprep.subr.bf16.mxu1 %v2145_v4  ;;  %v2159_v11 = vld [vmem:[%s2363_s13 + $0x4] ss:$20 sps:$4 sm:$0xff]   ;;  %v2157_v20 = vld [vmem:[%s2363_s13] ss:$20 sps:$4 sm:$0xff]   ;;  %v2172_v27 = vld [vmem:[%s2363_s13 + $0x28] ss:$20 sps:$4 sm:$0xff]  }
  0x13   : > { %v2162_v12 = vld [vmem:[%s2363_s13 + $0x1e4] ss:$20 sps:$4 sm:$0xff]   ;;  %1070 = vmatprep.mubr.bf16.mxu0 %v2159_v11  ;;  %v2160_v21 = vld [vmem:[%s2363_s13 + $0x1e0] ss:$20 sps:$4 sm:$0xff]   ;;  %v2173_v29 = vld [vmem:[%s2363_s13 + $0x208] ss:$20 sps:$4 sm:$0xff]  }
  0x14   : > { %1166 = vmatprep.mubr.bf16.mxu1 %v2162_v12  ;;  %v2168_v24 = vld [vmem:[%s2363_s13 + $0x2c] ss:$20 sps:$4 sm:$0xff]   ;;  %v2167_v26 = vld [vmem:[%s2892_s1 + $0xb0] sm:$0xff]   ;;  %v2184_v37 = vld [vmem:[%s2892_s1 + $0xd8] sm:$0xff]  }
  0x15   : > { %1837 = vmatpush3.bf16.msra.mxu0 %v2146_v5  ;;  %2126 = vmatpush3.bf16.msra.mxu1 %v2146_v5  ;;  %v2170_v25 = vld [vmem:[%s2363_s13 + $0x20c] ss:$20 sps:$4 sm:$0xff]   ;;  %v2178_v32 = vld [vmem:[%s2363_s13 + $0x54] ss:$20 sps:$4 sm:$0xff]   ;;  %v2182_v36 = vld [vmem:[%s2363_s13 + $0x50] ss:$20 sps:$4 sm:$0xff]  }
  0x16   : > { %1838 = vmatprep.subr.bf16.mxu0 %v2147_v6  ;;  %2119 = vmatprep.subr.bf16.mxu1 %v2147_v6  ;;  %v2175_v30 = vld [vmem:[%s2892_s1 + $0xa8] sm:$0xff]   ;;  %v2176_v31 = vld [vmem:[%s2892_s1 + $0xe0] sm:$0xff]   ;;  %v2197_v35 = vld [vmem:[%s2892_s1 + $0x110] sm:$0xff]  }
  0x17   : > { %v2180_v33 = vld [vmem:[%s2363_s13 + $0x234] ss:$20 sps:$4 sm:$0xff]   ;;  %v2177_v34 = vld [vmem:[%s2892_s1 + $0xa0] sm:$0xff]   ;;  %v2185_v39 = vld [vmem:[%s2892_s1 + $0x98] sm:$0xff]  }
  0x18   : > { %v2183_v38 = vld [vmem:[%s2363_s13 + $0x230] ss:$20 sps:$4 sm:$0xff]   ;;  %v2192_v44 = vld [vmem:[%s2363_s13 + $0x78] ss:$20 sps:$4 sm:$0xff]   ;;  %v2201_v53 = vld [vmem:[%s2363_s13 + $0x8] ss:$20 sps:$4 sm:$0xff]  }
  0x19   : > { %1839 = vmatpush3.bf16.msra.mxu0 %v2148_v7  ;;  %2127 = vmatpush3.bf16.msra.mxu1 %v2148_v7  ;;  %v2186_v40 = vld [vmem:[%s2892_s1 + $0xd0] sm:$0xff]   ;;  %v2193_v45 = vld [vmem:[%s2363_s13 + $0x258] ss:$20 sps:$4 sm:$0xff]   ;;  %v2196_v49 = vld [vmem:[%s2892_s1 + $0xc0] sm:$0xff]  }
  0x1a   : > { %1840 = vmatprep.subr.bf16.mxu0 %v2149_v8  ;;  %2120 = vmatprep.subr.bf16.mxu1 %v2149_v8  ;;  %v2188_v41 = vld [vmem:[%s2363_s13 + $0x7c] ss:$20 sps:$4 sm:$0xff]   ;;  %v2194_v46 = vld [vmem:[%s2892_s1 + $0xc8] sm:$0xff]   ;;  %v2199_v50 = vld [vmem:[%s2363_s13 + $0xa4] ss:$20 sps:$4 sm:$0xff]  }
  0x1b   : > { %v2190_v42 = vld [vmem:[%s2363_s13 + $0x25c] ss:$20 sps:$4 sm:$0xff]   ;;  %v2217_v47 = vld [vmem:[%s2892_s1 + $0x108] sm:$0xff]   ;;  %v2198_v52 = vld [vmem:[%s2892_s1 + $0x80] sm:$0xff]  }
  0x1c   : > { %v2187_v43 = vld [vmem:[%s2892_s1 + $0x90] sm:$0xff]   ;;  %v2195_v48 = vld [vmem:[%s2892_s1 + $0x88] sm:$0xff]   ;;  %v2236_v56 = vld [vmem:[%s2892_s1 + $0x100] sm:$0xff]  }
  0x1d   : > { %1841 = vmatpush3.bf16.msra.mxu0 %v2150_v9  ;;  %2128 = vmatpush3.bf16.msra.mxu1 %v2150_v9  ;;  %v2203_v51 = vld [vmem:[%s2363_s13 + $0xc] ss:$20 sps:$4 sm:$0xff]   ;;  %v2207_v57 = vld [vmem:[%s2363_s13 + $0x34] ss:$20 sps:$4 sm:$0xff]   ;;  %v2210_v59 = vld [vmem:[%s2363_s13 + $0x30] ss:$20 sps:$4 sm:$0xff]  }
  0x1e   : > { %1842 = vmatprep.subr.bf16.mxu0 %v2151_v10  ;;  %2121 = vmatprep.subr.bf16.mxu1 %v2151_v10  ;;  %v2204_v54 = vld [vmem:[%s2363_s13 + $0xa0] ss:$20 sps:$4 sm:$0xff]   ;;  %v2209_v58 = vld [vmem:[%s2363_s13 + $0xc8] ss:$20 sps:$4 sm:$0xff]   ;;  %v2215_v62 = vld [vmem:[%s2363_s13 + $0xf0] ss:$20 sps:$4 sm:$0xff]  }
  0x1f   : > { %v2205_v55 = vld [vmem:[%s2363_s13 + $0xcc] ss:$20 sps:$4 sm:$0xff]   ;;  %v2211_v60 = vld [vmem:[%s2363_s13 + $0xf4] ss:$20 sps:$4 sm:$0xff]   ;;  %v2213_v61 = vld [vmem:[%s2363_s13 + $0x5c] ss:$20 sps:$4 sm:$0xff]  }
  0x20   : > { %v2216_v63 = vld [vmem:[%s2363_s13 + $0x58] ss:$20 sps:$4 sm:$0xff]   ;;  %v2218_v0 = vld [vmem:[%s2363_s13 + $0x11c] ss:$20 sps:$4 sm:$0xff]   ;;  %v2223_v3 = vld [vmem:[%s2363_s13 + $0x80] ss:$20 sps:$4 sm:$0xff]  }
  0x21   : > { %1843 = vmatpush3.bf16.msra.mxu0 %v2152_v13  ;;  %2129 = vmatpush3.bf16.msra.mxu1 %v2152_v13  ;;  %v2220_v1 = vld [vmem:[%s2363_s13 + $0x84] ss:$20 sps:$4 sm:$0xff]   ;;  %v2226_v5 = vld [vmem:[%s2363_s13 + $0xac] ss:$20 sps:$4 sm:$0xff]   ;;  %v2229_v7 = vld [vmem:[%s2363_s13 + $0xa8] ss:$20 sps:$4 sm:$0xff]  }
  0x22   : > { %1844 = vmatprep.subr.bf16.mxu0 %v2153_v14  ;;  %2122 = vmatprep.subr.bf16.mxu1 %v2153_v14  ;;  %v2222_v2 = vld [vmem:[%s2363_s13 + $0x118] ss:$20 sps:$4 sm:$0xff]   ;;  %v2228_v6 = vld [vmem:[%s2363_s13 + $0x140] ss:$20 sps:$4 sm:$0xff]   ;;  %v2234_v10 = vld [vmem:[%s2363_s13 + $0x168] ss:$20 sps:$4 sm:$0xff]  }
  0x23   : > { %v2224_v4 = vld [vmem:[%s2363_s13 + $0x144] ss:$20 sps:$4 sm:$0xff]   ;;  %v2230_v8 = vld [vmem:[%s2363_s13 + $0x16c] ss:$20 sps:$4 sm:$0xff]   ;;  %v2232_v9 = vld [vmem:[%s2363_s13 + $0xd4] ss:$20 sps:$4 sm:$0xff]  }
  0x24   : > { %v2235_v11 = vld [vmem:[%s2363_s13 + $0xd0] ss:$20 sps:$4 sm:$0xff]   ;;  %v2237_v12 = vld [vmem:[%s2363_s13 + $0x194] ss:$20 sps:$4 sm:$0xff]  }
  0x25   : > { %1845 = vmatpush3.bf16.msra.mxu0 %v2154_v15  ;;  %2130 = vmatpush3.bf16.msra.mxu1 %v2154_v15  ;;  %v2239_v13 = vld [vmem:[%s2363_s13 + $0xfc] ss:$20 sps:$4 sm:$0xff]   ;;  %v2242_v15 = vld [vmem:[%s2363_s13 + $0xf8] ss:$20 sps:$4 sm:$0xff]  }
  0x26   : > { %1846 = vmatprep.subr.bf16.mxu0 %v2155_v16  ;;  %2123 = vmatprep.subr.bf16.mxu1 %v2155_v16  ;;  %v2241_v14 = vld [vmem:[%s2363_s13 + $0x190] ss:$20 sps:$4 sm:$0xff]  }
  0x27   : > { %v2243_v16 = vld [vmem:[%s2363_s13 + $0x1bc] ss:$20 sps:$4 sm:$0xff]  }
  0x29   : > { %1847 = vmatpush3.bf16.msra.mxu0 %v2156_v17  ;;  %2131 = vmatpush3.bf16.msra.mxu1 %v2156_v17  ;;  %v2245_v17 = vld [vmem:[%s2363_s13 + $0x124] ss:$20 sps:$4 sm:$0xff]  }
  0x2a   : > { %1944 = vmatprep.subr.bf16.mxu1 %v2163_v18  ;;  %2076 = vmatprep.subr.bf16.mxu0 %v2166_v19  ;;  %v2247_v18 = vld [vmem:[%s2363_s13 + $0x1b8] ss:$20 sps:$4 sm:$0xff]  }
  0x2c   : > { %1071 = vmatmul.mubr.bf16.vlgmr.msra.gmra.mxu0 %v2157_v20  ;;  %1167 = vmatmul.mubr.bf16.vlgmr.msra.gmra.mxu1 %v2160_v21  ;;  %v2249_v20 = vld [vmem:[%s2363_s13 + $0x14c] ss:$20 sps:$4 sm:$0xff]   ;;  %v2251_v21 = vld [vmem:[%s2363_s13 + $0x10] ss:$20 sps:$4 sm:$0xff]  }
  0x2d   : > { %1945 = vmatpush3.bf16.msra.mxu1 %v2164_v22  ;;  %2077 = vmatpush3.bf16.msra.mxu0 %v2166_v19  ;;  %v2248_v19 = vld [vmem:[%s2363_s13 + $0x120] ss:$20 sps:$4 sm:$0xff]   ;;  %v2252_v22 = vld [vmem:[%s2363_s13 + $0x148] ss:$20 sps:$4 sm:$0xff]  }
  0x2e   : > { %1946 = vmatprep.subr.bf16.mxu1 %v2165_v23  ;;  %1078 = vmatprep.mubr.bf16.mxu0 %v2168_v24  ;;  %v2253_v23 = vld [vmem:[%s2363_s13 + $0x38] ss:$20 sps:$4 sm:$0xff]   ;;  %v2254_v24 = vld [vmem:[%s2363_s13 + $0x174] ss:$20 sps:$4 sm:$0xff]  }
  0x2f   : > { %1174 = vmatprep.mubr.bf16.mxu1 %v2170_v25  ;;  %2078 = vmatprep.subr.bf16.mxu0 %v2197_v35  ;;  %v2256_v25 = vld [vmem:[%s2363_s13 + $0x60] ss:$20 sps:$4 sm:$0xff]  }
  0x31   : > { %1947 = vmatpush3.bf16.msra.mxu1 %v2167_v26  ;;  %2079 = vmatpush3.bf16.msra.mxu0 %v2197_v35  ;;  %v2257_v26 = vld [vmem:[%s2363_s13 + $0x170] ss:$20 sps:$4 sm:$0xff]   ;;  %v2268_v35 = vld [vmem:[%s2363_s13 + $0x128] ss:$20 sps:$4 sm:$0xff]  }
  0x32   : > { %1948 = vmatprep.subr.bf16.mxu1 %v2174_v28  ;;  %2080 = vmatprep.subr.bf16.mxu0 %v2217_v47  ;;  %v2259_v28 = vld [vmem:[%s2363_s13 + $0x19c] ss:$20 sps:$4 sm:$0xff]  }
  0x34   : > { %1079 = vmatmul.mubr.bf16.gmra.mxu0 %v2172_v27  ;;  %1175 = vmatmul.mubr.bf16.gmra.mxu1 %v2173_v29  ;;  %v2258_v27 = vld [vmem:[%s2363_s13 + $0x88] ss:$20 sps:$4 sm:$0xff]   ;;  %v2261_v29 = vld [vmem:[%s2363_s13 + $0xb0] ss:$20 sps:$4 sm:$0xff]  }
  0x35   : > { %1949 = vmatpush3.bf16.msra.mxu1 %v2175_v30  ;;  %1086 = vmatprep.mubr.bf16.mxu0 %v2178_v32  ;;  %v2262_v30 = vld [vmem:[%s2363_s13 + $0x198] ss:$20 sps:$4 sm:$0xff]  }
  0x36   : > { %1950 = vmatprep.subr.bf16.mxu1 %v2176_v31  ;;  %1182 = vmatprep.mubr.bf16.mxu1 %v2180_v33  ;;  %v2263_v31 = vld [vmem:[%s2363_s13 + $0xd8] ss:$20 sps:$4 sm:$0xff]   ;;  %v2266_v33 = vld [vmem:[%s2363_s13 + $0x100] ss:$20 sps:$4 sm:$0xff]  }
  0x37   : > { %2081 = vmatpush3.bf16.msra.mxu0 %v2217_v47  ;;  %v2264_v32 = vld [vmem:[%s2363_s13 + $0x1c4] ss:$20 sps:$4 sm:$0xff]  }
  0x38   : > { %2082 = vmatprep.subr.bf16.mxu0 %v2236_v56  ;;  %v2283_v47 = vld [vmem:[%s2363_s13 + $0x218] ss:$20 sps:$4 sm:$0xff]  }
  0x39   : > { %1951 = vmatpush3.bf16.msra.mxu1 %v2177_v34  ;;  %v2267_v34 = vld [vmem:[%s2363_s13 + $0x1c0] ss:$20 sps:$4 sm:$0xff]  }
  0x3a   : > { %1952 = vmatprep.subr.bf16.mxu1 %v2184_v37  ;;  %v2271_v37 = vld [vmem:[%s2363_s13 + $0x150] ss:$20 sps:$4 sm:$0xff]  }
  0x3b   : > { %2083 = vmatpush3.bf16.msra.mxu0 %v2236_v56 }
  0x3c   : > { %1087 = vmatmul.mubr.bf16.gmra.mxu0 %v2182_v36  ;;  %1183 = vmatmul.mubr.bf16.gmra.mxu1 %v2183_v38  ;;  %v2269_v36 = vld [vmem:[%s2363_s13 + $0x1ec] ss:$20 sps:$4 sm:$0xff]   ;;  %v2272_v38 = vld [vmem:[%s2363_s13 + $0x1e8] ss:$20 sps:$4 sm:$0xff]  }
  0x3d   : > { %1953 = vmatpush3.bf16.msra.mxu1 %v2185_v39  ;;  %1094 = vmatprep.mubr.bf16.mxu0 %v2188_v41  ;;  %v2273_v39 = vld [vmem:[%s2363_s13 + $0x178] ss:$20 sps:$4 sm:$0xff]   ;;  %v2276_v41 = vld [vmem:[%s2363_s13 + $0x1a0] ss:$20 sps:$4 sm:$0xff]  }
  0x3e   : > { %1954 = vmatprep.subr.bf16.mxu1 %v2186_v40  ;;  %1190 = vmatprep.mubr.bf16.mxu1 %v2190_v42  ;;  %v2274_v40 = vld [vmem:[%s2363_s13 + $0x214] ss:$20 sps:$4 sm:$0xff]   ;;  %v2277_v42 = vld [vmem:[%s2363_s13 + $0x210] ss:$20 sps:$4 sm:$0xff]  }
  0x41   : > { %1955 = vmatpush3.bf16.msra.mxu1 %v2187_v43  ;;  %v2278_v43 = vld [vmem:[%s2363_s13 + $0x1c8] ss:$20 sps:$4 sm:$0xff]  }
  0x42   : > { %1956 = vmatprep.subr.bf16.mxu1 %v2194_v46  ;;  %v2282_v46 = vld [vmem:[%s2363_s13 + $0x238] ss:$20 sps:$4 sm:$0xff]  }
  0x44   : > { %1095 = vmatmul.mubr.bf16.gmra.mxu0 %v2192_v44  ;;  %1191 = vmatmul.mubr.bf16.gmra.mxu1 %v2193_v45  ;;  %v2279_v44 = vld [vmem:[%s2363_s13 + $0x23c] ss:$20 sps:$4 sm:$0xff]  }
  0x45   : > { %1957 = vmatpush3.bf16.msra.mxu1 %v2195_v48  ;;  %1102 = vmatprep.mubr.bf16.mxu0 %v2199_v50  ;;  %v2281_v45 = vld [vmem:[%s2363_s13 + $0x1f0] ss:$20 sps:$4 sm:$0xff]   ;;  %v2287_v50 = vld [vmem:[%s2363_s13 + $0x260] ss:$20 sps:$4 sm:$0xff]  }
  0x46   : > { %1958 = vmatprep.subr.bf16.mxu1 %v2196_v49  ;;  %1231 = vmatprep.mubr.bf16.mxu1 %v2203_v51  ;;  %v2284_v48 = vld [vmem:[%s2363_s13 + $0x264] ss:$20 sps:$4 sm:$0xff]   ;;  %v2286_v49 = vld [vmem:[%s2363_s13 + $0x240] ss:$20 sps:$4 sm:$0xff]   ;;  %v2288_v51 = vld [vmem:[%s2363_s13 + $0x268] ss:$20 sps:$4 sm:$0xff]  }
  0x49   : > { %1959 = vmatpush3.bf16.msra.mxu1 %v2198_v52 }
  0x4c   : > { %1103 = vmatmul.mubr.bf16.gmra.mxu0 %v2204_v54  ;;  %1232 = vmatmul.mubr.bf16.vlgmr.msra.gmra.mxu1 %v2201_v53 }
  0x4d   : > { %1110 = vmatprep.mubr.bf16.mxu0 %v2205_v55  ;;  %1239 = vmatprep.mubr.bf16.mxu1 %v2207_v57 }
  0x54   : > { %1111 = vmatmul.mubr.bf16.gmra.mxu0 %v2209_v58  ;;  %1240 = vmatmul.mubr.bf16.gmra.mxu1 %v2210_v59 }
  0x55   : > { %1118 = vmatprep.mubr.bf16.mxu0 %v2211_v60  ;;  %1247 = vmatprep.mubr.bf16.mxu1 %v2213_v61 }
  0x5c   : > { %1119 = vmatmul.mubr.bf16.gmra.mxu0 %v2215_v62  ;;  %1248 = vmatmul.mubr.bf16.gmra.mxu1 %v2216_v63 }
  0x5d   : > { %1126 = vmatprep.mubr.bf16.mxu0 %v2218_v0  ;;  %1255 = vmatprep.mubr.bf16.mxu1 %v2220_v1 }
  0x64   : > { %1127 = vmatmul.mubr.bf16.gmra.mxu0 %v2222_v2  ;;  %1256 = vmatmul.mubr.bf16.gmra.mxu1 %v2223_v3 }
  0x65   : > { %1134 = vmatprep.mubr.bf16.mxu0 %v2224_v4  ;;  %1263 = vmatprep.mubr.bf16.mxu1 %v2226_v5 }
  0x6c   : > { %1135 = vmatmul.mubr.bf16.gmra.mxu0 %v2228_v6  ;;  %1264 = vmatmul.mubr.bf16.gmra.mxu1 %v2229_v7 }
  0x6d   : > { %1142 = vmatprep.mubr.bf16.mxu0 %v2230_v8  ;;  %1271 = vmatprep.mubr.bf16.mxu1 %v2232_v9 }
  0x74   : > { %1143 = vmatmul.mubr.bf16.gmra.mxu0 %v2234_v10  ;;  %1272 = vmatmul.mubr.bf16.gmra.mxu1 %v2235_v11 }
  0x75   : > { %1150 = vmatprep.mubr.bf16.mxu0 %v2237_v12  ;;  %1279 = vmatprep.mubr.bf16.mxu1 %v2239_v13 }
  0x7c   : > { %1151 = vmatmul.mubr.bf16.gmra.mxu0 %v2241_v14  ;;  %1280 = vmatmul.mubr.bf16.gmra.mxu1 %v2242_v15 }
  0x7d   : > { %1158 = vmatprep.mubr.bf16.mxu0 %v2243_v16  ;;  %1287 = vmatprep.mubr.bf16.mxu1 %v2245_v17 }
  0x84   : > { %1159 = vmatmul.mubr.bf16.gmra.mxu0 %v2247_v18  ;;  %1288 = vmatmul.mubr.bf16.gmra.mxu1 %v2248_v19 }
  0x85   : > { %1295 = vmatprep.mubr.bf16.mxu1 %v2249_v20  ;;  %2084 = vmatprep.mubr.msk.bf16.mxu0 %vm989_vm0, %v2251_v21 }
  0x8c   : > { %1296 = vmatmul.mubr.bf16.gmra.mxu1 %v2252_v22  ;;  %2085 = vmatmul.mubr.msk.bf16.vlgmr.msra.gmra.mxu0 %vm989_vm0, %v2253_v23 }
  0x8d   : > { %1303 = vmatprep.mubr.bf16.mxu1 %v2254_v24  ;;  %2088 = vmatprep.mubr.msk.bf16.mxu0 %vm989_vm0, %v2256_v25 }
  0x94   : > { %1304 = vmatmul.mubr.bf16.gmra.mxu1 %v2257_v26  ;;  %2089 = vmatmul.mubr.msk.bf16.gmra.mxu0 %vm989_vm0, %v2258_v27 }
  0x95   : > { %1311 = vmatprep.mubr.bf16.mxu1 %v2259_v28  ;;  %2092 = vmatprep.mubr.msk.bf16.mxu0 %vm989_vm0, %v2261_v29 }
  0x9c   : > { %1312 = vmatmul.mubr.bf16.gmra.mxu1 %v2262_v30  ;;  %2093 = vmatmul.mubr.msk.bf16.gmra.mxu0 %vm989_vm0, %v2263_v31 }
  0x9d   : > { %1319 = vmatprep.mubr.bf16.mxu1 %v2264_v32  ;;  %2096 = vmatprep.mubr.msk.bf16.mxu0 %vm989_vm0, %v2266_v33 }
  0xa4   : > { %1320 = vmatmul.mubr.bf16.gmra.mxu1 %v2267_v34  ;;  %2097 = vmatmul.mubr.msk.bf16.gmra.mxu0 %vm989_vm0, %v2268_v35 }
  0xa5   : > { %1327 = vmatprep.mubr.bf16.mxu1 %v2269_v36  ;;  %2100 = vmatprep.mubr.msk.bf16.mxu0 %vm989_vm0, %v2271_v37 }
  0xac   : > { %1328 = vmatmul.mubr.bf16.gmra.mxu1 %v2272_v38  ;;  %2101 = vmatmul.mubr.msk.bf16.gmra.mxu0 %vm989_vm0, %v2273_v39 }
  0xad   : > { %1335 = vmatprep.mubr.bf16.mxu1 %v2274_v40  ;;  %2104 = vmatprep.mubr.msk.bf16.mxu0 %vm989_vm0, %v2276_v41 }
  0xb4   : > { %1336 = vmatmul.mubr.bf16.gmra.mxu1 %v2277_v42  ;;  %2105 = vmatmul.mubr.msk.bf16.gmra.mxu0 %vm989_vm0, %v2278_v43 }
  0xb5   : > { %1343 = vmatprep.mubr.bf16.mxu1 %v2279_v44  ;;  %2108 = vmatprep.mubr.msk.bf16.mxu0 %vm989_vm0, %v2281_v45 }
  0xbc   : > { %1344 = vmatmul.mubr.bf16.gmra.mxu1 %v2282_v46  ;;  %2109 = vmatmul.mubr.msk.bf16.gmra.mxu0 %vm989_vm0, %v2283_v47 }
  0xbd   : > { %1351 = vmatprep.mubr.bf16.mxu1 %v2284_v48  ;;  %2112 = vmatprep.mubr.msk.bf16.mxu0 %vm989_vm0, %v2286_v49 }
  0xc4   : > { %1352 = vmatmul.mubr.bf16.gmra.mxu1 %v2287_v50  ;;  %2113 = vmatmul.mubr.msk.bf16.gmra.mxu0 %vm989_vm0, %v2288_v51 }
  0xec   : > { %v1848_v52 = vpop.f32.mrf.mxu0  ;;  %v1920_v53 = vpop.f32.mrf.mxu1 }
  0xee   : > { %v1849_v54 = vpop.f32.mrf.mxu0  ;;  %v1921_v55 = vpop.f32.mrf.mxu1 }
  0xef   : > { %v2542_v56 = vadd.f32 %v1849_v54, %v1848_v52  ;;  %v2544_v57 = vadd.f32 %v1921_v55, %v1920_v53 }
  0xf0   : > { %v1851_v58 = vpop.f32.mrf.mxu0  ;;  %v1923_v59 = vpop.f32.mrf.mxu1 }
  0xf1   : > { %2896 = vst [vmem:[#allocation2_spill] sm:$0xff] %v2544_v57 }
  0xf2   : > { %v1852_v60 = vpop.f32.mrf.mxu0  ;;  %v1924_v61 = vpop.f32.mrf.mxu1 }
  0xf3   : > { %v2546_v62 = vadd.f32 %v1852_v60, %v1851_v58  ;;  %v2548_v63 = vadd.f32 %v1924_v61, %v1923_v59 }
  0xf4   : > { %v1854_v0 = vpop.f32.mrf.mxu0  ;;  %v1926_v1 = vpop.f32.mrf.mxu1 }
  0xf5   : > { %2897 = vst [vmem:[#allocation3_spill] sm:$0xff] %v2548_v63 }
  0xf6   : > { %v1855_v2 = vpop.f32.mrf.mxu0  ;;  %v1927_v3 = vpop.f32.mrf.mxu1 }
  0xf7   : > { %v2550_v4 = vadd.f32 %v1855_v2, %v1854_v0  ;;  %v2552_v5 = vadd.f32 %v1927_v3, %v1926_v1 }
  0xf8   : > { %v1857_v6 = vpop.f32.mrf.mxu0  ;;  %v1929_v7 = vpop.f32.mrf.mxu1 }
  0xf9   : > { %2898 = vst [vmem:[#allocation4_spill] sm:$0xff] %v2552_v5 }
  0xfa   : > { %v1858_v8 = vpop.f32.mrf.mxu0  ;;  %v1930_v9 = vpop.f32.mrf.mxu1 }
  0xfb   : > { %v2554_v10 = vadd.f32 %v1858_v8, %v1857_v6  ;;  %v2556_v11 = vadd.f32 %v1930_v9, %v1929_v7 }
  0xfc   : > { %v1860_v12 = vpop.f32.mrf.mxu0  ;;  %v1932_v13 = vpop.f32.mrf.mxu1 }
  0xfd   : > { %2899 = vst [vmem:[#allocation5_spill] sm:$0xff] %v2556_v11 }
  0xfe   : > { %v1861_v14 = vpop.f32.mrf.mxu0  ;;  %v1933_v15 = vpop.f32.mrf.mxu1 }
  0xff   : > { %v2558_v16 = vadd.f32 %v1861_v14, %v1860_v12  ;;  %v2560_v17 = vadd.f32 %v1933_v15, %v1932_v13 }
 0x100   : > { %v1863_v18 = vpop.f32.mrf.mxu0  ;;  %v1935_v19 = vpop.f32.mrf.mxu1 }
 0x101   : > { %2900 = vst [vmem:[#allocation6_spill] sm:$0xff] %v2560_v17 }
 0x102   : > { %v1864_v20 = vpop.f32.mrf.mxu0  ;;  %v1936_v21 = vpop.f32.mrf.mxu1 }
 0x103   : > { %v2562_v22 = vadd.f32 %v1864_v20, %v1863_v18  ;;  %v2564_v23 = vadd.f32 %v1936_v21, %v1935_v19 }
 0x104   : > { %v1866_v24 = vpop.f32.mrf.mxu0  ;;  %v1938_v25 = vpop.f32.mrf.mxu1 }
 0x105   : > { %2901 = vst [vmem:[#allocation7_spill] sm:$0xff] %v2564_v23 }
 0x106   : > { %v1867_v26 = vpop.f32.mrf.mxu0  ;;  %v1939_v27 = vpop.f32.mrf.mxu1 }
 0x107   : > { %v2566_v28 = vadd.f32 %v1867_v26, %v1866_v24  ;;  %v2568_v29 = vadd.f32 %v1939_v27, %v1938_v25 }
 0x108   : > { %v1869_v30 = vpop.f32.mrf.mxu0  ;;  %v1941_v31 = vpop.f32.mrf.mxu1 }
 0x109   : > { %2902 = vst [vmem:[#allocation8_spill] sm:$0xff] %v2568_v29 }
 0x10a   : > { %v1870_v32 = vpop.f32.mrf.mxu0  ;;  %v1942_v33 = vpop.f32.mrf.mxu1 }
 0x10b   : > { %v2570_v34 = vadd.f32 %v1870_v32, %v1869_v30  ;;  %v2572_v35 = vadd.f32 %v1942_v33, %v1941_v31 }
 0x10c   : > { %v1872_v36 = vpop.f32.mrf.mxu0  ;;  %v2574_v37 = vpop.f32.mrf.mxu1 }
 0x10d   : > { %2903 = vst [vmem:[#allocation9_spill] sm:$0xff] %v2572_v35 }
 0x10e   : > { %v1873_v38 = vpop.f32.mrf.mxu0  ;;  %v2576_v39 = vpop.f32.mrf.mxu1 }
 0x10f   : > { %v2578_v40 = vadd.f32 %v1873_v38, %v1872_v36 }
 0x110   : > { %v1875_v41 = vpop.f32.mrf.mxu0  ;;  %v2580_v42 = vpop.f32.mrf.mxu1 }
 0x112   : > { %v1876_v43 = vpop.f32.mrf.mxu0  ;;  %v2582_v44 = vpop.f32.mrf.mxu1 }
 0x113   : > { %v2584_v45 = vadd.f32 %v1876_v43, %v1875_v41 }
 0x114   : > { %v1878_v46 = vpop.f32.mrf.mxu0  ;;  %v1966_v47 = vpop.f32.mrf.mxu1 }
 0x116   : > { %v1879_v48 = vpop.f32.mrf.mxu0  ;;  %v1967_v49 = vpop.f32.mrf.mxu1 }
 0x117   : > { %v2586_v50 = vadd.f32 %v1879_v48, %v1878_v46  ;;  %v1968_v57 = vadd.f32 %v1967_v49, %v1966_v47  ;;  %v2684_v49 = vld [vmem:[%s2893_s2] ss:$0 sm:$0xff] }
 0x118   : > { %v1881_v51 = vpop.f32.mrf.mxu0  ;;  %v1969_v52 = vpop.f32.mrf.mxu1 }
 0x11a   : > { %v1882_v53 = vpop.f32.mrf.mxu0  ;;  %v1970_v54 = vpop.f32.mrf.mxu1 }
 0x11b   : > { %v2588_v55 = vadd.f32 %v1882_v53, %v1881_v51 }
 0x11c   : > { %v1884_v58 = vpop.f32.mrf.mxu0  ;;  %v2590_v59 = vpop.f32.mrf.mxu1 }
 0x11e   : > { %v1885_v60 = vpop.f32.mrf.mxu0  ;;  %v2592_v61 = vpop.f32.mrf.mxu1 }
 0x11f   : > { %v2594_v0 = vadd.f32 %v1885_v60, %v1884_v58 }
 0x120   : > { %v1887_v1 = vpop.f32.mrf.mxu0  ;;  %v2596_v2 = vpop.f32.mrf.mxu1 }
 0x122   : > { %v1888_v3 = vpop.f32.mrf.mxu0  ;;  %v2598_v6 = vpop.f32.mrf.mxu1 }
 0x123   : > { %v2600_v7 = vadd.f32 %v1888_v3, %v1887_v1 }
 0x124   : > { %v2602_v8 = vpop.f32.mrf.mxu0  ;;  %v1978_v9 = vpop.f32.mrf.mxu1 }
 0x126   : > { %v2604_v12 = vpop.f32.mrf.mxu0  ;;  %v1979_v13 = vpop.f32.mrf.mxu1 }
 0x128   : > { %v2606_v14 = vpop.f32.mrf.mxu0  ;;  %v1981_v15 = vpop.f32.mrf.mxu1 }
 0x12a   : > { %v2608_v18 = vpop.f32.mrf.mxu0  ;;  %v1982_v19 = vpop.f32.mrf.mxu1 }
 0x12c   : > { %v2610_v20 = vpop.f32.mrf.mxu0  ;;  %v2612_v21 = vpop.f32.mrf.mxu1 }
 0x12e   : > { %v2614_v24 = vpop.f32.mrf.mxu0  ;;  %v2616_v25 = vpop.f32.mrf.mxu1 }
 0x130   : > { %v2618_v26 = vpop.f32.mrf.mxu0  ;;  %v2620_v27 = vpop.f32.mrf.mxu1 }
 0x131   : > { %2904 = vst [vmem:[#allocation10_spill] sm:$0xff] %v2618_v26 }
 0x132   : > { %v2622_v30 = vpop.f32.mrf.mxu0  ;;  %v2624_v31 = vpop.f32.mrf.mxu1 }
 0x133   : > { %2905 = vst [vmem:[#allocation11_spill] sm:$0xff] %v2622_v30  ;;  %v1242_v30 = vadd.f32 %v1968_v57, %v2550_v4 }
 0x134   : > { %v2626_v32 = vpop.f32.mrf.mxu0  ;;  %v2628_v33 = vpop.f32.mrf.mxu1 }
 0x136   : > { %v2630_v36 = vpop.f32.mrf.mxu0  ;;  %v2632_v38 = vpop.f32.mrf.mxu1 }
 0x138   : > { %v2634_v41 = vpop.f32.mrf.mxu0  ;;  %v2636_v43 = vpop.f32.mrf.mxu1 }
 0x13a   : > { %v2638_v46 = vpop.f32.mrf.mxu0  ;;  %v2640_v48 = vpop.f32.mrf.mxu1 }
 0x13c   : > { %v2642_v51 = vpop.f32.mrf.mxu0  ;;  %v2644_v53 = vpop.f32.mrf.mxu1 }
 0x13d   : > { %2906 = vst [vmem:[#allocation12_spill] sm:$0xff] %v2642_v51 }
 0x13e   : > { %v2646_v58 = vpop.f32.mrf.mxu0  ;;  %v2648_v60 = vpop.f32.mrf.mxu1 }
 0x13f   : > { %2907 = vst [vmem:[#allocation13_spill] sm:$0xff] %v2646_v58 }
 0x140   : > { %v2650_v1 = vpop.f32.mrf.mxu0  ;;  %v2652_v3 = vpop.f32.mrf.mxu1 }
 0x141   : > { %2908 = vst [vmem:[#allocation14_spill] sm:$0xff] %v2650_v1  ;;  %v1962_v1 = vadd.f32 %v2576_v39, %v2574_v37 }
 0x142   : > { %v2654_v35 = vpop.f32.mrf.mxu0  ;;  %v2656_v23 = vpop.f32.mrf.mxu1 }
 0x143   : > { %2909 = vst [vmem:[#allocation15_spill] sm:$0xff] %v2654_v35  ;;  %v1234_v39 = vadd.f32 %v1962_v1, %v2542_v56 }
 0x144   : > { %v2658_v29 = vpop.f32.mrf.mxu0  ;;  %v2660_v17 = vpop.f32.mrf.mxu1 }
 0x145   : > { %2910 = vst [vmem:[#allocation16_spill] sm:$0xff] %v2658_v29  ;;  %v1971_v29 = vadd.f32 %v1970_v54, %v1969_v52  ;;  %v2691_v52 = vld [vmem:[%s2894_s3] ss:$0 sm:$0xff] }
 0x146   : > { %v2662_v63 = vpop.f32.mrf.mxu0  ;;  %v2664_v11 = vpop.f32.mrf.mxu1 }
 0x147   : > { %2911 = vst [vmem:[#allocation17_spill] sm:$0xff] %v2662_v63  ;;  %v1965_v63 = vadd.f32 %v2582_v44, %v2580_v42  ;;  %v1980_v42 = vadd.f32 %v1979_v13, %v1978_v9  ;;  %v1974_v9 = vadd.f32 %v2592_v61, %v2590_v59  ;;  %v1977_v59 = vadd.f32 %v2598_v6, %v2596_v2 }
 0x148   : > { %v2666_v5 = vpop.f32.mrf.mxu0  ;;  %v2668_v58 = vpop.f32.mrf.mxu1  ;;  %v1992_v2 = vadd.f32 %v2632_v38, %v2628_v33 }
 0x149   : > { %2912 = vst [vmem:[#allocation18_spill] sm:$0xff] %v2666_v5  ;;  %v1237_v1 = vadd.f32 %v1965_v63, %v2546_v62  ;;  %v1258_v63 = vadd.f32 %v1980_v42, %v2566_v28 }
 0x14a   : > { %v2672_v35 = vpop.f32.mrf.mxu0  ;;  %v2674_v51 = vpop.f32.mrf.mxu1 }
 0x14b   : > { %2913 = vst [vmem:[#allocation19_spill] sm:$0xff] %v2672_v35  ;;  %v1245_v35 = vadd.f32 %v1971_v29, %v2554_v10  ;;  %v1983_v29 = vadd.f32 %v1982_v19, %v1981_v15 }
 0x14c   : > { %v2679_v26 = vpop.f32.mrf.mxu1  ;;  %v2086_v47 = vpop.f32.mrf.mxu0 }
 0x14d   : > { %v1403_v37 = vadd.f32 %v2086_v47, %v1242_v30  ;;  %v1261_v28 = vadd.f32 %v1983_v29, %v2570_v34 }
 0x14e   : > { %v2693_v57 = vpop.f32.mrf.mxu1  ;;  %v1394_v4 = vpop.f32.mrf.mxu0 }
 0x14f   : > { %v1530_v44 = vmul.f32 %v2684_v49, %v1403_v37  ;;  %v1395_v54 = vadd.f32 %v1394_v4, %v1234_v39 }
 0x150   : > { %v2702_v56 = vpop.f32.mrf.mxu1  ;;  %v2087_v30 = vpop.f32.mrf.mxu0 }
 0x151   : > { %v1569_v13 = vadd.f32 %v2691_v52, %v1530_v44  ;;  %v1528_v47 = vmul.f32 %v2684_v49, %v1395_v54  ;;  %v1406_v10 = vadd.f32 %v2087_v30, %v1245_v35  ;;  %v1250_v54 = vadd.f32 %v1974_v9, %v2558_v16 }
 0x152   : > { %v2709_v37 = vpop.f32.mrf.mxu1  ;;  %v1397_v39 = vpop.f32.mrf.mxu0  ;;  %v1253_v16 = vadd.f32 %v1977_v59, %v2562_v22  ;;  %v1986_v9 = vadd.f32 %v2616_v25, %v2612_v21  ;;  %v1274_v25 = vadd.f32 %v1992_v2, %v2586_v50 }
 0x153   : > { %1601 = vst [vmem:[%s2700_s19 + $0x10] sm:$0xff] %v1569_v13  ;;  %v1567_v4 = vadd.f32 %v2691_v52, %v1528_v47  ;;  %v1531_v5 = vmul.f32 %v2684_v49, %v1406_v10  ;;  %v1398_v62 = vadd.f32 %v1397_v39, %v1237_v1  ;;  %v1995_v10 = vadd.f32 %v2640_v48, %v2636_v43 }
 0x154   : > { %v2717_v61 = vpop.f32.mrf.mxu1  ;;  %v2090_v44 = vpop.f32.mrf.mxu0 }
 0x155   : > { %1599 = vst [vmem:[%s2700_s19] sm:$0xff] %v1567_v4  ;;  %v1570_v35 = vadd.f32 %v2691_v52, %v1531_v5  ;;  %v1529_v15 = vmul.f32 %v2684_v49, %v1398_v62  ;;  %v1419_v19 = vadd.f32 %v2090_v44, %v1258_v63  ;;  %v1989_v62 = vadd.f32 %v2624_v31, %v2620_v27 }
 0x156   : > { %v2723_v30 = vpop.f32.mrf.mxu1  ;;  %v1410_v1 = vpop.f32.mrf.mxu0  ;;  %v1277_v50 = vadd.f32 %v1995_v10, %v2588_v55  ;;  %v2004_v27 = vadd.f32 %v2664_v11, %v2660_v17  ;;  %v1998_v55 = vadd.f32 %v2648_v60, %v2644_v53 }
 0x157   : > { %1602 = vst [vmem:[%s2700_s19 + $0x18] sm:$0xff] %v1570_v35  ;;  %v1568_v6 = vadd.f32 %v2691_v52, %v1529_v15  ;;  %v1534_v5 = vmul.f32 %v2684_v49, %v1419_v19  ;;  %v1411_v42 = vadd.f32 %v1410_v1, %v1250_v54  ;;  %v1266_v35 = vadd.f32 %v1986_v9, %v2578_v40 }
 0x158   : > { %v2731_v13 = vpop.f32.mrf.mxu1  ;;  %v2091_v47 = vpop.f32.mrf.mxu0  ;;  %v2001_v9 = vadd.f32 %v2656_v23, %v2652_v3  ;;  %v1282_v10 = vadd.f32 %v1998_v55, %v2594_v0 }
 0x159   : > { %1600 = vst [vmem:[%s2700_s19 + $0x8] sm:$0xff] %v1568_v6  ;;  %v1573_v34 = vadd.f32 %v2691_v52, %v1534_v5  ;;  %v1532_v33 = vmul.f32 %v2684_v49, %v1411_v42  ;;  %v1422_v38 = vadd.f32 %v2091_v47, %v1261_v28  ;;  %v1892_v28 = vadd.f32 %v2604_v12, %v2602_v8 }
 0x15a   : > { %v2741_v29 = vpop.f32.mrf.mxu1  ;;  %v1413_v39 = vpop.f32.mrf.mxu0  ;;  %v1269_v6 = vadd.f32 %v1989_v62, %v2584_v45  ;;  %v2007_v42 = vadd.f32 %v2674_v51, %v2668_v58  ;;  %v1285_v0 = vadd.f32 %v2001_v9, %v2600_v7  ;;  %v2918_v9 = vld [vmem:[#allocation12_spill] sm:$0xff] }
 0x15b   : > { %1605 = vst [vmem:[%s2700_s19 + $0x30] sm:$0xff] %v1573_v34  ;;  %v1571_v4 = vadd.f32 %v2691_v52, %v1532_v33  ;;  %v1535_v22 = vmul.f32 %v2684_v49, %v1422_v38  ;;  %v1414_v21 = vadd.f32 %v1413_v39, %v1253_v16  ;;  %v1290_v60 = vadd.f32 %v2004_v27, %v1892_v28 }
 0x15c   : > { %v2749_v63 = vpop.f32.mrf.mxu1  ;;  %v2094_v59 = vpop.f32.mrf.mxu0  ;;  %v1895_v16 = vadd.f32 %v2608_v18, %v2606_v14  ;;  %v2016_v14 = vadd.f32 %v2723_v30, %v2717_v61 }
 0x15d   : > { %1603 = vst [vmem:[%s2700_s19 + $0x20] sm:$0xff] %v1571_v4  ;;  %v1574_v43 = vadd.f32 %v2691_v52, %v1535_v22  ;;  %v1533_v48 = vmul.f32 %v2684_v49, %v1414_v21  ;;  %v1435_v44 = vadd.f32 %v2094_v59, %v1274_v25  ;;  %v1904_v21 = vadd.f32 %v2630_v36, %v2626_v32 }
 0x15e   : > { %v2755_v15 = vpop.f32.mrf.mxu1  ;;  %v1426_v19 = vpop.f32.mrf.mxu0  ;;  %v1293_v22 = vadd.f32 %v2007_v42, %v1895_v16  ;;  %v2010_v59 = vadd.f32 %v2693_v57, %v2679_v26  ;;  %v2019_v32 = vadd.f32 %v2741_v29, %v2731_v13 }
 0x15f   : > { %1606 = vst [vmem:[%s2700_s19 + $0x38] sm:$0xff] %v1574_v43  ;;  %v1572_v31 = vadd.f32 %v2691_v52, %v1533_v48  ;;  %v1538_v54 = vmul.f32 %v2684_v49, %v1435_v44  ;;  %v1427_v1 = vadd.f32 %v1426_v19, %v1266_v35  ;;  %v1898_v48 = vadd.f32 %v2614_v24, %v2610_v20 }
 0x160   : > { %v2765_v2 = vpop.f32.mrf.mxu1  ;;  %v2095_v40 = vpop.f32.mrf.mxu0  ;;  %v1306_v35 = vadd.f32 %v2016_v14, %v1904_v21  ;;  %v1907_v19 = vadd.f32 %v2638_v46, %v2634_v41 }
 0x161   : > { %1604 = vst [vmem:[%s2700_s19 + $0x28] sm:$0xff] %v1572_v31  ;;  %v1577_v11 = vadd.f32 %v2691_v52, %v1538_v54  ;;  %v1536_v17 = vmul.f32 %v2684_v49, %v1427_v1  ;;  %v1438_v5 = vadd.f32 %v2095_v40, %v1277_v50  ;;  %v2013_v50 = vadd.f32 %v2709_v37, %v2702_v56  ;;  %v2914_v54 = vld [vmem:[#allocation10_spill] sm:$0xff]  ;;  %v2915_v1 = vld [vmem:[#allocation11_spill] sm:$0xff] }
 0x162   : > { %v2775_v47 = vpop.f32.mrf.mxu1  ;;  %v1429_v8 = vpop.f32.mrf.mxu0  ;;  %v1298_v31 = vadd.f32 %v2010_v59, %v1898_v48  ;;  %v1901_v28 = vadd.f32 %v2915_v1, %v2914_v54  ;;  %v1309_v55 = vadd.f32 %v2019_v32, %v1907_v19  ;;  %v2922_v59 = vld [vmem:[#allocation14_spill] sm:$0xff] }
 0x163   : > { %1609 = vst [vmem:[%s2700_s19 + $0x50] sm:$0xff] %v1577_v11  ;;  %v1575_v12 = vadd.f32 %v2691_v52, %v1536_v17  ;;  %v1539_v45 = vmul.f32 %v2684_v49, %v1438_v5  ;;  %v1430_v53 = vadd.f32 %v1429_v8, %v1269_v6  ;;  %v2916_v11 = vld [vmem:[#allocation16_spill] sm:$0xff]  ;;  %v2917_v17 = vld [vmem:[#allocation17_spill] sm:$0xff] }
 0x164   : > { %v2026_v34 = vpop.f32.mrf.mxu1  ;;  %v2098_v33 = vpop.f32.mrf.mxu0  ;;  %v1916_v5 = vadd.f32 %v2917_v17, %v2916_v11 }
 0x165   : > { %1607 = vst [vmem:[%s2700_s19 + $0x40] sm:$0xff] %v1575_v12  ;;  %v1578_v51 = vadd.f32 %v2691_v52, %v1539_v45  ;;  %v1537_v58 = vmul.f32 %v2684_v49, %v1430_v53  ;;  %v1451_v38 = vadd.f32 %v2098_v33, %v1290_v60  ;;  %v1301_v12 = vadd.f32 %v2013_v50, %v1901_v28 }
 0x166   : > { %v2027_v39 = vpop.f32.mrf.mxu1  ;;  %v1442_v4 = vpop.f32.mrf.mxu0  ;;  %v2022_v45 = vadd.f32 %v2755_v15, %v2749_v63 }
 0x167   : > { %1610 = vst [vmem:[%s2700_s19 + $0x58] sm:$0xff] %v1578_v51  ;;  %v1576_v23 = vadd.f32 %v2691_v52, %v1537_v58  ;;  %v1542_v18 = vmul.f32 %v2684_v49, %v1451_v38  ;;  %v1443_v3 = vadd.f32 %v1442_v4, %v1282_v10  ;;  %v2028_v41 = vadd.f32 %v2027_v39, %v2026_v34  ;;  %v2919_v34 = vld [vmem:[#allocation13_spill] sm:$0xff]  ;;  %v2920_v4 = vld [vmem:[#allocation18_spill] sm:$0xff] }
 0x168   : > { %v2029_v25 = vpop.f32.mrf.mxu1  ;;  %v2099_v62 = vpop.f32.mrf.mxu0  ;;  %v1910_v33 = vadd.f32 %v2919_v34, %v2918_v9  ;;  %v2927_v9 = vld [vmem:[#allocation3_spill] sm:$0xff] }
 0x169   : > { %1608 = vst [vmem:[%s2700_s19 + $0x48] sm:$0xff] %v1576_v23  ;;  %v1581_v61 = vadd.f32 %v2691_v52, %v1542_v18  ;;  %v1540_v30 = vmul.f32 %v2684_v49, %v1443_v3  ;;  %v1454_v43 = vadd.f32 %v2099_v62, %v1293_v22  ;;  %v1322_v15 = vadd.f32 %v2028_v41, %v1916_v5  ;;  %v2921_v22 = vld [vmem:[#allocation19_spill] sm:$0xff] }
 0x16a   : > { %v2030_v36 = vpop.f32.mrf.mxu1  ;;  %v1445_v44 = vpop.f32.mrf.mxu0  ;;  %v1919_v14 = vadd.f32 %v2921_v22, %v2920_v4  ;;  %v2025_v23 = vadd.f32 %v2775_v47, %v2765_v2 }
 0x16b   : > { %1613 = vst [vmem:[%s2700_s19 + $0x70] sm:$0xff] %v1581_v61  ;;  %v1579_v7 = vadd.f32 %v2691_v52, %v1540_v30  ;;  %v1543_v26 = vmul.f32 %v2684_v49, %v1454_v43  ;;  %v1446_v57 = vadd.f32 %v1445_v44, %v1285_v0  ;;  %v2031_v51 = vadd.f32 %v2030_v36, %v2029_v25  ;;  %v2923_v61 = vld [vmem:[#allocation15_spill] sm:$0xff] }
 0x16c   : > { %v2032_v20 = vpop.f32.mrf.mxu1  ;;  %v2102_v24 = vpop.f32.mrf.mxu0  ;;  %v1314_v0 = vadd.f32 %v2022_v45, %v1910_v33  ;;  %v1913_v30 = vadd.f32 %v2923_v61, %v2922_v59  ;;  %v2926_v45 = vld [vmem:[#allocation5_spill] sm:$0xff] }
 0x16d   : > { %1611 = vst [vmem:[%s2700_s19 + $0x60] sm:$0xff] %v1579_v7  ;;  %v1582_v13 = vadd.f32 %v2691_v52, %v1543_v26  ;;  %v1541_v29 = vmul.f32 %v2684_v49, %v1446_v57  ;;  %v1467_v27 = vadd.f32 %v2102_v24, %v1306_v35  ;;  %v1325_v32 = vadd.f32 %v2031_v51, %v1919_v14 }
 0x16e   : > { %v2033_v40 = vpop.f32.mrf.mxu1  ;;  %v1458_v6 = vpop.f32.mrf.mxu0  ;;  %v1317_v57 = vadd.f32 %v2025_v23, %v1913_v30 }
 0x16f   : > { %1614 = vst [vmem:[%s2700_s19 + $0x78] sm:$0xff] %v1582_v13  ;;  %v1580_v46 = vadd.f32 %v2691_v52, %v1541_v29  ;;  %v1546_v56 = vmul.f32 %v2684_v49, %v1467_v27  ;;  %v1459_v37 = vadd.f32 %v1458_v6, %v1298_v31  ;;  %v2034_v35 = vadd.f32 %v2033_v40, %v2032_v20  ;;  %v2924_v27 = vld [vmem:[#allocation4_spill] sm:$0xff] }
 0x170   : > { %v2035_v42 = vpop.f32.mrf.mxu1  ;;  %v2103_v8 = vpop.f32.mrf.mxu0 }
 0x171   : > { %1612 = vst [vmem:[%s2700_s19 + $0x68] sm:$0xff] %v1580_v46  ;;  %v1585_v53 = vadd.f32 %v2691_v52, %v1546_v56  ;;  %v1544_v60 = vmul.f32 %v2684_v49, %v1459_v37  ;;  %v1470_v16 = vadd.f32 %v2103_v8, %v1309_v55  ;;  %v2925_v37 = vld [vmem:[#allocation2_spill] sm:$0xff] }
 0x172   : > { %v2036_v58 = vpop.f32.mrf.mxu1  ;;  %v1461_v38 = vpop.f32.mrf.mxu0  ;;  %v1330_v11 = vadd.f32 %v2034_v35, %v2925_v37 }
 0x173   : > { %1617 = vst [vmem:[%s2700_s19 + $0x90] sm:$0xff] %v1585_v53  ;;  %v1583_v10 = vadd.f32 %v2691_v52, %v1544_v60  ;;  %v1547_v39 = vmul.f32 %v2684_v49, %v1470_v16  ;;  %v1462_v63 = vadd.f32 %v1461_v38, %v1301_v12  ;;  %v2037_v20 = vadd.f32 %v2036_v58, %v2035_v42 }
 0x174   : > { %v2038_v18 = vpop.f32.mrf.mxu1  ;;  %v2106_v3 = vpop.f32.mrf.mxu0 }
 0x175   : > { %1615 = vst [vmem:[%s2700_s19 + $0x80] sm:$0xff] %v1583_v10  ;;  %v1586_v21 = vadd.f32 %v2691_v52, %v1547_v39  ;;  %v1545_v25 = vmul.f32 %v2684_v49, %v1462_v63  ;;  %v1483_v62 = vadd.f32 %v2106_v3, %v1322_v15  ;;  %v1333_v34 = vadd.f32 %v2037_v20, %v2927_v9 }
 0x176   : > { %v2039_v43 = vpop.f32.mrf.mxu1  ;;  %v1474_v48 = vpop.f32.mrf.mxu0 }
 0x177   : > { %1618 = vst [vmem:[%s2700_s19 + $0x98] sm:$0xff] %v1586_v21  ;;  %v1584_v2 = vadd.f32 %v2691_v52, %v1545_v25  ;;  %v1550_v47 = vmul.f32 %v2684_v49, %v1483_v62  ;;  %v2040_v36 = vadd.f32 %v2039_v43, %v2038_v18  ;;  %v1475_v44 = vadd.f32 %v1474_v48, %v1314_v0  ;;  %v2928_v21 = vld [vmem:[#allocation6_spill] sm:$0xff] }
 0x178   : > { %v2041_v7 = vpop.f32.mrf.mxu1  ;;  %v2107_v26 = vpop.f32.mrf.mxu0 }
 0x179   : > { %1616 = vst [vmem:[%s2700_s19 + $0x88] sm:$0xff] %v1584_v2  ;;  %v1589_v19 = vadd.f32 %v2691_v52, %v1550_v47  ;;  %v1548_v50 = vmul.f32 %v2684_v49, %v1475_v44  ;;  %v1486_v24 = vadd.f32 %v2107_v26, %v1325_v32  ;;  %v1338_v31 = vadd.f32 %v2040_v36, %v2924_v27  ;;  %v2929_v32 = vld [vmem:[#allocation8_spill] sm:$0xff]  ;;  %v2930_v36 = vld [vmem:[#allocation7_spill] sm:$0xff] }
 0x17a   : > { %v2042_v13 = vpop.f32.mrf.mxu1  ;;  %v1477_v29 = vpop.f32.mrf.mxu0 }
 0x17b   : > { %1621 = vst [vmem:[%s2700_s19 + $0xb0] sm:$0xff] %v1589_v19  ;;  %v1587_v54 = vadd.f32 %v2691_v52, %v1548_v50  ;;  %v1551_v1 = vmul.f32 %v2684_v49, %v1486_v24  ;;  %v2043_v28 = vadd.f32 %v2042_v13, %v2041_v7  ;;  %v1478_v6 = vadd.f32 %v1477_v29, %v1317_v57  ;;  %v2931_v13 = vld [vmem:[#allocation9_spill] sm:$0xff] }
 0x17c   : > { %v2044_v40 = vpop.f32.mrf.mxu1  ;;  %v2110_v55 = vpop.f32.mrf.mxu0 }
 0x17d   : > { %1619 = vst [vmem:[%s2700_s19 + $0xa0] sm:$0xff] %v1587_v54  ;;  %v1590_v41 = vadd.f32 %v2691_v52, %v1551_v1  ;;  %v1549_v46 = vmul.f32 %v2684_v49, %v1478_v6  ;;  %v1499_v56 = vadd.f32 %v2110_v55, %v1338_v31  ;;  %v1341_v53 = vadd.f32 %v2043_v28, %v2926_v45 }
 0x17e   : > { %v2045_v17 = vpop.f32.mrf.mxu1  ;;  %v1490_v5 = vpop.f32.mrf.mxu0 }
 0x17f   : > { %1622 = vst [vmem:[%s2700_s19 + $0xb8] sm:$0xff] %v1590_v41  ;;  %v1588_v8 = vadd.f32 %v2691_v52, %v1549_v46  ;;  %v1554_v12 = vmul.f32 %v2684_v49, %v1499_v56  ;;  %v1491_v42 = vadd.f32 %v1490_v5, %v1330_v11  ;;  %v2046_v51 = vadd.f32 %v2045_v17, %v2044_v40 }
 0x180   : > { %v2047_v60 = vpop.f32.mrf.mxu1  ;;  %v2111_v16 = vpop.f32.mrf.mxu0 }
 0x181   : > { %1620 = vst [vmem:[%s2700_s19 + $0xa8] sm:$0xff] %v1588_v8  ;;  %v1593_v33 = vadd.f32 %v2691_v52, %v1554_v12  ;;  %v1552_v58 = vmul.f32 %v2684_v49, %v1491_v42  ;;  %v1502_v38 = vadd.f32 %v2111_v16, %v1341_v53  ;;  %v1346_v25 = vadd.f32 %v2046_v51, %v2928_v21 }
 0x182   : > { %v2048_v10 = vpop.f32.mrf.mxu1  ;;  %v1493_v39 = vpop.f32.mrf.mxu0 }
 0x183   : > { %1625 = vst [vmem:[%s2700_s19 + $0xd0] sm:$0xff] %v1593_v33  ;;  %v1591_v63 = vadd.f32 %v2691_v52, %v1552_v58  ;;  %v1555_v15 = vmul.f32 %v2684_v49, %v1502_v38  ;;  %v1494_v4 = vadd.f32 %v1493_v39, %v1333_v34  ;;  %v2049_v18 = vadd.f32 %v2048_v10, %v2047_v60 }
 0x184   : > { %v2050_v22 = vpop.f32.mrf.mxu1  ;;  %v2114_v14 = vpop.f32.mrf.mxu0 }
 0x185   : > { %1623 = vst [vmem:[%s2700_s19 + $0xc0] sm:$0xff] %v1591_v63  ;;  %v1594_v23 = vadd.f32 %v2691_v52, %v1555_v15  ;;  %v1553_v3 = vmul.f32 %v2684_v49, %v1494_v4  ;;  %v1349_v44 = vadd.f32 %v2049_v18, %v2930_v36 }
 0x186   : > { %v2051_v62 = vpop.f32.mrf.mxu1  ;;  %v1506_v0 = vpop.f32.mrf.mxu0 }
 0x187   : > { %1626 = vst [vmem:[%s2700_s19 + $0xd8] sm:$0xff] %v1594_v23  ;;  %v1592_v59 = vadd.f32 %v2691_v52, %v1553_v3  ;;  %v2052_v61 = vadd.f32 %v2051_v62, %v2050_v22  ;;  %v1507_v30 = vadd.f32 %v1506_v0, %v1346_v25 }
 0x188   : > { %v2053_v43 = vpop.f32.mrf.mxu1  ;;  %v2115_v48 = vpop.f32.mrf.mxu0 }
 0x189   : > { %1624 = vst [vmem:[%s2700_s19 + $0xc8] sm:$0xff] %v1592_v59  ;;  %v1354_v2 = vadd.f32 %v2052_v61, %v2929_v32  ;;  %v1556_v47 = vmul.f32 %v2684_v49, %v1507_v30 }
 0x18a   : > { %v2054_v7 = vpop.f32.mrf.mxu1  ;;  %v1509_v26 = vpop.f32.mrf.mxu0 }
 0x18b   : > { %v1515_v57 = vadd.f32 %v2114_v14, %v1354_v2  ;;  %v1595_v35 = vadd.f32 %v2691_v52, %v1556_v47  ;;  %v2055_v19 = vadd.f32 %v2054_v7, %v2053_v43  ;;  %v1510_v50 = vadd.f32 %v1509_v26, %v1349_v44 }
 0x18d   : > { %v1558_v24 = vmul.f32 %v2684_v49, %v1515_v57  ;;  %1627 = vst [vmem:[%s2700_s19 + $0xe0] sm:$0xff] %v1595_v35  ;;  %v1357_v29 = vadd.f32 %v2055_v19, %v2931_v13  ;;  %v1557_v27 = vmul.f32 %v2684_v49, %v1510_v50 }
 0x18f   : > { %v1597_v31 = vadd.f32 %v2691_v52, %v1558_v24  ;;  %v1518_v54 = vadd.f32 %v2115_v48, %v1357_v29  ;;  %v1596_v1 = vadd.f32 %v2691_v52, %v1557_v27 }
 0x191   : > { %1629 = vst [vmem:[%s2700_s19 + $0xf0] sm:$0xff] %v1597_v31  ;;  %v1559_v28 = vmul.f32 %v2684_v49, %v1518_v54  ;;  %1628 = vst [vmem:[%s2700_s19 + $0xe8] sm:$0xff] %v1596_v1 }
 0x193   : > { %v1598_v6 = vadd.f32 %v2691_v52, %v1559_v28 }
 0x195   : > { %1630 = vst [vmem:[%s2700_s19 + $0xf8] sm:$0xff] %v1598_v6 }
 0x196 PF: > { %s14_s15 = sadd.s32 1, %s2295_s15  }
 0x197   : > { %p11_p4 = scmp.ge.s32.totalorder %s14_s15, 4  }
 0x199   :  { %13 = sbr.rel (!%p11_p4) target bundleno = 1 (0x1), region = 66 }

// kernel: _lambda_.17
= control target key start
LH: loop header
LB: loop body
LE: loop exit
PB: predicated region body
PF: predicated region fallthrough
CT: control target
= control target key end

     0   :  { %s1089_s15 = smov 0   ;;  %s1349_s0 = inlined_call_operand.vmem [shape: f32[512,128], index: 0, kind: input, shape index: {}]   ;;  %s1350_s1 = inlined_call_operand.vmem [shape: bf16[128,128], index: 1, kind: input, shape index: {}]   ;;  %s1351_s2 = inlined_call_operand.vmem [shape: f32[1,128], index: 2, kind: input, shape index: {}]   ;;  %s1352_s3 = inlined_call_operand.vmem [shape: f32[1,128], index: 3, kind: input, shape index: {}]   ;;  %s1353_s4 = inlined_call_operand.vmem [shape: f32[512,128], index: 4, kind: output, shape index: {}]  }
   0x1 LB: > { %s865_s16 = sadd.s32 4294967295, %s1061_s15   ;;  %p869_p0 = scmp.ge.s32.totalorder %s1061_s15, 1  ;;  %s1061_s15 = sphi %s1089_s15, %s14_s15  }
   0x2   : > { %p163_p1 = scmp.lt.s32.totalorder %s1061_s15, 3 }
   0x4   : > { %p164_p2 = pnand %p869_p0, %p163_p1 }
   0x5   : > { %s870_s19 = sshll.u32 (!%p164_p2), %s865_s16, 5 }
   0x6   : > { %167 = sbr.rel (%p164_p2) target bundleno = 272 (0x110), region = 36  ;;  %p190_p3 = scmp.lt.s32.totalorder (!%p164_p2), %s870_s19, 63 }
   0xb   : > { %v1047_v0 = vld [vmem:[%s1350_s1 + $0x38] sm:$0xff]   ;;  %v1048_v1 = vld [vmem:[%s1350_s1 + $0x30] sm:$0xff]   ;;  %s1355_s19 = smov (!%p190_p3, %s870_s19), 63  ;;  %v1049_v2 = vld [vmem:[%s1350_s1 + $0x28] sm:$0xff]   ;;  %v1063_v8 = vmov 0.0  }
   0xc   : > { %974 = vmatprep.subr.bf16.mxu0 %v1047_v0  ;;  %1022 = vmatprep.subr.bf16.mxu1 %v1047_v0  ;;  %s871_s24 = sshll.u32 %s1355_s19, 3  ;;  %v1050_v3 = vld [vmem:[%s1350_s1 + $0x20] sm:$0xff]   ;;  %v1051_v17 = vld [vmem:[%s1350_s1 + $0x18] sm:$0xff]   ;;  %v1052_v31 = vld [vmem:[%s1350_s1 + $0x10] sm:$0xff]  }
   0xd   : > { %975 = vmatpush3.bf16.msra.mxu0 %v1047_v0  ;;  %1030 = vmatpush3.bf16.msra.mxu1 %v1047_v0  ;;  %s1114_s27 = scalar_lea.vmem %s1349_s0, %s871_s24  ;;  %v1053_v45 = vld [vmem:[%s1350_s1 + $0x8] sm:$0xff]   ;;  %v1054_v59 = vld [vmem:[%s1350_s1] sm:$0xff]   ;;  %s1250_s20 = scalar_lea.vmem %s1353_s4, %s871_s24 }
   0xe   : > { %976 = vmatprep.subr.bf16.mxu0 %v1048_v1  ;;  %1023 = vmatprep.subr.bf16.mxu1 %v1048_v1  ;;  %v202_v4 = vld [vmem:[%s1114_s27] sm:$0xff]  ;;  %v203_v5 = vld [vmem:[%s1114_s27 + $0x8] sm:$0xff]  ;;  %v204_v13 = vld [vmem:[%s1114_s27 + $0x10] sm:$0xff] }
   0xf   : > { %v218_v6 = vld [vmem:[%s1114_s27 + $0x80] sm:$0xff]  ;;  %vm234_vm0 = vcmp.gt.f32.partialorder %v202_v4, 0.0  ;;  %vm235_vm1 = vcmp.gt.f32.partialorder %v203_v5, 0.0  ;;  %vm330_vm2 = vcmp.lt.f32.partialorder %v202_v4, 0.0  ;;  %vm331_vm3 = vcmp.lt.f32.partialorder %v203_v5, 0.0  ;;  %v219_v7 = vld [vmem:[%s1114_s27 + $0x88] sm:$0xff] }
  0x10   : > { %v874_v9 = vsel %vm234_vm0, 1.0, %v1063_v8  ;;  %v875_v10 = vsel %vm235_vm1, 1.0, %v1063_v8  ;;  %v906_v11 = vsel %vm330_vm2, 1.0, %v1063_v8  ;;  %v907_v12 = vsel %vm331_vm3, 1.0, %v1063_v8  ;;  %v205_v16 = vld [vmem:[%s1114_s27 + $0x18] sm:$0xff]  ;;  %v220_v20 = vld [vmem:[%s1114_s27 + $0x90] sm:$0xff] }
  0x11   : > { %977 = vmatpush3.bf16.msra.mxu0 %v1048_v1  ;;  %1031 = vmatpush3.bf16.msra.mxu1 %v1048_v1  ;;  %v426_v14 = vsub.f32 %v874_v9, %v906_v11  ;;  %v427_v15 = vsub.f32 %v875_v10, %v907_v12  ;;  %vm250_vm4 = vcmp.gt.f32.partialorder %v218_v6, 0.0  ;;  %vm251_vm5 = vcmp.gt.f32.partialorder %v219_v7, 0.0  ;;  %v221_v24 = vld [vmem:[%s1114_s27 + $0x98] sm:$0xff]  ;;  %v206_v29 = vld [vmem:[%s1114_s27 + $0x20] sm:$0xff]  ;;  %v207_v30 = vld [vmem:[%s1114_s27 + $0x28] sm:$0xff] }
  0x12   : > { %978 = vmatprep.subr.bf16.mxu0 %v1049_v2  ;;  %1024 = vmatprep.subr.bf16.mxu1 %v1049_v2  ;;  %v890_v18 = vsel %vm250_vm4, 1.0, %v1063_v8  ;;  %v891_v19 = vsel %vm251_vm5, 1.0, %v1063_v8  ;;  %vm346_vm6 = vcmp.lt.f32.partialorder %v218_v6, 0.0  ;;  %vm347_vm7 = vcmp.lt.f32.partialorder %v219_v7, 0.0  ;;  %v222_v39 = vld [vmem:[%s1114_s27 + $0xa0] sm:$0xff]  ;;  %v223_v40 = vld [vmem:[%s1114_s27 + $0xa8] sm:$0xff] }
  0x13   : > { %v458_v21 = vpack.c.bf16 %v427_v15, %v426_v14  ;;  %v922_v22 = vsel %vm346_vm6, 1.0, %v1063_v8  ;;  %v923_v23 = vsel %vm347_vm7, 1.0, %v1063_v8  ;;  %vm236_vm8 = vcmp.gt.f32.partialorder %v204_v13, 0.0  ;;  %v208_v50 = vld [vmem:[%s1114_s27 + $0x30] sm:$0xff]  ;;  %v209_v51 = vld [vmem:[%s1114_s27 + $0x38] sm:$0xff]  ;;  %v210_v4 = vld [vmem:[%s1114_s27 + $0x40] sm:$0xff] }
  0x14   : > { %v442_v25 = vsub.f32 %v890_v18, %v922_v22  ;;  %v443_v26 = vsub.f32 %v891_v19, %v923_v23  ;;  %vm237_vm9 = vcmp.gt.f32.partialorder %v205_v16, 0.0  ;;  %v876_v27 = vsel %vm236_vm8, 1.0, %v1063_v8  ;;  %v224_v58 = vld [vmem:[%s1114_s27 + $0xb0] sm:$0xff]  ;;  %v225_v62 = vld [vmem:[%s1114_s27 + $0xb8] sm:$0xff]  ;;  %v211_v5 = vld [vmem:[%s1114_s27 + $0x48] sm:$0xff] }
  0x15   : > { %979 = vmatpush3.bf16.msra.mxu0 %v1049_v2  ;;  %1032 = vmatpush3.bf16.msra.mxu1 %v1049_v2  ;;  %v877_v28 = vsel %vm237_vm9, 1.0, %v1063_v8  ;;  %vm332_vm10 = vcmp.lt.f32.partialorder %v204_v13, 0.0  ;;  %vm333_vm11 = vcmp.lt.f32.partialorder %v205_v16, 0.0  ;;  %vm252_vm12 = vcmp.gt.f32.partialorder %v220_v20, 0.0  ;;  %v226_v14 = vld [vmem:[%s1114_s27 + $0xc0] sm:$0xff]  ;;  %v227_v15 = vld [vmem:[%s1114_s27 + $0xc8] sm:$0xff] }
  0x16   : > { %980 = vmatprep.subr.bf16.mxu0 %v1050_v3  ;;  %1025 = vmatprep.subr.bf16.mxu1 %v1050_v3  ;;  %v466_v32 = vpack.c.bf16 %v443_v26, %v442_v25  ;;  %v908_v33 = vsel %vm332_vm10, 1.0, %v1063_v8  ;;  %v909_v34 = vsel %vm333_vm11, 1.0, %v1063_v8  ;;  %vm253_vm13 = vcmp.gt.f32.partialorder %v221_v24, 0.0  ;;  %v213_v25 = vld [vmem:[%s1114_s27 + $0x58] sm:$0xff] }
  0x17   : > { %990 = vmatprep.mubr.bf16.mxu0 %v458_v21  ;;  %v428_v35 = vsub.f32 %v876_v27, %v908_v33  ;;  %v429_v36 = vsub.f32 %v877_v28, %v909_v34  ;;  %v892_v37 = vsel %vm252_vm12, 1.0, %v1063_v8  ;;  %v893_v38 = vsel %vm253_vm13, 1.0, %v1063_v8 }
  0x18   : > { %1006 = vmatprep.mubr.bf16.mxu1 %v466_v32  ;;  %vm348_vm14 = vcmp.lt.f32.partialorder %v220_v20, 0.0  ;;  %vm349_vm15 = vcmp.lt.f32.partialorder %v221_v24, 0.0  ;;  %vm238_vm0 = vcmp.gt.f32.partialorder %v206_v29, 0.0  ;;  %vm239_vm1 = vcmp.gt.f32.partialorder %v207_v30, 0.0  ;;  %v212_v24 = vld [vmem:[%s1114_s27 + $0x50] sm:$0xff] }
  0x19   : > { %981 = vmatpush3.bf16.msra.mxu0 %v1050_v3  ;;  %1033 = vmatpush3.bf16.msra.mxu1 %v1050_v3  ;;  %v1151_v41 = vpack.c.bf16 %v429_v36, %v428_v35  ;;  %v924_v42 = vsel %vm348_vm14, 1.0, %v1063_v8  ;;  %v925_v43 = vsel %vm349_vm15, 1.0, %v1063_v8  ;;  %v878_v44 = vsel %vm238_vm0, 1.0, %v1063_v8  ;;  %v228_v32 = vld [vmem:[%s1114_s27 + $0xd0] sm:$0xff]  ;;  %v229_v35 = vld [vmem:[%s1114_s27 + $0xd8] sm:$0xff] }
  0x1a   : > { %982 = vmatprep.subr.bf16.mxu0 %v1051_v17  ;;  %1026 = vmatprep.subr.bf16.mxu1 %v1051_v17  ;;  %v444_v46 = vsub.f32 %v892_v37, %v924_v42  ;;  %v445_v47 = vsub.f32 %v893_v38, %v925_v43  ;;  %v879_v48 = vsel %vm239_vm1, 1.0, %v1063_v8  ;;  %vm334_vm2 = vcmp.lt.f32.partialorder %v206_v29, 0.0  ;;  %v215_v42 = vld [vmem:[%s1114_s27 + $0x68] sm:$0xff] }
  0x1b   : > { %vm335_vm3 = vcmp.lt.f32.partialorder %v207_v30, 0.0  ;;  %v910_v49 = vsel %vm334_vm2, 1.0, %v1063_v8  ;;  %vm254_vm4 = vcmp.gt.f32.partialorder %v222_v39, 0.0  ;;  %vm255_vm5 = vcmp.gt.f32.partialorder %v223_v40, 0.0 }
  0x1c   : > { %v1163_v52 = vpack.c.bf16 %v445_v47, %v444_v46  ;;  %v911_v53 = vsel %vm335_vm3, 1.0, %v1063_v8  ;;  %v430_v54 = vsub.f32 %v878_v44, %v910_v49  ;;  %v894_v55 = vsel %vm254_vm4, 1.0, %v1063_v8 }
  0x1d   : > { %983 = vmatpush3.bf16.msra.mxu0 %v1051_v17  ;;  %1034 = vmatpush3.bf16.msra.mxu1 %v1051_v17  ;;  %v431_v56 = vsub.f32 %v879_v48, %v911_v53  ;;  %v895_v57 = vsel %vm255_vm5, 1.0, %v1063_v8  ;;  %vm350_vm6 = vcmp.lt.f32.partialorder %v222_v39, 0.0  ;;  %vm351_vm7 = vcmp.lt.f32.partialorder %v223_v40, 0.0 }
  0x1e   : > { %984 = vmatprep.subr.bf16.mxu0 %v1052_v31  ;;  %1027 = vmatprep.subr.bf16.mxu1 %v1052_v31  ;;  %v926_v60 = vsel %vm350_vm6, 1.0, %v1063_v8  ;;  %v927_v61 = vsel %vm351_vm7, 1.0, %v1063_v8  ;;  %vm240_vm8 = vcmp.gt.f32.partialorder %v208_v50, 0.0  ;;  %vm241_vm9 = vcmp.gt.f32.partialorder %v209_v51, 0.0 }
  0x1f   : > { %v460_v63 = vpack.c.bf16 %v431_v56, %v430_v54  ;;  %v446_v0 = vsub.f32 %v894_v55, %v926_v60  ;;  %v447_v1 = vsub.f32 %v895_v57, %v927_v61  ;;  %v880_v2 = vsel %vm240_vm8, 1.0, %v1063_v8  ;;  %v216_v60 = vld [vmem:[%s1114_s27 + $0x70] sm:$0xff]  ;;  %v217_v61 = vld [vmem:[%s1114_s27 + $0x78] sm:$0xff] }
  0x20   : > { %v881_v3 = vsel %vm241_vm9, 1.0, %v1063_v8  ;;  %vm336_vm10 = vcmp.lt.f32.partialorder %v208_v50, 0.0  ;;  %vm337_vm11 = vcmp.lt.f32.partialorder %v209_v51, 0.0  ;;  %vm256_vm12 = vcmp.gt.f32.partialorder %v224_v58, 0.0  ;;  %v230_v50 = vld [vmem:[%s1114_s27 + $0xe0] sm:$0xff]  ;;  %v231_v51 = vld [vmem:[%s1114_s27 + $0xe8] sm:$0xff] }
  0x21   : > { %985 = vmatpush3.bf16.msra.mxu0 %v1052_v31  ;;  %1035 = vmatpush3.bf16.msra.mxu1 %v1052_v31  ;;  %v468_v6 = vpack.c.bf16 %v447_v1, %v446_v0  ;;  %v912_v7 = vsel %vm336_vm10, 1.0, %v1063_v8  ;;  %v913_v9 = vsel %vm337_vm11, 1.0, %v1063_v8  ;;  %vm257_vm13 = vcmp.gt.f32.partialorder %v225_v62, 0.0 }
  0x22   : > { %986 = vmatprep.subr.bf16.mxu0 %v1053_v45  ;;  %1028 = vmatprep.subr.bf16.mxu1 %v1053_v45  ;;  %v432_v10 = vsub.f32 %v880_v2, %v912_v7  ;;  %v433_v11 = vsub.f32 %v881_v3, %v913_v9  ;;  %v896_v12 = vsel %vm256_vm12, 1.0, %v1063_v8  ;;  %v897_v13 = vsel %vm257_vm13, 1.0, %v1063_v8  ;;  %v233_v7 = vld [vmem:[%s1114_s27 + $0xf8] sm:$0xff] }
  0x23   : > { %vm352_vm14 = vcmp.lt.f32.partialorder %v224_v58, 0.0  ;;  %vm353_vm15 = vcmp.lt.f32.partialorder %v225_v62, 0.0  ;;  %vm242_vm0 = vcmp.gt.f32.partialorder %v210_v4, 0.0  ;;  %vm243_vm1 = vcmp.gt.f32.partialorder %v211_v5, 0.0 }
  0x24   : > { %v461_v16 = vpack.c.bf16 %v433_v11, %v432_v10  ;;  %v928_v17 = vsel %vm352_vm14, 1.0, %v1063_v8  ;;  %v929_v18 = vsel %vm353_vm15, 1.0, %v1063_v8  ;;  %v882_v19 = vsel %vm242_vm0, 1.0, %v1063_v8 }
  0x25   : > { %987 = vmatpush3.bf16.msra.mxu0 %v1053_v45  ;;  %1036 = vmatpush3.bf16.msra.mxu1 %v1053_v45  ;;  %v448_v20 = vsub.f32 %v896_v12, %v928_v17  ;;  %v449_v21 = vsub.f32 %v897_v13, %v929_v18  ;;  %v883_v22 = vsel %vm243_vm1, 1.0, %v1063_v8  ;;  %vm338_vm2 = vcmp.lt.f32.partialorder %v210_v4, 0.0  ;;  %v232_v4 = vld [vmem:[%s1114_s27 + $0xf0] sm:$0xff] }
  0x26   : > { %988 = vmatprep.subr.bf16.mxu0 %v1054_v59  ;;  %1029 = vmatprep.subr.bf16.mxu1 %v1054_v59  ;;  %vm339_vm3 = vcmp.lt.f32.partialorder %v211_v5, 0.0  ;;  %v914_v23 = vsel %vm338_vm2, 1.0, %v1063_v8  ;;  %vm258_vm4 = vcmp.gt.f32.partialorder %v226_v14, 0.0  ;;  %vm259_vm5 = vcmp.gt.f32.partialorder %v227_v15, 0.0 }
  0x27   : > { %v469_v26 = vpack.c.bf16 %v449_v21, %v448_v20  ;;  %v915_v27 = vsel %vm339_vm3, 1.0, %v1063_v8  ;;  %v434_v28 = vsub.f32 %v882_v19, %v914_v23  ;;  %v898_v29 = vsel %vm258_vm4, 1.0, %v1063_v8 }
  0x28   : > { %v435_v30 = vsub.f32 %v883_v22, %v915_v27  ;;  %v899_v31 = vsel %vm259_vm5, 1.0, %v1063_v8  ;;  %vm354_vm6 = vcmp.lt.f32.partialorder %v226_v14, 0.0  ;;  %vm355_vm7 = vcmp.lt.f32.partialorder %v227_v15, 0.0  ;;  %v1236_v27 = vld [vmem:[%s1351_s2] ss:$0 sm:$0xff] }
  0x29   : > { %989 = vmatpush3.bf16.msra.mxu0 %v1054_v59  ;;  %1037 = vmatpush3.bf16.msra.mxu1 %v1054_v59  ;;  %v930_v33 = vsel %vm354_vm6, 1.0, %v1063_v8  ;;  %v931_v34 = vsel %vm355_vm7, 1.0, %v1063_v8  ;;  %vm244_vm8 = vcmp.gt.f32.partialorder %v212_v24, 0.0  ;;  %vm245_vm9 = vcmp.gt.f32.partialorder %v213_v25, 0.0 }
  0x2a   : > { %v462_v36 = vpack.c.bf16 %v435_v30, %v434_v28  ;;  %v450_v37 = vsub.f32 %v898_v29, %v930_v33  ;;  %v451_v38 = vsub.f32 %v899_v31, %v931_v34  ;;  %v884_v39 = vsel %vm244_vm8, 1.0, %v1063_v8  ;;  %v1241_v29 = vld [vmem:[%s1352_s3] ss:$0 sm:$0xff] }
  0x2b   : > { %v885_v40 = vsel %vm245_vm9, 1.0, %v1063_v8  ;;  %vm340_vm10 = vcmp.lt.f32.partialorder %v212_v24, 0.0  ;;  %vm341_vm11 = vcmp.lt.f32.partialorder %v213_v25, 0.0  ;;  %vm260_vm12 = vcmp.gt.f32.partialorder %v228_v32, 0.0 }
  0x2c   : > { %991 = vmatmul.mubr.bf16.vlgmr.msra.gmra.mxu0 %v1151_v41  ;;  %1007 = vmatmul.mubr.bf16.vlgmr.msra.gmra.mxu1 %v1163_v52  ;;  %v214_v41 = vld [vmem:[%s1114_s27 + $0x60] sm:$0xff]  ;;  %v470_v43 = vpack.c.bf16 %v451_v38, %v450_v37  ;;  %v916_v44 = vsel %vm340_vm10, 1.0, %v1063_v8  ;;  %v917_v45 = vsel %vm341_vm11, 1.0, %v1063_v8  ;;  %vm261_vm13 = vcmp.gt.f32.partialorder %v229_v35, 0.0 }
  0x2d   : > { %994 = vmatprep.mubr.bf16.mxu0 %v460_v63  ;;  %1010 = vmatprep.mubr.bf16.mxu1 %v468_v6  ;;  %v436_v46 = vsub.f32 %v884_v39, %v916_v44  ;;  %v437_v47 = vsub.f32 %v885_v40, %v917_v45  ;;  %v900_v48 = vsel %vm260_vm12, 1.0, %v1063_v8  ;;  %v901_v49 = vsel %vm261_vm13, 1.0, %v1063_v8 }
  0x2e   : > { %vm356_vm14 = vcmp.lt.f32.partialorder %v228_v32, 0.0  ;;  %vm357_vm15 = vcmp.lt.f32.partialorder %v229_v35, 0.0  ;;  %vm246_vm0 = vcmp.gt.f32.partialorder %v214_v41, 0.0  ;;  %vm247_vm1 = vcmp.gt.f32.partialorder %v215_v42, 0.0 }
  0x2f   : > { %v463_v52 = vpack.c.bf16 %v437_v47, %v436_v46  ;;  %v932_v53 = vsel %vm356_vm14, 1.0, %v1063_v8  ;;  %v933_v54 = vsel %vm357_vm15, 1.0, %v1063_v8  ;;  %v886_v55 = vsel %vm246_vm0, 1.0, %v1063_v8 }
  0x30   : > { %v452_v56 = vsub.f32 %v900_v48, %v932_v53  ;;  %v453_v57 = vsub.f32 %v901_v49, %v933_v54  ;;  %v887_v58 = vsel %vm247_vm1, 1.0, %v1063_v8  ;;  %vm342_vm2 = vcmp.lt.f32.partialorder %v214_v41, 0.0 }
  0x31   : > { %vm343_vm3 = vcmp.lt.f32.partialorder %v215_v42, 0.0  ;;  %v918_v59 = vsel %vm342_vm2, 1.0, %v1063_v8  ;;  %vm262_vm4 = vcmp.gt.f32.partialorder %v230_v50, 0.0  ;;  %vm263_vm5 = vcmp.gt.f32.partialorder %v231_v51, 0.0 }
  0x32   : > { %v471_v62 = vpack.c.bf16 %v453_v57, %v452_v56  ;;  %v919_v63 = vsel %vm343_vm3, 1.0, %v1063_v8  ;;  %v438_v0 = vsub.f32 %v886_v55, %v918_v59  ;;  %v902_v1 = vsel %vm262_vm4, 1.0, %v1063_v8 }
  0x33   : > { %v439_v2 = vsub.f32 %v887_v58, %v919_v63  ;;  %v903_v3 = vsel %vm263_vm5, 1.0, %v1063_v8  ;;  %vm358_vm6 = vcmp.lt.f32.partialorder %v230_v50, 0.0  ;;  %vm359_vm7 = vcmp.lt.f32.partialorder %v231_v51, 0.0 }
  0x34   : > { %995 = vmatmul.mubr.bf16.gmra.mxu0 %v461_v16  ;;  %1011 = vmatmul.mubr.bf16.gmra.mxu1 %v469_v26  ;;  %v934_v5 = vsel %vm358_vm6, 1.0, %v1063_v8  ;;  %v935_v6 = vsel %vm359_vm7, 1.0, %v1063_v8  ;;  %vm248_vm8 = vcmp.gt.f32.partialorder %v216_v60, 0.0  ;;  %vm249_vm9 = vcmp.gt.f32.partialorder %v217_v61, 0.0 }
  0x35   : > { %998 = vmatprep.mubr.bf16.mxu0 %v462_v36  ;;  %1014 = vmatprep.mubr.bf16.mxu1 %v470_v43  ;;  %v464_v9 = vpack.c.bf16 %v439_v2, %v438_v0  ;;  %v454_v10 = vsub.f32 %v902_v1, %v934_v5  ;;  %v455_v11 = vsub.f32 %v903_v3, %v935_v6  ;;  %v888_v12 = vsel %vm248_vm8, 1.0, %v1063_v8 }
  0x36   : > { %v889_v13 = vsel %vm249_vm9, 1.0, %v1063_v8  ;;  %vm344_vm10 = vcmp.lt.f32.partialorder %v216_v60, 0.0  ;;  %vm345_vm11 = vcmp.lt.f32.partialorder %v217_v61, 0.0  ;;  %vm264_vm12 = vcmp.gt.f32.partialorder %v232_v4, 0.0 }
  0x37   : > { %v472_v14 = vpack.c.bf16 %v455_v11, %v454_v10  ;;  %v920_v15 = vsel %vm344_vm10, 1.0, %v1063_v8  ;;  %v921_v16 = vsel %vm345_vm11, 1.0, %v1063_v8  ;;  %vm265_vm13 = vcmp.gt.f32.partialorder %v233_v7, 0.0 }
  0x38   : > { %v440_v17 = vsub.f32 %v888_v12, %v920_v15  ;;  %v441_v18 = vsub.f32 %v889_v13, %v921_v16  ;;  %v904_v19 = vsel %vm264_vm12, 1.0, %v1063_v8  ;;  %v905_v20 = vsel %vm265_vm13, 1.0, %v1063_v8 }
  0x39   : > { %vm360_vm14 = vcmp.lt.f32.partialorder %v232_v4, 0.0  ;;  %vm361_vm15 = vcmp.lt.f32.partialorder %v233_v7, 0.0 }
  0x3a   : > { %v936_v21 = vsel %vm360_vm14, 1.0, %v1063_v8  ;;  %v937_v22 = vsel %vm361_vm15, 1.0, %v1063_v8  ;;  %v465_v25 = vpack.c.bf16 %v441_v18, %v440_v17 }
  0x3b   : > { %v456_v23 = vsub.f32 %v904_v19, %v936_v21  ;;  %v457_v24 = vsub.f32 %v905_v20, %v937_v22 }
  0x3c   : > { %999 = vmatmul.mubr.bf16.gmra.mxu0 %v463_v52  ;;  %1015 = vmatmul.mubr.bf16.gmra.mxu1 %v471_v62 }
  0x3d   : > { %1002 = vmatprep.mubr.bf16.mxu0 %v464_v9  ;;  %1018 = vmatprep.mubr.bf16.mxu1 %v472_v14  ;;  %v473_v26 = vpack.c.bf16 %v457_v24, %v456_v23 }
  0x44   : > { %1003 = vmatmul.mubr.bf16.gmra.mxu0 %v465_v25  ;;  %1019 = vmatmul.mubr.bf16.gmra.mxu1 %v473_v26 }
  0xec   : > { %v992_v28 = vpop.f32.mrf.mxu0  ;;  %v1008_v30 = vpop.f32.mrf.mxu1 }
  0xed   : > { %v708_v8 = vmul.f32 %v992_v28, %v1236_v27  ;;  %v724_v31 = vmul.f32 %v1008_v30, %v1236_v27 }
  0xee   : > { %v572_v32 = vpop.f32.mrf.mxu0  ;;  %v636_v33 = vpop.f32.mrf.mxu1 }
  0xef   : > { %v747_v34 = vadd.f32 %v1241_v29, %v708_v8  ;;  %v763_v35 = vadd.f32 %v1241_v29, %v724_v31  ;;  %v706_v36 = vmul.f32 %v1236_v27, %v572_v32  ;;  %v722_v37 = vmul.f32 %v1236_v27, %v636_v33 }
  0xf0   : > { %v993_v38 = vpop.f32.mrf.mxu0  ;;  %v1009_v39 = vpop.f32.mrf.mxu1 }
  0xf1   : > { %779 = vst [vmem:[%s1250_s20 + $0x10] sm:$0xff] %v747_v34  ;;  %795 = vst [vmem:[%s1250_s20 + $0x90] sm:$0xff] %v763_v35  ;;  %v745_v40 = vadd.f32 %v1241_v29, %v706_v36  ;;  %v761_v41 = vadd.f32 %v1241_v29, %v722_v37  ;;  %v709_v42 = vmul.f32 %v993_v38, %v1236_v27 }
  0xf2   : > { %v725_v43 = vmul.f32 %v1009_v39, %v1236_v27  ;;  %v575_v44 = vpop.f32.mrf.mxu0  ;;  %v639_v45 = vpop.f32.mrf.mxu1 }
  0xf3   : > { %777 = vst [vmem:[%s1250_s20] sm:$0xff] %v745_v40  ;;  %793 = vst [vmem:[%s1250_s20 + $0x80] sm:$0xff] %v761_v41  ;;  %v748_v46 = vadd.f32 %v1241_v29, %v709_v42  ;;  %v707_v48 = vmul.f32 %v1236_v27, %v575_v44  ;;  %v723_v49 = vmul.f32 %v1236_v27, %v639_v45 }
  0xf4   : > { %v764_v47 = vadd.f32 %v1241_v29, %v725_v43  ;;  %v996_v50 = vpop.f32.mrf.mxu0  ;;  %v1012_v51 = vpop.f32.mrf.mxu1 }
  0xf5   : > { %780 = vst [vmem:[%s1250_s20 + $0x18] sm:$0xff] %v748_v46  ;;  %v746_v52 = vadd.f32 %v1241_v29, %v707_v48  ;;  %v762_v53 = vadd.f32 %v1241_v29, %v723_v49  ;;  %v712_v54 = vmul.f32 %v996_v50, %v1236_v27  ;;  %v728_v55 = vmul.f32 %v1012_v51, %v1236_v27 }
  0xf6   : > { %796 = vst [vmem:[%s1250_s20 + $0x98] sm:$0xff] %v764_v47  ;;  %v588_v56 = vpop.f32.mrf.mxu0  ;;  %v652_v57 = vpop.f32.mrf.mxu1 }
  0xf7   : > { %778 = vst [vmem:[%s1250_s20 + $0x8] sm:$0xff] %v746_v52  ;;  %794 = vst [vmem:[%s1250_s20 + $0x88] sm:$0xff] %v762_v53  ;;  %v751_v58 = vadd.f32 %v1241_v29, %v712_v54  ;;  %v767_v59 = vadd.f32 %v1241_v29, %v728_v55  ;;  %v710_v60 = vmul.f32 %v1236_v27, %v588_v56 }
  0xf8   : > { %v726_v61 = vmul.f32 %v1236_v27, %v652_v57  ;;  %v997_v62 = vpop.f32.mrf.mxu0  ;;  %v1013_v63 = vpop.f32.mrf.mxu1 }
  0xf9   : > { %783 = vst [vmem:[%s1250_s20 + $0x30] sm:$0xff] %v751_v58  ;;  %799 = vst [vmem:[%s1250_s20 + $0xb0] sm:$0xff] %v767_v59  ;;  %v749_v0 = vadd.f32 %v1241_v29, %v710_v60  ;;  %v713_v2 = vmul.f32 %v997_v62, %v1236_v27  ;;  %v729_v3 = vmul.f32 %v1013_v63, %v1236_v27 }
  0xfa   : > { %v765_v1 = vadd.f32 %v1241_v29, %v726_v61  ;;  %v591_v4 = vpop.f32.mrf.mxu0  ;;  %v655_v5 = vpop.f32.mrf.mxu1 }
  0xfb   : > { %781 = vst [vmem:[%s1250_s20 + $0x20] sm:$0xff] %v749_v0  ;;  %v752_v6 = vadd.f32 %v1241_v29, %v713_v2  ;;  %v768_v7 = vadd.f32 %v1241_v29, %v729_v3  ;;  %v711_v9 = vmul.f32 %v1236_v27, %v591_v4  ;;  %v727_v10 = vmul.f32 %v1236_v27, %v655_v5 }
  0xfc   : > { %797 = vst [vmem:[%s1250_s20 + $0xa0] sm:$0xff] %v765_v1  ;;  %v1000_v11 = vpop.f32.mrf.mxu0  ;;  %v1016_v12 = vpop.f32.mrf.mxu1 }
  0xfd   : > { %784 = vst [vmem:[%s1250_s20 + $0x38] sm:$0xff] %v752_v6  ;;  %800 = vst [vmem:[%s1250_s20 + $0xb8] sm:$0xff] %v768_v7  ;;  %v750_v13 = vadd.f32 %v1241_v29, %v711_v9  ;;  %v766_v14 = vadd.f32 %v1241_v29, %v727_v10  ;;  %v716_v15 = vmul.f32 %v1000_v11, %v1236_v27 }
  0xfe   : > { %v732_v16 = vmul.f32 %v1016_v12, %v1236_v27  ;;  %v604_v17 = vpop.f32.mrf.mxu0  ;;  %v668_v18 = vpop.f32.mrf.mxu1 }
  0xff   : > { %782 = vst [vmem:[%s1250_s20 + $0x28] sm:$0xff] %v750_v13  ;;  %798 = vst [vmem:[%s1250_s20 + $0xa8] sm:$0xff] %v766_v14  ;;  %v755_v19 = vadd.f32 %v1241_v29, %v716_v15  ;;  %v714_v21 = vmul.f32 %v1236_v27, %v604_v17  ;;  %v730_v22 = vmul.f32 %v1236_v27, %v668_v18 }
 0x100   : > { %v771_v20 = vadd.f32 %v1241_v29, %v732_v16  ;;  %v1001_v23 = vpop.f32.mrf.mxu0  ;;  %v1017_v24 = vpop.f32.mrf.mxu1 }
 0x101   : > { %787 = vst [vmem:[%s1250_s20 + $0x50] sm:$0xff] %v755_v19  ;;  %v753_v25 = vadd.f32 %v1241_v29, %v714_v21  ;;  %v769_v26 = vadd.f32 %v1241_v29, %v730_v22  ;;  %v717_v28 = vmul.f32 %v1001_v23, %v1236_v27  ;;  %v733_v30 = vmul.f32 %v1017_v24, %v1236_v27 }
 0x102   : > { %803 = vst [vmem:[%s1250_s20 + $0xd0] sm:$0xff] %v771_v20  ;;  %v607_v8 = vpop.f32.mrf.mxu0  ;;  %v671_v31 = vpop.f32.mrf.mxu1 }
 0x103   : > { %785 = vst [vmem:[%s1250_s20 + $0x40] sm:$0xff] %v753_v25  ;;  %801 = vst [vmem:[%s1250_s20 + $0xc0] sm:$0xff] %v769_v26  ;;  %v756_v32 = vadd.f32 %v1241_v29, %v717_v28  ;;  %v772_v33 = vadd.f32 %v1241_v29, %v733_v30  ;;  %v715_v34 = vmul.f32 %v1236_v27, %v607_v8 }
 0x104   : > { %v731_v35 = vmul.f32 %v1236_v27, %v671_v31  ;;  %v1004_v36 = vpop.f32.mrf.mxu0  ;;  %v1020_v37 = vpop.f32.mrf.mxu1 }
 0x105   : > { %788 = vst [vmem:[%s1250_s20 + $0x58] sm:$0xff] %v756_v32  ;;  %804 = vst [vmem:[%s1250_s20 + $0xd8] sm:$0xff] %v772_v33  ;;  %v754_v38 = vadd.f32 %v1241_v29, %v715_v34  ;;  %v720_v40 = vmul.f32 %v1004_v36, %v1236_v27  ;;  %v736_v41 = vmul.f32 %v1020_v37, %v1236_v27 }
 0x106   : > { %v770_v39 = vadd.f32 %v1241_v29, %v731_v35  ;;  %v620_v42 = vpop.f32.mrf.mxu0  ;;  %v684_v43 = vpop.f32.mrf.mxu1 }
 0x107   : > { %786 = vst [vmem:[%s1250_s20 + $0x48] sm:$0xff] %v754_v38  ;;  %v759_v44 = vadd.f32 %v1241_v29, %v720_v40  ;;  %v775_v45 = vadd.f32 %v1241_v29, %v736_v41  ;;  %v718_v46 = vmul.f32 %v1236_v27, %v620_v42  ;;  %v734_v47 = vmul.f32 %v1236_v27, %v684_v43 }
 0x108   : > { %802 = vst [vmem:[%s1250_s20 + $0xc8] sm:$0xff] %v770_v39  ;;  %v1005_v48 = vpop.f32.mrf.mxu0  ;;  %v1021_v49 = vpop.f32.mrf.mxu1 }
 0x109   : > { %791 = vst [vmem:[%s1250_s20 + $0x70] sm:$0xff] %v759_v44  ;;  %807 = vst [vmem:[%s1250_s20 + $0xf0] sm:$0xff] %v775_v45  ;;  %v757_v50 = vadd.f32 %v1241_v29, %v718_v46  ;;  %v773_v51 = vadd.f32 %v1241_v29, %v734_v47  ;;  %v721_v52 = vmul.f32 %v1005_v48, %v1236_v27 }
 0x10a   : > { %v737_v53 = vmul.f32 %v1021_v49, %v1236_v27  ;;  %v623_v54 = vpop.f32.mrf.mxu0  ;;  %v687_v55 = vpop.f32.mrf.mxu1 }
 0x10b   : > { %789 = vst [vmem:[%s1250_s20 + $0x60] sm:$0xff] %v757_v50  ;;  %805 = vst [vmem:[%s1250_s20 + $0xe0] sm:$0xff] %v773_v51  ;;  %v760_v56 = vadd.f32 %v1241_v29, %v721_v52  ;;  %v719_v58 = vmul.f32 %v1236_v27, %v623_v54  ;;  %v735_v59 = vmul.f32 %v1236_v27, %v687_v55 }
 0x10c   : > { %v776_v57 = vadd.f32 %v1241_v29, %v737_v53 }
 0x10d   : > { %792 = vst [vmem:[%s1250_s20 + $0x78] sm:$0xff] %v760_v56  ;;  %v758_v60 = vadd.f32 %v1241_v29, %v719_v58  ;;  %v774_v61 = vadd.f32 %v1241_v29, %v735_v59 }
 0x10e   : > { %808 = vst [vmem:[%s1250_s20 + $0xf8] sm:$0xff] %v776_v57 }
 0x10f   : > { %790 = vst [vmem:[%s1250_s20 + $0x68] sm:$0xff] %v758_v60  ;;  %806 = vst [vmem:[%s1250_s20 + $0xe8] sm:$0xff] %v774_v61 }
 0x110 PF: > { %s14_s15 = sadd.s32 1, %s1061_s15  }
 0x111   : > { %p11_p4 = scmp.ge.s32.totalorder %s14_s15, 4  }
 0x113   :  { %13 = sbr.rel (!%p11_p4) target bundleno = 1 (0x1), region = 66 }

// kernel: _lambda_.19
= control target key start
LH: loop header
LB: loop body
LE: loop exit
PB: predicated region body
PF: predicated region fallthrough
CT: control target
= control target key end

     0   :  { %s282_s6 = smov 0   ;;  %s343_s0 = inlined_call_operand.vmem [shape: f32[16,2,8,256], index: 0, kind: input, shape index: {}]   ;;  %s344_s1 = inlined_call_operand.vmem [shape: f32[16,8,128], index: 1, kind: output, shape index: {}]  }
   0x1 LB: > { %s243_s7 = sadd.s32 4294967295, %s270_s6   ;;  %p247_p0 = scmp.ge.s32.totalorder %s270_s6, 1  ;;  %s270_s6 = sphi %s282_s6, %s11_s6  }
   0x2   : > { %p89_p1 = scmp.lt.s32.totalorder %s270_s6, 3 }
   0x4   : > { %p90_p2 = pnand %p247_p0, %p89_p1 }
   0x5   : > { %s248_s8 = sshll.u32 (!%p90_p2), %s243_s7, 3 }
   0x6   : > { %93 = sbr.rel (%p90_p2) target bundleno = 30 (0x1e), region = 24  ;;  %p111_p3 = scmp.lt.s32.totalorder (!%p90_p2), %s248_s8, 15 }
   0xb   : > { %s346_s8 = smov (!%p111_p3, %s248_s8), 15 }
   0xc   : > { %s255_s9 = sshll.u32 %s346_s8, 5  ;;  %s252_s13 = sshll.u32 %s346_s8, 3 }
   0xd   : > { %s293_s12 = scalar_lea.vmem %s343_s0, %s255_s9  ;;  %s307_s16 = scalar_lea.vmem %s344_s1, %s252_s13 }
   0xe   : > { %v123_v0 = vld [vmem:[%s293_s12] sm:$0xff]  ;;  %v124_v1 = vld [vmem:[%s293_s12 + $0x8] sm:$0xff]  ;;  %v125_v2 = vld [vmem:[%s293_s12 + $0x10] sm:$0xff] }
   0xf   : > { %v126_v3 = vld [vmem:[%s293_s12 + $0x18] sm:$0xff]  ;;  %v155_v4 = vmax.f32 %v123_v0, %v125_v2  ;;  %v127_v5 = vld [vmem:[%s293_s12 + $0x20] sm:$0xff]  ;;  %v128_v6 = vld [vmem:[%s293_s12 + $0x28] sm:$0xff] }
  0x10   : > { %v156_v7 = vmax.f32 %v124_v1, %v126_v3  ;;  %v129_v8 = vld [vmem:[%s293_s12 + $0x30] sm:$0xff]  ;;  %v130_v9 = vld [vmem:[%s293_s12 + $0x38] sm:$0xff]  ;;  %v131_v10 = vld [vmem:[%s293_s12 + $0x40] sm:$0xff] }
  0x11   : > { %v157_v11 = vmax.f32 %v127_v5, %v129_v8  ;;  %v158_v12 = vmax.f32 %v128_v6, %v130_v9  ;;  %v132_v13 = vld [vmem:[%s293_s12 + $0x48] sm:$0xff]  ;;  %v133_v14 = vld [vmem:[%s293_s12 + $0x50] sm:$0xff]  ;;  %v134_v15 = vld [vmem:[%s293_s12 + $0x58] sm:$0xff] }
  0x12   : > { %v171_v16 = vmax.f32 %v155_v4, %v156_v7  ;;  %v159_v17 = vmax.f32 %v131_v10, %v133_v14  ;;  %v160_v18 = vmax.f32 %v132_v13, %v134_v15  ;;  %v135_v19 = vld [vmem:[%s293_s12 + $0x60] sm:$0xff]  ;;  %v136_v20 = vld [vmem:[%s293_s12 + $0x68] sm:$0xff]  ;;  %v137_v21 = vld [vmem:[%s293_s12 + $0x70] sm:$0xff] }
  0x13   : > { %v172_v22 = vmax.f32 %v157_v11, %v158_v12  ;;  %v138_v23 = vld [vmem:[%s293_s12 + $0x78] sm:$0xff]  ;;  %v161_v24 = vmax.f32 %v135_v19, %v137_v21  ;;  %v139_v25 = vld [vmem:[%s293_s12 + $0x80] sm:$0xff]  ;;  %v140_v26 = vld [vmem:[%s293_s12 + $0x88] sm:$0xff] }
  0x14   : > { %179 = vst [vmem:[%s307_s16] sm:$0xff] %v171_v16  ;;  %v173_v27 = vmax.f32 %v159_v17, %v160_v18  ;;  %v162_v28 = vmax.f32 %v136_v20, %v138_v23  ;;  %v141_v29 = vld [vmem:[%s293_s12 + $0x90] sm:$0xff]  ;;  %v142_v30 = vld [vmem:[%s293_s12 + $0x98] sm:$0xff]  ;;  %v143_v31 = vld [vmem:[%s293_s12 + $0xa0] sm:$0xff] }
  0x15   : > { %180 = vst [vmem:[%s307_s16 + $0x8] sm:$0xff] %v172_v22  ;;  %v163_v32 = vmax.f32 %v139_v25, %v141_v29  ;;  %v164_v33 = vmax.f32 %v140_v26, %v142_v30  ;;  %v144_v34 = vld [vmem:[%s293_s12 + $0xa8] sm:$0xff]  ;;  %v145_v35 = vld [vmem:[%s293_s12 + $0xb0] sm:$0xff]  ;;  %v146_v36 = vld [vmem:[%s293_s12 + $0xb8] sm:$0xff] }
  0x16   : > { %181 = vst [vmem:[%s307_s16 + $0x10] sm:$0xff] %v173_v27  ;;  %v174_v37 = vmax.f32 %v161_v24, %v162_v28  ;;  %v165_v38 = vmax.f32 %v143_v31, %v145_v35  ;;  %v166_v39 = vmax.f32 %v144_v34, %v146_v36  ;;  %v147_v40 = vld [vmem:[%s293_s12 + $0xc0] sm:$0xff]  ;;  %v148_v41 = vld [vmem:[%s293_s12 + $0xc8] sm:$0xff]  ;;  %v149_v42 = vld [vmem:[%s293_s12 + $0xd0] sm:$0xff] }
  0x17   : > { %v175_v43 = vmax.f32 %v163_v32, %v164_v33  ;;  %v150_v44 = vld [vmem:[%s293_s12 + $0xd8] sm:$0xff]  ;;  %v167_v45 = vmax.f32 %v147_v40, %v149_v42  ;;  %v151_v46 = vld [vmem:[%s293_s12 + $0xe0] sm:$0xff]  ;;  %v152_v47 = vld [vmem:[%s293_s12 + $0xe8] sm:$0xff] }
  0x18   : > { %182 = vst [vmem:[%s307_s16 + $0x18] sm:$0xff] %v174_v37  ;;  %v176_v48 = vmax.f32 %v165_v38, %v166_v39  ;;  %v168_v49 = vmax.f32 %v148_v41, %v150_v44  ;;  %v153_v50 = vld [vmem:[%s293_s12 + $0xf0] sm:$0xff]  ;;  %v154_v51 = vld [vmem:[%s293_s12 + $0xf8] sm:$0xff] }
  0x19   : > { %183 = vst [vmem:[%s307_s16 + $0x20] sm:$0xff] %v175_v43  ;;  %v169_v52 = vmax.f32 %v151_v46, %v153_v50  ;;  %v170_v53 = vmax.f32 %v152_v47, %v154_v51 }
  0x1a   : > { %184 = vst [vmem:[%s307_s16 + $0x28] sm:$0xff] %v176_v48  ;;  %v177_v54 = vmax.f32 %v167_v45, %v168_v49 }
  0x1b   : > { %v178_v55 = vmax.f32 %v169_v52, %v170_v53 }
  0x1c   : > { %185 = vst [vmem:[%s307_s16 + $0x30] sm:$0xff] %v177_v54 }
  0x1d   : > { %186 = vst [vmem:[%s307_s16 + $0x38] sm:$0xff] %v178_v55 }
  0x1e PF: > { %s11_s6 = sadd.s32 1, %s270_s6  }
  0x1f   : > { %p8_p4 = scmp.ge.s32.totalorder %s11_s6, 4  }
  0x21   :  { %10 = sbr.rel (!%p8_p4) target bundleno = 1 (0x1), region = 54 }

// kernel: _lambda_.20
= control target key start
LH: loop header
LB: loop body
LE: loop exit
PB: predicated region body
PF: predicated region fallthrough
CT: control target
= control target key end

     0   :  { %s2311_s15 = smov 0   ;;  %s2970_s0 = inlined_call_operand.vmem [shape: bf16[128,1152], index: 0, kind: input, shape index: {}]   ;;  %s2971_s1 = inlined_call_operand.vmem [shape: bf16[1152,256], index: 1, kind: input, shape index: {}]   ;;  %s2972_s2 = inlined_call_operand.vmem [shape: f32[1,256], index: 2, kind: input, shape index: {}]   ;;  %s2973_s3 = inlined_call_operand.vmem [shape: f32[1,256], index: 3, kind: input, shape index: {}]   ;;  %s2974_s4 = inlined_call_operand.vmem [shape: f32[128,256], index: 4, kind: output, shape index: {}]  }
   0x1 LB: > { %s1790_s16 = sadd.s32 4294967295, %s2283_s15   ;;  %p1794_p0 = scmp.ge.s32.totalorder %s2283_s15, 1  ;;  %s2283_s15 = sphi %s2311_s15, %s14_s15  }
   0x2   : > { %p164_p1 = scmp.lt.s32.totalorder %s2283_s15, 3 }
   0x4   : > { %p165_p2 = pnand %p1794_p0, %p164_p1 }
   0x6   : > { %168 = sbr.rel (%p165_p2) target bundleno = 387 (0x183), region = 36 }
   0xb   : > { %v2009_v0 = vld [vmem:[%s2971_s1 + $0x74] ss:$8 sps:$4 sm:$0xff]   ;;  %v2013_v2 = vld [vmem:[%s2971_s1 + $0x70] ss:$8 sps:$4 sm:$0xff]   ;;  %v2015_v4 = vld [vmem:[%s2971_s1 + $0x64] ss:$8 sps:$4 sm:$0xff]  }
   0xc   : > { %v2011_v1 = vld [vmem:[%s2971_s1 + $0x174] ss:$8 sps:$4 sm:$0xff]   ;;  %1295 = vmatprep.subr.bf16.mxu0 %v2009_v0  ;;  %v2014_v3 = vld [vmem:[%s2971_s1 + $0x170] ss:$8 sps:$4 sm:$0xff]   ;;  %v2017_v5 = vld [vmem:[%s2971_s1 + $0x164] ss:$8 sps:$4 sm:$0xff]  }
   0xd   : > { %1368 = vmatprep.subr.bf16.mxu1 %v2011_v1  ;;  %1296 = vmatpush1.bf16.msra.mxu0 %v2013_v2  ;;  %v2019_v6 = vld [vmem:[%s2971_s1 + $0x60] ss:$8 sps:$4 sm:$0xff]   ;;  %v2021_v8 = vld [vmem:[%s2971_s1 + $0x54] ss:$8 sps:$4 sm:$0xff]   ;;  %v2025_v10 = vld [vmem:[%s2971_s1 + $0x50] ss:$8 sps:$4 sm:$0xff]  }
   0xe   : > { %1369 = vmatpush1.bf16.msra.mxu1 %v2014_v3  ;;  %1297 = vmatprep.subr.bf16.mxu0 %v2015_v4  ;;  %v2020_v7 = vld [vmem:[%s2971_s1 + $0x160] ss:$8 sps:$4 sm:$0xff]   ;;  %v2023_v9 = vld [vmem:[%s2971_s1 + $0x154] ss:$8 sps:$4 sm:$0xff]   ;;  %v2026_v11 = vld [vmem:[%s2971_s1 + $0x150] ss:$8 sps:$4 sm:$0xff]  }
   0xf   : > { %1370 = vmatprep.subr.bf16.mxu1 %v2017_v5  ;;  %v2027_v12 = vld [vmem:[%s2971_s1 + $0x44] ss:$8 sps:$4 sm:$0xff]   ;;  %v2031_v14 = vld [vmem:[%s2971_s1 + $0x40] ss:$8 sps:$4 sm:$0xff]   ;;  %v2033_v16 = vld [vmem:[%s2971_s1 + $0x34] ss:$8 sps:$4 sm:$0xff]  }
  0x10   : > { %v2029_v13 = vld [vmem:[%s2971_s1 + $0x144] ss:$8 sps:$4 sm:$0xff]   ;;  %v2032_v15 = vld [vmem:[%s2971_s1 + $0x140] ss:$8 sps:$4 sm:$0xff]   ;;  %v2035_v17 = vld [vmem:[%s2971_s1 + $0x134] ss:$8 sps:$4 sm:$0xff]  }
  0x11   : > { %1298 = vmatpush1.bf16.msra.mxu0 %v2019_v6  ;;  %v2037_v18 = vld [vmem:[%s2971_s1 + $0x30] ss:$8 sps:$4 sm:$0xff]   ;;  %v2039_v20 = vld [vmem:[%s2971_s1 + $0x24] ss:$8 sps:$4 sm:$0xff]   ;;  %v2043_v22 = vld [vmem:[%s2971_s1 + $0x20] ss:$8 sps:$4 sm:$0xff]  }
  0x12   : > { %1371 = vmatpush1.bf16.msra.mxu1 %v2020_v7  ;;  %1299 = vmatprep.subr.bf16.mxu0 %v2021_v8  ;;  %v2038_v19 = vld [vmem:[%s2971_s1 + $0x130] ss:$8 sps:$4 sm:$0xff]   ;;  %v2041_v21 = vld [vmem:[%s2971_s1 + $0x124] ss:$8 sps:$4 sm:$0xff]   ;;  %v2044_v23 = vld [vmem:[%s2971_s1 + $0x120] ss:$8 sps:$4 sm:$0xff]  }
  0x13   : > { %1372 = vmatprep.subr.bf16.mxu1 %v2023_v9  ;;  %v2045_v24 = vld [vmem:[%s2971_s1 + $0x14] ss:$8 sps:$4 sm:$0xff]   ;;  %v2049_v26 = vld [vmem:[%s2971_s1 + $0x10] ss:$8 sps:$4 sm:$0xff]   ;;  %v2051_v28 = vld [vmem:[%s2971_s1 + $0x4] ss:$8 sps:$4 sm:$0xff]  }
  0x14   : > { %v2047_v25 = vld [vmem:[%s2971_s1 + $0x114] ss:$8 sps:$4 sm:$0xff]   ;;  %v2050_v27 = vld [vmem:[%s2971_s1 + $0x110] ss:$8 sps:$4 sm:$0xff]   ;;  %v2053_v29 = vld [vmem:[%s2971_s1 + $0x104] ss:$8 sps:$4 sm:$0xff]  }
  0x15   : > { %1300 = vmatpush1.bf16.msra.mxu0 %v2025_v10  ;;  %s1795_s29 = sshll.u32 %s1790_s16, 3  ;;  %v2055_v30 = vld [vmem:[%s2971_s1] ss:$8 sps:$4 sm:$0xff]   ;;  %v2057_v32 = vld [vmem:[%s2971_s1 + $0xf4] ss:$8 sps:$4 sm:$0xff]  }
  0x16   : > { %1373 = vmatpush1.bf16.msra.mxu1 %v2026_v11  ;;  %1301 = vmatprep.subr.bf16.mxu0 %v2027_v12  ;;  %v2056_v31 = vld [vmem:[%s2971_s1 + $0x100] ss:$8 sps:$4 sm:$0xff]   ;;  %p193_p3 = scmp.lt.s32.totalorder %s1795_s29, 15  ;;  %v2059_v33 = vld [vmem:[%s2971_s1 + $0x1f4] ss:$8 sps:$4 sm:$0xff]  }
  0x17   : > { %1374 = vmatprep.subr.bf16.mxu1 %v2029_v13  ;;  %v2061_v34 = vld [vmem:[%s2971_s1 + $0xf0] ss:$8 sps:$4 sm:$0xff]   ;;  %v2063_v36 = vld [vmem:[%s2971_s1 + $0xe4] ss:$8 sps:$4 sm:$0xff]   ;;  %v2067_v38 = vld [vmem:[%s2971_s1 + $0xe0] ss:$8 sps:$4 sm:$0xff]  }
  0x18   : > { %v2062_v35 = vld [vmem:[%s2971_s1 + $0x1f0] ss:$8 sps:$4 sm:$0xff]   ;;  %s2996_s29 = smov (!%p193_p3, %s1795_s29), 15  ;;  %v2065_v37 = vld [vmem:[%s2971_s1 + $0x1e4] ss:$8 sps:$4 sm:$0xff]  }
  0x19   : > { %1302 = vmatpush1.bf16.msra.mxu0 %v2031_v14  ;;  %v2068_v39 = vld [vmem:[%s2971_s1 + $0x1e0] ss:$8 sps:$4 sm:$0xff]   ;;  %v2069_v40 = vld [vmem:[%s2971_s1 + $0xd4] ss:$8 sps:$4 sm:$0xff]   ;;  %s1999_s27 = smul.u32 36, %s2996_s29  ;;  %s1982_s7 = sshll.u32 %s2996_s29, 4 }
  0x1a   : > { %1375 = vmatpush1.bf16.msra.mxu1 %v2032_v15  ;;  %1303 = vmatprep.subr.bf16.mxu0 %v2033_v16  ;;  %v2071_v41 = vld [vmem:[%s2971_s1 + $0x1d4] ss:$8 sps:$4 sm:$0xff]   ;;  %v2073_v42 = vld [vmem:[%s2971_s1 + $0xd0] ss:$8 sps:$4 sm:$0xff]   ;;  %v2075_v44 = vld [vmem:[%s2971_s1 + $0xc4] ss:$8 sps:$4 sm:$0xff]   ;;  %s2913_s9 = scalar_lea.vmem %s2974_s4, %s1982_s7 }
  0x1b   : > { %1376 = vmatprep.subr.bf16.mxu1 %v2035_v17  ;;  %v2074_v43 = vld [vmem:[%s2971_s1 + $0x1d0] ss:$8 sps:$4 sm:$0xff]   ;;  %s2462_s12 = scalar_lea.vmem %s2970_s0, %s1999_s27  ;;  %v2077_v45 = vld [vmem:[%s2971_s1 + $0x1c4] ss:$8 sps:$4 sm:$0xff]   ;;  %v2079_v46 = vld [vmem:[%s2971_s1 + $0xc0] ss:$8 sps:$4 sm:$0xff]  }
  0x1c   : > { %v2080_v47 = vld [vmem:[%s2971_s1 + $0x1c0] ss:$8 sps:$4 sm:$0xff]   ;;  %v2081_v48 = vld [vmem:[%s2971_s1 + $0xb4] ss:$8 sps:$4 sm:$0xff]   ;;  %v2110_v51 = vld [vmem:[%s2462_s12 + $0xc] ss:$36 sps:$4 sm:$0xff]  }
  0x1d   : > { %1304 = vmatpush1.bf16.msra.mxu0 %v2037_v18  ;;  %v2107_v49 = vld [vmem:[%s2462_s12 + $0x4] ss:$36 sps:$4 sm:$0xff]   ;;  %v2083_v50 = vld [vmem:[%s2971_s1 + $0x1b4] ss:$8 sps:$4 sm:$0xff]   ;;  %v2085_v52 = vld [vmem:[%s2971_s1 + $0xb0] ss:$8 sps:$4 sm:$0xff]   ;;  %1400 = vmatprep.mubr.bf16.mxu1 %v2110_v51 }
  0x1e   : > { %1377 = vmatpush1.bf16.msra.mxu1 %v2038_v19  ;;  %1305 = vmatprep.subr.bf16.mxu0 %v2039_v20  ;;  %v2086_v53 = vld [vmem:[%s2971_s1 + $0x1b0] ss:$8 sps:$4 sm:$0xff]   ;;  %v2087_v54 = vld [vmem:[%s2971_s1 + $0xa4] ss:$8 sps:$4 sm:$0xff]   ;;  %v2091_v56 = vld [vmem:[%s2971_s1 + $0xa0] ss:$8 sps:$4 sm:$0xff]  }
  0x1f   : > { %1378 = vmatprep.subr.bf16.mxu1 %v2041_v21  ;;  %1327 = vmatprep.mubr.bf16.mxu0 %v2107_v49  ;;  %v2089_v55 = vld [vmem:[%s2971_s1 + $0x1a4] ss:$8 sps:$4 sm:$0xff]   ;;  %v2092_v57 = vld [vmem:[%s2971_s1 + $0x1a0] ss:$8 sps:$4 sm:$0xff]   ;;  %v2093_v58 = vld [vmem:[%s2971_s1 + $0x94] ss:$8 sps:$4 sm:$0xff]  }
  0x20   : > { %v2095_v59 = vld [vmem:[%s2971_s1 + $0x194] ss:$8 sps:$4 sm:$0xff]   ;;  %v2097_v60 = vld [vmem:[%s2971_s1 + $0x90] ss:$8 sps:$4 sm:$0xff]   ;;  %v2099_v62 = vld [vmem:[%s2971_s1 + $0x84] ss:$8 sps:$4 sm:$0xff]  }
  0x21   : > { %1306 = vmatpush1.bf16.msra.mxu0 %v2043_v22  ;;  %v2098_v61 = vld [vmem:[%s2971_s1 + $0x190] ss:$8 sps:$4 sm:$0xff]   ;;  %v2101_v63 = vld [vmem:[%s2971_s1 + $0x184] ss:$8 sps:$4 sm:$0xff]   ;;  %v2103_v0 = vld [vmem:[%s2971_s1 + $0x80] ss:$8 sps:$4 sm:$0xff]  }
  0x22   : > { %1379 = vmatpush1.bf16.msra.mxu1 %v2044_v23  ;;  %1307 = vmatprep.subr.bf16.mxu0 %v2045_v24  ;;  %v2104_v1 = vld [vmem:[%s2971_s1 + $0x180] ss:$8 sps:$4 sm:$0xff]   ;;  %v2113_v2 = vld [vmem:[%s2971_s1 + $0x274] ss:$8 sps:$4 sm:$0xff]   ;;  %v2111_v6 = vld [vmem:[%s2971_s1 + $0x270] ss:$8 sps:$4 sm:$0xff]  }
  0x23   : > { %1380 = vmatprep.subr.bf16.mxu1 %v2047_v25  ;;  %v2116_v3 = vld [vmem:[%s2971_s1 + $0x374] ss:$8 sps:$4 sm:$0xff]   ;;  %v2105_v4 = vld [vmem:[%s2462_s12] ss:$36 sps:$4 sm:$0xff]   ;;  %v2108_v5 = vld [vmem:[%s2462_s12 + $0x8] ss:$36 sps:$4 sm:$0xff]  }
  0x24   : > { %v2114_v7 = vld [vmem:[%s2971_s1 + $0x370] ss:$8 sps:$4 sm:$0xff]   ;;  %v2119_v8 = vld [vmem:[%s2971_s1 + $0x264] ss:$8 sps:$4 sm:$0xff]   ;;  %v2117_v10 = vld [vmem:[%s2971_s1 + $0x260] ss:$8 sps:$4 sm:$0xff]  }
  0x25   : > { %1308 = vmatpush1.bf16.msra.mxu0 %v2049_v26  ;;  %v2122_v9 = vld [vmem:[%s2971_s1 + $0x364] ss:$8 sps:$4 sm:$0xff]   ;;  %v2120_v11 = vld [vmem:[%s2971_s1 + $0x360] ss:$8 sps:$4 sm:$0xff]   ;;  %v2125_v12 = vld [vmem:[%s2971_s1 + $0x254] ss:$8 sps:$4 sm:$0xff]  }
  0x26   : > { %1381 = vmatpush1.bf16.msra.mxu1 %v2050_v27  ;;  %1309 = vmatprep.subr.bf16.mxu0 %v2051_v28  ;;  %v2128_v13 = vld [vmem:[%s2971_s1 + $0x354] ss:$8 sps:$4 sm:$0xff]   ;;  %v2123_v14 = vld [vmem:[%s2971_s1 + $0x250] ss:$8 sps:$4 sm:$0xff]   ;;  %v2169_v18 = vld [vmem:[%s2462_s12 + $0x48] ss:$36 sps:$4 sm:$0xff]  }
  0x27   : > { %1382 = vmatprep.subr.bf16.mxu1 %v2053_v29  ;;  %v2126_v15 = vld [vmem:[%s2971_s1 + $0x350] ss:$8 sps:$4 sm:$0xff]   ;;  %v2131_v20 = vld [vmem:[%s2971_s1 + $0x244] ss:$8 sps:$4 sm:$0xff]   ;;  %v2129_v22 = vld [vmem:[%s2971_s1 + $0x240] ss:$8 sps:$4 sm:$0xff]  }
  0x28   : > { %v2165_v16 = vld [vmem:[%s2462_s12 + $0x4c] ss:$36 sps:$4 sm:$0xff]   ;;  %v2167_v17 = vld [vmem:[%s2462_s12 + $0x54] ss:$36 sps:$4 sm:$0xff]   ;;  %v2132_v23 = vld [vmem:[%s2971_s1 + $0x340] ss:$8 sps:$4 sm:$0xff]  }
  0x29   : > { %1310 = vmatpush1.bf16.msra.mxu0 %v2055_v30  ;;  %v2170_v19 = vld [vmem:[%s2462_s12 + $0x50] ss:$36 sps:$4 sm:$0xff]   ;;  %v2134_v21 = vld [vmem:[%s2971_s1 + $0x344] ss:$8 sps:$4 sm:$0xff]   ;;  %v2185_v29 = vld [vmem:[%s2462_s12 + $0x9c] ss:$36 sps:$4 sm:$0xff]  }
  0x2a   : > { %1383 = vmatpush1.bf16.msra.mxu1 %v2056_v31  ;;  %1311 = vmatprep.subr.bf16.mxu0 %v2057_v32  ;;  %v2137_v24 = vld [vmem:[%s2971_s1 + $0x234] ss:$8 sps:$4 sm:$0xff]   ;;  %v2135_v26 = vld [vmem:[%s2971_s1 + $0x230] ss:$8 sps:$4 sm:$0xff]   ;;  %v2143_v32 = vld [vmem:[%s2971_s1 + $0x224] ss:$8 sps:$4 sm:$0xff]  }
  0x2b   : > { %1384 = vmatprep.subr.bf16.mxu1 %v2059_v33  ;;  %v2140_v25 = vld [vmem:[%s2971_s1 + $0x334] ss:$8 sps:$4 sm:$0xff]   ;;  %v2138_v27 = vld [vmem:[%s2971_s1 + $0x330] ss:$8 sps:$4 sm:$0xff]   ;;  %v2146_v33 = vld [vmem:[%s2971_s1 + $0x324] ss:$8 sps:$4 sm:$0xff]  }
  0x2c   : > { %v2183_v28 = vld [vmem:[%s2462_s12 + $0x94] ss:$36 sps:$4 sm:$0xff]  }
  0x2d   : > { %1312 = vmatpush2.bf16.msra.mxu0 %v2061_v34  ;;  %v2187_v30 = vld [vmem:[%s2462_s12 + $0x90] ss:$36 sps:$4 sm:$0xff]   ;;  %v2188_v31 = vld [vmem:[%s2462_s12 + $0x98] ss:$36 sps:$4 sm:$0xff]   ;;  %v2141_v34 = vld [vmem:[%s2971_s1 + $0x220] ss:$8 sps:$4 sm:$0xff]  }
  0x2e   : > { %1385 = vmatpush2.bf16.msra.mxu1 %v2062_v35  ;;  %1313 = vmatprep.subr.bf16.mxu0 %v2063_v36  ;;  %v2144_v35 = vld [vmem:[%s2971_s1 + $0x320] ss:$8 sps:$4 sm:$0xff]   ;;  %v2149_v36 = vld [vmem:[%s2971_s1 + $0x214] ss:$8 sps:$4 sm:$0xff]   ;;  %v2162_v51 = vld [vmem:[%s2971_s1 + $0x3f0] ss:$8 sps:$4 sm:$0xff]  }
  0x2f   : > { %1386 = vmatprep.subr.bf16.mxu1 %v2065_v37  ;;  %v2152_v37 = vld [vmem:[%s2971_s1 + $0x314] ss:$8 sps:$4 sm:$0xff]  }
  0x30   : > { %v2164_v49 = vld [vmem:[%s2971_s1 + $0x3f4] ss:$8 sps:$4 sm:$0xff]  }
  0x31   : > { %1314 = vmatpush2.bf16.msra.mxu0 %v2067_v38  ;;  %v2147_v38 = vld [vmem:[%s2971_s1 + $0x210] ss:$8 sps:$4 sm:$0xff]  }
  0x32   : > { %1387 = vmatpush2.bf16.msra.mxu1 %v2068_v39  ;;  %1315 = vmatprep.subr.bf16.mxu0 %v2069_v40  ;;  %v2150_v39 = vld [vmem:[%s2971_s1 + $0x310] ss:$8 sps:$4 sm:$0xff]   ;;  %v2201_v40 = vld [vmem:[%s2462_s12 + $0xdc] ss:$36 sps:$4 sm:$0xff]  }
  0x33   : > { %1388 = vmatprep.subr.bf16.mxu1 %v2071_v41  ;;  %v2203_v41 = vld [vmem:[%s2462_s12 + $0xe4] ss:$36 sps:$4 sm:$0xff]  }
  0x35   : > { %1316 = vmatpush2.bf16.msra.mxu0 %v2073_v42  ;;  %v2205_v42 = vld [vmem:[%s2462_s12 + $0xd8] ss:$36 sps:$4 sm:$0xff]  }
  0x36   : > { %1389 = vmatpush2.bf16.msra.mxu1 %v2074_v43  ;;  %1317 = vmatprep.subr.bf16.mxu0 %v2075_v44  ;;  %v2206_v43 = vld [vmem:[%s2462_s12 + $0xe0] ss:$36 sps:$4 sm:$0xff]  }
  0x37   : > { %1390 = vmatprep.subr.bf16.mxu1 %v2077_v45  ;;  %v2155_v44 = vld [vmem:[%s2971_s1 + $0x204] ss:$8 sps:$4 sm:$0xff]  }
  0x38   : > { %v2158_v45 = vld [vmem:[%s2971_s1 + $0x304] ss:$8 sps:$4 sm:$0xff]  }
  0x39   : > { %1318 = vmatpush2.bf16.msra.mxu0 %v2079_v46  ;;  %v2153_v46 = vld [vmem:[%s2971_s1 + $0x200] ss:$8 sps:$4 sm:$0xff]  }
  0x3a   : > { %1391 = vmatpush2.bf16.msra.mxu1 %v2080_v47  ;;  %1319 = vmatprep.subr.bf16.mxu0 %v2081_v48  ;;  %v2156_v47 = vld [vmem:[%s2971_s1 + $0x300] ss:$8 sps:$4 sm:$0xff]   ;;  %v2161_v48 = vld [vmem:[%s2971_s1 + $0x2f4] ss:$8 sps:$4 sm:$0xff]  }
  0x3b   : > { %1392 = vmatprep.subr.bf16.mxu1 %v2083_v50  ;;  %v2159_v50 = vld [vmem:[%s2971_s1 + $0x2f0] ss:$8 sps:$4 sm:$0xff]  }
  0x3d   : > { %1320 = vmatpush2.bf16.msra.mxu0 %v2085_v52  ;;  %v2173_v52 = vld [vmem:[%s2971_s1 + $0x2e4] ss:$8 sps:$4 sm:$0xff]  }
  0x3e   : > { %1393 = vmatpush2.bf16.msra.mxu1 %v2086_v53  ;;  %1321 = vmatprep.subr.bf16.mxu0 %v2087_v54  ;;  %v2176_v53 = vld [vmem:[%s2971_s1 + $0x3e4] ss:$8 sps:$4 sm:$0xff]   ;;  %v2227_v54 = vld [vmem:[%s2462_s12 + $0x14] ss:$36 sps:$4 sm:$0xff]  }
  0x3f   : > { %1394 = vmatprep.subr.bf16.mxu1 %v2089_v55  ;;  %v2230_v55 = vld [vmem:[%s2462_s12 + $0x1c] ss:$36 sps:$4 sm:$0xff]  }
  0x41   : > { %1322 = vmatpush2.bf16.msra.mxu0 %v2091_v56  ;;  %v2171_v56 = vld [vmem:[%s2971_s1 + $0x2e0] ss:$8 sps:$4 sm:$0xff]  }
  0x42   : > { %1395 = vmatpush2.bf16.msra.mxu1 %v2092_v57  ;;  %1323 = vmatprep.subr.bf16.mxu0 %v2093_v58  ;;  %v2174_v57 = vld [vmem:[%s2971_s1 + $0x3e0] ss:$8 sps:$4 sm:$0xff]   ;;  %v2179_v58 = vld [vmem:[%s2971_s1 + $0x2d4] ss:$8 sps:$4 sm:$0xff]  }
  0x43   : > { %1396 = vmatprep.subr.bf16.mxu1 %v2095_v59  ;;  %v2182_v59 = vld [vmem:[%s2971_s1 + $0x3d4] ss:$8 sps:$4 sm:$0xff]  }
  0x45   : > { %1324 = vmatpush2.bf16.msra.mxu0 %v2097_v60  ;;  %v2177_v60 = vld [vmem:[%s2971_s1 + $0x2d0] ss:$8 sps:$4 sm:$0xff]  }
  0x46   : > { %1397 = vmatpush2.bf16.msra.mxu1 %v2098_v61  ;;  %1325 = vmatprep.subr.bf16.mxu0 %v2099_v62  ;;  %v2180_v61 = vld [vmem:[%s2971_s1 + $0x3d0] ss:$8 sps:$4 sm:$0xff]   ;;  %v2191_v62 = vld [vmem:[%s2971_s1 + $0x2c4] ss:$8 sps:$4 sm:$0xff]  }
  0x47   : > { %1398 = vmatprep.subr.bf16.mxu1 %v2101_v63  ;;  %v2194_v63 = vld [vmem:[%s2971_s1 + $0x3c4] ss:$8 sps:$4 sm:$0xff]  }
  0x49   : > { %1326 = vmatpush2.bf16.msra.mxu0 %v2103_v0  ;;  %v2189_v0 = vld [vmem:[%s2971_s1 + $0x2c0] ss:$8 sps:$4 sm:$0xff]  }
  0x4a   : > { %1399 = vmatpush2.bf16.msra.mxu1 %v2104_v1  ;;  %1441 = vmatprep.subr.bf16.mxu0 %v2113_v2  ;;  %v2192_v1 = vld [vmem:[%s2971_s1 + $0x3c0] ss:$8 sps:$4 sm:$0xff]   ;;  %v2197_v2 = vld [vmem:[%s2971_s1 + $0x2b4] ss:$8 sps:$4 sm:$0xff]  }
  0x4b   : > { %1514 = vmatprep.subr.bf16.mxu1 %v2116_v3  ;;  %v2200_v3 = vld [vmem:[%s2971_s1 + $0x3b4] ss:$8 sps:$4 sm:$0xff]  }
  0x4c   : > { %1328 = vmatmul.mubr.bf16.vlgmr.msra.gmra.mxu0 %v2105_v4  ;;  %v2195_v4 = vld [vmem:[%s2971_s1 + $0x2b0] ss:$8 sps:$4 sm:$0xff]  }
  0x4d   : > { %1401 = vmatmul.mubr.bf16.vlgmr.msra.gmra.mxu1 %v2108_v5  ;;  %1442 = vmatpush1.bf16.msra.mxu0 %v2111_v6  ;;  %v2198_v5 = vld [vmem:[%s2971_s1 + $0x3b0] ss:$8 sps:$4 sm:$0xff]   ;;  %v2209_v6 = vld [vmem:[%s2971_s1 + $0x2a4] ss:$8 sps:$4 sm:$0xff]  }
  0x4e   : > { %1515 = vmatpush1.bf16.msra.mxu1 %v2114_v7  ;;  %1443 = vmatprep.subr.bf16.mxu0 %v2119_v8  ;;  %v2212_v7 = vld [vmem:[%s2971_s1 + $0x3a4] ss:$8 sps:$4 sm:$0xff]   ;;  %v2207_v8 = vld [vmem:[%s2971_s1 + $0x2a0] ss:$8 sps:$4 sm:$0xff]  }
  0x4f   : > { %1516 = vmatprep.subr.bf16.mxu1 %v2122_v9  ;;  %1337 = vmatprep.mubr.bf16.mxu0 %v2165_v16  ;;  %v2210_v9 = vld [vmem:[%s2971_s1 + $0x3a0] ss:$8 sps:$4 sm:$0xff]  }
  0x50   : > { %1410 = vmatprep.mubr.bf16.mxu1 %v2167_v17  ;;  %v2219_v16 = vld [vmem:[%s2971_s1 + $0x280] ss:$8 sps:$4 sm:$0xff]  }
  0x51   : > { %1444 = vmatpush1.bf16.msra.mxu0 %v2117_v10  ;;  %v2215_v10 = vld [vmem:[%s2971_s1 + $0x294] ss:$8 sps:$4 sm:$0xff]   ;;  %v2222_v17 = vld [vmem:[%s2971_s1 + $0x380] ss:$8 sps:$4 sm:$0xff]  }
  0x52   : > { %1517 = vmatpush1.bf16.msra.mxu1 %v2120_v11  ;;  %1445 = vmatprep.subr.bf16.mxu0 %v2125_v12  ;;  %v2218_v11 = vld [vmem:[%s2971_s1 + $0x394] ss:$8 sps:$4 sm:$0xff]   ;;  %v2213_v12 = vld [vmem:[%s2971_s1 + $0x290] ss:$8 sps:$4 sm:$0xff]  }
  0x53   : > { %1518 = vmatprep.subr.bf16.mxu1 %v2128_v13  ;;  %v2216_v13 = vld [vmem:[%s2971_s1 + $0x390] ss:$8 sps:$4 sm:$0xff]  }
  0x54   : > { %1338 = vmatmul.mubr.bf16.gmra.mxu0 %v2169_v18  ;;  %v2233_v18 = vld [vmem:[%s2971_s1 + $0x474] ss:$8 sps:$4 sm:$0xff]  }
  0x55   : > { %1411 = vmatmul.mubr.bf16.gmra.mxu1 %v2170_v19  ;;  %1446 = vmatpush1.bf16.msra.mxu0 %v2123_v14  ;;  %v2221_v14 = vld [vmem:[%s2971_s1 + $0x284] ss:$8 sps:$4 sm:$0xff]   ;;  %v2225_v19 = vld [vmem:[%s2462_s12 + $0x10] ss:$36 sps:$4 sm:$0xff]  }
  0x56   : > { %1519 = vmatpush1.bf16.msra.mxu1 %v2126_v15  ;;  %1447 = vmatprep.subr.bf16.mxu0 %v2131_v20  ;;  %v2224_v15 = vld [vmem:[%s2971_s1 + $0x384] ss:$8 sps:$4 sm:$0xff]   ;;  %v2228_v20 = vld [vmem:[%s2462_s12 + $0x18] ss:$36 sps:$4 sm:$0xff]  }
  0x57   : > { %1520 = vmatprep.subr.bf16.mxu1 %v2134_v21  ;;  %1347 = vmatprep.mubr.bf16.mxu0 %v2183_v28  ;;  %v2231_v21 = vld [vmem:[%s2971_s1 + $0x470] ss:$8 sps:$4 sm:$0xff]   ;;  %v2242_v28 = vld [vmem:[%s2462_s12 + $0x60] ss:$36 sps:$4 sm:$0xff]  }
  0x58   : > { %1420 = vmatprep.mubr.bf16.mxu1 %v2185_v29  ;;  %v2243_v29 = vld [vmem:[%s2971_s1 + $0x450] ss:$8 sps:$4 sm:$0xff]  }
  0x59   : > { %1448 = vmatpush1.bf16.msra.mxu0 %v2129_v22  ;;  %v2236_v22 = vld [vmem:[%s2971_s1 + $0x464] ss:$8 sps:$4 sm:$0xff]  }
  0x5a   : > { %1521 = vmatpush1.bf16.msra.mxu1 %v2132_v23  ;;  %1449 = vmatprep.subr.bf16.mxu0 %v2137_v24  ;;  %v2237_v23 = vld [vmem:[%s2462_s12 + $0x5c] ss:$36 sps:$4 sm:$0xff]   ;;  %v2239_v24 = vld [vmem:[%s2462_s12 + $0x64] ss:$36 sps:$4 sm:$0xff]  }
  0x5b   : > { %1522 = vmatprep.subr.bf16.mxu1 %v2140_v25  ;;  %v2234_v25 = vld [vmem:[%s2971_s1 + $0x460] ss:$8 sps:$4 sm:$0xff]  }
  0x5c   : > { %1348 = vmatmul.mubr.bf16.gmra.mxu0 %v2187_v30  ;;  %v2248_v30 = vld [vmem:[%s2971_s1 + $0x444] ss:$8 sps:$4 sm:$0xff]  }
  0x5d   : > { %1421 = vmatmul.mubr.bf16.gmra.mxu1 %v2188_v31  ;;  %1450 = vmatpush1.bf16.msra.mxu0 %v2135_v26  ;;  %v2245_v26 = vld [vmem:[%s2971_s1 + $0x454] ss:$8 sps:$4 sm:$0xff]   ;;  %v2249_v31 = vld [vmem:[%s2462_s12 + $0xa4] ss:$36 sps:$4 sm:$0xff]  }
  0x5e   : > { %1523 = vmatpush1.bf16.msra.mxu1 %v2138_v27  ;;  %1451 = vmatprep.subr.bf16.mxu0 %v2143_v32  ;;  %v2241_v27 = vld [vmem:[%s2462_s12 + $0x58] ss:$36 sps:$4 sm:$0xff]   ;;  %v2251_v32 = vld [vmem:[%s2462_s12 + $0xac] ss:$36 sps:$4 sm:$0xff]  }
  0x5f   : > { %1524 = vmatprep.subr.bf16.mxu1 %v2146_v33  ;;  %1357 = vmatprep.mubr.bf16.mxu0 %v2201_v40  ;;  %v2246_v33 = vld [vmem:[%s2971_s1 + $0x440] ss:$8 sps:$4 sm:$0xff]   ;;  %v2263_v40 = vld [vmem:[%s2462_s12 + $0xf4] ss:$36 sps:$4 sm:$0xff]  }
  0x60   : > { %1430 = vmatprep.mubr.bf16.mxu1 %v2203_v41  ;;  %v2258_v41 = vld [vmem:[%s2971_s1 + $0x420] ss:$8 sps:$4 sm:$0xff]  }
  0x61   : > { %1452 = vmatpush1.bf16.msra.mxu0 %v2141_v34  ;;  %v2257_v34 = vld [vmem:[%s2971_s1 + $0x434] ss:$8 sps:$4 sm:$0xff]  }
  0x62   : > { %1525 = vmatpush1.bf16.msra.mxu1 %v2144_v35  ;;  %1453 = vmatprep.subr.bf16.mxu0 %v2149_v36  ;;  %v2253_v35 = vld [vmem:[%s2462_s12 + $0xa0] ss:$36 sps:$4 sm:$0xff]   ;;  %v2254_v36 = vld [vmem:[%s2462_s12 + $0xa8] ss:$36 sps:$4 sm:$0xff]  }
  0x63   : > { %1526 = vmatprep.subr.bf16.mxu1 %v2152_v37  ;;  %v2255_v37 = vld [vmem:[%s2971_s1 + $0x430] ss:$8 sps:$4 sm:$0xff]  }
  0x64   : > { %1358 = vmatmul.mubr.bf16.gmra.mxu0 %v2205_v42  ;;  %v2269_v42 = vld [vmem:[%s2971_s1 + $0x414] ss:$8 sps:$4 sm:$0xff]  }
  0x65   : > { %1431 = vmatmul.mubr.bf16.gmra.mxu1 %v2206_v43  ;;  %1454 = vmatpush1.bf16.msra.mxu0 %v2147_v38  ;;  %v2260_v38 = vld [vmem:[%s2971_s1 + $0x424] ss:$8 sps:$4 sm:$0xff]  }
  0x66   : > { %1527 = vmatpush1.bf16.msra.mxu1 %v2150_v39  ;;  %1455 = vmatprep.subr.bf16.mxu0 %v2155_v44  ;;  %v2261_v39 = vld [vmem:[%s2462_s12 + $0xec] ss:$36 sps:$4 sm:$0xff]  }
  0x67   : > { %1528 = vmatprep.subr.bf16.mxu1 %v2158_v45  ;;  %1473 = vmatprep.mubr.bf16.mxu0 %v2227_v54  ;;  %v2265_v43 = vld [vmem:[%s2462_s12 + $0xe8] ss:$36 sps:$4 sm:$0xff]   ;;  %v2266_v44 = vld [vmem:[%s2462_s12 + $0xf0] ss:$36 sps:$4 sm:$0xff]  }
  0x68   : > { %1546 = vmatprep.mubr.bf16.mxu1 %v2230_v55  ;;  %v2267_v45 = vld [vmem:[%s2971_s1 + $0x410] ss:$8 sps:$4 sm:$0xff]  }
  0x69   : > { %1456 = vmatpush1.bf16.msra.mxu0 %v2153_v46  ;;  %v2272_v46 = vld [vmem:[%s2971_s1 + $0x404] ss:$8 sps:$4 sm:$0xff]  }
  0x6a   : > { %1529 = vmatpush1.bf16.msra.mxu1 %v2156_v47  ;;  %1457 = vmatprep.subr.bf16.mxu0 %v2161_v48  ;;  %v2270_v47 = vld [vmem:[%s2971_s1 + $0x400] ss:$8 sps:$4 sm:$0xff]   ;;  %v2285_v48 = vmov 0  }
  0x6b   : > { %1530 = vmatprep.subr.bf16.mxu1 %v2164_v49  ;;  %v2273_v49 = vld [vmem:[%s2462_s12 + $0x20] ss:$36 sps:$4 sm:$0xff]  }
  0x6d   : > { %1458 = vmatpush2.bf16.msra.mxu0 %v2159_v50  ;;  %v2274_v50 = vld [vmem:[%s2462_s12 + $0xb0] ss:$36 sps:$4 sm:$0xff]  }
  0x6e   : > { %1531 = vmatpush2.bf16.msra.mxu1 %v2162_v51  ;;  %1459 = vmatprep.subr.bf16.mxu0 %v2173_v52  ;;  %v2275_v51 = vld [vmem:[%s2462_s12 + $0x68] ss:$36 sps:$4 sm:$0xff]   ;;  %v2276_v52 = vld [vmem:[%s2462_s12 + $0xf8] ss:$36 sps:$4 sm:$0xff]  }
  0x6f   : > { %1532 = vmatprep.subr.bf16.mxu1 %v2176_v53 }
  0x71   : > { %1460 = vmatpush2.bf16.msra.mxu0 %v2171_v56 }
  0x72   : > { %1533 = vmatpush2.bf16.msra.mxu1 %v2174_v57  ;;  %1461 = vmatprep.subr.bf16.mxu0 %v2179_v58 }
  0x73   : > { %1534 = vmatprep.subr.bf16.mxu1 %v2182_v59 }
  0x75   : > { %1462 = vmatpush2.bf16.msra.mxu0 %v2177_v60 }
  0x76   : > { %1535 = vmatpush2.bf16.msra.mxu1 %v2180_v61  ;;  %1463 = vmatprep.subr.bf16.mxu0 %v2191_v62 }
  0x77   : > { %1536 = vmatprep.subr.bf16.mxu1 %v2194_v63 }
  0x79   : > { %1464 = vmatpush2.bf16.msra.mxu0 %v2189_v0 }
  0x7a   : > { %1537 = vmatpush2.bf16.msra.mxu1 %v2192_v1  ;;  %1465 = vmatprep.subr.bf16.mxu0 %v2197_v2 }
  0x7b   : > { %1538 = vmatprep.subr.bf16.mxu1 %v2200_v3 }
  0x7d   : > { %1466 = vmatpush2.bf16.msra.mxu0 %v2195_v4 }
  0x7e   : > { %1539 = vmatpush2.bf16.msra.mxu1 %v2198_v5  ;;  %1467 = vmatprep.subr.bf16.mxu0 %v2209_v6 }
  0x7f   : > { %1540 = vmatprep.subr.bf16.mxu1 %v2212_v7 }
  0x81   : > { %1468 = vmatpush2.bf16.msra.mxu0 %v2207_v8 }
  0x82   : > { %1541 = vmatpush2.bf16.msra.mxu1 %v2210_v9  ;;  %1469 = vmatprep.subr.bf16.mxu0 %v2215_v10 }
  0x83   : > { %1542 = vmatprep.subr.bf16.mxu1 %v2218_v11 }
  0x85   : > { %1470 = vmatpush2.bf16.msra.mxu0 %v2213_v12 }
  0x86   : > { %1543 = vmatpush2.bf16.msra.mxu1 %v2216_v13  ;;  %1471 = vmatprep.subr.bf16.mxu0 %v2221_v14 }
  0x87   : > { %1544 = vmatprep.subr.bf16.mxu1 %v2224_v15 }
  0x89   : > { %1472 = vmatpush2.bf16.msra.mxu0 %v2219_v16 }
  0x8a   : > { %1545 = vmatpush2.bf16.msra.mxu1 %v2222_v17  ;;  %1587 = vmatprep.subr.bf16.mxu0 %v2233_v18 }
  0x8b   : > { %1983 = vmatprep.subr.bf16.mxu1 %v2233_v18 }
  0x8c   : > { %1474 = vmatmul.mubr.bf16.vlgmr.msra.gmra.mxu0 %v2225_v19 }
  0x8d   : > { %1547 = vmatmul.mubr.bf16.vlgmr.msra.gmra.mxu1 %v2228_v20  ;;  %1588 = vmatpush1.bf16.msra.mxu0 %v2231_v21 }
  0x8e   : > { %1991 = vmatpush1.bf16.msra.mxu1 %v2231_v21  ;;  %1589 = vmatprep.subr.bf16.mxu0 %v2236_v22 }
  0x8f   : > { %1984 = vmatprep.subr.bf16.mxu1 %v2236_v22  ;;  %1483 = vmatprep.mubr.bf16.mxu0 %v2237_v23 }
  0x90   : > { %1556 = vmatprep.mubr.bf16.mxu1 %v2239_v24 }
  0x91   : > { %1590 = vmatpush1.bf16.msra.mxu0 %v2234_v25 }
  0x92   : > { %1992 = vmatpush1.bf16.msra.mxu1 %v2234_v25  ;;  %1591 = vmatprep.subr.bf16.mxu0 %v2245_v26 }
  0x93   : > { %1985 = vmatprep.subr.bf16.mxu1 %v2245_v26 }
  0x94   : > { %1484 = vmatmul.mubr.bf16.gmra.mxu0 %v2241_v27 }
  0x95   : > { %1557 = vmatmul.mubr.bf16.gmra.mxu1 %v2242_v28  ;;  %1592 = vmatpush1.bf16.msra.mxu0 %v2243_v29 }
  0x96   : > { %1993 = vmatpush1.bf16.msra.mxu1 %v2243_v29  ;;  %1593 = vmatprep.subr.bf16.mxu0 %v2248_v30 }
  0x97   : > { %1986 = vmatprep.subr.bf16.mxu1 %v2248_v30  ;;  %1493 = vmatprep.mubr.bf16.mxu0 %v2249_v31 }
  0x98   : > { %1566 = vmatprep.mubr.bf16.mxu1 %v2251_v32 }
  0x99   : > { %1594 = vmatpush1.bf16.msra.mxu0 %v2246_v33 }
  0x9a   : > { %1994 = vmatpush1.bf16.msra.mxu1 %v2246_v33  ;;  %1595 = vmatprep.subr.bf16.mxu0 %v2257_v34 }
  0x9b   : > { %1987 = vmatprep.subr.bf16.mxu1 %v2257_v34 }
  0x9c   : > { %1494 = vmatmul.mubr.bf16.gmra.mxu0 %v2253_v35  ;;  %v1662_v35 = vlaneseq }
  0x9d   : > { %1567 = vmatmul.mubr.bf16.gmra.mxu1 %v2254_v36  ;;  %1596 = vmatpush1.bf16.msra.mxu0 %v2255_v37 }
  0x9e   : > { %1995 = vmatpush1.bf16.msra.mxu1 %v2255_v37  ;;  %1597 = vmatprep.subr.bf16.mxu0 %v2260_v38 }
  0x9f   : > { %1988 = vmatprep.subr.bf16.mxu1 %v2260_v38  ;;  %1503 = vmatprep.mubr.bf16.mxu0 %v2261_v39 }
  0xa0   : > { %1576 = vmatprep.mubr.bf16.mxu1 %v2263_v40  ;;  %v1663_v40 = vshrl.u32 %v1662_v35, 7 }
  0xa1   : > { %1598 = vmatpush1.bf16.msra.mxu0 %v2258_v41 }
  0xa2   : > { %1996 = vmatpush1.bf16.msra.mxu1 %v2258_v41  ;;  %1599 = vmatprep.subr.bf16.mxu0 %v2269_v42 }
  0xa3   : > { %1989 = vmatprep.subr.bf16.mxu1 %v2269_v42 }
  0xa4   : > { %1504 = vmatmul.mubr.bf16.gmra.mxu0 %v2265_v43 }
  0xa5   : > { %1577 = vmatmul.mubr.bf16.gmra.mxu1 %v2266_v44  ;;  %1600 = vmatpush1.bf16.msra.mxu0 %v2267_v45 }
  0xa6   : > { %1997 = vmatpush1.bf16.msra.mxu1 %v2267_v45  ;;  %1601 = vmatprep.subr.bf16.mxu0 %v2272_v46  ;;  %v1664_v45 = vsub.s32 0, %v1663_v40 }
  0xa7   : > { %1990 = vmatprep.subr.bf16.mxu1 %v2272_v46  ;;  %1619 = vmatprep.mubr.bf16.mxu0 %v2285_v48  ;;  %v1660_v46 = vld [vmem:[%s2972_s2] sm:$0x3] }
  0xa8   : > { %1639 = vmatprep.mubr.bf16.mxu1 %v2285_v48  ;;  %v2863_v35 = vrot.slane %v1660_v46, %v1664_v45 }
  0xa9   : > { %1602 = vmatpush1.bf16.msra.mxu0 %v2270_v47 }
  0xaa   : > { %1998 = vmatpush1.bf16.msra.mxu1 %v2270_v47  ;;  %v1688_v47 = vld [vmem:[%s2973_s3] sm:$0x3]  ;;  %2984 = vst [vmem:[#allocation9_spill] sm:$0xff] %v2863_v35 }
  0xac   : > { %1620 = vmatmul.mubr.bf16.vlgmr.msra.gmra.mxu0 %v2273_v49 }
  0xad   : > { %1640 = vmatmul.mubr.bf16.vlgmr.msra.gmra.mxu1 %v2274_v50  ;;  %1629 = vmatprep.mubr.bf16.mxu0 %v2285_v48 }
  0xae   : > { %1649 = vmatprep.mubr.bf16.mxu1 %v2285_v48  ;;  %v1668_v48 = vsub.s32 1, %v1663_v40 }
  0xb4   : > { %1630 = vmatmul.mubr.bf16.gmra.mxu0 %v2275_v51 }
  0xb5   : > { %1650 = vmatmul.mubr.bf16.gmra.mxu1 %v2276_v52 }
 0x10c   : > { %v2797_v53 = vpop.f32.mrf.mxu0 }
 0x10d   : > { %v2799_v54 = vpop.f32.mrf.mxu1 }
 0x10e   : > { %v2801_v55 = vpop.f32.mrf.mxu0 }
 0x10f   : > { %v2803_v56 = vpop.f32.mrf.mxu1 }
 0x110   : > { %v2805_v57 = vpop.f32.mrf.mxu0 }
 0x111   : > { %v2807_v58 = vpop.f32.mrf.mxu1 }
 0x112   : > { %v2809_v59 = vpop.f32.mrf.mxu0  ;;  %v1407_v40 = vadd.f32 %v2807_v58, %v2805_v57 }
 0x113   : > { %v2811_v60 = vpop.f32.mrf.mxu1 }
 0x114   : > { %v2813_v61 = vpop.f32.mrf.mxu0 }
 0x115   : > { %v2815_v62 = vpop.f32.mrf.mxu1 }
 0x116   : > { %v2817_v63 = vpop.f32.mrf.mxu0 }
 0x117   : > { %v2819_v0 = vpop.f32.mrf.mxu1 }
 0x118   : > { %v2821_v1 = vpop.f32.mrf.mxu0 }
 0x119   : > { %v2823_v2 = vpop.f32.mrf.mxu1 }
 0x11a   : > { %v2825_v3 = vpop.f32.mrf.mxu0 }
 0x11b   : > { %v2827_v4 = vpop.f32.mrf.mxu1 }
 0x11c   : > { %v1349_v5 = vpop.f32.mrf.mxu0 }
 0x11d   : > { %v1422_v6 = vpop.f32.mrf.mxu1 }
 0x11e   : > { %v1351_v7 = vpop.f32.mrf.mxu0 }
 0x11f   : > { %v1424_v8 = vpop.f32.mrf.mxu1 }
 0x120   : > { %v1353_v9 = vpop.f32.mrf.mxu0 }
 0x121   : > { %v1426_v10 = vpop.f32.mrf.mxu1 }
 0x122   : > { %v1355_v11 = vpop.f32.mrf.mxu0  ;;  %v1427_v57 = vadd.f32 %v1426_v10, %v1353_v9 }
 0x123   : > { %v1428_v12 = vpop.f32.mrf.mxu1 }
 0x124   : > { %v1359_v13 = vpop.f32.mrf.mxu0  ;;  %v1429_v58 = vadd.f32 %v1428_v12, %v1355_v11 }
 0x125   : > { %v1432_v14 = vpop.f32.mrf.mxu1 }
 0x126   : > { %v1361_v15 = vpop.f32.mrf.mxu0 }
 0x127   : > { %v1434_v16 = vpop.f32.mrf.mxu1 }
 0x128   : > { %v2829_v17 = vpop.f32.mrf.mxu0 }
 0x129   : > { %v2831_v18 = vpop.f32.mrf.mxu1 }
 0x12a   : > { %v2833_v19 = vpop.f32.mrf.mxu0 }
 0x12b   : > { %v2835_v20 = vpop.f32.mrf.mxu1 }
 0x14c   : > { %v1475_v21 = vpop.f32.mrf.mxu0 }
 0x14d   : > { %v2837_v22 = vpop.f32.mrf.mxu1 }
 0x14e   : > { %v1477_v23 = vpop.f32.mrf.mxu0 }
 0x14f   : > { %v2839_v24 = vpop.f32.mrf.mxu1 }
 0x150   : > { %v1479_v25 = vpop.f32.mrf.mxu0 }
 0x151   : > { %v2841_v26 = vpop.f32.mrf.mxu1 }
 0x152   : > { %v1481_v27 = vpop.f32.mrf.mxu0 }
 0x153   : > { %v2843_v28 = vpop.f32.mrf.mxu1 }
 0x154   : > { %2977 = vst [vmem:[#allocation2_spill] sm:$0xff] %v2843_v28  ;;  %v1485_v29 = vpop.f32.mrf.mxu0  ;;  %v1409_v28 = vadd.f32 %v2811_v60, %v2809_v59 }
 0x155   : > { %v2845_v30 = vpop.f32.mrf.mxu1 }
 0x156   : > { %2978 = vst [vmem:[#allocation3_spill] sm:$0xff] %v2845_v30  ;;  %v1487_v31 = vpop.f32.mrf.mxu0  ;;  %v1405_v30 = vadd.f32 %v2803_v56, %v2801_v55  ;;  %v1417_v55 = vadd.f32 %v2823_v2, %v2821_v1  ;;  %v2889_v56 = vadd.f32 %v2827_v4, %v2825_v3  ;;  %v1437_v2 = vadd.f32 %v2831_v18, %v2829_v17 }
 0x157   : > { %v2847_v32 = vpop.f32.mrf.mxu1  ;;  %v1439_v3 = vadd.f32 %v2835_v20, %v2833_v19 }
 0x158   : > { %2979 = vst [vmem:[#allocation4_spill] sm:$0xff] %v2847_v32  ;;  %v1489_v33 = vpop.f32.mrf.mxu0  ;;  %v2871_v32 = vrot.slane %v1688_v47, %v1668_v48 }
 0x159   : > { %v2849_v34 = vpop.f32.mrf.mxu1  ;;  %v1490_v10 = vadd.f32 %v1489_v33, %v1417_v55  ;;  %v2989_v33 = vld [vmem:[#allocation9_spill] sm:$0xff] }
 0x15a   : > { %2980 = vst [vmem:[#allocation5_spill] sm:$0xff] %v2849_v34  ;;  %v2851_v36 = vpop.f32.mrf.mxu0  ;;  %v2869_v34 = vrot.slane %v1660_v46, %v1668_v48  ;;  %v1478_v46 = vadd.f32 %v1477_v23, %v1405_v30 }
 0x15b   : > { %2981 = vst [vmem:[#allocation6_spill] sm:$0xff] %v2851_v36  ;;  %v2853_v37 = vpop.f32.mrf.mxu1  ;;  %v1403_v36 = vadd.f32 %v2799_v54, %v2797_v53  ;;  %v1415_v53 = vadd.f32 %v2819_v0, %v2817_v63  ;;  %v1425_v54 = vadd.f32 %v1424_v8, %v1351_v7  ;;  %v1480_v63 = vadd.f32 %v1479_v25, %v1407_v40  ;;  %v2986_v18 = vld [vmem:[#allocation2_spill] sm:$0xff] }
 0x15c   : > { %2982 = vst [vmem:[#allocation7_spill] sm:$0xff] %v2853_v37  ;;  %v1495_v38 = vpop.f32.mrf.mxu0  ;;  %v2865_v37 = vrot.slane %v1688_v47, %v1664_v45  ;;  %v1413_v45 = vadd.f32 %v2815_v62, %v2813_v61  ;;  %v1433_v61 = vadd.f32 %v1432_v14, %v1359_v13  ;;  %v1435_v62 = vadd.f32 %v1434_v16, %v1361_v15 }
 0x15d   : > { %v1568_v39 = vpop.f32.mrf.mxu1  ;;  %v1482_v0 = vadd.f32 %v1481_v27, %v1409_v28  ;;  %v1488_v8 = vadd.f32 %v1487_v31, %v1415_v53  ;;  %v1551_v16 = vadd.f32 %v2839_v24, %v1478_v46  ;;  %v1553_v17 = vadd.f32 %v2841_v26, %v1480_v63  ;;  %v2987_v19 = vld [vmem:[#allocation3_spill] sm:$0xff] }
 0x15e   : > { %v1497_v41 = vpop.f32.mrf.mxu0  ;;  %2985 = vst [vmem:[#allocation10_spill] sm:$0xff] %v2865_v37  ;;  %v1486_v7 = vadd.f32 %v1485_v29, %v1413_v45 }
 0x15f   : > { %v1570_v42 = vpop.f32.mrf.mxu1  ;;  %v1498_v47 = vadd.f32 %v1497_v41, %v1425_v54  ;;  %v1555_v28 = vadd.f32 %v2986_v18, %v1482_v0 }
 0x160   : > { %v1499_v43 = vpop.f32.mrf.mxu0  ;;  %v1559_v20 = vadd.f32 %v2987_v19, %v1486_v7 }
 0x161   : > { %v2855_v44 = vpop.f32.mrf.mxu1  ;;  %v1500_v11 = vadd.f32 %v1499_v43, %v1427_v57  ;;  %v1571_v23 = vadd.f32 %v1570_v42, %v1498_v47  ;;  %v2990_v41 = vld [vmem:[#allocation5_spill] sm:$0xff] }
 0x162   : > { %2983 = vst [vmem:[#allocation8_spill] sm:$0xff] %v2855_v44  ;;  %v1501_v49 = vpop.f32.mrf.mxu0  ;;  %v1423_v44 = vadd.f32 %v1422_v6, %v1349_v5  ;;  %v1476_v5 = vadd.f32 %v1475_v21, %v1403_v36  ;;  %v1563_v42 = vadd.f32 %v2990_v41, %v1490_v10  ;;  %v2993_v0 = vld [vmem:[#allocation6_spill] sm:$0xff] }
 0x163   : > { %v1574_v50 = vpop.f32.mrf.mxu1  ;;  %v1502_v12 = vadd.f32 %v1501_v49, %v1429_v58  ;;  %v1492_v7 = vadd.f32 %v2993_v0, %v2889_v56 }
 0x164   : > { %v1505_v51 = vpop.f32.mrf.mxu0  ;;  %v1496_v6 = vadd.f32 %v1495_v38, %v1423_v44  ;;  %v1549_v4 = vadd.f32 %v2837_v22, %v1476_v5  ;;  %v2988_v22 = vld [vmem:[#allocation4_spill] sm:$0xff] }
 0x165   : > { %v1578_v52 = vpop.f32.mrf.mxu1  ;;  %v1506_v13 = vadd.f32 %v1505_v51, %v1433_v61  ;;  %v1561_v29 = vadd.f32 %v2988_v22, %v1488_v8  ;;  %v1575_v48 = vadd.f32 %v1574_v50, %v1502_v12  ;;  %v2992_v40 = vld [vmem:[#allocation10_spill] sm:$0xff] }
 0x166   : > { %v1507_v37 = vpop.f32.mrf.mxu0  ;;  %v1569_v9 = vadd.f32 %v1568_v39, %v1496_v6 }
 0x167   : > { %v2881_v35 = vpop.f32.mrf.mxu1  ;;  %v1579_v26 = vadd.f32 %v1578_v52, %v1506_v13  ;;  %v1508_v6 = vadd.f32 %v1507_v37, %v1435_v62 }
 0x168   : > { %v1509_v59 = vpop.f32.mrf.mxu0 }
 0x169   : > { %v2891_v60 = vpop.f32.mrf.mxu1  ;;  %v2991_v43 = vld [vmem:[#allocation8_spill] sm:$0xff]  ;;  %v1510_v50 = vadd.f32 %v1509_v59, %v1437_v2  ;;  %v1581_v12 = vadd.f32 %v2881_v35, %v1508_v6 }
 0x16a   : > { %v1511_v21 = vpop.f32.mrf.mxu0  ;;  %v1573_v44 = vadd.f32 %v2991_v43, %v1500_v11 }
 0x16b   : > { %v2893_v1 = vpop.f32.mrf.mxu1  ;;  %v1512_v8 = vadd.f32 %v1511_v21, %v1439_v3  ;;  %v1583_v56 = vadd.f32 %v2891_v60, %v1510_v50 }
 0x16c   : > { %v1621_v14 = vpop.f32.mrf.mxu0 }
 0x16d   : > { %v1641_v15 = vpop.f32.mrf.mxu1  ;;  %v1622_v25 = vadd.f32 %v1621_v14, %v1549_v4  ;;  %v1585_v60 = vadd.f32 %v2893_v1, %v1512_v8 }
 0x16e   : > { %v1642_v27 = vadd.f32 %v1641_v15, %v1569_v9  ;;  %v1623_v30 = vpop.f32.mrf.mxu0 }
 0x16f   : > { %v1643_v31 = vpop.f32.mrf.mxu1  ;;  %v1672_v36 = vmul.f32 %v2989_v33, %v1622_v25  ;;  %v1624_v39 = vadd.f32 %v1623_v30, %v1551_v16 }
 0x170   : > { %v1680_v38 = vmul.f32 %v2989_v33, %v1642_v27  ;;  %v1644_v24 = vadd.f32 %v1643_v31, %v1571_v23  ;;  %v1625_v49 = vpop.f32.mrf.mxu0  ;;  %v2994_v27 = vld [vmem:[#allocation7_spill] sm:$0xff] }
 0x171   : > { %v1645_v51 = vpop.f32.mrf.mxu1  ;;  %v1700_v45 = vadd.f32 %v2992_v40, %v1672_v36  ;;  %v1673_v54 = vmul.f32 %v2869_v34, %v1624_v39  ;;  %v1626_v52 = vadd.f32 %v1625_v49, %v1553_v17  ;;  %v1565_v35 = vadd.f32 %v2994_v27, %v1492_v7 }
 0x172   : > { %v1708_v53 = vadd.f32 %v2992_v40, %v1680_v38  ;;  %v1681_v5 = vmul.f32 %v2869_v34, %v1644_v24  ;;  %v1646_v55 = vadd.f32 %v1645_v51, %v1573_v44  ;;  %v1627_v57 = vpop.f32.mrf.mxu0 }
 0x173   : > { %v1647_v58 = vpop.f32.mrf.mxu1  ;;  %1716 = vst [vmem:[%s2913_s9] sm:$0xff] %v1700_v45  ;;  %v1701_v61 = vadd.f32 %v2871_v32, %v1673_v54  ;;  %v1628_v47 = vadd.f32 %v1627_v57, %v1555_v28  ;;  %v1674_v37 = vmul.f32 %v2989_v33, %v1626_v52 }
 0x174   : > { %1724 = vst [vmem:[%s2913_s9 + $0x40] sm:$0xff] %v1708_v53  ;;  %v1709_v46 = vadd.f32 %v2871_v32, %v1681_v5  ;;  %v1648_v63 = vadd.f32 %v1647_v58, %v1575_v48  ;;  %v1682_v59 = vmul.f32 %v2989_v33, %v1646_v55  ;;  %v1631_v62 = vpop.f32.mrf.mxu0 }
 0x175   : > { %v1651_v2 = vpop.f32.mrf.mxu1  ;;  %1717 = vst [vmem:[%s2913_s9 + $0x8] sm:$0xff] %v1701_v61  ;;  %v1675_v4 = vmul.f32 %v2869_v34, %v1628_v47  ;;  %v1632_v10 = vadd.f32 %v1631_v62, %v1559_v20  ;;  %v1702_v21 = vadd.f32 %v2992_v40, %v1674_v37 }
 0x176   : > { %1725 = vst [vmem:[%s2913_s9 + $0x48] sm:$0xff] %v1709_v46  ;;  %v1683_v9 = vmul.f32 %v2869_v34, %v1648_v63  ;;  %v1652_v11 = vadd.f32 %v1651_v2, %v1579_v26  ;;  %v1710_v3 = vadd.f32 %v2992_v40, %v1682_v59  ;;  %v1633_v13 = vpop.f32.mrf.mxu0 }
 0x177   : > { %v1653_v14 = vpop.f32.mrf.mxu1  ;;  %v1703_v15 = vadd.f32 %v2871_v32, %v1675_v4  ;;  %v1676_v23 = vmul.f32 %v2989_v33, %v1632_v10  ;;  %1718 = vst [vmem:[%s2913_s9 + $0x10] sm:$0xff] %v1702_v21  ;;  %v1634_v17 = vadd.f32 %v1633_v13, %v1561_v29 }
 0x178   : > { %v1711_v16 = vadd.f32 %v2871_v32, %v1683_v9  ;;  %v1684_v25 = vmul.f32 %v2989_v33, %v1652_v11  ;;  %1726 = vst [vmem:[%s2913_s9 + $0x50] sm:$0xff] %v1710_v3  ;;  %v1654_v18 = vadd.f32 %v1653_v14, %v1581_v12  ;;  %v1635_v28 = vpop.f32.mrf.mxu0 }
 0x179   : > { %v1655_v19 = vpop.f32.mrf.mxu1  ;;  %1719 = vst [vmem:[%s2913_s9 + $0x18] sm:$0xff] %v1703_v15  ;;  %v1704_v20 = vadd.f32 %v2992_v40, %v1676_v23  ;;  %v1636_v30 = vadd.f32 %v1635_v28, %v1563_v42  ;;  %v1677_v36 = vmul.f32 %v2869_v34, %v1634_v17 }
 0x17a   : > { %1727 = vst [vmem:[%s2913_s9 + $0x58] sm:$0xff] %v1711_v16  ;;  %v1712_v22 = vadd.f32 %v2992_v40, %v1684_v25  ;;  %v1656_v31 = vadd.f32 %v1655_v19, %v1583_v56  ;;  %v1685_v1 = vmul.f32 %v2869_v34, %v1654_v18  ;;  %v1637_v38 = vpop.f32.mrf.mxu0 }
 0x17b   : > { %v1657_v29 = vpop.f32.mrf.mxu1  ;;  %1720 = vst [vmem:[%s2913_s9 + $0x20] sm:$0xff] %v1704_v20  ;;  %v1678_v39 = vmul.f32 %v2989_v33, %v1636_v30  ;;  %v1638_v41 = vadd.f32 %v1637_v38, %v1565_v35  ;;  %v1705_v43 = vadd.f32 %v2871_v32, %v1677_v36 }
 0x17c   : > { %1728 = vst [vmem:[%s2913_s9 + $0x60] sm:$0xff] %v1712_v22  ;;  %v1686_v24 = vmul.f32 %v2989_v33, %v1656_v31  ;;  %v1658_v42 = vadd.f32 %v1657_v29, %v1585_v60  ;;  %v1713_v44 = vadd.f32 %v2871_v32, %v1685_v1 }
 0x17d   : > { %v1706_v48 = vadd.f32 %v2992_v40, %v1678_v39  ;;  %v1679_v49 = vmul.f32 %v2869_v34, %v1638_v41  ;;  %1721 = vst [vmem:[%s2913_s9 + $0x28] sm:$0xff] %v1705_v43 }
 0x17e   : > { %v1714_v26 = vadd.f32 %v2992_v40, %v1686_v24  ;;  %v1687_v51 = vmul.f32 %v2869_v34, %v1658_v42  ;;  %1729 = vst [vmem:[%s2913_s9 + $0x68] sm:$0xff] %v1713_v44 }
 0x17f   : > { %1722 = vst [vmem:[%s2913_s9 + $0x30] sm:$0xff] %v1706_v48  ;;  %v1707_v33 = vadd.f32 %v2871_v32, %v1679_v49 }
 0x180   : > { %1730 = vst [vmem:[%s2913_s9 + $0x70] sm:$0xff] %v1714_v26  ;;  %v1715_v45 = vadd.f32 %v2871_v32, %v1687_v51 }
 0x181   : > { %1723 = vst [vmem:[%s2913_s9 + $0x38] sm:$0xff] %v1707_v33 }
 0x182   : > { %1731 = vst [vmem:[%s2913_s9 + $0x78] sm:$0xff] %v1715_v45 }
 0x183 PF: > { %s14_s15 = sadd.s32 1, %s2283_s15  }
 0x184   : > { %p11_p4 = scmp.ge.s32.totalorder %s14_s15, 4  }
 0x186   :  { %13 = sbr.rel (!%p11_p4) target bundleno = 1 (0x1), region = 66 }

// kernel: _lambda_.21
= control target key start
LH: loop header
LB: loop body
LE: loop exit
PB: predicated region body
PF: predicated region fallthrough
CT: control target
= control target key end

     0   :  { %s1083_s15 = smov 0   ;;  %s1367_s0 = inlined_call_operand.vmem [shape: f32[128,256], index: 0, kind: input, shape index: {}]   ;;  %s1368_s1 = inlined_call_operand.vmem [shape: bf16[256,256], index: 1, kind: input, shape index: {}]   ;;  %s1369_s2 = inlined_call_operand.vmem [shape: f32[1,256], index: 2, kind: input, shape index: {}]   ;;  %s1370_s3 = inlined_call_operand.vmem [shape: f32[1,256], index: 3, kind: input, shape index: {}]   ;;  %s1371_s4 = inlined_call_operand.vmem [shape: f32[128,256], index: 4, kind: output, shape index: {}]  }
   0x1 LB: > { %s849_s16 = sadd.s32 4294967295, %s1055_s15   ;;  %p853_p0 = scmp.ge.s32.totalorder %s1055_s15, 1  ;;  %s1055_s15 = sphi %s1083_s15, %s14_s15  }
   0x2   : > { %p164_p1 = scmp.lt.s32.totalorder %s1055_s15, 3 }
   0x4   : > { %p165_p2 = pnand %p853_p0, %p164_p1 }
   0x5   : > { %s854_s27 = sshll.u32 (!%p165_p2), %s849_s16, 3 }
   0x6   : > { %168 = sbr.rel (%p165_p2) target bundleno = 303 (0x12f), region = 36  ;;  %p193_p3 = scmp.lt.s32.totalorder (!%p165_p2), %s854_s27, 15 }
   0xb   : > { %v1001_v0 = vld [vmem:[%s1368_s1 + $0x74] ss:$8 sps:$4 sm:$0xff]   ;;  %v1003_v1 = vld [vmem:[%s1368_s1 + $0x70] ss:$8 sps:$4 sm:$0xff]   ;;  %v1004_v2 = vld [vmem:[%s1368_s1 + $0x64] ss:$8 sps:$4 sm:$0xff]  }
   0xc   : > { %534 = vmatprep.subr.bf16.mxu0 %v1001_v0  ;;  %960 = vmatprep.subr.bf16.mxu1 %v1001_v0  ;;  %v1006_v3 = vld [vmem:[%s1368_s1 + $0x60] ss:$8 sps:$4 sm:$0xff]   ;;  %v1007_v4 = vld [vmem:[%s1368_s1 + $0x54] ss:$8 sps:$4 sm:$0xff]   ;;  %v1009_v5 = vld [vmem:[%s1368_s1 + $0x50] ss:$8 sps:$4 sm:$0xff]  }
   0xd   : > { %535 = vmatpush1.bf16.msra.mxu0 %v1003_v1  ;;  %976 = vmatpush1.bf16.msra.mxu1 %v1003_v1  ;;  %v1010_v6 = vld [vmem:[%s1368_s1 + $0x44] ss:$8 sps:$4 sm:$0xff]   ;;  %v1012_v7 = vld [vmem:[%s1368_s1 + $0x40] ss:$8 sps:$4 sm:$0xff]   ;;  %s1373_s27 = smov (!%p193_p3, %s854_s27), 15  ;;  %v1057_v18 = vmov 0.0  }
   0xe   : > { %536 = vmatprep.subr.bf16.mxu0 %v1004_v2  ;;  %961 = vmatprep.subr.bf16.mxu1 %v1004_v2  ;;  %v1013_v8 = vld [vmem:[%s1368_s1 + $0x34] ss:$8 sps:$4 sm:$0xff]   ;;  %v1015_v9 = vld [vmem:[%s1368_s1 + $0x30] ss:$8 sps:$4 sm:$0xff]   ;;  %s958_s12 = sshll.u32 %s1373_s27, 4 }
   0xf   : > { %v1016_v10 = vld [vmem:[%s1368_s1 + $0x24] ss:$8 sps:$4 sm:$0xff]   ;;  %s1132_s18 = scalar_lea.vmem %s1367_s0, %s958_s12  ;;  %v1018_v11 = vld [vmem:[%s1368_s1 + $0x20] ss:$8 sps:$4 sm:$0xff]   ;;  %v1019_v12 = vld [vmem:[%s1368_s1 + $0x14] ss:$8 sps:$4 sm:$0xff]   ;;  %s1288_s22 = scalar_lea.vmem %s1371_s4, %s958_s12 }
  0x10   : > { %v207_v13 = vld [vmem:[%s1132_s18 + $0x8] sm:$0xff]  ;;  %v209_v14 = vld [vmem:[%s1132_s18 + $0x18] sm:$0xff]  ;;  %v206_v43 = vld [vmem:[%s1132_s18] sm:$0xff] }
  0x11   : > { %537 = vmatpush1.bf16.msra.mxu0 %v1006_v3  ;;  %977 = vmatpush1.bf16.msra.mxu1 %v1006_v3  ;;  %vm223_vm0 = vcmp.gt.f32.partialorder %v207_v13, 0.0  ;;  %vm225_vm1 = vcmp.gt.f32.partialorder %v209_v14, 0.0  ;;  %vm271_vm2 = vcmp.lt.f32.partialorder %v207_v13, 0.0  ;;  %vm273_vm3 = vcmp.lt.f32.partialorder %v209_v14, 0.0  ;;  %v215_v15 = vld [vmem:[%s1132_s18 + $0x48] sm:$0xff]  ;;  %v217_v16 = vld [vmem:[%s1132_s18 + $0x58] sm:$0xff] }
  0x12   : > { %538 = vmatprep.subr.bf16.mxu0 %v1007_v4  ;;  %962 = vmatprep.subr.bf16.mxu1 %v1007_v4  ;;  %v1021_v17 = vld [vmem:[%s1368_s1 + $0x10] ss:$8 sps:$4 sm:$0xff]   ;;  %v861_v19 = vsel %vm223_vm0, 1.0, %v1057_v18  ;;  %v863_v20 = vsel %vm225_vm1, 1.0, %v1057_v18  ;;  %v877_v21 = vsel %vm271_vm2, 1.0, %v1057_v18  ;;  %v879_v22 = vsel %vm273_vm3, 1.0, %v1057_v18 }
  0x13   : > { %v1022_v23 = vld [vmem:[%s1368_s1 + $0x4] ss:$8 sps:$4 sm:$0xff]   ;;  %v319_v24 = vsub.f32 %v861_v19, %v877_v21  ;;  %v321_v25 = vsub.f32 %v863_v20, %v879_v22  ;;  %vm231_vm4 = vcmp.gt.f32.partialorder %v215_v15, 0.0  ;;  %vm233_vm5 = vcmp.gt.f32.partialorder %v217_v16, 0.0  ;;  %v1024_v31 = vld [vmem:[%s1368_s1] ss:$8 sps:$4 sm:$0xff]  }
  0x14   : > { %v869_v26 = vsel %vm231_vm4, 1.0, %v1057_v18  ;;  %v871_v27 = vsel %vm233_vm5, 1.0, %v1057_v18  ;;  %vm279_vm6 = vcmp.lt.f32.partialorder %v215_v15, 0.0  ;;  %vm281_vm7 = vcmp.lt.f32.partialorder %v217_v16, 0.0  ;;  %v1025_v34 = vld [vmem:[%s1368_s1 + $0xf4] ss:$8 sps:$4 sm:$0xff]  }
  0x15   : > { %539 = vmatpush1.bf16.msra.mxu0 %v1009_v5  ;;  %978 = vmatpush1.bf16.msra.mxu1 %v1009_v5  ;;  %v335_v28 = vpack.c.bf16 %v321_v25, %v319_v24  ;;  %v885_v29 = vsel %vm279_vm6, 1.0, %v1057_v18  ;;  %v887_v30 = vsel %vm281_vm7, 1.0, %v1057_v18  ;;  %v1027_v36 = vld [vmem:[%s1368_s1 + $0xf0] ss:$8 sps:$4 sm:$0xff]   ;;  %v1028_v37 = vld [vmem:[%s1368_s1 + $0xe4] ss:$8 sps:$4 sm:$0xff]  }
  0x16   : > { %540 = vmatprep.subr.bf16.mxu0 %v1010_v6  ;;  %963 = vmatprep.subr.bf16.mxu1 %v1010_v6  ;;  %v327_v32 = vsub.f32 %v869_v26, %v885_v29  ;;  %v329_v33 = vsub.f32 %v871_v27, %v887_v30  ;;  %v1030_v38 = vld [vmem:[%s1368_s1 + $0xe0] ss:$8 sps:$4 sm:$0xff]   ;;  %v1031_v39 = vld [vmem:[%s1368_s1 + $0xd4] ss:$8 sps:$4 sm:$0xff]   ;;  %v1033_v40 = vld [vmem:[%s1368_s1 + $0xd0] ss:$8 sps:$4 sm:$0xff]  }
  0x17   : > { %566 = vmatprep.mubr.bf16.mxu0 %v335_v28  ;;  %v1034_v41 = vld [vmem:[%s1368_s1 + $0xc4] ss:$8 sps:$4 sm:$0xff]   ;;  %v1036_v42 = vld [vmem:[%s1368_s1 + $0xc0] ss:$8 sps:$4 sm:$0xff]   ;;  %v208_v44 = vld [vmem:[%s1132_s18 + $0x10] sm:$0xff]  ;;  %vm222_vm8 = vcmp.gt.f32.partialorder %v206_v43, 0.0 }
  0x18   : > { %v339_v35 = vpack.c.bf16 %v329_v33, %v327_v32  ;;  %v1037_v45 = vld [vmem:[%s1368_s1 + $0xb4] ss:$8 sps:$4 sm:$0xff]   ;;  %vm224_vm9 = vcmp.gt.f32.partialorder %v208_v44, 0.0  ;;  %vm270_vm10 = vcmp.lt.f32.partialorder %v206_v43, 0.0  ;;  %v214_v46 = vld [vmem:[%s1132_s18 + $0x40] sm:$0xff]  ;;  %vm272_vm11 = vcmp.lt.f32.partialorder %v208_v44, 0.0 }
  0x19   : > { %541 = vmatpush1.bf16.msra.mxu0 %v1012_v7  ;;  %979 = vmatpush1.bf16.msra.mxu1 %v1012_v7  ;;  %v1039_v47 = vld [vmem:[%s1368_s1 + $0xb0] ss:$8 sps:$4 sm:$0xff]   ;;  %v1040_v49 = vld [vmem:[%s1368_s1 + $0xa4] ss:$8 sps:$4 sm:$0xff]   ;;  %v1201_v52 = vsel %vm222_vm8, 1.0, %v1057_v18  ;;  %v1204_v53 = vsel %vm224_vm9, 1.0, %v1057_v18 }
  0x1a   : > { %542 = vmatprep.subr.bf16.mxu0 %v1013_v8  ;;  %964 = vmatprep.subr.bf16.mxu1 %v1013_v8  ;;  %v216_v48 = vld [vmem:[%s1132_s18 + $0x50] sm:$0xff]  ;;  %v211_v50 = vld [vmem:[%s1132_s18 + $0x28] sm:$0xff]  ;;  %v213_v51 = vld [vmem:[%s1132_s18 + $0x38] sm:$0xff]  ;;  %v1207_v54 = vsel %vm270_vm10, 1.0, %v1057_v18  ;;  %vm230_vm12 = vcmp.gt.f32.partialorder %v214_v46, 0.0  ;;  %v878_v57 = vsel %vm272_vm11, 1.0, %v1057_v18 }
  0x1b   : > { %586 = vmatprep.mubr.bf16.mxu1 %v339_v35  ;;  %v219_v55 = vld [vmem:[%s1132_s18 + $0x68] sm:$0xff]  ;;  %v221_v56 = vld [vmem:[%s1132_s18 + $0x78] sm:$0xff]  ;;  %vm232_vm13 = vcmp.gt.f32.partialorder %v216_v48, 0.0  ;;  %vm278_vm14 = vcmp.lt.f32.partialorder %v214_v46, 0.0  ;;  %vm280_vm15 = vcmp.lt.f32.partialorder %v216_v48, 0.0  ;;  %vm227_vm0 = vcmp.gt.f32.partialorder %v211_v50, 0.0 }
  0x1c   : > { %v1042_v58 = vld [vmem:[%s1368_s1 + $0xa0] ss:$8 sps:$4 sm:$0xff]   ;;  %vm229_vm1 = vcmp.gt.f32.partialorder %v213_v51, 0.0  ;;  %vm275_vm2 = vcmp.lt.f32.partialorder %v211_v50, 0.0  ;;  %vm277_vm3 = vcmp.lt.f32.partialorder %v213_v51, 0.0  ;;  %vm235_vm4 = vcmp.gt.f32.partialorder %v219_v55, 0.0 }
  0x1d   : > { %543 = vmatpush1.bf16.msra.mxu0 %v1015_v9  ;;  %980 = vmatpush1.bf16.msra.mxu1 %v1015_v9  ;;  %v1043_v59 = vld [vmem:[%s1368_s1 + $0x94] ss:$8 sps:$4 sm:$0xff]   ;;  %vm237_vm5 = vcmp.gt.f32.partialorder %v221_v56, 0.0  ;;  %vm283_vm6 = vcmp.lt.f32.partialorder %v219_v55, 0.0  ;;  %vm285_vm7 = vcmp.lt.f32.partialorder %v221_v56, 0.0  ;;  %v868_v60 = vsel %vm230_vm12, 1.0, %v1057_v18 }
  0x1e   : > { %544 = vmatprep.subr.bf16.mxu0 %v1016_v10  ;;  %965 = vmatprep.subr.bf16.mxu1 %v1016_v10  ;;  %v870_v61 = vsel %vm232_vm13, 1.0, %v1057_v18  ;;  %v884_v62 = vsel %vm278_vm14, 1.0, %v1057_v18  ;;  %v886_v63 = vsel %vm280_vm15, 1.0, %v1057_v18  ;;  %v1045_v0 = vld [vmem:[%s1368_s1 + $0x90] ss:$8 sps:$4 sm:$0xff]   ;;  %v865_v1 = vsel %vm227_vm0, 1.0, %v1057_v18 }
  0x1f   : > { %v867_v2 = vsel %vm229_vm1, 1.0, %v1057_v18  ;;  %v881_v3 = vsel %vm275_vm2, 1.0, %v1057_v18  ;;  %v883_v4 = vsel %vm277_vm3, 1.0, %v1057_v18  ;;  %v873_v5 = vsel %vm235_vm4, 1.0, %v1057_v18  ;;  %v210_v9 = vld [vmem:[%s1132_s18 + $0x20] sm:$0xff]  ;;  %v212_v13 = vld [vmem:[%s1132_s18 + $0x30] sm:$0xff] }
  0x20   : > { %v875_v6 = vsel %vm237_vm5, 1.0, %v1057_v18  ;;  %v889_v7 = vsel %vm283_vm6, 1.0, %v1057_v18  ;;  %v891_v8 = vsel %vm285_vm7, 1.0, %v1057_v18  ;;  %v1046_v10 = vld [vmem:[%s1368_s1 + $0x84] ss:$8 sps:$4 sm:$0xff]   ;;  %v326_v14 = vsub.f32 %v868_v60, %v884_v62  ;;  %v220_v20 = vld [vmem:[%s1132_s18 + $0x70] sm:$0xff] }
  0x21   : > { %545 = vmatpush1.bf16.msra.mxu0 %v1018_v11  ;;  %981 = vmatpush1.bf16.msra.mxu1 %v1018_v11  ;;  %v318_v11 = vsub.f32 %v1201_v52, %v1207_v54  ;;  %v328_v15 = vsub.f32 %v870_v61, %v886_v63  ;;  %v323_v16 = vsub.f32 %v865_v1, %v881_v3  ;;  %v218_v19 = vld [vmem:[%s1132_s18 + $0x60] sm:$0xff]  ;;  %vm226_vm8 = vcmp.gt.f32.partialorder %v210_v9, 0.0 }
  0x22   : > { %546 = vmatprep.subr.bf16.mxu0 %v1019_v12  ;;  %966 = vmatprep.subr.bf16.mxu1 %v1019_v12  ;;  %v320_v12 = vsub.f32 %v1204_v53, %v878_v57  ;;  %v331_v21 = vsub.f32 %v873_v5, %v889_v7  ;;  %v333_v22 = vsub.f32 %v875_v6, %v891_v8  ;;  %vm228_vm9 = vcmp.gt.f32.partialorder %v212_v13, 0.0 }
  0x23   : > { %vm274_vm10 = vcmp.lt.f32.partialorder %v210_v9, 0.0  ;;  %vm276_vm11 = vcmp.lt.f32.partialorder %v212_v13, 0.0  ;;  %vm234_vm12 = vcmp.gt.f32.partialorder %v218_v19, 0.0  ;;  %vm236_vm13 = vcmp.gt.f32.partialorder %v220_v20, 0.0 }
  0x24   : > { %vm282_vm14 = vcmp.lt.f32.partialorder %v218_v19, 0.0  ;;  %vm284_vm15 = vcmp.lt.f32.partialorder %v220_v20, 0.0  ;;  %v334_v24 = vpack.c.bf16 %v320_v12, %v318_v11  ;;  %v338_v25 = vpack.c.bf16 %v328_v15, %v326_v14 }
  0x25   : > { %547 = vmatpush1.bf16.msra.mxu0 %v1021_v17  ;;  %982 = vmatpush1.bf16.msra.mxu1 %v1021_v17  ;;  %v325_v17 = vsub.f32 %v867_v2, %v883_v4  ;;  %v864_v27 = vsel %vm226_vm8, 1.0, %v1057_v18  ;;  %v341_v28 = vpack.c.bf16 %v333_v22, %v331_v21  ;;  %v866_v29 = vsel %vm228_vm9, 1.0, %v1057_v18 }
  0x26   : > { %548 = vmatprep.subr.bf16.mxu0 %v1022_v23  ;;  %967 = vmatprep.subr.bf16.mxu1 %v1022_v23  ;;  %v1048_v23 = vld [vmem:[%s1368_s1 + $0x80] ss:$8 sps:$4 sm:$0xff]   ;;  %v880_v30 = vsel %vm274_vm10, 1.0, %v1057_v18  ;;  %v872_v32 = vsel %vm234_vm12, 1.0, %v1057_v18  ;;  %v874_v33 = vsel %vm236_vm13, 1.0, %v1057_v18  ;;  %v890_v35 = vsel %vm284_vm15, 1.0, %v1057_v18 }
  0x27   : > { %v337_v26 = vpack.c.bf16 %v325_v17, %v323_v16 }
  0x29   : > { %549 = vmatpush1.bf16.msra.mxu0 %v1024_v31  ;;  %983 = vmatpush1.bf16.msra.mxu1 %v1024_v31  ;;  %v882_v31 = vsel %vm276_vm11, 1.0, %v1057_v18 }
  0x2a   : > { %550 = vmatprep.subr.bf16.mxu0 %v1025_v34  ;;  %968 = vmatprep.subr.bf16.mxu1 %v1025_v34  ;;  %v888_v34 = vsel %vm282_vm14, 1.0, %v1057_v18 }
  0x2d   : > { %551 = vmatpush2.bf16.msra.mxu0 %v1027_v36  ;;  %984 = vmatpush2.bf16.msra.mxu1 %v1027_v36  ;;  %v322_v36 = vsub.f32 %v864_v27, %v880_v30 }
  0x2e   : > { %552 = vmatprep.subr.bf16.mxu0 %v1028_v37  ;;  %969 = vmatprep.subr.bf16.mxu1 %v1028_v37  ;;  %v324_v37 = vsub.f32 %v866_v29, %v882_v31 }
  0x31   : > { %553 = vmatpush2.bf16.msra.mxu0 %v1030_v38  ;;  %985 = vmatpush2.bf16.msra.mxu1 %v1030_v38  ;;  %v330_v38 = vsub.f32 %v872_v32, %v888_v34 }
  0x32   : > { %554 = vmatprep.subr.bf16.mxu0 %v1031_v39  ;;  %970 = vmatprep.subr.bf16.mxu1 %v1031_v39  ;;  %v332_v39 = vsub.f32 %v874_v33, %v890_v35 }
  0x35   : > { %555 = vmatpush2.bf16.msra.mxu0 %v1033_v40  ;;  %986 = vmatpush2.bf16.msra.mxu1 %v1033_v40  ;;  %v336_v40 = vpack.c.bf16 %v324_v37, %v322_v36 }
  0x36   : > { %556 = vmatprep.subr.bf16.mxu0 %v1034_v41  ;;  %971 = vmatprep.subr.bf16.mxu1 %v1034_v41  ;;  %v340_v41 = vpack.c.bf16 %v332_v39, %v330_v38 }
  0x39   : > { %557 = vmatpush2.bf16.msra.mxu0 %v1036_v42  ;;  %987 = vmatpush2.bf16.msra.mxu1 %v1036_v42  ;;  %v609_v42 = vlaneseq }
  0x3a   : > { %558 = vmatprep.subr.bf16.mxu0 %v1037_v45  ;;  %972 = vmatprep.subr.bf16.mxu1 %v1037_v45  ;;  %v607_v45 = vld [vmem:[%s1369_s2] sm:$0x3] }
  0x3b   : > { %v610_v43 = vshrl.u32 %v609_v42, 7 }
  0x3d   : > { %559 = vmatpush2.bf16.msra.mxu0 %v1039_v47  ;;  %988 = vmatpush2.bf16.msra.mxu1 %v1039_v47  ;;  %v611_v44 = vsub.s32 0, %v610_v43  ;;  %v615_v46 = vsub.s32 1, %v610_v43  ;;  %v635_v47 = vld [vmem:[%s1370_s3] sm:$0x3] }
  0x3e   : > { %560 = vmatprep.subr.bf16.mxu0 %v1040_v49  ;;  %973 = vmatprep.subr.bf16.mxu1 %v1040_v49 }
  0x3f   : > { %v1269_v48 = vrot.slane %v607_v45, %v611_v44  ;;  %v1271_v49 = vrot.slane %v635_v47, %v611_v44  ;;  %v1273_v50 = vrot.slane %v607_v45, %v615_v46  ;;  %v1277_v56 = vrot.slane %v635_v47, %v615_v46 }
  0x41   : > { %561 = vmatpush2.bf16.msra.mxu0 %v1042_v58  ;;  %989 = vmatpush2.bf16.msra.mxu1 %v1042_v58 }
  0x42   : > { %562 = vmatprep.subr.bf16.mxu0 %v1043_v59  ;;  %974 = vmatprep.subr.bf16.mxu1 %v1043_v59 }
  0x45   : > { %563 = vmatpush2.bf16.msra.mxu0 %v1045_v0  ;;  %990 = vmatpush2.bf16.msra.mxu1 %v1045_v0 }
  0x46   : > { %564 = vmatprep.subr.bf16.mxu0 %v1046_v10  ;;  %975 = vmatprep.subr.bf16.mxu1 %v1046_v10 }
  0x49   : > { %565 = vmatpush2.bf16.msra.mxu0 %v1048_v23  ;;  %991 = vmatpush2.bf16.msra.mxu1 %v1048_v23 }
  0x4c   : > { %567 = vmatmul.mubr.bf16.vlgmr.msra.gmra.mxu0 %v334_v24  ;;  %587 = vmatmul.mubr.bf16.vlgmr.msra.gmra.mxu1 %v338_v25 }
  0x4d   : > { %576 = vmatprep.mubr.bf16.mxu0 %v337_v26  ;;  %596 = vmatprep.mubr.bf16.mxu1 %v341_v28 }
  0x54   : > { %577 = vmatmul.mubr.bf16.gmra.mxu0 %v336_v40  ;;  %597 = vmatmul.mubr.bf16.gmra.mxu1 %v340_v41 }
 0x10c   : > { %v568_v51 = vpop.f32.mrf.mxu0  ;;  %v588_v52 = vpop.f32.mrf.mxu1 }
 0x10d   : > { %v619_v53 = vmul.f32 %v1269_v48, %v568_v51  ;;  %v627_v54 = vmul.f32 %v1269_v48, %v588_v52 }
 0x10e   : > { %v570_v55 = vpop.f32.mrf.mxu0  ;;  %v590_v57 = vpop.f32.mrf.mxu1 }
 0x10f   : > { %v647_v58 = vadd.f32 %v1271_v49, %v619_v53  ;;  %v655_v59 = vadd.f32 %v1271_v49, %v627_v54  ;;  %v620_v60 = vmul.f32 %v1273_v50, %v570_v55  ;;  %v628_v61 = vmul.f32 %v1273_v50, %v590_v57 }
 0x110   : > { %v572_v62 = vpop.f32.mrf.mxu0  ;;  %v592_v63 = vpop.f32.mrf.mxu1 }
 0x111   : > { %vm663_vm0 = vcmp.gt.f32.partialorder %v647_v58, 0.0  ;;  %vm711_vm1 = vcmp.lt.f32.partialorder %v647_v58, 0.0  ;;  %vm671_vm2 = vcmp.gt.f32.partialorder %v655_v59, 0.0  ;;  %vm719_vm3 = vcmp.lt.f32.partialorder %v655_v59, 0.0 }
 0x112   : > { %v924_v0 = vsel %vm663_vm0, 1.0, %v1057_v18  ;;  %v940_v1 = vsel %vm711_vm1, 1.0, %v1057_v18  ;;  %v932_v2 = vsel %vm671_vm2, 1.0, %v1057_v18  ;;  %v948_v3 = vsel %vm719_vm3, 1.0, %v1057_v18  ;;  %v574_v4 = vpop.f32.mrf.mxu0  ;;  %v594_v5 = vpop.f32.mrf.mxu1 }
 0x113   : > { %v759_v6 = vsub.f32 %v924_v0, %v940_v1  ;;  %v767_v7 = vsub.f32 %v932_v2, %v948_v3  ;;  %v648_v8 = vadd.f32 %v1277_v56, %v620_v60  ;;  %v656_v9 = vadd.f32 %v1277_v56, %v628_v61 }
 0x114   : > { %v621_v10 = vmul.f32 %v1269_v48, %v572_v62  ;;  %v629_v11 = vmul.f32 %v1269_v48, %v592_v63  ;;  %v622_v12 = vmul.f32 %v1273_v50, %v574_v4  ;;  %v630_v13 = vmul.f32 %v1273_v50, %v594_v5  ;;  %v578_v14 = vpop.f32.mrf.mxu0  ;;  %v598_v15 = vpop.f32.mrf.mxu1 }
 0x115   : > { %775 = vst [vmem:[%s1288_s22] sm:$0xff] %v759_v6  ;;  %783 = vst [vmem:[%s1288_s22 + $0x40] sm:$0xff] %v767_v7  ;;  %vm664_vm4 = vcmp.gt.f32.partialorder %v648_v8, 0.0  ;;  %vm712_vm5 = vcmp.lt.f32.partialorder %v648_v8, 0.0  ;;  %vm672_vm6 = vcmp.gt.f32.partialorder %v656_v9, 0.0  ;;  %vm720_vm7 = vcmp.lt.f32.partialorder %v656_v9, 0.0 }
 0x116   : > { %v925_v16 = vsel %vm664_vm4, 1.0, %v1057_v18  ;;  %v941_v17 = vsel %vm712_vm5, 1.0, %v1057_v18  ;;  %v933_v19 = vsel %vm672_vm6, 1.0, %v1057_v18  ;;  %v949_v20 = vsel %vm720_vm7, 1.0, %v1057_v18  ;;  %v580_v29 = vpop.f32.mrf.mxu0  ;;  %v600_v30 = vpop.f32.mrf.mxu1 }
 0x117   : > { %v760_v21 = vsub.f32 %v925_v16, %v941_v17  ;;  %v768_v22 = vsub.f32 %v933_v19, %v949_v20  ;;  %v649_v23 = vadd.f32 %v1271_v49, %v621_v10  ;;  %v657_v24 = vadd.f32 %v1271_v49, %v629_v11 }
 0x118   : > { %v650_v25 = vadd.f32 %v1277_v56, %v622_v12  ;;  %v658_v26 = vadd.f32 %v1277_v56, %v630_v13  ;;  %v623_v27 = vmul.f32 %v1269_v48, %v578_v14  ;;  %v631_v28 = vmul.f32 %v1269_v48, %v598_v15  ;;  %v582_v39 = vpop.f32.mrf.mxu0  ;;  %v602_v40 = vpop.f32.mrf.mxu1 }
 0x119   : > { %776 = vst [vmem:[%s1288_s22 + $0x8] sm:$0xff] %v760_v21  ;;  %784 = vst [vmem:[%s1288_s22 + $0x48] sm:$0xff] %v768_v22  ;;  %vm665_vm8 = vcmp.gt.f32.partialorder %v649_v23, 0.0  ;;  %vm713_vm9 = vcmp.lt.f32.partialorder %v649_v23, 0.0  ;;  %vm673_vm10 = vcmp.gt.f32.partialorder %v657_v24, 0.0  ;;  %vm721_vm11 = vcmp.lt.f32.partialorder %v657_v24, 0.0 }
 0x11a   : > { %v926_v31 = vsel %vm665_vm8, 1.0, %v1057_v18  ;;  %v942_v32 = vsel %vm713_vm9, 1.0, %v1057_v18  ;;  %v934_v33 = vsel %vm673_vm10, 1.0, %v1057_v18  ;;  %v950_v34 = vsel %vm721_vm11, 1.0, %v1057_v18  ;;  %v584_v57 = vpop.f32.mrf.mxu0  ;;  %v604_v58 = vpop.f32.mrf.mxu1 }
 0x11b   : > { %v761_v35 = vsub.f32 %v926_v31, %v942_v32  ;;  %v769_v36 = vsub.f32 %v934_v33, %v950_v34  ;;  %vm666_vm12 = vcmp.gt.f32.partialorder %v650_v25, 0.0  ;;  %vm714_vm13 = vcmp.lt.f32.partialorder %v650_v25, 0.0 }
 0x11c   : > { %v927_v37 = vsel %vm666_vm12, 1.0, %v1057_v18  ;;  %v943_v38 = vsel %vm714_vm13, 1.0, %v1057_v18  ;;  %vm674_vm14 = vcmp.gt.f32.partialorder %v658_v26, 0.0  ;;  %vm722_vm15 = vcmp.lt.f32.partialorder %v658_v26, 0.0 }
 0x11d   : > { %777 = vst [vmem:[%s1288_s22 + $0x10] sm:$0xff] %v761_v35  ;;  %785 = vst [vmem:[%s1288_s22 + $0x50] sm:$0xff] %v769_v36  ;;  %v762_v41 = vsub.f32 %v927_v37, %v943_v38  ;;  %v935_v42 = vsel %vm674_vm14, 1.0, %v1057_v18  ;;  %v951_v43 = vsel %vm722_vm15, 1.0, %v1057_v18  ;;  %v651_v44 = vadd.f32 %v1271_v49, %v623_v27 }
 0x11e   : > { %v770_v45 = vsub.f32 %v935_v42, %v951_v43  ;;  %v659_v46 = vadd.f32 %v1271_v49, %v631_v28  ;;  %v624_v47 = vmul.f32 %v1273_v50, %v580_v29  ;;  %v632_v51 = vmul.f32 %v1273_v50, %v600_v30 }
 0x11f   : > { %778 = vst [vmem:[%s1288_s22 + $0x18] sm:$0xff] %v762_v41  ;;  %vm667_vm0 = vcmp.gt.f32.partialorder %v651_v44, 0.0  ;;  %vm715_vm1 = vcmp.lt.f32.partialorder %v651_v44, 0.0  ;;  %v625_v52 = vmul.f32 %v1269_v48, %v582_v39  ;;  %v633_v53 = vmul.f32 %v1269_v48, %v602_v40 }
 0x120   : > { %786 = vst [vmem:[%s1288_s22 + $0x58] sm:$0xff] %v770_v45  ;;  %v928_v54 = vsel %vm667_vm0, 1.0, %v1057_v18  ;;  %v944_v55 = vsel %vm715_vm1, 1.0, %v1057_v18  ;;  %vm675_vm2 = vcmp.gt.f32.partialorder %v659_v46, 0.0  ;;  %vm723_vm3 = vcmp.lt.f32.partialorder %v659_v46, 0.0 }
 0x121   : > { %v763_v59 = vsub.f32 %v928_v54, %v944_v55  ;;  %v936_v60 = vsel %vm675_vm2, 1.0, %v1057_v18  ;;  %v952_v61 = vsel %vm723_vm3, 1.0, %v1057_v18  ;;  %v652_v62 = vadd.f32 %v1277_v56, %v624_v47 }
 0x122   : > { %v771_v63 = vsub.f32 %v936_v60, %v952_v61  ;;  %v660_v48 = vadd.f32 %v1277_v56, %v632_v51  ;;  %v653_v0 = vadd.f32 %v1271_v49, %v625_v52  ;;  %v661_v1 = vadd.f32 %v1271_v49, %v633_v53 }
 0x123   : > { %779 = vst [vmem:[%s1288_s22 + $0x20] sm:$0xff] %v763_v59  ;;  %vm668_vm4 = vcmp.gt.f32.partialorder %v652_v62, 0.0  ;;  %vm716_vm5 = vcmp.lt.f32.partialorder %v652_v62, 0.0  ;;  %v626_v2 = vmul.f32 %v1273_v50, %v584_v57  ;;  %v634_v3 = vmul.f32 %v1273_v50, %v604_v58 }
 0x124   : > { %787 = vst [vmem:[%s1288_s22 + $0x60] sm:$0xff] %v771_v63  ;;  %v929_v4 = vsel %vm668_vm4, 1.0, %v1057_v18  ;;  %v945_v5 = vsel %vm716_vm5, 1.0, %v1057_v18  ;;  %vm676_vm6 = vcmp.gt.f32.partialorder %v660_v48, 0.0  ;;  %vm724_vm7 = vcmp.lt.f32.partialorder %v660_v48, 0.0 }
 0x125   : > { %v764_v6 = vsub.f32 %v929_v4, %v945_v5  ;;  %v937_v7 = vsel %vm676_vm6, 1.0, %v1057_v18  ;;  %v953_v49 = vsel %vm724_vm7, 1.0, %v1057_v18  ;;  %vm669_vm8 = vcmp.gt.f32.partialorder %v653_v0, 0.0 }
 0x126   : > { %v772_v8 = vsub.f32 %v937_v7, %v953_v49  ;;  %v930_v9 = vsel %vm669_vm8, 1.0, %v1057_v18  ;;  %vm717_vm9 = vcmp.lt.f32.partialorder %v653_v0, 0.0  ;;  %vm677_vm10 = vcmp.gt.f32.partialorder %v661_v1, 0.0 }
 0x127   : > { %780 = vst [vmem:[%s1288_s22 + $0x28] sm:$0xff] %v764_v6  ;;  %v946_v50 = vsel %vm717_vm9, 1.0, %v1057_v18  ;;  %v938_v10 = vsel %vm677_vm10, 1.0, %v1057_v18  ;;  %vm725_vm11 = vcmp.lt.f32.partialorder %v661_v1, 0.0  ;;  %v654_v11 = vadd.f32 %v1277_v56, %v626_v2 }
 0x128   : > { %788 = vst [vmem:[%s1288_s22 + $0x68] sm:$0xff] %v772_v8  ;;  %v765_v12 = vsub.f32 %v930_v9, %v946_v50  ;;  %v954_v13 = vsel %vm725_vm11, 1.0, %v1057_v18  ;;  %v662_v14 = vadd.f32 %v1277_v56, %v634_v3 }
 0x129   : > { %v773_v15 = vsub.f32 %v938_v10, %v954_v13  ;;  %vm670_vm12 = vcmp.gt.f32.partialorder %v654_v11, 0.0  ;;  %vm718_vm13 = vcmp.lt.f32.partialorder %v654_v11, 0.0 }
 0x12a   : > { %781 = vst [vmem:[%s1288_s22 + $0x30] sm:$0xff] %v765_v12  ;;  %v931_v16 = vsel %vm670_vm12, 1.0, %v1057_v18  ;;  %v947_v17 = vsel %vm718_vm13, 1.0, %v1057_v18  ;;  %vm678_vm14 = vcmp.gt.f32.partialorder %v662_v14, 0.0  ;;  %vm726_vm15 = vcmp.lt.f32.partialorder %v662_v14, 0.0 }
 0x12b   : > { %789 = vst [vmem:[%s1288_s22 + $0x70] sm:$0xff] %v773_v15  ;;  %v766_v19 = vsub.f32 %v931_v16, %v947_v17  ;;  %v939_v20 = vsel %vm678_vm14, 1.0, %v1057_v18  ;;  %v955_v21 = vsel %vm726_vm15, 1.0, %v1057_v18 }
 0x12c   : > { %v774_v22 = vsub.f32 %v939_v20, %v955_v21 }
 0x12d   : > { %782 = vst [vmem:[%s1288_s22 + $0x38] sm:$0xff] %v766_v19 }
 0x12e   : > { %790 = vst [vmem:[%s1288_s22 + $0x78] sm:$0xff] %v774_v22 }
 0x12f PF: > { %s14_s15 = sadd.s32 1, %s1055_s15  }
 0x130   : > { %p11_p4 = scmp.ge.s32.totalorder %s14_s15, 4  }
 0x132   :  { %13 = sbr.rel (!%p11_p4) target bundleno = 1 (0x1), region = 66 }

// kernel: _lambda_.22
= control target key start
LH: loop header
LB: loop body
LE: loop exit
PB: predicated region body
PF: predicated region fallthrough
CT: control target
= control target key end

     0   :  { %s604_s15 = smov 0   ;;  %s765_s0 = inlined_call_operand.vmem [shape: f32[128,256], index: 0, kind: input, shape index: {}]   ;;  %s766_s1 = inlined_call_operand.vmem [shape: f32[256,10], index: 1, kind: input, shape index: {}]   ;;  %s767_s2 = inlined_call_operand.vmem [shape: f32[1,10], index: 2, kind: input, shape index: {}]   ;;  %s768_s3 = inlined_call_operand.vmem [shape: f32[1,10], index: 3, kind: input, shape index: {}]   ;;  %s769_s4 = inlined_call_operand.vmem [shape: f32[128,10], index: 4, kind: output, shape index: {}]  }
   0x1 LB: > { %s460_s16 = sadd.s32 4294967295, %s577_s15   ;;  %p464_p0 = scmp.ge.s32.totalorder %s577_s15, 1  ;;  %s577_s15 = sphi %s604_s15, %s14_s15  }
   0x2   : > { %p164_p1 = scmp.lt.s32.totalorder %s577_s15, 3 }
   0x4   : > { %p165_p2 = pnand %p464_p0, %p164_p1 }
   0x5   : > { %s465_s25 = sshll.u32 (!%p165_p2), %s460_s16, 3 }
   0x6   : > { %168 = sbr.rel (%p165_p2) target bundleno = 261 (0x105), region = 36  ;;  %p192_p3 = scmp.lt.s32.totalorder (!%p165_p2), %s465_s25, 15 }
   0xb   : > { %v251_v0 = vld [vmem:[%s766_s1 + $0xf8] sm:$0xff]  ;;  %v250_v2 = vld [vmem:[%s766_s1 + $0xf0] sm:$0xff]  ;;  %v249_v4 = vld [vmem:[%s766_s1 + $0xe8] sm:$0xff]  ;;  %s771_s25 = smov (!%p192_p3, %s465_s25), 15  ;;  %vm395_vm0 = vcmask 80896  }
   0xc   : > { %v235_v1 = vld [vmem:[%s766_s1 + $0x78] sm:$0xff]  ;;  %475 = vmatprep.subr.mxu0 %v251_v0  ;;  %531 = vmatprep.subr.mxu1 %v251_v0  ;;  %v234_v3 = vld [vmem:[%s766_s1 + $0x70] sm:$0xff]  ;;  %v233_v5 = vld [vmem:[%s766_s1 + $0x68] sm:$0xff]  ;;  %s474_s23 = sshll.u32 %s771_s25, 4  ;;  %s469_s17 = sshll.u32 %s771_s25, 3 }
   0xd   : > { %476 = vmatpush3.msra.mxu0 %v235_v1  ;;  %547 = vmatpush3.msra.mxu1 %v235_v1  ;;  %v248_v6 = vld [vmem:[%s766_s1 + $0xe0] sm:$0xff]  ;;  %v247_v8 = vld [vmem:[%s766_s1 + $0xd8] sm:$0xff]  ;;  %v246_v10 = vld [vmem:[%s766_s1 + $0xd0] sm:$0xff]  ;;  %s710_s6 = scalar_lea.vmem %s765_s0, %s474_s23  ;;  %s744_s20 = scalar_lea.vmem %s769_s4, %s469_s17 }
   0xe   : > { %477 = vmatprep.subr.mxu0 %v250_v2  ;;  %532 = vmatprep.subr.mxu1 %v250_v2  ;;  %v232_v7 = vld [vmem:[%s766_s1 + $0x60] sm:$0xff]  ;;  %v231_v9 = vld [vmem:[%s766_s1 + $0x58] sm:$0xff]  ;;  %v230_v11 = vld [vmem:[%s766_s1 + $0x50] sm:$0xff] }
   0xf   : > { %478 = vmatpush3.msra.mxu0 %v234_v3  ;;  %548 = vmatpush3.msra.mxu1 %v234_v3  ;;  %v245_v12 = vld [vmem:[%s766_s1 + $0xc8] sm:$0xff]  ;;  %v244_v14 = vld [vmem:[%s766_s1 + $0xc0] sm:$0xff]  ;;  %v243_v16 = vld [vmem:[%s766_s1 + $0xb8] sm:$0xff] }
  0x10   : > { %479 = vmatprep.subr.mxu0 %v249_v4  ;;  %533 = vmatprep.subr.mxu1 %v249_v4  ;;  %v229_v13 = vld [vmem:[%s766_s1 + $0x48] sm:$0xff]  ;;  %v228_v15 = vld [vmem:[%s766_s1 + $0x40] sm:$0xff]  ;;  %v227_v17 = vld [vmem:[%s766_s1 + $0x38] sm:$0xff] }
  0x11   : > { %480 = vmatpush3.msra.mxu0 %v233_v5  ;;  %549 = vmatpush3.msra.mxu1 %v233_v5  ;;  %v242_v18 = vld [vmem:[%s766_s1 + $0xb0] sm:$0xff]  ;;  %v241_v20 = vld [vmem:[%s766_s1 + $0xa8] sm:$0xff]  ;;  %v240_v22 = vld [vmem:[%s766_s1 + $0xa0] sm:$0xff] }
  0x12   : > { %481 = vmatprep.subr.mxu0 %v248_v6  ;;  %534 = vmatprep.subr.mxu1 %v248_v6  ;;  %v226_v19 = vld [vmem:[%s766_s1 + $0x30] sm:$0xff]  ;;  %v225_v21 = vld [vmem:[%s766_s1 + $0x28] sm:$0xff]  ;;  %v224_v23 = vld [vmem:[%s766_s1 + $0x20] sm:$0xff] }
  0x13   : > { %482 = vmatpush3.msra.mxu0 %v232_v7  ;;  %550 = vmatpush3.msra.mxu1 %v232_v7  ;;  %v239_v24 = vld [vmem:[%s766_s1 + $0x98] sm:$0xff]  ;;  %v238_v26 = vld [vmem:[%s766_s1 + $0x90] sm:$0xff]  ;;  %v237_v28 = vld [vmem:[%s766_s1 + $0x88] sm:$0xff] }
  0x14   : > { %483 = vmatprep.subr.mxu0 %v247_v8  ;;  %535 = vmatprep.subr.mxu1 %v247_v8  ;;  %v223_v25 = vld [vmem:[%s766_s1 + $0x18] sm:$0xff]  ;;  %v222_v27 = vld [vmem:[%s766_s1 + $0x10] sm:$0xff]  ;;  %v221_v29 = vld [vmem:[%s766_s1 + $0x8] sm:$0xff] }
  0x15   : > { %484 = vmatpush3.msra.mxu0 %v231_v9  ;;  %551 = vmatpush3.msra.mxu1 %v231_v9  ;;  %v236_v30 = vld [vmem:[%s766_s1 + $0x80] sm:$0xff]  ;;  %v205_v32 = vld [vmem:[%s710_s6 + $0x8] sm:$0xff]  ;;  %v207_v36 = vld [vmem:[%s710_s6 + $0x18] sm:$0xff] }
  0x16   : > { %485 = vmatprep.subr.mxu0 %v246_v10  ;;  %536 = vmatprep.subr.mxu1 %v246_v10  ;;  %v220_v31 = vld [vmem:[%s766_s1] sm:$0xff]  ;;  %v213_v33 = vld [vmem:[%s710_s6 + $0x48] sm:$0xff]  ;;  %v215_v37 = vld [vmem:[%s710_s6 + $0x58] sm:$0xff] }
  0x17   : > { %486 = vmatpush3.msra.mxu0 %v230_v11  ;;  %552 = vmatpush3.msra.mxu1 %v230_v11  ;;  %v204_v34 = vld [vmem:[%s710_s6] sm:$0xff]  ;;  %v206_v38 = vld [vmem:[%s710_s6 + $0x10] sm:$0xff]  ;;  %v209_v40 = vld [vmem:[%s710_s6 + $0x28] sm:$0xff] }
  0x18   : > { %487 = vmatprep.subr.mxu0 %v245_v12  ;;  %537 = vmatprep.subr.mxu1 %v245_v12  ;;  %v212_v35 = vld [vmem:[%s710_s6 + $0x40] sm:$0xff]  ;;  %v214_v39 = vld [vmem:[%s710_s6 + $0x50] sm:$0xff]  ;;  %v217_v41 = vld [vmem:[%s710_s6 + $0x68] sm:$0xff] }
  0x19   : > { %488 = vmatpush3.msra.mxu0 %v229_v13  ;;  %553 = vmatpush3.msra.mxu1 %v229_v13  ;;  %v208_v42 = vld [vmem:[%s710_s6 + $0x20] sm:$0xff]  ;;  %v211_v44 = vld [vmem:[%s710_s6 + $0x38] sm:$0xff]  ;;  %v210_v46 = vld [vmem:[%s710_s6 + $0x30] sm:$0xff] }
  0x1a   : > { %489 = vmatprep.subr.mxu0 %v244_v14  ;;  %538 = vmatprep.subr.mxu1 %v244_v14  ;;  %v216_v43 = vld [vmem:[%s710_s6 + $0x60] sm:$0xff]  ;;  %v219_v45 = vld [vmem:[%s710_s6 + $0x78] sm:$0xff]  ;;  %v218_v47 = vld [vmem:[%s710_s6 + $0x70] sm:$0xff] }
  0x1b   : > { %490 = vmatpush3.msra.mxu0 %v228_v15  ;;  %554 = vmatpush3.msra.mxu1 %v228_v15  ;;  %v470_v51 = vld [vmem:[%s767_s2] ss:$0 sm:$0xff] }
  0x1c   : > { %491 = vmatprep.subr.mxu0 %v243_v16  ;;  %539 = vmatprep.subr.mxu1 %v243_v16  ;;  %v471_v55 = vld [vmem:[%s768_s3] ss:$0 sm:$0xff] }
  0x1d   : > { %492 = vmatpush3.msra.mxu0 %v227_v17  ;;  %555 = vmatpush3.msra.mxu1 %v227_v17 }
  0x1e   : > { %493 = vmatprep.subr.mxu0 %v242_v18  ;;  %540 = vmatprep.subr.mxu1 %v242_v18 }
  0x1f   : > { %494 = vmatpush3.msra.mxu0 %v226_v19  ;;  %556 = vmatpush3.msra.mxu1 %v226_v19 }
  0x20   : > { %495 = vmatprep.subr.mxu0 %v241_v20  ;;  %541 = vmatprep.subr.mxu1 %v241_v20 }
  0x21   : > { %496 = vmatpush3.msra.mxu0 %v225_v21  ;;  %557 = vmatpush3.msra.mxu1 %v225_v21 }
  0x22   : > { %497 = vmatprep.subr.mxu0 %v240_v22  ;;  %542 = vmatprep.subr.mxu1 %v240_v22 }
  0x23   : > { %498 = vmatpush3.msra.mxu0 %v224_v23  ;;  %558 = vmatpush3.msra.mxu1 %v224_v23 }
  0x24   : > { %499 = vmatprep.subr.mxu0 %v239_v24  ;;  %543 = vmatprep.subr.mxu1 %v239_v24 }
  0x25   : > { %500 = vmatpush3.msra.mxu0 %v223_v25  ;;  %559 = vmatpush3.msra.mxu1 %v223_v25 }
  0x26   : > { %501 = vmatprep.subr.mxu0 %v238_v26  ;;  %544 = vmatprep.subr.mxu1 %v238_v26 }
  0x27   : > { %502 = vmatpush3.msra.mxu0 %v222_v27  ;;  %560 = vmatpush3.msra.mxu1 %v222_v27 }
  0x28   : > { %503 = vmatprep.subr.mxu0 %v237_v28  ;;  %545 = vmatprep.subr.mxu1 %v237_v28 }
  0x29   : > { %504 = vmatpush3.msra.mxu0 %v221_v29  ;;  %561 = vmatpush3.msra.mxu1 %v221_v29 }
  0x2a   : > { %505 = vmatprep.subr.mxu0 %v236_v30  ;;  %546 = vmatprep.subr.mxu1 %v236_v30 }
  0x2b   : > { %506 = vmatpush3.msra.mxu0 %v220_v31  ;;  %562 = vmatpush3.msra.mxu1 %v220_v31 }
  0x2c   : > { %316 = vmatprep.mubr.f32.mxu0 %v205_v32  ;;  %336 = vmatprep.mubr.f32.mxu1 %v213_v33 }
  0x2d   : > { %317 = vmatmul.mubr.f32.vlgmr.msra.gmra.mxu0 %v204_v34  ;;  %337 = vmatmul.mubr.f32.vlgmr.msra.gmra.mxu1 %v212_v35 }
  0x2e   : > { %321 = vmatprep.mubr.f32.mxu0 %v207_v36  ;;  %341 = vmatprep.mubr.f32.mxu1 %v215_v37 }
  0x31   : > { %322 = vmatmul.mubr.f32.gmra.mxu0 %v206_v38  ;;  %342 = vmatmul.mubr.f32.gmra.mxu1 %v214_v39 }
  0x32   : > { %326 = vmatprep.mubr.f32.mxu0 %v209_v40  ;;  %346 = vmatprep.mubr.f32.mxu1 %v217_v41 }
  0x35   : > { %327 = vmatmul.mubr.f32.gmra.mxu0 %v208_v42  ;;  %347 = vmatmul.mubr.f32.gmra.mxu1 %v216_v43 }
  0x36   : > { %331 = vmatprep.mubr.f32.mxu0 %v211_v44  ;;  %351 = vmatprep.mubr.f32.mxu1 %v219_v45 }
  0x39   : > { %332 = vmatmul.mubr.f32.gmra.mxu0 %v210_v46  ;;  %352 = vmatmul.mubr.f32.gmra.mxu1 %v218_v47 }
  0xed   : > { %v507_v48 = vpop.f32.mrf.mxu0  ;;  %v519_v49 = vpop.f32.mrf.mxu1 }
  0xef   : > { %v508_v50 = vpop.f32.mrf.mxu0  ;;  %v520_v52 = vpop.f32.mrf.mxu1 }
  0xf0   : > { %v509_v53 = vadd.f32 %v508_v50, %v507_v48  ;;  %v521_v54 = vadd.f32 %v520_v52, %v519_v49 }
  0xf1   : > { %v510_v56 = vpop.f32.mrf.mxu0  ;;  %v522_v57 = vpop.f32.mrf.mxu1 }
  0xf2   : > { %v364_v58 = vmul.f32 %v509_v53, %v470_v51  ;;  %v368_v59 = vmul.f32 %v521_v54, %v470_v51 }
  0xf3   : > { %v511_v60 = vpop.f32.mrf.mxu0  ;;  %v523_v61 = vpop.f32.mrf.mxu1 }
  0xf4   : > { %v379_v62 = vadd.f32 %v471_v55, %v364_v58  ;;  %v383_v63 = vadd.f32 %v471_v55, %v368_v59  ;;  %v512_v0 = vadd.f32 %v511_v60, %v510_v56  ;;  %v524_v1 = vadd.f32 %v523_v61, %v522_v57 }
  0xf5   : > { %v513_v2 = vpop.f32.mrf.mxu0  ;;  %v525_v3 = vpop.f32.mrf.mxu1 }
  0xf6   : > { %v387_v4 = vmax.f32 %v379_v62, 0.0  ;;  %v391_v5 = vmax.f32 %v383_v63, 0.0  ;;  %v365_v6 = vmul.f32 %v512_v0, %v470_v51  ;;  %v369_v7 = vmul.f32 %v524_v1, %v470_v51 }
  0xf7   : > { %v514_v8 = vpop.f32.mrf.mxu0  ;;  %v526_v9 = vpop.f32.mrf.mxu1 }
  0xf8   : > { %396 = vst.msk [vmem:[%s744_s20] sm:$0xff] %vm395_vm0, %v387_v4  ;;  %400 = vst.msk [vmem:[%s744_s20 + $0x20] sm:$0xff] %vm395_vm0, %v391_v5  ;;  %v380_v10 = vadd.f32 %v471_v55, %v365_v6  ;;  %v384_v11 = vadd.f32 %v471_v55, %v369_v7  ;;  %v515_v12 = vadd.f32 %v514_v8, %v513_v2 }
  0xf9   : > { %v527_v13 = vadd.f32 %v526_v9, %v525_v3  ;;  %v516_v14 = vpop.f32.mrf.mxu0  ;;  %v528_v15 = vpop.f32.mrf.mxu1 }
  0xfa   : > { %v388_v16 = vmax.f32 %v380_v10, 0.0  ;;  %v392_v17 = vmax.f32 %v384_v11, 0.0  ;;  %v366_v18 = vmul.f32 %v515_v12, %v470_v51 }
  0xfb   : > { %v370_v19 = vmul.f32 %v527_v13, %v470_v51  ;;  %v517_v20 = vpop.f32.mrf.mxu0  ;;  %v529_v21 = vpop.f32.mrf.mxu1 }
  0xfc   : > { %397 = vst.msk [vmem:[%s744_s20 + $0x8] sm:$0xff] %vm395_vm0, %v388_v16  ;;  %401 = vst.msk [vmem:[%s744_s20 + $0x28] sm:$0xff] %vm395_vm0, %v392_v17  ;;  %v381_v22 = vadd.f32 %v471_v55, %v366_v18  ;;  %v518_v24 = vadd.f32 %v517_v20, %v516_v14  ;;  %v530_v25 = vadd.f32 %v529_v21, %v528_v15 }
  0xfd   : > { %v385_v23 = vadd.f32 %v471_v55, %v370_v19 }
  0xfe   : > { %v389_v26 = vmax.f32 %v381_v22, 0.0  ;;  %v367_v28 = vmul.f32 %v518_v24, %v470_v51  ;;  %v371_v29 = vmul.f32 %v530_v25, %v470_v51 }
  0xff   : > { %v393_v27 = vmax.f32 %v385_v23, 0.0 }
 0x100   : > { %398 = vst.msk [vmem:[%s744_s20 + $0x10] sm:$0xff] %vm395_vm0, %v389_v26  ;;  %v382_v30 = vadd.f32 %v471_v55, %v367_v28  ;;  %v386_v31 = vadd.f32 %v471_v55, %v371_v29 }
 0x101   : > { %402 = vst.msk [vmem:[%s744_s20 + $0x30] sm:$0xff] %vm395_vm0, %v393_v27 }
 0x102   : > { %v390_v32 = vmax.f32 %v382_v30, 0.0  ;;  %v394_v33 = vmax.f32 %v386_v31, 0.0 }
 0x104   : > { %399 = vst.msk [vmem:[%s744_s20 + $0x18] sm:$0xff] %vm395_vm0, %v390_v32  ;;  %403 = vst.msk [vmem:[%s744_s20 + $0x38] sm:$0xff] %vm395_vm0, %v394_v33 }
 0x105 PF: > { %s14_s15 = sadd.s32 1, %s577_s15  }
 0x106   : > { %p11_p4 = scmp.ge.s32.totalorder %s14_s15, 4  }
 0x108   :  { %13 = sbr.rel (!%p11_p4) target bundleno = 1 (0x1), region = 66 }

// kernel: _lambda_.23
= control target key start
LH: loop header
LB: loop body
LE: loop exit
PB: predicated region body
PF: predicated region fallthrough
CT: control target
= control target key end

     0   :  { %6 = vsyncpa [#allocation3], 0  ;;  %s433_s0 = inlined_call_operand.vmem [shape: f32[2,64,10], index: 0, kind: input, shape index: {}]   ;;  %s434_s1 = inlined_call_operand.hbm [shape: f32[2,1,10], index: 1, kind: output, shape index: {}]  }
   0x1   :  { %8 = vsyncpa [#allocation3 + $0x1], 0  ;;  %s338_s6 = smov 0   ;;  %s340_s7 = smov 0  }
   0x2   :  { %s342_s8 = smov 0   ;;  %s344_s9 = smov 0  }
   0x3 LB: > { %s359_s10 = sadd.s32 4294967295, %s325_s9   ;;  %s216_s11 = sadd.s32 4294967294, %s325_s9   ;;  %s325_s9 = sphi %s344_s9, %s440_s9   ;;  %s321_s8 = sphi %s342_s8, %s439_s8   ;;  %s317_s7 = sphi %s340_s7, %s438_s7   ;;  %s313_s6 = sphi %s338_s6, %s437_s6  }
   0x4   : > { %s363_s12 = sadd.s32 1, %s325_s9   ;;  %s47_s13 = sadd.s32 1, %s321_s8 }
   0x5   : > { %s44_s14 = ssub.s32 %s325_s9, %s363_s12  ;;  %p57_p0 = scmp.ne.s32.totalorder %s321_s8, %s317_s7 }
   0x6   : > { %p45_p1 = scmp.eq.s32.totalorder %s44_s14, 0  ;;  %p58_p2 = scmp.eq.s32.totalorder %s359_s10, 1 }
   0x7   : > { %p63_p3 = scmp.ne.s32.totalorder %s317_s7, %s313_s6  ;;  %p64_p4 = scmp.eq.s32.totalorder %s216_s11, 1 }
   0x8   : > { %s374_s15 = scalar_select %p45_p1, %s321_s8, %s47_s13  }
   0x9   : > { %p376_p5 = por %p58_p2, %p57_p0  ;;  %p380_p6 = por %p64_p4, %p63_p3 }
   0xa   : > { %p219_p7 = scmp.ge.s32.totalorder %s325_s9, 1  ;;  %p90_p8 = scmp.lt.s32.totalorder %s325_s9, 3 }
   0xc   : > { %p91_p9 = pnand %p219_p7, %p90_p8 }
   0xd   : > { %p109_p10 = scmp.lt.s32.totalorder (!%p91_p9), %s359_s10, 1  ;;  %s107_s23 = sand.u32 (!%p91_p9), 1, %s317_s7  }
   0xe   : > { %94 = sbr.rel (%p91_p9) target bundleno = 66 (0x42), region = 24  ;;  %s108_s24 = scalar_lea.vmem (!%p91_p9), [#allocation2], %s107_s23 }
   0xf   : > { %s161_s25 = sshll.u32 (!%p91_p9), %s108_s24, 4  ;;  %s222_s26 = sshll.u32 (!%p91_p9), %s359_s10, 4  ;;  %s162_s25 = int_to_ptr.vmem [resolvable:$true] %s161_s25 }
  0x10   : > { %s159_s29 = scalar_lea.hbm (!%p91_p9), %s434_s1, %s222_s26  ;;  %s149_s30 = scalar_lea.sflag (!%p91_p9), [#allocation3], %s107_s23 }
  0x11   : > { %s265_s2 = scalar_lea.vmem (!%p91_p9), %s162_s25, 16  ;;  %s327_s3 = smov (!%p91_p9), [#allocation2]  }
  0x12   : > { %p266_p11 = scmp.ne.s32.totalorder (!%p91_p9), %s162_s25, %s265_s2  ;;  %s269_s4 = sshll.u32 (!%p91_p9), %s327_s3, 4  ;;  %s270_s4 = int_to_ptr.vmem [resolvable:$false] %s269_s4 }
  0x13   : > { %s110_s18 = scalar_select %p109_p10, %s359_s10, 1  ;;  %vm122_vm0 = vcmask 80896   ;;  %vm146_vm1 = vcmask 73728  }
  0x14   : > { %p267_p12 = pnand %p266_p11, %p376_p5  ;;  %s271_s5 = scalar_lea.vmem %s270_s4, 32 }
  0x15   : > { %s225_s19 = sshll.u32 %s110_s18, 6  ;;  %p272_p0 = scmp.lt.s32.totalorder %s162_s25, %s270_s4 }
  0x16   : > { %s113_s22 = scalar_lea.vmem %s433_s0, %s225_s19  ;;  %p268_p13 = pneg %p267_p12 }
  0x17   : > { %v114_v0 = vld [vmem:[%s113_s22] sm:$0xff]  ;;  %v115_v1 = vld [vmem:[%s113_s22 + $0x8] sm:$0xff]  ;;  %v116_v2 = vld [vmem:[%s113_s22 + $0x10] sm:$0xff]  ;;  %p273_p1 = scmp.lt.s32.totalorder %s271_s5, %s265_s2 }
  0x18   : > { %v117_v3 = vld [vmem:[%s113_s22 + $0x18] sm:$0xff]  ;;  %v123_v4 = vsel %vm122_vm0, %v114_v0, 0.0  ;;  %v124_v5 = vsel %vm122_vm0, %v115_v1, 0.0  ;;  %v126_v6 = vsel %vm122_vm0, %v116_v2, 0.0  ;;  %v118_v7 = vld [vmem:[%s113_s22 + $0x20] sm:$0xff]  ;;  %v119_v10 = vld [vmem:[%s113_s22 + $0x28] sm:$0xff] }
  0x19   : > { %v125_v8 = vadd.f32 %v124_v5, %v123_v4  ;;  %v128_v9 = vsel %vm122_vm0, %v117_v3, 0.0  ;;  %v130_v12 = vsel %vm122_vm0, %v118_v7, 0.0  ;;  %v120_v13 = vld [vmem:[%s113_s22 + $0x30] sm:$0xff]  ;;  %v132_v15 = vsel %vm122_vm0, %v119_v10, 0.0  ;;  %v121_v16 = vld [vmem:[%s113_s22 + $0x38] sm:$0xff]  ;;  %p274_p2 = por %p273_p1, %p272_p0 }
  0x1a   : > { %v134_v18 = vsel %vm122_vm0, %v120_v13, 0.0  ;;  %v136_v20 = vsel %vm122_vm0, %v121_v16, 0.0 }
  0x1b   : > { %v127_v11 = vadd.f32 %v126_v6, %v125_v8  ;;  %p275_p3 = pnand %p274_p2, %p268_p13 }
  0x1d   : > { %v129_v14 = vadd.f32 %v128_v9, %v127_v11 }
  0x1f   : > { %v131_v17 = vadd.f32 %v130_v12, %v129_v14 }
  0x21   : > { %v133_v19 = vadd.f32 %v132_v15, %v131_v17 }
  0x23   : > { %v135_v21 = vadd.f32 %v134_v18, %v133_v19 }
  0x25   : > { %v137_v22 = vadd.f32 %v136_v20, %v135_v21 }
  0x27   : > { %v138_v23 = vrot.slane %v137_v22, 4 }
  0x29   : > { %v139_v24 = vadd.f32 %v138_v23, %v137_v22 }
  0x2b   : > { %v140_v25 = vrot.slane %v139_v24, 2 }
  0x2d   : > { %v141_v26 = vadd.f32 %v140_v25, %v139_v24 }
  0x2f   : > { %v142_v27 = vrot.slane %v141_v26, 1 }
  0x31   : > { %v143_v28 = vadd.f32 %v142_v27, %v141_v26 }
  0x33   : > { %v145_v29 = vmul.f32 0.015625, %v143_v28 }
  0x35   : > { %147 = vst.msk [vmem:[%s108_s24] sm:$0x1] %vm146_vm1, %v145_v29 }
  0x36   : > { %278 = shalt.err (!%p275_p3)
}
  0x37   : > { %s279_s10 = scalar_lea.hbm %s159_s29, 16  ;;  %s283_s14 = scalar_lea.hbm %s434_s1, 32 }
  0x38   : > { %p280_p4 = scmp.ne.s32.totalorder %s159_s29, %s279_s10  ;;  %p284_p9 = scmp.lt.s32.totalorder %s159_s29, %s434_s1 }
  0x39   : > { %p285_p10 = scmp.lt.s32.totalorder %s283_s14, %s279_s10 }
  0x3a   : > { %p281_p7 = pnand %p280_p4, %p376_p5 }
  0x3b   : > { %p286_p11 = por %p285_p10, %p284_p9 }
  0x3c   : > { %p282_p8 = pneg %p281_p7 }
  0x3e   : > { %p287_p12 = pnand %p286_p11, %p282_p8 }
  0x40   : > { %290 = shalt.err (!%p287_p12)
}
  0x41   : > { %226 = dma.vmem_to_hbm [thread:$0]  (%p376_p5), %s162_s25, 16, %s159_s29, %s149_s30  }
  0x42 PF: > { %p232_p13 = scmp.ge.s32.totalorder %s325_s9, 2  ;;  %s173_s20 = sand.u32 1, %s313_s6  }
  0x43   : > { %s174_s21 = scalar_lea.sflag [#allocation3], %s173_s20 }
  0x44   : > { %p229_p0 = pnand %p232_p13, %p380_p6 }
  0x46   : > { %p230_p1 = pneg %p229_p0 }
  0x48   : > { %308 = dma.done.wait (%p230_p1), %s174_s21, 16  }
  0x49   : > { %310 = vsyncadd (%p230_p1), %s174_s21, 4294967280  ;;  %p11_p2 = scmp.ge.s32.totalorder %s363_s12, 4   ;;  %s437_s6 = smov %s317_s7 }
  0x4a   : > { %s438_s7 = smov %s321_s8  ;;  %s439_s8 = smov %s374_s15 }
  0x4b   : > { %s440_s9 = smov %s363_s12  ;;  %13 = sbr.rel (!%p11_p2) target bundleno = 3 (0x3), region = 59 }
  0x50   :  { %178 = vsyncpa [#allocation3], 1 }
  0x51   :  { %180 = vsyncpa [#allocation3 + $0x1], 1 }

</bundles_post_ra>
